<compile_context>
chip_gen: v7x
topology: tpu7x:2x2x1
jax: 0.10.0
libtpu: 0.0.40
codegen_flags: <defaults>
</compile_context>

<pallas_src>
import functools

import jax
import jax.numpy as jnp
from jax.experimental import pallas as pl
from jax.experimental.pallas import tpu as pltpu


# --------------------------------------------------------------------------
# Static geometry (84x84 input is pinned by fc1 = Linear(7*7*64, 512)).
# --------------------------------------------------------------------------
# conv1 after 4x4 space-to-depth: 2x2 stride-1 conv over a 21x21x(16*C) grid.
_P1 = 448                              # per-sample row pitch (21*21=441 real + 7 pad)
_OFF1 = (0, 1, 21, 22)                 # row offsets of the 2x2 taps (width 21)
_TAIL1 = 28                            # rows at the block tail we never compute

# conv2 after 2x2 space-to-depth of conv1's 20x20x32: 2x2 stride-1 over 10x10x128.
_P2 = 112                              # 10*10=100 real rows + 12 pad
_OFF2 = (0, 1, 10, 11)
_TAIL2 = 16

# conv3: 3x3 stride-1 over the 9x9x64 conv2 output, held at row width 10.
_OFF3 = tuple(kh * 10 + kw for kh in range(3) for kw in range(3))
_TAIL3 = 24

_K_FC = 3200                           # 7*7*64 = 3136 fc1 features, padded to 128*25


def _round_up(x, m):
    return (x + m - 1) // m * m


def _vmem_capacity_bytes():
    try:
        info = pltpu.get_tpu_info()
        cap = getattr(info, "vmem_capacity_bytes", None)
        if cap:
            return int(cap)
    except Exception:
        pass
    return 64 * 1024 * 1024            # conservative fallback (v7x-sized)


_VMEM_CAP = _vmem_capacity_bytes()
_VMEM_LIMIT = min(_VMEM_CAP * 3 // 4, 100 * 1024 * 1024)   # ~96 MiB v5e/v6e, ~48 MiB v7x
_MLP_TILE_MAX = 1024 if _VMEM_CAP >= (100 << 20) else 512


def _compiler_params():
    return pltpu.CompilerParams(dimension_semantics=("parallel",),
                                vmem_limit_bytes=_VMEM_LIMIT)


# --------------------------------------------------------------------------
# Pallas kernels
# --------------------------------------------------------------------------
def _conv1_kernel(x_ref, w_ref, b_ref, o_ref):
    """conv1 as 4 shifted matmuls over the flat space-to-depth'd input block."""
    m = o_ref.shape[0] - _TAIL1
    acc = jnp.zeros((m, o_ref.shape[1]), jnp.float32)
    for j, off in enumerate(_OFF1):
        acc += jnp.dot(x_ref[off:off + m, :], w_ref[j],
                       preferred_element_type=jnp.float32)
    o_ref[0:m, :] = jnp.maximum(acc + b_ref[...], 0.0).astype(o_ref.dtype)


def _conv23_kernel(x_ref, w2_ref, b2_ref, w3_ref, b3_ref, o_ref, h2_ref):
    """conv2 (2x2 over s2d'd conv1 output) + ReLU + conv3 (3x3) + ReLU, fused.

    The conv2 activation never leaves VMEM (h2_ref scratch)."""
    nb = x_ref.shape[0]
    m2 = nb - _TAIL2
    m3 = nb - _TAIL3

    # conv2
    acc = jnp.zeros((m2, w2_ref.shape[2]), jnp.float32)
    for j, off in enumerate(_OFF2):
        acc += jnp.dot(x_ref[off:off + m2, :], w2_ref[j],
                       preferred_element_type=jnp.float32)
    # Deterministic tail (conv3 taps may read a few rows past the computed part;
    # those only ever feed discarded output columns).
    h2_ref[m2:nb, :] = jnp.zeros((nb - m2, h2_ref.shape[1]), h2_ref.dtype)
    h2_ref[0:m2, :] = jnp.maximum(acc + b2_ref[...], 0.0).astype(h2_ref.dtype)

    # conv3
    acc = jnp.zeros((m3, w3_ref.shape[2]), jnp.float32)
    for j, off in enumerate(_OFF3):
        acc += jnp.dot(h2_ref[off:off + m3, :], w3_ref[j],
                       preferred_element_type=jnp.float32)
    o_ref[0:m3, :] = jnp.maximum(acc + b3_ref[...], 0.0).astype(o_ref.dtype)


def _mlp_kernel(x_ref, w1_ref, b1_ref, w2_ref, b2_ref, o_ref):
    """Fused fc1 + ReLU + fc2: the [tile_m, 512] intermediate stays on-chip."""
    h = jnp.dot(x_ref[...], w1_ref[...], preferred_element_type=jnp.float32)
    h = jnp.maximum(h + b1_ref[...], 0.0).astype(jnp.bfloat16)
    q = jnp.dot(h, w2_ref[...], preferred_element_type=jnp.float32)
    o_ref[...] = (q + b2_ref[...]).astype(o_ref.dtype)


# --------------------------------------------------------------------------
# Pallas wrappers
# --------------------------------------------------------------------------
def _conv1_pallas(x1, w1, b1, tb):
    """x1: [Bp*_P1, 16*C] bf16 flat s2d input; returns [Bp*_P1, 32] bf16."""
    rows, cin = x1.shape
    cout = w1.shape[2]
    blk = tb * _P1
    return pl.pallas_call(
        _conv1_kernel,
        out_shape=jax.ShapeDtypeStruct((rows, cout), jnp.bfloat16),
        grid=(rows // blk,),
        in_specs=[
            pl.BlockSpec((blk, cin), lambda i: (i, 0)),
            pl.BlockSpec(w1.shape, lambda i: (0, 0, 0)),   # grid-invariant
            pl.BlockSpec((1, cout), lambda i: (0, 0)),
        ],
        out_specs=pl.BlockSpec((blk, cout), lambda i: (i, 0)),
        compiler_params=_compiler_params(),
    )(x1, w1, b1)


def _conv23_pallas(x2, w2, b2, w3, b3, tb):
    """x2: [Bp*_P2, 128] bf16; returns the conv3 activation [Bp*_P2, 64] bf16."""
    rows, cin = x2.shape
    c2 = w2.shape[2]
    c3 = w3.shape[2]
    blk = tb * _P2
    return pl.pallas_call(
        _conv23_kernel,
        out_shape=jax.ShapeDtypeStruct((rows, c3), jnp.bfloat16),
        grid=(rows // blk,),
        in_specs=[
            pl.BlockSpec((blk, cin), lambda i: (i, 0)),
            pl.BlockSpec(w2.shape, lambda i: (0, 0, 0)),
            pl.BlockSpec((1, c2), lambda i: (0, 0)),
            pl.BlockSpec(w3.shape, lambda i: (0, 0, 0)),
            pl.BlockSpec((1, c3), lambda i: (0, 0)),
        ],
        out_specs=pl.BlockSpec((blk, c3), lambda i: (i, 0)),
        scratch_shapes=[pltpu.VMEM((blk, c2), jnp.bfloat16)],
        compiler_params=_compiler_params(),
    )(x2, w2, b2, w3, b3)


def _mlp_pallas(x, w1, b1, w2, b2):
    """q = relu(x @ w1 + b1) @ w2 + b2, fused in a single pallas_call."""
    M, K = x.shape
    H = w1.shape[1]
    N = w2.shape[1]
    tile_m = min(_MLP_TILE_MAX, _round_up(M, 16))
    m_pad = _round_up(M, tile_m)
    x = x.astype(jnp.bfloat16)
    if m_pad != M:
        x = jnp.pad(x, ((0, m_pad - M), (0, 0)))
    y = pl.pallas_call(
        _mlp_kernel,
        out_shape=jax.ShapeDtypeStruct((m_pad, N), jnp.float32),
        grid=(m_pad // tile_m,),
        in_specs=[
            pl.BlockSpec((tile_m, K), lambda i: (i, 0)),
            pl.BlockSpec((K, H), lambda i: (0, 0)),        # grid-invariant weight
            pl.BlockSpec((1, H), lambda i: (0, 0)),
            pl.BlockSpec((H, N), lambda i: (0, 0)),
            pl.BlockSpec((1, N), lambda i: (0, 0)),
        ],
        out_specs=pl.BlockSpec((tile_m, N), lambda i: (i, 0)),
        compiler_params=_compiler_params(),
    )(x, w1, b1, w2, b2)
    return y[:M] if m_pad != M else y


# --------------------------------------------------------------------------
# Cheap XLA layout helpers (reshapes / transposes only — no im2col expansion)
# --------------------------------------------------------------------------
def _space_to_depth(x, block):
    """[B, H, W, C] -> [B, H//b, W//b, b*b*C] with channel order (ph, pw, c)."""
    B, H, W, C = x.shape
    x = x.reshape(B, H // block, block, W // block, block, C)
    x = x.transpose(0, 1, 3, 2, 4, 5)
    return x.reshape(B, H // block, W // block, block * block * C)


# --------------------------------------------------------------------------
# Parameters: raw (PyTorch layout) + one-time kernel-ready repack
# --------------------------------------------------------------------------
def init_params(key, in_channels=4, num_actions=4):
    """Raw parameters in PyTorch layouts (OIHW convs, [out, in] linears)."""
    ks = jax.random.split(key, 10)

    def u(k, shape, fan_in):
        bound = 1.0 / jnp.sqrt(fan_in)
        return jax.random.uniform(k, shape, jnp.float32, -bound, bound)

    return {
        "conv1_w": u(ks[0], (32, in_channels, 8, 8), in_channels * 8 * 8),
        "conv1_b": u(ks[1], (32,), in_channels * 8 * 8),
        "conv2_w": u(ks[2], (64, 32, 4, 4), 32 * 4 * 4),
        "conv2_b": u(ks[3], (64,), 32 * 4 * 4),
        "conv3_w": u(ks[4], (64, 64, 3, 3), 64 * 3 * 3),
        "conv3_b": u(ks[5], (64,), 64 * 3 * 3),
        "fc1_w":   u(ks[6], (512, 7 * 7 * 64), 7 * 7 * 64),
        "fc1_b":   u(ks[7], (512,), 7 * 7 * 64),
        "fc2_w":   u(ks[8], (num_actions, 512), 512),
        "fc2_b":   u(ks[9], (num_actions,), 512),
    }


def prepare_params(raw):
    """One-time repack into kernel-ready layouts (done outside the per-step jit)."""
    def conv_w_s2d(w, s):
        # w: [O, I, KH, KW] (PyTorch OIHW); s = stride = space-to-depth factor.
        o, i, kh, kw = w.shape
        a, b = kh // s, kw // s
        wt = jnp.transpose(w, (2, 3, 1, 0))          # [KH, KW, I, O]
        wt = wt.reshape(a, s, b, s, i, o)            # (a, ph, b, pw, i, o)
        wt = wt.transpose(0, 2, 1, 3, 4, 5)          # (a, b, ph, pw, i, o)
        return wt.reshape(a * b, s * s * i, o).astype(jnp.bfloat16)

    p = {}
    p["conv1_w"] = conv_w_s2d(raw["conv1_w"], 4)     # [4, 16*C, 32]
    p["conv1_b"] = raw["conv1_b"].astype(jnp.float32).reshape(1, -1)
    p["conv2_w"] = conv_w_s2d(raw["conv2_w"], 2)     # [4, 128, 64]
    p["conv2_b"] = raw["conv2_b"].astype(jnp.float32).reshape(1, -1)
    p["conv3_w"] = conv_w_s2d(raw["conv3_w"], 1)     # [9, 64, 64]
    p["conv3_b"] = raw["conv3_b"].astype(jnp.float32).reshape(1, -1)

    # fc1: PyTorch flatten order is (c=64, h=7, w=7); ours is (h, w, c=64).
    w1 = raw["fc1_w"].reshape(512, 64, 7, 7).transpose(2, 3, 1, 0)   # [7,7,64,512]
    w1 = w1.reshape(7 * 7 * 64, 512)
    w1 = jnp.pad(w1, ((0, _K_FC - 7 * 7 * 64), (0, 0)))              # K -> 3200
    p["fc1_w"] = w1.astype(jnp.bfloat16)
    p["fc1_b"] = raw["fc1_b"].astype(jnp.float32).reshape(1, 512)

    num_actions = raw["fc2_w"].shape[0]
    n_pad = _round_up(num_actions, 128)                              # lane-dense out
    p["fc2_w"] = jnp.pad(raw["fc2_w"].T,
                         ((0, 0), (0, n_pad - num_actions))).astype(jnp.bfloat16)
    p["fc2_b"] = jnp.pad(raw["fc2_b"],
                         (0, n_pad - num_actions)).astype(jnp.float32).reshape(1, n_pad)
    return p


# --------------------------------------------------------------------------
# Forward pass (mirrors DQN.forward)
# --------------------------------------------------------------------------
def dqn_forward(x, params, *, num_actions):
    """x: [B, C, 84, 84] float32 (NCHW, as in the PyTorch module)."""
    B = x.shape[0]
    tb = min(16, B)                       # samples per grid step
    b_pad = _round_up(B, tb)

    # NCHW f32 -> NHWC bf16, 4x4 space-to-depth (conv1 becomes stride-1 2x2).
    h = jnp.transpose(x, (0, 2, 3, 1)).astype(jnp.bfloat16)          # [B,84,84,C]
    h = _space_to_depth(h, 4)                                        # [B,21,21,16C]
    h = h.reshape(B, 21 * 21, h.shape[-1])
    h = jnp.pad(h, ((0, b_pad - B), (0, _P1 - 21 * 21), (0, 0)))     # [Bp,448,16C]
    h = h.reshape(b_pad * _P1, h.shape[-1])

    h = _conv1_pallas(h, params["conv1_w"], params["conv1_b"], tb)   # [Bp*448,32]

    # conv1 output -> valid 20x20x32, 2x2 space-to-depth (conv2 becomes stride-1).
    h = h.reshape(b_pad, _P1, 32)[:, :441, :]
    h = h.reshape(b_pad, 21, 21, 32)[:, :20, :20, :]
    h = _space_to_depth(h, 2)                                        # [Bp,10,10,128]
    h = h.reshape(b_pad, 100, 128)
    h = jnp.pad(h, ((0, 0), (0, _P2 - 100), (0, 0)))
    h = h.reshape(b_pad * _P2, 128)

    h = _conv23_pallas(h, params["conv2_w"], params["conv2_b"],
                       params["conv3_w"], params["conv3_b"], tb)     # [Bp*112,64]

    # conv3 output -> valid 7x7x64, flattened (h, w, c) and padded to _K_FC.
    h = h.reshape(b_pad, _P2, 64)[:, :70, :]
    h = h.reshape(b_pad, 7, 10, 64)[:, :, :7, :]
    h = h.reshape(b_pad, 7 * 7 * 64)
    h = jnp.pad(h, ((0, 0), (0, _K_FC - 7 * 7 * 64)))

    q = _mlp_pallas(h, params["fc1_w"], params["fc1_b"],
                    params["fc2_w"], params["fc2_b"])                # [Bp,128] f32
    return q[:B, :num_actions]


# Pure-JAX f32 reference (PyTorch layouts) for the correctness check.
def dqn_forward_ref(x, raw):
    dn = ("NCHW", "OIHW", "NCHW")

    def conv(h, w, b, s):
        y = jax.lax.conv_general_dilated(h, w, (s, s), "VALID", dimension_numbers=dn)
        return jax.nn.relu(y + b[None, :, None, None])

    h = conv(x, raw["conv1_w"], raw["conv1_b"], 4)
    h = conv(h, raw["conv2_w"], raw["conv2_b"], 2)
    h = conv(h, raw["conv3_w"], raw["conv3_b"], 1)
    h = h.reshape(h.shape[0], -1)
    h = jax.nn.relu(h @ raw["fc1_w"].T + raw["fc1_b"])
    return h @ raw["fc2_w"].T + raw["fc2_b"]


if __name__ == "__main__":
    key = jax.random.PRNGKey(0)
    k_x, k_p = jax.random.split(key)

    batch, in_channels, num_actions = 2, 4, 4
    # Spatial size is pinned to 84x84 by fc1's 7*7*64 input, as in the module.
    x = jax.random.normal(k_x, (batch, in_channels, 84, 84), jnp.float32)

    raw = init_params(k_p, in_channels=in_channels, num_actions=num_actions)
    params = prepare_params(raw)

    fwd = jax.jit(functools.partial(dqn_forward, num_actions=num_actions))
    q = jax.block_until_ready(fwd(x, params))
    assert q.shape == (batch, num_actions), q.shape

    q_ref = jax.block_until_ready(dqn_forward_ref(x, raw))
    max_err = float(jnp.max(jnp.abs(q - q_ref)))
    # bf16 MXU operands vs the f32 reference -> loosened tolerance.
    assert jnp.allclose(q, q_ref, atol=5e-2, rtol=5e-2), max_err

    print("KERNEL_OK")
</pallas_src>

<mosaic_0001>
module attributes {stable_mosaic.version = 11 : i64} {
  func.func @_conv1_kernel(%arg0: i32, %arg1: memref<896x64xbf16, #tpu.memory_space<vmem>>, %arg2: memref<4x64x32xbf16, #tpu.memory_space<vmem>>, %arg3: memref<1x32xf32, #tpu.memory_space<vmem>>, %arg4: memref<896x32xbf16, #tpu.memory_space<vmem>>) attributes {dimension_semantics = [#tpu.dimension_semantics<parallel>], iteration_bounds = array<i64: 1>, scalar_prefetch = 0 : i64, scratch_operands = 0 : i64, tpu.core_type = #tpu.core_type<tc>, window_params = [{transform_indices = @transform_0, window_bounds = array<i64: 896, 64>}, {pipeline_mode = #tpu.pipeline_mode<synchronous>, transform_indices = @transform_1, window_bounds = array<i64: 4, 64, 32>}, {pipeline_mode = #tpu.pipeline_mode<synchronous>, transform_indices = @transform_2, window_bounds = array<i64: 1, 32>}, {transform_indices = @transform_3, window_bounds = array<i64: 896, 32>}]} {
    %cst = arith.constant 0.000000e+00 : f32
    %0 = vector.broadcast %cst : f32 to vector<868x32xf32>
    %c0 = arith.constant 0 : index
    %c0_0 = arith.constant 0 : index
    %1 = vector.load %arg1[%c0, %c0_0] : memref<896x64xbf16, #tpu.memory_space<vmem>>, vector<868x64xbf16>
    %c0_1 = arith.constant 0 : index
    %c0_2 = arith.constant 0 : index
    %c0_3 = arith.constant 0 : index
    %2 = vector.load %arg2[%c0_1, %c0_2, %c0_3] : memref<4x64x32xbf16, #tpu.memory_space<vmem>>, vector<1x64x32xbf16>
    %3 = vector.shape_cast %2 : vector<1x64x32xbf16> to vector<64x32xbf16>
    %cst_4 = arith.constant dense<0.000000e+00> : vector<868x32xf32>
    %4 = tpu.matmul %1, %3, %cst_4 {dimension_numbers = #tpu.dot_dimension_numbers<[1], [0], [0], [1], [0, 0, 1, 1], [], []>} : vector<868x64xbf16>, vector<64x32xbf16>, vector<868x32xf32> -> vector<868x32xf32>
    %5 = arith.addf %0, %4 : vector<868x32xf32>
    %c1 = arith.constant 1 : index
    %c0_5 = arith.constant 0 : index
    %6 = vector.load %arg1[%c1, %c0_5] : memref<896x64xbf16, #tpu.memory_space<vmem>>, vector<868x64xbf16>
    %c1_6 = arith.constant 1 : index
    %c0_7 = arith.constant 0 : index
    %c0_8 = arith.constant 0 : index
    %7 = vector.load %arg2[%c1_6, %c0_7, %c0_8] : memref<4x64x32xbf16, #tpu.memory_space<vmem>>, vector<1x64x32xbf16>
    %8 = vector.shape_cast %7 : vector<1x64x32xbf16> to vector<64x32xbf16>
    %cst_9 = arith.constant dense<0.000000e+00> : vector<868x32xf32>
    %9 = tpu.matmul %6, %8, %cst_9 {dimension_numbers = #tpu.dot_dimension_numbers<[1], [0], [0], [1], [0, 0, 1, 1], [], []>} : vector<868x64xbf16>, vector<64x32xbf16>, vector<868x32xf32> -> vector<868x32xf32>
    %10 = arith.addf %5, %9 : vector<868x32xf32>
    %c21 = arith.constant 21 : index
    %c0_10 = arith.constant 0 : index
    %11 = vector.load %arg1[%c21, %c0_10] : memref<896x64xbf16, #tpu.memory_space<vmem>>, vector<868x64xbf16>
    %c2 = arith.constant 2 : index
    %c0_11 = arith.constant 0 : index
    %c0_12 = arith.constant 0 : index
    %12 = vector.load %arg2[%c2, %c0_11, %c0_12] : memref<4x64x32xbf16, #tpu.memory_space<vmem>>, vector<1x64x32xbf16>
    %13 = vector.shape_cast %12 : vector<1x64x32xbf16> to vector<64x32xbf16>
    %cst_13 = arith.constant dense<0.000000e+00> : vector<868x32xf32>
    %14 = tpu.matmul %11, %13, %cst_13 {dimension_numbers = #tpu.dot_dimension_numbers<[1], [0], [0], [1], [0, 0, 1, 1], [], []>} : vector<868x64xbf16>, vector<64x32xbf16>, vector<868x32xf32> -> vector<868x32xf32>
    %15 = arith.addf %10, %14 : vector<868x32xf32>
    %c22 = arith.constant 22 : index
    %c0_14 = arith.constant 0 : index
    %16 = vector.load %arg1[%c22, %c0_14] : memref<896x64xbf16, #tpu.memory_space<vmem>>, vector<868x64xbf16>
    %c3 = arith.constant 3 : index
    %c0_15 = arith.constant 0 : index
    %c0_16 = arith.constant 0 : index
    %17 = vector.load %arg2[%c3, %c0_15, %c0_16] : memref<4x64x32xbf16, #tpu.memory_space<vmem>>, vector<1x64x32xbf16>
    %18 = vector.shape_cast %17 : vector<1x64x32xbf16> to vector<64x32xbf16>
    %cst_17 = arith.constant dense<0.000000e+00> : vector<868x32xf32>
    %19 = tpu.matmul %16, %18, %cst_17 {dimension_numbers = #tpu.dot_dimension_numbers<[1], [0], [0], [1], [0, 0, 1, 1], [], []>} : vector<868x64xbf16>, vector<64x32xbf16>, vector<868x32xf32> -> vector<868x32xf32>
    %20 = arith.addf %15, %19 : vector<868x32xf32>
    %c0_18 = arith.constant 0 : index
    %c0_19 = arith.constant 0 : index
    %21 = vector.load %arg3[%c0_18, %c0_19] : memref<1x32xf32, #tpu.memory_space<vmem>>, vector<1x32xf32>
    %22 = vector.broadcast %21 : vector<1x32xf32> to vector<868x32xf32>
    %23 = arith.addf %20, %22 : vector<868x32xf32>
    %cst_20 = arith.constant 0.000000e+00 : f32
    %24 = vector.broadcast %cst_20 : f32 to vector<868x32xf32>
    %25 = arith.maximumf %23, %24 : vector<868x32xf32>
    %26 = arith.truncf %25 : vector<868x32xf32> to vector<868x32xbf16>
    %c0_21 = arith.constant 0 : index
    %c0_22 = arith.constant 0 : index
    %27 = vector.load %arg4[%c0_21, %c0_22] : memref<896x32xbf16, #tpu.memory_space<vmem>>, vector<868x32xbf16>
    tpu.vector_store %arg4[%c0_21, %c0_22], %26 {strides = array<i32>} : memref<896x32xbf16, #tpu.memory_space<vmem>>, vector<868x32xbf16>,
    return
  }
  func.func @transform_0(%arg0: i32) -> (i32, i32) {
    %c0_i32 = arith.constant 0 : i32
    %c0_i32_0 = arith.constant 0 : i32
    return %arg0, %c0_i32 : i32, i32
  }
  func.func @transform_1(%arg0: i32) -> (i32, i32, i32) {
    %c0_i32 = arith.constant 0 : i32
    %c0_i32_0 = arith.constant 0 : i32
    %c0_i32_1 = arith.constant 0 : i32
    %c0_i32_2 = arith.constant 0 : i32
    return %c0_i32, %c0_i32_0, %c0_i32_1 : i32, i32, i32
  }
  func.func @transform_2(%arg0: i32) -> (i32, i32) {
    %c0_i32 = arith.constant 0 : i32
    %c0_i32_0 = arith.constant 0 : i32
    %c0_i32_1 = arith.constant 0 : i32
    return %c0_i32, %c0_i32_0 : i32, i32
  }
  func.func @transform_3(%arg0: i32) -> (i32, i32) {
    %c0_i32 = arith.constant 0 : i32
    %c0_i32_0 = arith.constant 0 : i32
    return %arg0, %c0_i32 : i32, i32
  }
}

module attributes {stable_mosaic.version = 11 : i64} {
  func.func @_conv23_kernel(%arg0: i32, %arg1: memref<224x128xbf16, #tpu.memory_space<vmem>>, %arg2: memref<4x128x64xbf16, #tpu.memory_space<vmem>>, %arg3: memref<1x64xf32, #tpu.memory_space<vmem>>, %arg4: memref<9x64x64xbf16, #tpu.memory_space<vmem>>, %arg5: memref<1x64xf32, #tpu.memory_space<vmem>>, %arg6: memref<224x64xbf16, #tpu.memory_space<vmem>>, %arg7: memref<224x64xbf16, #tpu.memory_space<vmem>>) attributes {dimension_semantics = [#tpu.dimension_semantics<parallel>], iteration_bounds = array<i64: 1>, scalar_prefetch = 0 : i64, scratch_operands = 1 : i64, tpu.core_type = #tpu.core_type<tc>, window_params = [{transform_indices = @transform_0, window_bounds = array<i64: 224, 128>}, {pipeline_mode = #tpu.pipeline_mode<synchronous>, transform_indices = @transform_1, window_bounds = array<i64: 4, 128, 64>}, {pipeline_mode = #tpu.pipeline_mode<synchronous>, transform_indices = @transform_2, window_bounds = array<i64: 1, 64>}, {pipeline_mode = #tpu.pipeline_mode<synchronous>, transform_indices = @transform_3, window_bounds = array<i64: 9, 64, 64>}, {pipeline_mode = #tpu.pipeline_mode<synchronous>, transform_indices = @transform_4, window_bounds = array<i64: 1, 64>}, {transform_indices = @transform_5, window_bounds = array<i64: 224, 64>}]} {
    %cst = arith.constant 0.000000e+00 : f32
    %0 = vector.broadcast %cst : f32 to vector<208x64xf32>
    %c0 = arith.constant 0 : index
    %c0_0 = arith.constant 0 : index
    %1 = vector.load %arg1[%c0, %c0_0] : memref<224x128xbf16, #tpu.memory_space<vmem>>, vector<208x128xbf16>
    %c0_1 = arith.constant 0 : index
    %c0_2 = arith.constant 0 : index
    %c0_3 = arith.constant 0 : index
    %2 = vector.load %arg2[%c0_1, %c0_2, %c0_3] : memref<4x128x64xbf16, #tpu.memory_space<vmem>>, vector<1x128x64xbf16>
    %3 = vector.shape_cast %2 : vector<1x128x64xbf16> to vector<128x64xbf16>
    %cst_4 = arith.constant dense<0.000000e+00> : vector<208x64xf32>
    %4 = tpu.matmul %1, %3, %cst_4 {dimension_numbers = #tpu.dot_dimension_numbers<[1], [0], [0], [1], [0, 0, 1, 1], [], []>} : vector<208x128xbf16>, vector<128x64xbf16>, vector<208x64xf32> -> vector<208x64xf32>
    %5 = arith.addf %0, %4 : vector<208x64xf32>
    %c1 = arith.constant 1 : index
    %c0_5 = arith.constant 0 : index
    %6 = vector.load %arg1[%c1, %c0_5] : memref<224x128xbf16, #tpu.memory_space<vmem>>, vector<208x128xbf16>
    %c1_6 = arith.constant 1 : index
    %c0_7 = arith.constant 0 : index
    %c0_8 = arith.constant 0 : index
    %7 = vector.load %arg2[%c1_6, %c0_7, %c0_8] : memref<4x128x64xbf16, #tpu.memory_space<vmem>>, vector<1x128x64xbf16>
    %8 = vector.shape_cast %7 : vector<1x128x64xbf16> to vector<128x64xbf16>
    %cst_9 = arith.constant dense<0.000000e+00> : vector<208x64xf32>
    %9 = tpu.matmul %6, %8, %cst_9 {dimension_numbers = #tpu.dot_dimension_numbers<[1], [0], [0], [1], [0, 0, 1, 1], [], []>} : vector<208x128xbf16>, vector<128x64xbf16>, vector<208x64xf32> -> vector<208x64xf32>
    %10 = arith.addf %5, %9 : vector<208x64xf32>
    %c10 = arith.constant 10 : index
    %c0_10 = arith.constant 0 : index
    %11 = vector.load %arg1[%c10, %c0_10] : memref<224x128xbf16, #tpu.memory_space<vmem>>, vector<208x128xbf16>
    %c2 = arith.constant 2 : index
    %c0_11 = arith.constant 0 : index
    %c0_12 = arith.constant 0 : index
    %12 = vector.load %arg2[%c2, %c0_11, %c0_12] : memref<4x128x64xbf16, #tpu.memory_space<vmem>>, vector<1x128x64xbf16>
    %13 = vector.shape_cast %12 : vector<1x128x64xbf16> to vector<128x64xbf16>
    %cst_13 = arith.constant dense<0.000000e+00> : vector<208x64xf32>
    %14 = tpu.matmul %11, %13, %cst_13 {dimension_numbers = #tpu.dot_dimension_numbers<[1], [0], [0], [1], [0, 0, 1, 1], [], []>} : vector<208x128xbf16>, vector<128x64xbf16>, vector<208x64xf32> -> vector<208x64xf32>
    %15 = arith.addf %10, %14 : vector<208x64xf32>
    %c11 = arith.constant 11 : index
    %c0_14 = arith.constant 0 : index
    %16 = vector.load %arg1[%c11, %c0_14] : memref<224x128xbf16, #tpu.memory_space<vmem>>, vector<208x128xbf16>
    %c3 = arith.constant 3 : index
    %c0_15 = arith.constant 0 : index
    %c0_16 = arith.constant 0 : index
    %17 = vector.load %arg2[%c3, %c0_15, %c0_16] : memref<4x128x64xbf16, #tpu.memory_space<vmem>>, vector<1x128x64xbf16>
    %18 = vector.shape_cast %17 : vector<1x128x64xbf16> to vector<128x64xbf16>
    %cst_17 = arith.constant dense<0.000000e+00> : vector<208x64xf32>
    %19 = tpu.matmul %16, %18, %cst_17 {dimension_numbers = #tpu.dot_dimension_numbers<[1], [0], [0], [1], [0, 0, 1, 1], [], []>} : vector<208x128xbf16>, vector<128x64xbf16>, vector<208x64xf32> -> vector<208x64xf32>
    %20 = arith.addf %15, %19 : vector<208x64xf32>
    %cst_18 = arith.constant 0.000000e+00 : bf16
    %21 = vector.broadcast %cst_18 : bf16 to vector<16x64xbf16>
    %c208 = arith.constant 208 : index
    %c0_19 = arith.constant 0 : index
    %22 = vector.load %arg7[%c208, %c0_19] : memref<224x64xbf16, #tpu.memory_space<vmem>>, vector<16x64xbf16>
    tpu.vector_store %arg7[%c208, %c0_19], %21 {strides = array<i32>} : memref<224x64xbf16, #tpu.memory_space<vmem>>, vector<16x64xbf16>,
    %c0_20 = arith.constant 0 : index
    %c0_21 = arith.constant 0 : index
    %23 = vector.load %arg3[%c0_20, %c0_21] : memref<1x64xf32, #tpu.memory_space<vmem>>, vector<1x64xf32>
    %24 = vector.broadcast %23 : vector<1x64xf32> to vector<208x64xf32>
    %25 = arith.addf %20, %24 : vector<208x64xf32>
    %cst_22 = arith.constant 0.000000e+00 : f32
    %26 = vector.broadcast %cst_22 : f32 to vector<208x64xf32>
    %27 = arith.maximumf %25, %26 : vector<208x64xf32>
    %28 = arith.truncf %27 : vector<208x64xf32> to vector<208x64xbf16>
    %c0_23 = arith.constant 0 : index
    %c0_24 = arith.constant 0 : index
    %29 = vector.load %arg7[%c0_23, %c0_24] : memref<224x64xbf16, #tpu.memory_space<vmem>>, vector<208x64xbf16>
    tpu.vector_store %arg7[%c0_23, %c0_24], %28 {strides = array<i32>} : memref<224x64xbf16, #tpu.memory_space<vmem>>, vector<208x64xbf16>,
    %cst_25 = arith.constant 0.000000e+00 : f32
    %30 = vector.broadcast %cst_25 : f32 to vector<200x64xf32>
    %c0_26 = arith.constant 0 : index
    %c0_27 = arith.constant 0 : index
    %31 = vector.load %arg7[%c0_26, %c0_27] : memref<224x64xbf16, #tpu.memory_space<vmem>>, vector<200x64xbf16>
    %c0_28 = arith.constant 0 : index
    %c0_29 = arith.constant 0 : index
    %c0_30 = arith.constant 0 : index
    %32 = vector.load %arg4[%c0_28, %c0_29, %c0_30] : memref<9x64x64xbf16, #tpu.memory_space<vmem>>, vector<1x64x64xbf16>
    %33 = vector.shape_cast %32 : vector<1x64x64xbf16> to vector<64x64xbf16>
    %cst_31 = arith.constant dense<0.000000e+00> : vector<200x64xf32>
    %34 = tpu.matmul %31, %33, %cst_31 {dimension_numbers = #tpu.dot_dimension_numbers<[1], [0], [0], [1], [0, 0, 1, 1], [], []>} : vector<200x64xbf16>, vector<64x64xbf16>, vector<200x64xf32> -> vector<200x64xf32>
    %35 = arith.addf %30, %34 : vector<200x64xf32>
    %c1_32 = arith.constant 1 : index
    %c0_33 = arith.constant 0 : index
    %36 = vector.load %arg7[%c1_32, %c0_33] : memref<224x64xbf16, #tpu.memory_space<vmem>>, vector<200x64xbf16>
    %c1_34 = arith.constant 1 : index
    %c0_35 = arith.constant 0 : index
    %c0_36 = arith.constant 0 : index
    %37 = vector.load %arg4[%c1_34, %c0_35, %c0_36] : memref<9x64x64xbf16, #tpu.memory_space<vmem>>, vector<1x64x64xbf16>
    %38 = vector.shape_cast %37 : vector<1x64x64xbf16> to vector<64x64xbf16>
    %cst_37 = arith.constant dense<0.000000e+00> : vector<200x64xf32>
    %39 = tpu.matmul %36, %38, %cst_37 {dimension_numbers = #tpu.dot_dimension_numbers<[1], [0], [0], [1], [0, 0, 1, 1], [], []>} : vector<200x64xbf16>, vector<64x64xbf16>, vector<200x64xf32> -> vector<200x64xf32>
    %40 = arith.addf %35, %39 : vector<200x64xf32>
    %c2_38 = arith.constant 2 : index
    %c0_39 = arith.constant 0 : index
    %41 = vector.load %arg7[%c2_38, %c0_39] : memref<224x64xbf16, #tpu.memory_space<vmem>>, vector<200x64xbf16>
    %c2_40 = arith.constant 2 : index
    %c0_41 = arith.constant 0 : index
    %c0_42 = arith.constant 0 : index
    %42 = vector.load %arg4[%c2_40, %c0_41, %c0_42] : memref<9x64x64xbf16, #tpu.memory_space<vmem>>, vector<1x64x64xbf16>
    %43 = vector.shape_cast %42 : vector<1x64x64xbf16> to vector<64x64xbf16>
    %cst_43 = arith.constant dense<0.000000e+00> : vector<200x64xf32>
    %44 = tpu.matmul %41, %43, %cst_43 {dimension_numbers = #tpu.dot_dimension_numbers<[1], [0], [0], [1], [0, 0, 1, 1], [], []>} : vector<200x64xbf16>, vector<64x64xbf16>, vector<200x64xf32> -> vector<200x64xf32>
    %45 = arith.addf %40, %44 : vector<200x64xf32>
    %c10_44 = arith.constant 10 : index
    %c0_45 = arith.constant 0 : index
    %46 = vector.load %arg7[%c10_44, %c0_45] : memref<224x64xbf16, #tpu.memory_space<vmem>>, vector<200x64xbf16>
    %c3_46 = arith.constant 3 : index
    %c0_47 = arith.constant 0 : index
    %c0_48 = arith.constant 0 : index
    %47 = vector.load %arg4[%c3_46, %c0_47, %c0_48] : memref<9x64x64xbf16, #tpu.memory_space<vmem>>, vector<1x64x64xbf16>
    %48 = vector.shape_cast %47 : vector<1x64x64xbf16> to vector<64x64xbf16>
    %cst_49 = arith.constant dense<0.000000e+00> : vector<200x64xf32>
    %49 = tpu.matmul %46, %48, %cst_49 {dimension_numbers = #tpu.dot_dimension_numbers<[1], [0], [0], [1], [0, 0, 1, 1], [], []>} : vector<200x64xbf16>, vector<64x64xbf16>, vector<200x64xf32> -> vector<200x64xf32>
    %50 = arith.addf %45, %49 : vector<200x64xf32>
    %c11_50 = arith.constant 11 : index
    %c0_51 = arith.constant 0 : index
    %51 = vector.load %arg7[%c11_50, %c0_51] : memref<224x64xbf16, #tpu.memory_space<vmem>>, vector<200x64xbf16>
    %c4 = arith.constant 4 : index
    %c0_52 = arith.constant 0 : index
    %c0_53 = arith.constant 0 : index
    %52 = vector.load %arg4[%c4, %c0_52, %c0_53] : memref<9x64x64xbf16, #tpu.memory_space<vmem>>, vector<1x64x64xbf16>
    %53 = vector.shape_cast %52 : vector<1x64x64xbf16> to vector<64x64xbf16>
    %cst_54 = arith.constant dense<0.000000e+00> : vector<200x64xf32>
    %54 = tpu.matmul %51, %53, %cst_54 {dimension_numbers = #tpu.dot_dimension_numbers<[1], [0], [0], [1], [0, 0, 1, 1], [], []>} : vector<200x64xbf16>, vector<64x64xbf16>, vector<200x64xf32> -> vector<200x64xf32>
    %55 = arith.addf %50, %54 : vector<200x64xf32>
    %c12 = arith.constant 12 : index
    %c0_55 = arith.constant 0 : index
    %56 = vector.load %arg7[%c12, %c0_55] : memref<224x64xbf16, #tpu.memory_space<vmem>>, vector<200x64xbf16>
    %c5 = arith.constant 5 : index
    %c0_56 = arith.constant 0 : index
    %c0_57 = arith.constant 0 : index
    %57 = vector.load %arg4[%c5, %c0_56, %c0_57] : memref<9x64x64xbf16, #tpu.memory_space<vmem>>, vector<1x64x64xbf16>
    %58 = vector.shape_cast %57 : vector<1x64x64xbf16> to vector<64x64xbf16>
    %cst_58 = arith.constant dense<0.000000e+00> : vector<200x64xf32>
    %59 = tpu.matmul %56, %58, %cst_58 {dimension_numbers = #tpu.dot_dimension_numbers<[1], [0], [0], [1], [0, 0, 1, 1], [], []>} : vector<200x64xbf16>, vector<64x64xbf16>, vector<200x64xf32> -> vector<200x64xf32>
    %60 = arith.addf %55, %59 : vector<200x64xf32>
    %c20 = arith.constant 20 : index
    %c0_59 = arith.constant 0 : index
    %61 = vector.load %arg7[%c20, %c0_59] : memref<224x64xbf16, #tpu.memory_space<vmem>>, vector<200x64xbf16>
    %c6 = arith.constant 6 : index
    %c0_60 = arith.constant 0 : index
    %c0_61 = arith.constant 0 : index
    %62 = vector.load %arg4[%c6, %c0_60, %c0_61] : memref<9x64x64xbf16, #tpu.memory_space<vmem>>, vector<1x64x64xbf16>
    %63 = vector.shape_cast %62 : vector<1x64x64xbf16> to vector<64x64xbf16>
    %cst_62 = arith.constant dense<0.000000e+00> : vector<200x64xf32>
    %64 = tpu.matmul %61, %63, %cst_62 {dimension_numbers = #tpu.dot_dimension_numbers<[1], [0], [0], [1], [0, 0, 1, 1], [], []>} : vector<200x64xbf16>, vector<64x64xbf16>, vector<200x64xf32> -> vector<200x64xf32>
    %65 = arith.addf %60, %64 : vector<200x64xf32>
    %c21 = arith.constant 21 : index
    %c0_63 = arith.constant 0 : index
    %66 = vector.load %arg7[%c21, %c0_63] : memref<224x64xbf16, #tpu.memory_space<vmem>>, vector<200x64xbf16>
    %c7 = arith.constant 7 : index
    %c0_64 = arith.constant 0 : index
    %c0_65 = arith.constant 0 : index
    %67 = vector.load %arg4[%c7, %c0_64, %c0_65] : memref<9x64x64xbf16, #tpu.memory_space<vmem>>, vector<1x64x64xbf16>
    %68 = vector.shape_cast %67 : vector<1x64x64xbf16> to vector<64x64xbf16>
    %cst_66 = arith.constant dense<0.000000e+00> : vector<200x64xf32>
    %69 = tpu.matmul %66, %68, %cst_66 {dimension_numbers = #tpu.dot_dimension_numbers<[1], [0], [0], [1], [0, 0, 1, 1], [], []>} : vector<200x64xbf16>, vector<64x64xbf16>, vector<200x64xf32> -> vector<200x64xf32>
    %70 = arith.addf %65, %69 : vector<200x64xf32>
    %c22 = arith.constant 22 : index
    %c0_67 = arith.constant 0 : index
    %71 = vector.load %arg7[%c22, %c0_67] : memref<224x64xbf16, #tpu.memory_space<vmem>>, vector<200x64xbf16>
    %c8 = arith.constant 8 : index
    %c0_68 = arith.constant 0 : index
    %c0_69 = arith.constant 0 : index
    %72 = vector.load %arg4[%c8, %c0_68, %c0_69] : memref<9x64x64xbf16, #tpu.memory_space<vmem>>, vector<1x64x64xbf16>
    %73 = vector.shape_cast %72 : vector<1x64x64xbf16> to vector<64x64xbf16>
    %cst_70 = arith.constant dense<0.000000e+00> : vector<200x64xf32>
    %74 = tpu.matmul %71, %73, %cst_70 {dimension_numbers = #tpu.dot_dimension_numbers<[1], [0], [0], [1], [0, 0, 1, 1], [], []>} : vector<200x64xbf16>, vector<64x64xbf16>, vector<200x64xf32> -> vector<200x64xf32>
    %75 = arith.addf %70, %74 : vector<200x64xf32>
    %c0_71 = arith.constant 0 : index
    %c0_72 = arith.constant 0 : index
    %76 = vector.load %arg5[%c0_71, %c0_72] : memref<1x64xf32, #tpu.memory_space<vmem>>, vector<1x64xf32>
    %77 = vector.broadcast %76 : vector<1x64xf32> to vector<200x64xf32>
    %78 = arith.addf %75, %77 : vector<200x64xf32>
    %cst_73 = arith.constant 0.000000e+00 : f32
    %79 = vector.broadcast %cst_73 : f32 to vector<200x64xf32>
    %80 = arith.maximumf %78, %79 : vector<200x64xf32>
    %81 = arith.truncf %80 : vector<200x64xf32> to vector<200x64xbf16>
    %c0_74 = arith.constant 0 : index
    %c0_75 = arith.constant 0 : index
    %82 = vector.load %arg6[%c0_74, %c0_75] : memref<224x64xbf16, #tpu.memory_space<vmem>>, vector<200x64xbf16>
    tpu.vector_store %arg6[%c0_74, %c0_75], %81 {strides = array<i32>} : memref<224x64xbf16, #tpu.memory_space<vmem>>, vector<200x64xbf16>,
    return
  }
  func.func @transform_0(%arg0: i32) -> (i32, i32) {
    %c0_i32 = arith.constant 0 : i32
    %c0_i32_0 = arith.constant 0 : i32
    return %arg0, %c0_i32 : i32, i32
  }
  func.func @transform_1(%arg0: i32) -> (i32, i32, i32) {
    %c0_i32 = arith.constant 0 : i32
    %c0_i32_0 = arith.constant 0 : i32
    %c0_i32_1 = arith.constant 0 : i32
    %c0_i32_2 = arith.constant 0 : i32
    return %c0_i32, %c0_i32_0, %c0_i32_1 : i32, i32, i32
  }
  func.func @transform_2(%arg0: i32) -> (i32, i32) {
    %c0_i32 = arith.constant 0 : i32
    %c0_i32_0 = arith.constant 0 : i32
    %c0_i32_1 = arith.constant 0 : i32
    return %c0_i32, %c0_i32_0 : i32, i32
  }
  func.func @transform_3(%arg0: i32) -> (i32, i32, i32) {
    %c0_i32 = arith.constant 0 : i32
    %c0_i32_0 = arith.constant 0 : i32
    %c0_i32_1 = arith.constant 0 : i32
    %c0_i32_2 = arith.constant 0 : i32
    return %c0_i32, %c0_i32_0, %c0_i32_1 : i32, i32, i32
  }
  func.func @transform_4(%arg0: i32) -> (i32, i32) {
    %c0_i32 = arith.constant 0 : i32
    %c0_i32_0 = arith.constant 0 : i32
    %c0_i32_1 = arith.constant 0 : i32
    return %c0_i32, %c0_i32_0 : i32, i32
  }
  func.func @transform_5(%arg0: i32) -> (i32, i32) {
    %c0_i32 = arith.constant 0 : i32
    %c0_i32_0 = arith.constant 0 : i32
    return %arg0, %c0_i32 : i32, i32
  }
}

module attributes {stable_mosaic.version = 11 : i64} {
  func.func @_mlp_kernel(%arg0: i32, %arg1: memref<16x3200xbf16, #tpu.memory_space<vmem>>, %arg2: memref<3200x512xbf16, #tpu.memory_space<vmem>>, %arg3: memref<1x512xf32, #tpu.memory_space<vmem>>, %arg4: memref<512x128xbf16, #tpu.memory_space<vmem>>, %arg5: memref<1x128xf32, #tpu.memory_space<vmem>>, %arg6: memref<16x128xf32, #tpu.memory_space<vmem>>) attributes {dimension_semantics = [#tpu.dimension_semantics<parallel>], iteration_bounds = array<i64: 1>, scalar_prefetch = 0 : i64, scratch_operands = 0 : i64, tpu.core_type = #tpu.core_type<tc>, window_params = [{transform_indices = @transform_0, window_bounds = array<i64: 16, 3200>}, {pipeline_mode = #tpu.pipeline_mode<synchronous>, transform_indices = @transform_1, window_bounds = array<i64: 3200, 512>}, {pipeline_mode = #tpu.pipeline_mode<synchronous>, transform_indices = @transform_2, window_bounds = array<i64: 1, 512>}, {pipeline_mode = #tpu.pipeline_mode<synchronous>, transform_indices = @transform_3, window_bounds = array<i64: 512, 128>}, {pipeline_mode = #tpu.pipeline_mode<synchronous>, transform_indices = @transform_4, window_bounds = array<i64: 1, 128>}, {transform_indices = @transform_5, window_bounds = array<i64: 16, 128>}]} {
    %c0 = arith.constant 0 : index
    %c0_0 = arith.constant 0 : index
    %0 = vector.load %arg1[%c0, %c0_0] : memref<16x3200xbf16, #tpu.memory_space<vmem>>, vector<16x3200xbf16>
    %c0_1 = arith.constant 0 : index
    %c0_2 = arith.constant 0 : index
    %1 = vector.load %arg2[%c0_1, %c0_2] : memref<3200x512xbf16, #tpu.memory_space<vmem>>, vector<3200x512xbf16>
    %cst = arith.constant dense<0.000000e+00> : vector<16x512xf32>
    %2 = tpu.matmul %0, %1, %cst {dimension_numbers = #tpu.dot_dimension_numbers<[1], [0], [0], [1], [0, 0, 1, 1], [], []>} : vector<16x3200xbf16>, vector<3200x512xbf16>, vector<16x512xf32> -> vector<16x512xf32>
    %c0_3 = arith.constant 0 : index
    %c0_4 = arith.constant 0 : index
    %3 = vector.load %arg3[%c0_3, %c0_4] : memref<1x512xf32, #tpu.memory_space<vmem>>, vector<1x512xf32>
    %4 = vector.broadcast %3 : vector<1x512xf32> to vector<16x512xf32>
    %5 = arith.addf %2, %4 : vector<16x512xf32>
    %cst_5 = arith.constant 0.000000e+00 : f32
    %6 = vector.broadcast %cst_5 : f32 to vector<16x512xf32>
    %7 = arith.maximumf %5, %6 : vector<16x512xf32>
    %8 = arith.truncf %7 : vector<16x512xf32> to vector<16x512xbf16>
    %c0_6 = arith.constant 0 : index
    %c0_7 = arith.constant 0 : index
    %9 = vector.load %arg4[%c0_6, %c0_7] : memref<512x128xbf16, #tpu.memory_space<vmem>>, vector<512x128xbf16>
    %cst_8 = arith.constant dense<0.000000e+00> : vector<16x128xf32>
    %10 = tpu.matmul %8, %9, %cst_8 {dimension_numbers = #tpu.dot_dimension_numbers<[1], [0], [0], [1], [0, 0, 1, 1], [], []>} : vector<16x512xbf16>, vector<512x128xbf16>, vector<16x128xf32> -> vector<16x128xf32>
    %c0_9 = arith.constant 0 : index
    %c0_10 = arith.constant 0 : index
    %11 = vector.load %arg5[%c0_9, %c0_10] : memref<1x128xf32, #tpu.memory_space<vmem>>, vector<1x128xf32>
    %12 = vector.broadcast %11 : vector<1x128xf32> to vector<16x128xf32>
    %13 = arith.addf %10, %12 : vector<16x128xf32>
    %c0_11 = arith.constant 0 : index
    %c0_12 = arith.constant 0 : index
    %14 = vector.load %arg6[%c0_11, %c0_12] : memref<16x128xf32, #tpu.memory_space<vmem>>, vector<16x128xf32>
    tpu.vector_store %arg6[%c0_11, %c0_12], %13 {strides = array<i32>} : memref<16x128xf32, #tpu.memory_space<vmem>>, vector<16x128xf32>,
    return
  }
  func.func @transform_0(%arg0: i32) -> (i32, i32) {
    %c0_i32 = arith.constant 0 : i32
    %c0_i32_0 = arith.constant 0 : i32
    return %arg0, %c0_i32 : i32, i32
  }
  func.func @transform_1(%arg0: i32) -> (i32, i32) {
    %c0_i32 = arith.constant 0 : i32
    %c0_i32_0 = arith.constant 0 : i32
    %c0_i32_1 = arith.constant 0 : i32
    return %c0_i32, %c0_i32_0 : i32, i32
  }
  func.func @transform_2(%arg0: i32) -> (i32, i32) {
    %c0_i32 = arith.constant 0 : i32
    %c0_i32_0 = arith.constant 0 : i32
    %c0_i32_1 = arith.constant 0 : i32
    return %c0_i32, %c0_i32_0 : i32, i32
  }
  func.func @transform_3(%arg0: i32) -> (i32, i32) {
    %c0_i32 = arith.constant 0 : i32
    %c0_i32_0 = arith.constant 0 : i32
    %c0_i32_1 = arith.constant 0 : i32
    return %c0_i32, %c0_i32_0 : i32, i32
  }
  func.func @transform_4(%arg0: i32) -> (i32, i32) {
    %c0_i32 = arith.constant 0 : i32
    %c0_i32_0 = arith.constant 0 : i32
    %c0_i32_1 = arith.constant 0 : i32
    return %c0_i32, %c0_i32_0 : i32, i32
  }
  func.func @transform_5(%arg0: i32) -> (i32, i32) {
    %c0_i32 = arith.constant 0 : i32
    %c0_i32_0 = arith.constant 0 : i32
    return %arg0, %c0_i32 : i32, i32
  }
}

</mosaic_0001>

<bundles_post_ra>
// kernel: dqn_forward.3
= control target key start
LH: loop header
LB: loop body
LE: loop exit
PB: predicated region body
PF: predicated region fallthrough
CT: control target
= control target key end

     0   :  { %v9734_v0 = vmov 0.0   ;;  %vm7328_vm0 = vmmov 0   ;;  %vm415_vm1 = vsmask.f32 7424  ;;  %vm879_vm2 = vcmask 523264   ;;  %s9730_s1 = inlined_call_operand.vmem [shape: bf16[4,64,32], index: 1, kind: input, shape index: {}]   ;;  %s9731_s0 = inlined_call_operand.vmem [shape: bf16[896,64], index: 0, kind: input, shape index: {}]   ;;  %s9732_s2 = inlined_call_operand.vmem [shape: f32[1,32], index: 2, kind: input, shape index: {}]   ;;  %s9733_s3 = inlined_call_operand.vmem [shape: bf16[896,32], index: 3, kind: output, shape index: {}]  }
   0x1   :  { %6283 = vmatprep.subr.bf16.mxu0 %v9734_v0  ;;  %6511 = vmatprep.subr.bf16.mxu1 %v9734_v0  ;;  %v7197_v1 = vld [vmem:[%s9730_s1 + $0x20] sm:$0xff]   ;;  %v7199_v3 = vld [vmem:[%s9730_s1 + $0x28] sm:$0xff]   ;;  %v7201_v5 = vld [vmem:[%s9730_s1 + $0x30] sm:$0xff]   ;;  %vm2521_vm3 = vsmask.f32 5376  ;;  %vm3799_vm4 = vcmask 1044480  }
   0x2   :  { %v7198_v2 = vld [vmem:[%s9730_s1] sm:$0xff]   ;;  %6291 = vmatprep.mubr.msk.bf16.mxu0 %vm7328_vm0, %v9734_v0  ;;  %6519 = vmatprep.mubr.msk.bf16.mxu1 %vm7328_vm0, %v9734_v0  ;;  %v7200_v4 = vld [vmem:[%s9730_s1 + $0x8] sm:$0xff]   ;;  %v7202_v6 = vld [vmem:[%s9730_s1 + $0x10] sm:$0xff]   ;;  %vm5341_vm5 = vcmask 257024   ;;  %vm5450_vm6 = vcmask 254976  }
   0x3   :  { %6284 = vmatpush3.bf16.msra.mxu0 %v7197_v1  ;;  %6512 = vmatpush3.bf16.msra.mxu1 %v7198_v2  ;;  %v7205_v7 = vld [vmem:[%s9731_s0] sm:$0xff]   ;;  %v7206_v8 = vld [vmem:[%s9731_s0 + $0x8] sm:$0xff]   ;;  %v7203_v9 = vld [vmem:[%s9730_s1 + $0x38] sm:$0xff]  }
   0x4   :  { %6285 = vmatprep.subr.bf16.mxu0 %v9734_v0  ;;  %6513 = vmatprep.subr.bf16.mxu1 %v9734_v0  ;;  %v7204_v10 = vld [vmem:[%s9730_s1 + $0x18] sm:$0xff]   ;;  %v417_v11 = vshrl.u32 %v7205_v7, 16  ;;  %v419_v12 = vshll.u32 %v7205_v7, 16  ;;  %v424_v13 = vshll.u32 %v7206_v8, 16  ;;  %v7209_v16 = vld [vmem:[%s9731_s0 + $0x10] sm:$0xff]   ;;  %v7207_v18 = vld [vmem:[%s9730_s1 + $0x40] sm:$0xff]  }
   0x5   :  { %v7208_v19 = vld [vmem:[%s9730_s1 + $0x60] sm:$0xff]   ;;  %v428_v20 = vshrl.u32 %v7206_v8, 16  ;;  %v432_v21 = vshll.u32 %v7209_v16, 16  ;;  %v7210_v25 = vld [vmem:[%s9731_s0 + $0x18] sm:$0xff]   ;;  %v436_v27 = vshrl.u32 %v7209_v16, 16  ;;  %v7222_v32 = vld [vmem:[%s9730_s1 + $0x48] sm:$0xff]  }
   0x6   :  { %v421_v14 = vrot.slane %v419_v12, 1  ;;  %v426_v15 = vrot.slane %v424_v13, 1  ;;  %v440_v28 = vshll.u32 %v7210_v25, 16  ;;  %v7211_v31 = vld [vmem:[%s9731_s0 + $0x20] sm:$0xff]   ;;  %v444_v34 = vshrl.u32 %v7210_v25, 16  ;;  %v7224_v36 = vld [vmem:[%s9730_s1 + $0x68] sm:$0xff]  }
   0x7   :  { %6286 = vmatpush3.bf16.msra.mxu0 %v7199_v3  ;;  %6514 = vmatpush3.bf16.msra.mxu1 %v7200_v4  ;;  %v434_v24 = vrot.slane %v432_v21, 1  ;;  %v448_v35 = vshll.u32 %v7211_v31, 16  ;;  %v7212_v39 = vld [vmem:[%s9731_s0 + $0x28] sm:$0xff]   ;;  %v452_v41 = vshrl.u32 %v7211_v31, 16  ;;  %v7213_v45 = vld [vmem:[%s9731_s0 + $0x30] sm:$0xff]   ;;  %v7214_v51 = vld [vmem:[%s9731_s0 + $0x38] sm:$0xff]  }
   0x8   :  { %6287 = vmatprep.subr.bf16.mxu0 %v9734_v0  ;;  %6515 = vmatprep.subr.bf16.mxu1 %v9734_v0  ;;  %v422_v17 = vor.u32 %v421_v14, %v417_v11  ;;  %v430_v23 = vor.u32 %v428_v20, %v426_v15  ;;  %v442_v30 = vrot.slane %v440_v28, 1  ;;  %v456_v42 = vshll.u32 %v7212_v39, 16  ;;  %v7215_v57 = vld [vmem:[%s9731_s0 + $0x40] sm:$0xff]   ;;  %v7216_v63 = vld [vmem:[%s9731_s0 + $0x48] sm:$0xff]   ;;  %v7218_v12 = vld [vmem:[%s9731_s0 + $0x58] sm:$0xff]  }
   0x9   :  { %v438_v29 = vor.u32 %v436_v27, %v434_v24  ;;  %v450_v38 = vrot.slane %v448_v35, 1  ;;  %v460_v47 = vshrl.u32 %v7212_v39, 16  ;;  %v464_v48 = vshll.u32 %v7213_v45, 16  ;;  %v7239_v35 = vld [vmem:[%s9730_s1 + $0x70] sm:$0xff]  }
   0xa   :  { %v427_v22 = vsel %vm415_vm1, %v422_v17, %v426_v15  ;;  %v435_v26 = vsel %vm415_vm1, %v430_v23, %v434_v24  ;;  %v446_v37 = vor.u32 %v444_v34, %v442_v30  ;;  %v458_v44 = vrot.slane %v456_v42, 1  ;;  %v7220_v24 = vld [vmem:[%s9731_s0 + $0x68] sm:$0xff]   ;;  %v7238_v34 = vld [vmem:[%s9730_s1 + $0x50] sm:$0xff]  }
   0xb   :  { %6288 = vmatpush3.bf16.msra.mxu0 %v7201_v5  ;;  %6516 = vmatpush3.bf16.msra.mxu1 %v7202_v6  ;;  %v443_v33 = vsel %vm415_vm1, %v438_v29, %v442_v30  ;;  %v454_v43 = vor.u32 %v452_v41, %v450_v38  ;;  %v466_v50 = vrot.slane %v464_v48, 1  ;;  %v468_v53 = vshrl.u32 %v7213_v45, 16  ;;  %v7217_v6 = vld [vmem:[%s9731_s0 + $0x50] sm:$0xff]  }
   0xc   :  { %6289 = vmatprep.subr.bf16.mxu0 %v9734_v0  ;;  %6517 = vmatprep.subr.bf16.mxu1 %v9734_v0  ;;  %v451_v40 = vsel %vm415_vm1, %v446_v37, %v450_v38  ;;  %v462_v49 = vor.u32 %v460_v47, %v458_v44  ;;  %v472_v54 = vshll.u32 %v7214_v51, 16  ;;  %v476_v59 = vshrl.u32 %v7214_v51, 16  ;;  %v7221_v30 = vld [vmem:[%s9731_s0 + $0x70] sm:$0xff]   ;;  %v7223_v38 = vld [vmem:[%s9731_s0 + $0x78] sm:$0xff]  }
   0xd   :  { %v459_v46 = vsel %vm415_vm1, %v454_v43, %v458_v44  ;;  %v470_v55 = vor.u32 %v468_v53, %v466_v50  ;;  %v480_v60 = vshll.u32 %v7215_v57, 16  ;;  %v484_v2 = vshrl.u32 %v7215_v57, 16  ;;  %v7225_v44 = vld [vmem:[%s9731_s0 + $0x80] sm:$0xff]  }
   0xe   :  { %v467_v52 = vsel %vm415_vm1, %v462_v49, %v466_v50  ;;  %v474_v56 = vrot.slane %v472_v54, 1  ;;  %v488_v3 = vshll.u32 %v7216_v63, 16  ;;  %v500_v14 = vshrl.u32 %v7217_v6, 16  ;;  %v7226_v50 = vld [vmem:[%s9731_s0 + $0x88] sm:$0xff]  }
   0xf   :  { %6290 = vmatpush3.bf16.msra.mxu0 %v7203_v9  ;;  %6518 = vmatpush3.bf16.msra.mxu1 %v7204_v10  ;;  %v482_v62 = vrot.slane %v480_v60, 1  ;;  %v496_v9 = vshll.u32 %v7217_v6, 16  ;;  %v504_v15 = vshll.u32 %v7218_v12, 16  ;;  %v508_v20 = vshrl.u32 %v7218_v12, 16 }
  0x10   :  { %6739 = vmatprep.subr.bf16.mxu0 %v9734_v0  ;;  %6967 = vmatprep.subr.bf16.mxu1 %v9734_v0  ;;  %v475_v58 = vsel %vm415_vm1, %v470_v55, %v474_v56  ;;  %v478_v61 = vor.u32 %v476_v59, %v474_v56  ;;  %v490_v5 = vrot.slane %v488_v3, 1  ;;  %v520_v27 = vshll.u32 %v7220_v24, 16  ;;  %v7227_v56 = vld [vmem:[%s9731_s0 + $0x90] sm:$0xff]  }
  0x11   :  { %v486_v4 = vor.u32 %v484_v2, %v482_v62  ;;  %v498_v11 = vrot.slane %v496_v9, 1  ;;  %v506_v17 = vrot.slane %v504_v15, 1  ;;  %v536_v41 = vshll.u32 %v7223_v38, 16 }
  0x12   :  { %6292 = vmatmul.mubr.msk.bf16.vlgmr.msra.gmra.mrb[0].mxu0 %vm879_vm2, %v427_v22  ;;  %6520 = vmatmul.mubr.msk.bf16.vlgmr.msra.gmra.mrb[0].mxu1 %vm879_vm2, %v7205_v7  ;;  %v483_v1 = vsel %vm415_vm1, %v478_v61, %v482_v62  ;;  %v522_v29 = vrot.slane %v520_v27, 1  ;;  %v544_v47 = vshll.u32 %v7225_v44, 16  ;;  %v552_v53 = vshll.u32 %v7226_v50, 16  ;;  %v7228_v62 = vld [vmem:[%s9731_s0 + $0x98] sm:$0xff]  }
  0x13   :  { %6740 = vmatpush3.bf16.msra.mxu0 %v7207_v18  ;;  %6968 = vmatpush3.bf16.msra.mxu1 %v7208_v19  ;;  %v491_v7 = vsel %vm415_vm1, %v486_v4, %v490_v5  ;;  %v7219_v18 = vld [vmem:[%s9731_s0 + $0x60] sm:$0xff]   ;;  %v510_v22 = vor.u32 %v508_v20, %v506_v17  ;;  %v538_v43 = vrot.slane %v536_v41, 1  ;;  %v560_v59 = vshll.u32 %v7227_v56, 16  ;;  %v7235_v41 = vld [vmem:[%s9731_s0 + $0xd0] sm:$0xff]  }
  0x14   :  { %6295 = vmatprep.mubr.msk.bf16.mxu0 %vm7328_vm0, %v9734_v0  ;;  %6523 = vmatprep.mubr.msk.bf16.mxu1 %vm7328_vm0, %v9734_v0  ;;  %v512_v21 = vshll.u32 %v7219_v18, 16  ;;  %v546_v49 = vrot.slane %v544_v47, 1  ;;  %v554_v55 = vrot.slane %v552_v53, 1  ;;  %v568_v2 = vshll.u32 %v7228_v62, 16  ;;  %v7236_v47 = vld [vmem:[%s9731_s0 + $0xd8] sm:$0xff]   ;;  %v7237_v53 = vld [vmem:[%s9731_s0 + $0xe0] sm:$0xff]  }
  0x15   :  { %6741 = vmatprep.subr.bf16.mxu0 %v9734_v0  ;;  %6969 = vmatprep.subr.bf16.mxu1 %v9734_v0  ;;  %v562_v61 = vrot.slane %v560_v59, 1 }
  0x16   :  { %v514_v23 = vrot.slane %v512_v21, 1  ;;  %v570_v4 = vrot.slane %v568_v2, 1 }
  0x17   :  { %6742 = vmatpush3.bf16.msra.mxu0 %v7222_v32  ;;  %6970 = vmatpush3.bf16.msra.mxu1 %v7224_v36  ;;  %v524_v32 = vshrl.u32 %v7220_v24, 16 }
  0x18   :  { %6743 = vmatprep.subr.bf16.mxu0 %v9734_v0  ;;  %6971 = vmatprep.subr.bf16.mxu1 %v9734_v0 }
  0x19   :  { %v526_v36 = vor.u32 %v524_v32, %v522_v29 }
  0x1a   :  { %6296 = vmatmul.mubr.msk.bf16.gmra.mrb[4].mxu0 %vm879_vm2, %v435_v26  ;;  %6524 = vmatmul.mubr.msk.bf16.gmra.mrb[4].mxu1 %vm879_vm2, %v7206_v8  ;;  %v492_v8 = vshrl.u32 %v7216_v63, 16  ;;  %v516_v26 = vshrl.u32 %v7219_v18, 16 }
  0x1b   :  { %6299 = vmatprep.mubr.msk.bf16.mxu0 %vm7328_vm0, %v9734_v0  ;;  %6527 = vmatprep.mubr.msk.bf16.mxu1 %vm7328_vm0, %v9734_v0 }
  0x1c   :  { %v494_v10 = vor.u32 %v492_v8, %v490_v5  ;;  %v518_v28 = vor.u32 %v516_v26, %v514_v23  ;;  %6744 = vmatpush3.bf16.msra.mxu0 %v7238_v34  ;;  %6972 = vmatpush3.bf16.msra.mxu1 %v7239_v35  ;;  %v7229_v5 = vld [vmem:[%s9731_s0 + $0xa0] sm:$0xff]   ;;  %v7234_v35 = vld [vmem:[%s9731_s0 + $0xc8] sm:$0xff]  }
  0x1d   :  { %6745 = vmatprep.subr.bf16.mxu0 %v9734_v0  ;;  %6973 = vmatprep.subr.bf16.mxu1 %v9734_v0  ;;  %v576_v8 = vshll.u32 %v7229_v5, 16 }
  0x1e   :  { %v499_v13 = vsel %vm415_vm1, %v494_v10, %v498_v11 }
  0x1f   :  { %v578_v10 = vrot.slane %v576_v8, 1 }
  0x22   :  { %6300 = vmatmul.mubr.msk.bf16.gmra.mrb[8].mxu0 %vm879_vm2, %v443_v33  ;;  %6528 = vmatmul.mubr.msk.bf16.gmra.mrb[8].mxu1 %vm879_vm2, %v7209_v16  ;;  %v502_v16 = vor.u32 %v500_v14, %v498_v11  ;;  %v528_v33 = vshll.u32 %v7221_v30, 16  ;;  %v7230_v11 = vld [vmem:[%s9731_s0 + $0xa8] sm:$0xff]  }
  0x23   :  { %6303 = vmatprep.mubr.msk.bf16.mxu0 %vm7328_vm0, %v9734_v0  ;;  %6531 = vmatprep.mubr.msk.bf16.mxu1 %vm7328_vm0, %v9734_v0  ;;  %v584_v14 = vshll.u32 %v7230_v11, 16 }
  0x24   :  { %v507_v19 = vsel %vm415_vm1, %v502_v16, %v506_v17  ;;  %v530_v37 = vrot.slane %v528_v33, 1  ;;  %v7231_v17 = vld [vmem:[%s9731_s0 + $0xb0] sm:$0xff]  }
  0x25   :  { %v586_v16 = vrot.slane %v584_v14, 1  ;;  %v592_v20 = vshll.u32 %v7231_v17, 16  ;;  %v7241_v14 = vld [vmem:[%s9731_s0 + $0xf0] sm:$0xff]  }
  0x2a   :  { %6304 = vmatmul.mubr.msk.bf16.gmra.mrb[12].mxu0 %vm879_vm2, %v451_v40  ;;  %6532 = vmatmul.mubr.msk.bf16.gmra.mrb[12].mxu1 %vm879_vm2, %v7210_v25  ;;  %v515_v25 = vsel %vm415_vm1, %v510_v22, %v514_v23  ;;  %v532_v40 = vshrl.u32 %v7221_v30, 16  ;;  %v594_v22 = vrot.slane %v592_v20, 1  ;;  %v7232_v23 = vld [vmem:[%s9731_s0 + $0xb8] sm:$0xff]  }
  0x2b   :  { %6307 = vmatprep.mubr.msk.bf16.mxu0 %vm7328_vm0, %v9734_v0  ;;  %6535 = vmatprep.mubr.msk.bf16.mxu1 %vm7328_vm0, %v9734_v0  ;;  %v600_v26 = vshll.u32 %v7232_v23, 16 }
  0x2c   :  { %v534_v42 = vor.u32 %v532_v40, %v530_v37 }
  0x32   :  { %6308 = vmatmul.mubr.msk.bf16.gmra.mrb[16].mxu0 %vm879_vm2, %v459_v46  ;;  %6536 = vmatmul.mubr.msk.bf16.gmra.mrb[16].mxu1 %vm879_vm2, %v7211_v31  ;;  %v523_v31 = vsel %vm415_vm1, %v518_v28, %v522_v29  ;;  %v540_v46 = vshrl.u32 %v7223_v38, 16  ;;  %v602_v28 = vrot.slane %v600_v26, 1  ;;  %v7233_v29 = vld [vmem:[%s9731_s0 + $0xc0] sm:$0xff]  }
  0x33   :  { %6311 = vmatprep.mubr.msk.bf16.mxu0 %vm7328_vm0, %v9734_v0  ;;  %6539 = vmatprep.mubr.msk.bf16.mxu1 %vm7328_vm0, %v9734_v0  ;;  %v608_v32 = vshll.u32 %v7233_v29, 16 }
  0x34   :  { %v542_v48 = vor.u32 %v540_v46, %v538_v43 }
  0x35   :  { %v610_v34 = vrot.slane %v608_v32, 1 }
  0x3a   :  { %6312 = vmatmul.mubr.msk.bf16.gmra.mrb[20].mxu0 %vm879_vm2, %v467_v52  ;;  %6540 = vmatmul.mubr.msk.bf16.gmra.mrb[20].mxu1 %vm879_vm2, %v7212_v39  ;;  %v531_v39 = vsel %vm415_vm1, %v526_v36, %v530_v37  ;;  %v548_v52 = vshrl.u32 %v7225_v44, 16  ;;  %v612_v37 = vshrl.u32 %v7233_v29, 16 }
  0x3b   :  { %6315 = vmatprep.mubr.msk.bf16.mxu0 %vm7328_vm0, %v9734_v0  ;;  %6543 = vmatprep.mubr.msk.bf16.mxu1 %vm7328_vm0, %v9734_v0 }
  0x3c   :  { %v550_v54 = vor.u32 %v548_v52, %v546_v49 }
  0x42   :  { %6316 = vmatmul.mubr.msk.bf16.gmra.mrb[24].mxu0 %vm879_vm2, %v475_v58  ;;  %6544 = vmatmul.mubr.msk.bf16.gmra.mrb[24].mxu1 %vm879_vm2, %v7213_v45  ;;  %v539_v45 = vsel %vm415_vm1, %v534_v42, %v538_v43  ;;  %v556_v58 = vshrl.u32 %v7226_v50, 16  ;;  %v620_v43 = vshrl.u32 %v7234_v35, 16 }
  0x43   :  { %6319 = vmatprep.mubr.msk.bf16.mxu0 %vm7328_vm0, %v9734_v0  ;;  %6547 = vmatprep.mubr.msk.bf16.mxu1 %vm7328_vm0, %v9734_v0 }
  0x44   :  { %v558_v60 = vor.u32 %v556_v58, %v554_v55  ;;  %v7255_v58 = vld [vmem:[%s9730_s1 + $0x78] sm:$0xff]  }
  0x45   :  { %6974 = vmatpush3.bf16.msra.mxu1 %v7255_v58 }
  0x4a   :  { %6320 = vmatmul.mubr.msk.bf16.gmra.mrb[28].mxu0 %vm879_vm2, %v483_v1  ;;  %6548 = vmatmul.mubr.msk.bf16.gmra.mrb[28].mxu1 %vm879_vm2, %v7214_v51  ;;  %v547_v51 = vsel %vm415_vm1, %v542_v48, %v546_v49  ;;  %v564_v1 = vshrl.u32 %v7227_v56, 16  ;;  %v628_v49 = vshrl.u32 %v7235_v41, 16 }
  0x4b   :  { %6323 = vmatprep.mubr.msk.bf16.mxu0 %vm7328_vm0, %v9734_v0  ;;  %6551 = vmatprep.mubr.msk.bf16.mxu1 %vm7328_vm0, %v9734_v0 }
  0x4c   :  { %v566_v3 = vor.u32 %v564_v1, %v562_v61 }
  0x52   :  { %6324 = vmatmul.mubr.msk.bf16.gmra.mrb[32].mxu0 %vm879_vm2, %v491_v7  ;;  %6552 = vmatmul.mubr.msk.bf16.gmra.mrb[32].mxu1 %vm879_vm2, %v7215_v57  ;;  %v555_v57 = vsel %vm415_vm1, %v550_v54, %v554_v55  ;;  %v572_v7 = vshrl.u32 %v7228_v62, 16  ;;  %v7254_v54 = vld [vmem:[%s9730_s1 + $0x58] sm:$0xff]  }
  0x53   :  { %6327 = vmatprep.mubr.msk.bf16.mxu0 %vm7328_vm0, %v9734_v0  ;;  %6555 = vmatprep.mubr.msk.bf16.mxu1 %vm7328_vm0, %v9734_v0 }
  0x54   :  { %v574_v9 = vor.u32 %v572_v7, %v570_v4  ;;  %6746 = vmatpush3.bf16.msra.mxu0 %v7254_v54  ;;  %v644_v7 = vshrl.u32 %v7237_v53, 16 }
  0x5a   :  { %6328 = vmatmul.mubr.msk.bf16.gmra.mrb[36].mxu0 %vm879_vm2, %v499_v13  ;;  %6556 = vmatmul.mubr.msk.bf16.gmra.mrb[36].mxu1 %vm879_vm2, %v7216_v63  ;;  %v563_v63 = vsel %vm415_vm1, %v558_v60, %v562_v61  ;;  %v580_v13 = vshrl.u32 %v7229_v5, 16  ;;  %v7240_v61 = vld [vmem:[%s9731_s0 + $0xe8] sm:$0xff]  }
  0x5b   :  { %6331 = vmatprep.mubr.msk.bf16.mxu0 %vm7328_vm0, %v9734_v0  ;;  %6559 = vmatprep.mubr.msk.bf16.mxu1 %vm7328_vm0, %v9734_v0  ;;  %v648_v8 = vshll.u32 %v7240_v61, 16 }
  0x5c   :  { %v582_v15 = vor.u32 %v580_v13, %v578_v10 }
  0x5d   :  { %v650_v13 = vrot.slane %v648_v8, 1 }
  0x62   :  { %6332 = vmatmul.mubr.msk.bf16.gmra.mrb[40].mxu0 %vm879_vm2, %v507_v19  ;;  %6560 = vmatmul.mubr.msk.bf16.gmra.mrb[40].mxu1 %vm879_vm2, %v7217_v6  ;;  %v571_v6 = vsel %vm415_vm1, %v566_v3, %v570_v4  ;;  %v588_v19 = vshrl.u32 %v7230_v11, 16 }
  0x63   :  { %6335 = vmatprep.mubr.msk.bf16.mxu0 %vm7328_vm0, %v9734_v0  ;;  %6563 = vmatprep.mubr.msk.bf16.mxu1 %vm7328_vm0, %v9734_v0 }
  0x64   :  { %v590_v21 = vor.u32 %v588_v19, %v586_v16 }
  0x6a   :  { %6336 = vmatmul.mubr.msk.bf16.gmra.mrb[44].mxu0 %vm879_vm2, %v515_v25  ;;  %6564 = vmatmul.mubr.msk.bf16.gmra.mrb[44].mxu1 %vm879_vm2, %v7218_v12  ;;  %v579_v12 = vsel %vm415_vm1, %v574_v9, %v578_v10  ;;  %v596_v25 = vshrl.u32 %v7231_v17, 16 }
  0x6b   :  { %6339 = vmatprep.mubr.msk.bf16.mxu0 %vm7328_vm0, %v9734_v0  ;;  %6567 = vmatprep.mubr.msk.bf16.mxu1 %vm7328_vm0, %v9734_v0 }
  0x6c   :  { %v598_v27 = vor.u32 %v596_v25, %v594_v22 }
  0x72   :  { %6340 = vmatmul.mubr.msk.bf16.gmra.mrb[48].mxu0 %vm879_vm2, %v523_v31  ;;  %6568 = vmatmul.mubr.msk.bf16.gmra.mrb[48].mxu1 %vm879_vm2, %v7219_v18  ;;  %v587_v18 = vsel %vm415_vm1, %v582_v15, %v586_v16  ;;  %v604_v31 = vshrl.u32 %v7232_v23, 16 }
  0x73   :  { %6343 = vmatprep.mubr.msk.bf16.mxu0 %vm7328_vm0, %v9734_v0  ;;  %6571 = vmatprep.mubr.msk.bf16.mxu1 %vm7328_vm0, %v9734_v0 }
  0x74   :  { %v606_v33 = vor.u32 %v604_v31, %v602_v28 }
  0x76   :  { %v611_v36 = vsel %vm415_vm1, %v606_v33, %v610_v34 }
  0x7a   :  { %6344 = vmatmul.mubr.msk.bf16.gmra.mrb[52].mxu0 %vm879_vm2, %v531_v39  ;;  %6572 = vmatmul.mubr.msk.bf16.gmra.mrb[52].mxu1 %vm879_vm2, %v7220_v24  ;;  %v595_v24 = vsel %vm415_vm1, %v590_v21, %v594_v22  ;;  %v614_v39 = vor.u32 %v612_v37, %v610_v34 }
  0x7b   :  { %6347 = vmatprep.mubr.msk.bf16.mxu0 %vm7328_vm0, %v9734_v0  ;;  %6575 = vmatprep.mubr.msk.bf16.mxu1 %vm7328_vm0, %v9734_v0 }
  0x82   :  { %6348 = vmatmul.mubr.msk.bf16.gmra.mrb[56].mxu0 %vm879_vm2, %v539_v45  ;;  %6576 = vmatmul.mubr.msk.bf16.gmra.mrb[56].mxu1 %vm879_vm2, %v7221_v30  ;;  %v603_v30 = vsel %vm415_vm1, %v598_v27, %v602_v28 }
  0x83   :  { %6351 = vmatprep.mubr.msk.bf16.mxu0 %vm7328_vm0, %v9734_v0  ;;  %6579 = vmatprep.mubr.msk.bf16.mxu1 %vm7328_vm0, %v9734_v0 }
  0x8a   :  { %6352 = vmatmul.mubr.msk.bf16.gmra.mrb[60].mxu0 %vm879_vm2, %v547_v51  ;;  %6580 = vmatmul.mubr.msk.bf16.gmra.mrb[60].mxu1 %vm879_vm2, %v7223_v38  ;;  %v616_v38 = vshll.u32 %v7234_v35, 16 }
  0x8b   :  { %6355 = vmatprep.mubr.msk.bf16.mxu0 %vm7328_vm0, %v9734_v0  ;;  %6583 = vmatprep.mubr.msk.bf16.mxu1 %vm7328_vm0, %v9734_v0 }
  0x8c   :  { %v618_v40 = vrot.slane %v616_v38, 1 }
  0x8e   :  { %v619_v42 = vsel %vm415_vm1, %v614_v39, %v618_v40  ;;  %v622_v45 = vor.u32 %v620_v43, %v618_v40  ;;  %v660_v39 = vshrl.u32 %v7241_v14, 16 }
  0x92   :  { %6356 = vmatmul.mubr.msk.bf16.gmra.mrb[64].mxu0 %vm879_vm2, %v555_v57  ;;  %6584 = vmatmul.mubr.msk.bf16.gmra.mrb[64].mxu1 %vm879_vm2, %v7225_v44  ;;  %v624_v44 = vshll.u32 %v7235_v41, 16  ;;  %v640_v57 = vshll.u32 %v7237_v53, 16 }
  0x93   :  { %6359 = vmatprep.mubr.msk.bf16.mxu0 %vm7328_vm0, %v9734_v0  ;;  %6587 = vmatprep.mubr.msk.bf16.mxu1 %vm7328_vm0, %v9734_v0 }
  0x94   :  { %v626_v46 = vrot.slane %v624_v44, 1  ;;  %v642_v60 = vrot.slane %v640_v57, 1 }
  0x96   :  { %v627_v48 = vsel %vm415_vm1, %v622_v45, %v626_v46  ;;  %v630_v51 = vor.u32 %v628_v49, %v626_v46  ;;  %v7243_v46 = vld [vmem:[%s9731_s0 + $0x100] sm:$0xff]  }
  0x9a   :  { %6360 = vmatmul.mubr.msk.bf16.gmra.mrb[68].mxu0 %vm879_vm2, %v563_v63  ;;  %6588 = vmatmul.mubr.msk.bf16.gmra.mrb[68].mxu1 %vm879_vm2, %v7226_v50  ;;  %v632_v50 = vshll.u32 %v7236_v47, 16 }
  0x9b   :  { %6363 = vmatprep.mubr.msk.bf16.mxu0 %vm7328_vm0, %v9734_v0  ;;  %6591 = vmatprep.mubr.msk.bf16.mxu1 %vm7328_vm0, %v9734_v0 }
  0x9c   :  { %v634_v52 = vrot.slane %v632_v50, 1 }
  0x9e   :  { %v635_v55 = vsel %vm415_vm1, %v630_v51, %v634_v52 }
  0xa2   :  { %6364 = vmatmul.mubr.msk.bf16.gmra.mrb[72].mxu0 %vm879_vm2, %v571_v6  ;;  %6592 = vmatmul.mubr.msk.bf16.gmra.mrb[72].mxu1 %vm879_vm2, %v7227_v56  ;;  %v636_v56 = vshrl.u32 %v7236_v47, 16 }
  0xa3   :  { %6367 = vmatprep.mubr.msk.bf16.mxu0 %vm7328_vm0, %v9734_v0  ;;  %6595 = vmatprep.mubr.msk.bf16.mxu1 %vm7328_vm0, %v9734_v0 }
  0xa4   :  { %v638_v59 = vor.u32 %v636_v56, %v634_v52  ;;  %v672_v56 = vshll.u32 %v7243_v46, 16 }
  0xa6   :  { %v643_v6 = vsel %vm415_vm1, %v638_v59, %v642_v60 }
  0xaa   :  { %6368 = vmatmul.mubr.msk.bf16.gmra.mrb[76].mxu0 %vm879_vm2, %v579_v12  ;;  %6596 = vmatmul.mubr.msk.bf16.gmra.mrb[76].mxu1 %vm879_vm2, %v7228_v62  ;;  %v646_v12 = vor.u32 %v644_v7, %v642_v60 }
  0xab   :  { %6371 = vmatprep.mubr.msk.bf16.mxu0 %vm7328_vm0, %v9734_v0  ;;  %6599 = vmatprep.mubr.msk.bf16.mxu1 %vm7328_vm0, %v9734_v0 }
  0xac   :  { %v651_v22 = vsel %vm415_vm1, %v646_v12, %v650_v13 }
  0xb2   :  { %6372 = vmatmul.mubr.msk.bf16.gmra.mrb[80].mxu0 %vm879_vm2, %v587_v18  ;;  %6600 = vmatmul.mubr.msk.bf16.gmra.mrb[80].mxu1 %vm879_vm2, %v7229_v5 }
  0xb3   :  { %6375 = vmatprep.mubr.msk.bf16.mxu0 %vm7328_vm0, %v9734_v0  ;;  %6603 = vmatprep.mubr.msk.bf16.mxu1 %vm7328_vm0, %v9734_v0 }
  0xba   :  { %6376 = vmatmul.mubr.msk.bf16.gmra.mrb[84].mxu0 %vm879_vm2, %v595_v24  ;;  %6604 = vmatmul.mubr.msk.bf16.gmra.mrb[84].mxu1 %vm879_vm2, %v7230_v11  ;;  %v656_v24 = vshll.u32 %v7241_v14, 16 }
  0xbb   :  { %6379 = vmatprep.mubr.msk.bf16.mxu0 %vm7328_vm0, %v9734_v0  ;;  %6607 = vmatprep.mubr.msk.bf16.mxu1 %vm7328_vm0, %v9734_v0 }
  0xc2   :  { %6380 = vmatmul.mubr.msk.bf16.gmra.mrb[88].mxu0 %vm879_vm2, %v603_v30  ;;  %6608 = vmatmul.mubr.msk.bf16.gmra.mrb[88].mxu1 %vm879_vm2, %v7231_v17  ;;  %v7242_v30 = vld [vmem:[%s9731_s0 + $0xf8] sm:$0xff]  }
  0xc3   :  { %6383 = vmatprep.mubr.msk.bf16.mxu0 %vm7328_vm0, %v9734_v0  ;;  %6611 = vmatprep.mubr.msk.bf16.mxu1 %vm7328_vm0, %v9734_v0  ;;  %v664_v40 = vshll.u32 %v7242_v30, 16 }
  0xc5   :  { %v666_v45 = vrot.slane %v664_v40, 1 }
  0xca   :  { %6384 = vmatmul.mubr.msk.bf16.gmra.mrb[92].mxu0 %vm879_vm2, %v611_v36  ;;  %6612 = vmatmul.mubr.msk.bf16.gmra.mrb[92].mxu1 %vm879_vm2, %v7232_v23  ;;  %v652_v23 = vshrl.u32 %v7240_v61, 16 }
  0xcb   :  { %6387 = vmatprep.mubr.msk.bf16.mxu0 %vm7328_vm0, %v9734_v0  ;;  %6615 = vmatprep.mubr.msk.bf16.mxu1 %vm7328_vm0, %v9734_v0 }
  0xcc   :  { %v654_v28 = vor.u32 %v652_v23, %v650_v13 }
  0xd2   :  { %6388 = vmatmul.mubr.msk.bf16.gmra.mrb[96].mxu0 %vm879_vm2, %v619_v42  ;;  %6616 = vmatmul.mubr.msk.bf16.gmra.mrb[96].mxu1 %vm879_vm2, %v7233_v29  ;;  %v658_v29 = vrot.slane %v656_v24, 1 }
  0xd3   :  { %6391 = vmatprep.mubr.msk.bf16.mxu0 %vm7328_vm0, %v9734_v0  ;;  %6619 = vmatprep.mubr.msk.bf16.mxu1 %vm7328_vm0, %v9734_v0 }
  0xd4   :  { %v659_v38 = vsel %vm415_vm1, %v654_v28, %v658_v29  ;;  %v662_v44 = vor.u32 %v660_v39, %v658_v29 }
  0xd6   :  { %v667_v54 = vsel %vm415_vm1, %v662_v44, %v666_v45 }
  0xda   :  { %6392 = vmatmul.mubr.msk.bf16.gmra.mrb[100].mxu0 %vm879_vm2, %v627_v48  ;;  %6620 = vmatmul.mubr.msk.bf16.gmra.mrb[100].mxu1 %vm879_vm2, %v7234_v35 }
  0xdb   :  { %6395 = vmatprep.mubr.msk.bf16.mxu0 %vm7328_vm0, %v9734_v0  ;;  %6623 = vmatprep.mubr.msk.bf16.mxu1 %vm7328_vm0, %v9734_v0 }
  0xe2   :  { %6396 = vmatmul.mubr.msk.bf16.gmra.mrb[104].mxu0 %vm879_vm2, %v635_v55  ;;  %6624 = vmatmul.mubr.msk.bf16.gmra.mrb[104].mxu1 %vm879_vm2, %v7235_v41  ;;  %v668_v55 = vshrl.u32 %v7242_v30, 16 }
  0xe3   :  { %6399 = vmatprep.mubr.msk.bf16.mxu0 %vm7328_vm0, %v9734_v0  ;;  %6627 = vmatprep.mubr.msk.bf16.mxu1 %vm7328_vm0, %v9734_v0 }
  0xe4   :  { %v670_v60 = vor.u32 %v668_v55, %v666_v45 }
  0xe5   :  { %v1079_v62 = vpop.f32.mrb[0].mxu0  ;;  %v1689_v63 = vpop.f32.mrb[0].mxu1 }
  0xe6   :  { %v6293_v1 = vpop.f32.mrb[1].mxu0  ;;  %v6521_v2 = vpop.f32.mrb[1].mxu1  ;;  %v7696_v3 = vadd.f32 %v1689_v63, %v1079_v62  ;;  %v7244_v62 = vld [vmem:[%s9731_s0 + $0x108] sm:$0xff]  }
  0xe7   :  { %v1082_v4 = vpop.f32.mrb[2].mxu0  ;;  %v1692_v5 = vpop.f32.mrb[2].mxu1  ;;  %v684_v28 = vshrl.u32 %v7244_v62, 16 }
  0xe8   :  { %v6294_v9 = vpop.f32.mrb[3].mxu0  ;;  %v6522_v10 = vpop.f32.mrb[3].mxu1  ;;  %v7699_v11 = vadd.f32 %v1692_v5, %v1082_v4 }
  0xe9   :  { %v676_v9 = vshrl.u32 %v7243_v46, 16  ;;  %v680_v10 = vshll.u32 %v7244_v62, 16 }
  0xea   :  { %6400 = vmatmul.mubr.msk.bf16.gmra.mrb[108].mxu0 %vm879_vm2, %v643_v6  ;;  %6628 = vmatmul.mubr.msk.bf16.gmra.mrb[108].mxu1 %vm879_vm2, %v7236_v47 }
  0xeb   :  { %6403 = vmatprep.mubr.msk.bf16.mxu0 %vm7328_vm0, %v9734_v0  ;;  %6631 = vmatprep.mubr.msk.bf16.mxu1 %vm7328_vm0, %v9734_v0 }
  0xed   :  { %v1087_v15 = vpop.f32.mrb[4].mxu0  ;;  %v1697_v16 = vpop.f32.mrb[4].mxu1 }
  0xee   :  { %v6297_v17 = vpop.f32.mrb[5].mxu0  ;;  %v6525_v18 = vpop.f32.mrb[5].mxu1  ;;  %v7710_v19 = vadd.f32 %v1697_v16, %v1087_v15  ;;  %v682_v16 = vrot.slane %v680_v10, 1  ;;  %v7248_v10 = vld [vmem:[%s9731_s0 + $0x128] sm:$0xff]  }
  0xef   :  { %v1090_v20 = vpop.f32.mrb[6].mxu0  ;;  %v1700_v21 = vpop.f32.mrb[6].mxu1  ;;  %v7245_v17 = vld [vmem:[%s9731_s0 + $0x110] sm:$0xff]  }
  0xf0   :  { %v6298_v25 = vpop.f32.mrb[7].mxu0  ;;  %v6526_v26 = vpop.f32.mrb[7].mxu1  ;;  %v7713_v27 = vadd.f32 %v1700_v21, %v1090_v20  ;;  %v688_v29 = vshll.u32 %v7245_v17, 16 }
  0xf2   :  { %6404 = vmatmul.mubr.msk.bf16.gmra.mrb[112].mxu0 %vm879_vm2, %v651_v22  ;;  %6632 = vmatmul.mubr.msk.bf16.gmra.mrb[112].mxu1 %vm879_vm2, %v7237_v53 }
  0xf3   :  { %6407 = vmatprep.mubr.msk.bf16.mxu0 %vm7328_vm0, %v9734_v0  ;;  %6635 = vmatprep.mubr.msk.bf16.mxu1 %vm7328_vm0, %v9734_v0 }
  0xf5   :  { %v1095_v31 = vpop.f32.mrb[8].mxu0  ;;  %v1705_v32 = vpop.f32.mrb[8].mxu1 }
  0xf6   :  { %v6301_v33 = vpop.f32.mrb[9].mxu0  ;;  %v6529_v34 = vpop.f32.mrb[9].mxu1  ;;  %v7724_v35 = vadd.f32 %v1705_v32, %v1095_v31 }
  0xf7   :  { %v1098_v36 = vpop.f32.mrb[10].mxu0  ;;  %v1708_v37 = vpop.f32.mrb[10].mxu1  ;;  %v686_v33 = vor.u32 %v684_v28, %v682_v16  ;;  %v690_v34 = vrot.slane %v688_v29, 1 }
  0xf8   :  { %v6302_v41 = vpop.f32.mrb[11].mxu0  ;;  %v6530_v42 = vpop.f32.mrb[11].mxu1  ;;  %v7727_v43 = vadd.f32 %v1708_v37, %v1098_v36  ;;  %v7246_v36 = vld [vmem:[%s9731_s0 + $0x118] sm:$0xff]  }
  0xf9   :  { %v691_v45 = vsel %vm415_vm1, %v686_v33, %v690_v34 }
  0xfa   :  { %6408 = vmatmul.mubr.msk.bf16.gmra.mrb[116].mxu0 %vm879_vm2, %v659_v38  ;;  %6636 = vmatmul.mubr.msk.bf16.gmra.mrb[116].mxu1 %vm879_vm2, %v7240_v61  ;;  %v674_v61 = vrot.slane %v672_v56, 1 }
  0xfb   :  { %6411 = vmatprep.mubr.msk.bf16.mxu0 %vm7328_vm0, %v9734_v0  ;;  %6639 = vmatprep.mubr.msk.bf16.mxu1 %vm7328_vm0, %v9734_v0 }
  0xfc   :  { %v675_v8 = vsel %vm415_vm1, %v670_v60, %v674_v61  ;;  %v678_v15 = vor.u32 %v676_v9, %v674_v61 }
  0xfd   :  { %v1103_v47 = vpop.f32.mrb[12].mxu0  ;;  %v1713_v48 = vpop.f32.mrb[12].mxu1 }
  0xfe   :  { %v6305_v49 = vpop.f32.mrb[13].mxu0  ;;  %v6533_v50 = vpop.f32.mrb[13].mxu1  ;;  %v7738_v51 = vadd.f32 %v1713_v48, %v1103_v47  ;;  %v683_v26 = vsel %vm415_vm1, %v678_v15, %v682_v16  ;;  %v696_v47 = vshll.u32 %v7246_v36, 16 }
  0xff   :  { %v1106_v52 = vpop.f32.mrb[14].mxu0  ;;  %v1716_v53 = vpop.f32.mrb[14].mxu1 }
 0x100   :  { %v6306_v57 = vpop.f32.mrb[15].mxu0  ;;  %v6534_v58 = vpop.f32.mrb[15].mxu1  ;;  %v7741_v59 = vadd.f32 %v1716_v53, %v1106_v52  ;;  %v698_v53 = vrot.slane %v696_v47, 1 }
 0x102   :  { %6412 = vmatmul.mubr.msk.bf16.gmra.mrb[120].mxu0 %vm879_vm2, %v667_v54  ;;  %6640 = vmatmul.mubr.msk.bf16.gmra.mrb[120].mxu1 %vm879_vm2, %v7241_v14  ;;  %v7247_v54 = vld [vmem:[%s9731_s0 + $0x120] sm:$0xff]  }
 0x103   :  { %6415 = vmatprep.mubr.msk.bf16.mxu0 %vm7328_vm0, %v9734_v0  ;;  %6643 = vmatprep.mubr.msk.bf16.mxu1 %vm7328_vm0, %v9734_v0 }
 0x105   :  { %v1111_v63 = vpop.f32.mrb[16].mxu0  ;;  %v1721_v1 = vpop.f32.mrb[16].mxu1 }
 0x106   :  { %v6309_v2 = vpop.f32.mrb[17].mxu0  ;;  %v6537_v4 = vpop.f32.mrb[17].mxu1  ;;  %v7752_v5 = vadd.f32 %v1721_v1, %v1111_v63  ;;  %v700_v1 = vshrl.u32 %v7246_v36, 16 }
 0x107   :  { %v1114_v6 = vpop.f32.mrb[18].mxu0  ;;  %v1724_v7 = vpop.f32.mrb[18].mxu1  ;;  %v704_v2 = vshll.u32 %v7247_v54, 16 }
 0x108   :  { %v6310_v12 = vpop.f32.mrb[19].mxu0  ;;  %v6538_v13 = vpop.f32.mrb[19].mxu1  ;;  %v7755_v14 = vadd.f32 %v1724_v7, %v1114_v6 }
 0x109   :  { %v706_v9 = vrot.slane %v704_v2, 1 }
 0x10a   :  { %6416 = vmatmul.mubr.msk.bf16.gmra.mrb[124].mxu0 %vm879_vm2, %v675_v8  ;;  %6644 = vmatmul.mubr.msk.bf16.gmra.mrb[124].mxu1 %vm879_vm2, %v7242_v30  ;;  %v702_v8 = vor.u32 %v700_v1, %v698_v53 }
 0x10b   :  { %6419 = vmatprep.mubr.msk.bf16.mxu0 %vm7328_vm0, %v9734_v0  ;;  %6647 = vmatprep.mubr.msk.bf16.mxu1 %vm7328_vm0, %v9734_v0 }
 0x10d   :  { %v1119_v18 = vpop.f32.mrb[20].mxu0  ;;  %v1729_v20 = vpop.f32.mrb[20].mxu1 }
 0x10e   :  { %v6313_v21 = vpop.f32.mrb[21].mxu0  ;;  %v6541_v22 = vpop.f32.mrb[21].mxu1  ;;  %v7766_v23 = vadd.f32 %v1729_v20, %v1119_v18 }
 0x10f   :  { %v1122_v24 = vpop.f32.mrb[22].mxu0  ;;  %v1732_v25 = vpop.f32.mrb[22].mxu1  ;;  %v707_v21 = vsel %vm415_vm1, %v702_v8, %v706_v9  ;;  %v708_v22 = vshrl.u32 %v7247_v54, 16 }
 0x110   :  { %v6314_v30 = vpop.f32.mrb[23].mxu0  ;;  %v6542_v31 = vpop.f32.mrb[23].mxu1  ;;  %v7769_v32 = vadd.f32 %v1732_v25, %v1122_v24  ;;  %v712_v24 = vshll.u32 %v7248_v10, 16 }
 0x111   :  { %v710_v29 = vor.u32 %v708_v22, %v706_v9  ;;  %v7249_v31 = vld [vmem:[%s9731_s0 + $0x130] sm:$0xff]  }
 0x112   :  { %6420 = vmatmul.mubr.msk.bf16.gmra.mrb[128].mxu0 %vm879_vm2, %v683_v26  ;;  %6648 = vmatmul.mubr.msk.bf16.gmra.mrb[128].mxu1 %vm879_vm2, %v7243_v46  ;;  %v692_v46 = vshrl.u32 %v7245_v17, 16  ;;  %v714_v30 = vrot.slane %v712_v24, 1  ;;  %v724_v1 = vshrl.u32 %v7249_v31, 16 }
 0x113   :  { %6423 = vmatprep.mubr.msk.bf16.mxu0 %vm7328_vm0, %v9734_v0  ;;  %6651 = vmatprep.mubr.msk.bf16.mxu1 %vm7328_vm0, %v9734_v0 }
 0x114   :  { %v694_v52 = vor.u32 %v692_v46, %v690_v34 }
 0x115   :  { %v1127_v37 = vpop.f32.mrb[24].mxu0  ;;  %v1737_v38 = vpop.f32.mrb[24].mxu1 }
 0x116   :  { %v6317_v39 = vpop.f32.mrb[25].mxu0  ;;  %v6545_v40 = vpop.f32.mrb[25].mxu1  ;;  %v7780_v41 = vadd.f32 %v1737_v38, %v1127_v37  ;;  %v699_v63 = vsel %vm415_vm1, %v694_v52, %v698_v53  ;;  %v7250_v53 = vld [vmem:[%s9731_s0 + $0x138] sm:$0xff]  }
 0x117   :  { %v1130_v42 = vpop.f32.mrb[26].mxu0  ;;  %v1740_v44 = vpop.f32.mrb[26].mxu1  ;;  %v728_v2 = vshll.u32 %v7250_v53, 16 }
 0x118   :  { %v6318_v48 = vpop.f32.mrb[27].mxu0  ;;  %v6546_v49 = vpop.f32.mrb[27].mxu1  ;;  %v7783_v50 = vadd.f32 %v1740_v44, %v1130_v42  ;;  %v715_v42 = vsel %vm415_vm1, %v710_v29, %v714_v30  ;;  %v716_v44 = vshrl.u32 %v7248_v10, 16 }
 0x11a   :  { %6424 = vmatmul.mubr.msk.bf16.gmra.mrb[132].mxu0 %vm879_vm2, %v691_v45  ;;  %6652 = vmatmul.mubr.msk.bf16.gmra.mrb[132].mxu1 %vm879_vm2, %v7244_v62  ;;  %v720_v45 = vshll.u32 %v7249_v31, 16  ;;  %v718_v49 = vor.u32 %v716_v44, %v714_v30 }
 0x11b   :  { %6427 = vmatprep.mubr.msk.bf16.mxu0 %vm7328_vm0, %v9734_v0  ;;  %6655 = vmatprep.mubr.msk.bf16.mxu1 %vm7328_vm0, %v9734_v0 }
 0x11c   :  { %v722_v52 = vrot.slane %v720_v45, 1 }
 0x11d   :  { %v1135_v55 = vpop.f32.mrb[28].mxu0  ;;  %v1745_v56 = vpop.f32.mrb[28].mxu1 }
 0x11e   :  { %v6321_v57 = vpop.f32.mrb[29].mxu0  ;;  %v6549_v58 = vpop.f32.mrb[29].mxu1  ;;  %v7794_v60 = vadd.f32 %v1745_v56, %v1135_v55  ;;  %v726_v9 = vor.u32 %v724_v1, %v722_v52 }
 0x11f   :  { %v1138_v61 = vpop.f32.mrb[30].mxu0  ;;  %v1748_v62 = vpop.f32.mrb[30].mxu1 }
 0x120   :  { %v6322_v4 = vpop.f32.mrb[31].mxu0  ;;  %v6550_v6 = vpop.f32.mrb[31].mxu1  ;;  %v7797_v7 = vadd.f32 %v1748_v62, %v1138_v61 }
 0x122   :  { %6428 = vmatmul.mubr.msk.bf16.gmra.mrb[136].mxu0 %vm879_vm2, %v699_v63  ;;  %6656 = vmatmul.mubr.msk.bf16.gmra.mrb[136].mxu1 %vm879_vm2, %v7245_v17  ;;  %v723_v63 = vsel %vm415_vm1, %v718_v49, %v722_v52 }
 0x123   :  { %6431 = vmatprep.mubr.msk.bf16.mxu0 %vm7328_vm0, %v9734_v0  ;;  %6659 = vmatprep.mubr.msk.bf16.mxu1 %vm7328_vm0, %v9734_v0 }
 0x125   :  { %v1143_v12 = vpop.f32.mrb[32].mxu0  ;;  %v1753_v13 = vpop.f32.mrb[32].mxu1 }
 0x126   :  { %v6325_v15 = vpop.f32.mrb[33].mxu0  ;;  %v6553_v16 = vpop.f32.mrb[33].mxu1  ;;  %v7808_v18 = vadd.f32 %v1753_v13, %v1143_v12  ;;  %v730_v12 = vrot.slane %v728_v2, 1  ;;  %v7251_v13 = vld [vmem:[%s9731_s0 + $0x140] sm:$0xff]  }
 0x127   :  { %v1146_v20 = vpop.f32.mrb[34].mxu0  ;;  %v1756_v17 = vpop.f32.mrb[34].mxu1  ;;  %v740_v49 = vshrl.u32 %v7251_v13, 16 }
 0x128   :  { %v6326_v25 = vpop.f32.mrb[35].mxu0  ;;  %v6554_v26 = vpop.f32.mrb[35].mxu1  ;;  %v7811_v28 = vadd.f32 %v1756_v17, %v1146_v20  ;;  %v731_v24 = vsel %vm415_vm1, %v726_v9, %v730_v12 }
 0x129   :  { %v732_v25 = vshrl.u32 %v7250_v53, 16  ;;  %v736_v26 = vshll.u32 %v7251_v13, 16 }
 0x12a   :  { %6432 = vmatmul.mubr.msk.bf16.gmra.mrb[140].mxu0 %vm879_vm2, %v707_v21  ;;  %6660 = vmatmul.mubr.msk.bf16.gmra.mrb[140].mxu1 %vm879_vm2, %v7246_v36 }
 0x12b   :  { %6435 = vmatprep.mubr.msk.bf16.mxu0 %vm7328_vm0, %v9734_v0  ;;  %6663 = vmatprep.mubr.msk.bf16.mxu1 %vm7328_vm0, %v9734_v0 }
 0x12d   :  { %v1151_v33 = vpop.f32.mrb[36].mxu0  ;;  %v1761_v34 = vpop.f32.mrb[36].mxu1 }
 0x12e   :  { %v6329_v37 = vpop.f32.mrb[37].mxu0  ;;  %v6557_v38 = vpop.f32.mrb[37].mxu1  ;;  %v7822_v39 = vadd.f32 %v1761_v34, %v1151_v33  ;;  %v734_v34 = vor.u32 %v732_v25, %v730_v12  ;;  %v7256_v25 = vld [vmem:[%s9731_s0 + $0x158] sm:$0xff]  }
 0x12f   :  { %v1154_v40 = vpop.f32.mrb[38].mxu0  ;;  %v1764_v36 = vpop.f32.mrb[38].mxu1  ;;  %v738_v37 = vrot.slane %v736_v26, 1  ;;  %v7252_v38 = vld [vmem:[%s9731_s0 + $0x148] sm:$0xff]  }
 0x130   :  { %v6330_v46 = vpop.f32.mrb[39].mxu0  ;;  %v6558_v47 = vpop.f32.mrb[39].mxu1  ;;  %v7825_v48 = vadd.f32 %v1764_v36, %v1154_v40  ;;  %v744_v52 = vshll.u32 %v7252_v38, 16 }
 0x131   :  { %v739_v47 = vsel %vm415_vm1, %v734_v34, %v738_v37 }
 0x132   :  { %6436 = vmatmul.mubr.msk.bf16.gmra.mrb[144].mxu0 %vm879_vm2, %v715_v42  ;;  %6664 = vmatmul.mubr.msk.bf16.gmra.mrb[144].mxu1 %vm879_vm2, %v7247_v54 }
 0x133   :  { %6439 = vmatprep.mubr.msk.bf16.mxu0 %vm7328_vm0, %v9734_v0  ;;  %6667 = vmatprep.mubr.msk.bf16.mxu1 %vm7328_vm0, %v9734_v0 }
 0x135   :  { %v1159_v55 = vpop.f32.mrb[40].mxu0  ;;  %v1769_v56 = vpop.f32.mrb[40].mxu1 }
 0x136   :  { %v6333_v57 = vpop.f32.mrb[41].mxu0  ;;  %v6561_v58 = vpop.f32.mrb[41].mxu1  ;;  %v7836_v61 = vadd.f32 %v1769_v56, %v1159_v55 }
 0x137   :  { %v1162_v62 = vpop.f32.mrb[42].mxu0  ;;  %v1772_v54 = vpop.f32.mrb[42].mxu1  ;;  %v742_v58 = vor.u32 %v740_v49, %v738_v37 }
 0x138   :  { %v6334_v4 = vpop.f32.mrb[43].mxu0  ;;  %v6562_v6 = vpop.f32.mrb[43].mxu1  ;;  %v7839_v8 = vadd.f32 %v1772_v54, %v1162_v62  ;;  %v746_v62 = vrot.slane %v744_v52, 1  ;;  %v7253_v54 = vld [vmem:[%s9731_s0 + $0x150] sm:$0xff]  }
 0x13a   :  { %6440 = vmatmul.mubr.msk.bf16.gmra.mrb[148].mxu0 %vm879_vm2, %v723_v63  ;;  %6668 = vmatmul.mubr.msk.bf16.gmra.mrb[148].mxu1 %vm879_vm2, %v7248_v10  ;;  %v747_v12 = vsel %vm415_vm1, %v742_v58, %v746_v62 }
 0x13b   :  { %6443 = vmatprep.mubr.msk.bf16.mxu0 %vm7328_vm0, %v9734_v0  ;;  %6671 = vmatprep.mubr.msk.bf16.mxu1 %vm7328_vm0, %v9734_v0 }
 0x13d   :  { %v1167_v15 = vpop.f32.mrb[44].mxu0  ;;  %v1777_v16 = vpop.f32.mrb[44].mxu1 }
 0x13e   :  { %v6337_v20 = vpop.f32.mrb[45].mxu0  ;;  %v6565_v17 = vpop.f32.mrb[45].mxu1  ;;  %v7850_v21 = vadd.f32 %v1777_v16, %v1167_v15  ;;  %v748_v15 = vshrl.u32 %v7252_v38, 16  ;;  %v752_v16 = vshll.u32 %v7253_v54, 16 }
 0x13f   :  { %v1170_v22 = vpop.f32.mrb[46].mxu0  ;;  %v1780_v10 = vpop.f32.mrb[46].mxu1 }
 0x140   :  { %v6338_v29 = vpop.f32.mrb[47].mxu0  ;;  %v6566_v30 = vpop.f32.mrb[47].mxu1  ;;  %v7853_v33 = vadd.f32 %v1780_v10, %v1170_v22  ;;  %v750_v10 = vor.u32 %v748_v15, %v746_v62 }
 0x142   :  { %6444 = vmatmul.mubr.msk.bf16.gmra.mrb[152].mxu0 %vm879_vm2, %v731_v24  ;;  %6672 = vmatmul.mubr.msk.bf16.gmra.mrb[152].mxu1 %vm879_vm2, %v7249_v31  ;;  %v754_v24 = vrot.slane %v752_v16, 1 }
 0x143   :  { %6447 = vmatprep.mubr.msk.bf16.mxu0 %vm7328_vm0, %v9734_v0  ;;  %6675 = vmatprep.mubr.msk.bf16.mxu1 %vm7328_vm0, %v9734_v0 }
 0x145   :  { %v1175_v40 = vpop.f32.mrb[48].mxu0  ;;  %v1785_v36 = vpop.f32.mrb[48].mxu1 }
 0x146   :  { %v6341_v42 = vpop.f32.mrb[49].mxu0  ;;  %v6569_v44 = vpop.f32.mrb[49].mxu1  ;;  %v7864_v45 = vadd.f32 %v1785_v36, %v1175_v40  ;;  %v755_v36 = vsel %vm415_vm1, %v750_v10, %v754_v24  ;;  %v7258_v10 = vld [vmem:[%s9731_s0 + $0x168] sm:$0xff]  }
 0x147   :  { %v1178_v46 = vpop.f32.mrb[50].mxu0  ;;  %v1788_v31 = vpop.f32.mrb[50].mxu1  ;;  %v756_v42 = vshrl.u32 %v7253_v54, 16  ;;  %v760_v44 = vshll.u32 %v7256_v25, 16 }
 0x148   :  { %v6342_v55 = vpop.f32.mrb[51].mxu0  ;;  %v6570_v56 = vpop.f32.mrb[51].mxu1  ;;  %v7867_v57 = vadd.f32 %v1788_v31, %v1178_v46 }
 0x149   :  { %v758_v49 = vor.u32 %v756_v42, %v754_v24  ;;  %v762_v52 = vrot.slane %v760_v44, 1  ;;  %v7257_v55 = vld [vmem:[%s9731_s0 + $0x160] sm:$0xff]   ;;  %v776_v42 = vshll.u32 %v7258_v10, 16 }
 0x14a   :  { %6448 = vmatmul.mubr.msk.bf16.gmra.mrb[156].mxu0 %vm879_vm2, %v739_v47  ;;  %6676 = vmatmul.mubr.msk.bf16.gmra.mrb[156].mxu1 %vm879_vm2, %v7250_v53 }
 0x14b   :  { %6451 = vmatprep.mubr.msk.bf16.mxu0 %vm7328_vm0, %v9734_v0  ;;  %6679 = vmatprep.mubr.msk.bf16.mxu1 %vm7328_vm0, %v9734_v0 }
 0x14d   :  { %v1183_v63 = vpop.f32.mrb[52].mxu0  ;;  %v1793_v1 = vpop.f32.mrb[52].mxu1 }
 0x14e   :  { %v6345_v2 = vpop.f32.mrb[53].mxu0  ;;  %v6573_v4 = vpop.f32.mrb[53].mxu1  ;;  %v7878_v6 = vadd.f32 %v1793_v1, %v1183_v63 }
 0x14f   :  { %v1186_v9 = vpop.f32.mrb[54].mxu0  ;;  %v1796_v53 = vpop.f32.mrb[54].mxu1  ;;  %v763_v4 = vsel %vm415_vm1, %v758_v49, %v762_v52 }
 0x150   :  { %v6346_v20 = vpop.f32.mrb[55].mxu0  ;;  %v6574_v17 = vpop.f32.mrb[55].mxu1  ;;  %v7881_v22 = vadd.f32 %v1796_v53, %v1186_v9  ;;  %v764_v9 = vshrl.u32 %v7256_v25, 16  ;;  %v768_v53 = vshll.u32 %v7257_v55, 16 }
 0x152   :  { %6452 = vmatmul.mubr.msk.bf16.gmra.mrb[160].mxu0 %vm879_vm2, %v747_v12  ;;  %6680 = vmatmul.mubr.msk.bf16.gmra.mrb[160].mxu1 %vm879_vm2, %v7251_v13  ;;  %v766_v20 = vor.u32 %v764_v9, %v762_v52  ;;  %v770_v17 = vrot.slane %v768_v53, 1  ;;  %v778_v52 = vrot.slane %v776_v42, 1  ;;  %v780_v53 = vshrl.u32 %v7258_v10, 16 }
 0x153   :  { %6455 = vmatprep.mubr.msk.bf16.mxu0 %vm7328_vm0, %v9734_v0  ;;  %6683 = vmatprep.mubr.msk.bf16.mxu1 %vm7328_vm0, %v9734_v0 }
 0x155   :  { %v1191_v26 = vpop.f32.mrb[56].mxu0  ;;  %v1801_v29 = vpop.f32.mrb[56].mxu1 }
 0x156   :  { %v6349_v30 = vpop.f32.mrb[57].mxu0  ;;  %v6577_v34 = vpop.f32.mrb[57].mxu1  ;;  %v7892_v37 = vadd.f32 %v1801_v29, %v1191_v26 }
 0x157   :  { %v1194_v40 = vpop.f32.mrb[58].mxu0  ;;  %v1804_v13 = vpop.f32.mrb[58].mxu1 }
 0x158   :  { %v6350_v46 = vpop.f32.mrb[59].mxu0  ;;  %v6578_v31 = vpop.f32.mrb[59].mxu1  ;;  %v7895_v47 = vadd.f32 %v1804_v13, %v1194_v40  ;;  %v771_v13 = vsel %vm415_vm1, %v766_v20, %v770_v17 }
 0x15a   :  { %6456 = vmatmul.mubr.msk.bf16.gmra.mrb[164].mxu0 %vm879_vm2, %v755_v36  ;;  %6684 = vmatmul.mubr.msk.bf16.gmra.mrb[164].mxu1 %vm879_vm2, %v7252_v38  ;;  %v772_v36 = vshrl.u32 %v7257_v55, 16 }
 0x15b   :  { %6459 = vmatprep.mubr.msk.bf16.mxu0 %vm7328_vm0, %v9734_v0  ;;  %6687 = vmatprep.mubr.msk.bf16.mxu1 %vm7328_vm0, %v9734_v0 }
 0x15c   :  { %v774_v49 = vor.u32 %v772_v36, %v770_v17 }
 0x15d   :  { %v1199_v56 = vpop.f32.mrb[60].mxu0  ;;  %v1809_v58 = vpop.f32.mrb[60].mxu1 }
 0x15e   :  { %v6353_v62 = vpop.f32.mrb[61].mxu0  ;;  %v6581_v63 = vpop.f32.mrb[61].mxu1  ;;  %v7906_v1 = vadd.f32 %v1809_v58, %v1199_v56  ;;  %v7259_v56 = vld [vmem:[%s9731_s0 + $0x170] sm:$0xff]   ;;  %v779_v9 = vsel %vm415_vm1, %v774_v49, %v778_v52 }
 0x15f   :  { %v1202_v2 = vpop.f32.mrb[62].mxu0  ;;  %v1812_v38 = vpop.f32.mrb[62].mxu1 }
 0x160   :  { %v6354_v12 = vpop.f32.mrb[63].mxu0  ;;  %v6582_v15 = vpop.f32.mrb[63].mxu1  ;;  %v7909_v16 = vadd.f32 %v1812_v38, %v1202_v2 }
 0x161   :  { %v784_v12 = vshll.u32 %v7259_v56, 16 }
 0x162   :  { %6460 = vmatmul.mubr.msk.bf16.gmra.mrb[168].mxu0 %vm879_vm2, %v763_v4  ;;  %6688 = vmatmul.mubr.msk.bf16.gmra.mrb[168].mxu1 %vm879_vm2, %v7253_v54 }
 0x163   :  { %6463 = vmatprep.mubr.msk.bf16.mxu0 %vm7328_vm0, %v9734_v0  ;;  %6691 = vmatprep.mubr.msk.bf16.mxu1 %vm7328_vm0, %v9734_v0 }
 0x165   :  { %v1207_v24 = vpop.f32.mrb[64].mxu0  ;;  %v1817_v26 = vpop.f32.mrb[64].mxu1 }
 0x166   :  { %v6357_v29 = vpop.f32.mrb[65].mxu0  ;;  %v6585_v30 = vpop.f32.mrb[65].mxu1  ;;  %v7920_v34 = vadd.f32 %v1817_v26, %v1207_v24  ;;  %v782_v24 = vor.u32 %v780_v53, %v778_v52  ;;  %v786_v26 = vrot.slane %v784_v12, 1 }
 0x167   :  { %v1210_v40 = vpop.f32.mrb[66].mxu0  ;;  %v1820_v54 = vpop.f32.mrb[66].mxu1  ;;  %v7260_v29 = vld [vmem:[%s9731_s0 + $0x178] sm:$0xff]  }
 0x168   :  { %v6358_v44 = vpop.f32.mrb[67].mxu0  ;;  %v6586_v46 = vpop.f32.mrb[67].mxu1  ;;  %v7923_v31 = vadd.f32 %v1820_v54, %v1210_v40  ;;  %v792_v49 = vshll.u32 %v7260_v29, 16 }
 0x169   :  { %v787_v44 = vsel %vm415_vm1, %v782_v24, %v786_v26  ;;  %v788_v46 = vshrl.u32 %v7259_v56, 16 }
 0x16a   :  { %6464 = vmatmul.mubr.msk.bf16.gmra.mrb[172].mxu0 %vm879_vm2, %v771_v13  ;;  %6692 = vmatmul.mubr.msk.bf16.gmra.mrb[172].mxu1 %vm879_vm2, %v7256_v25 }
 0x16b   :  { %6467 = vmatprep.mubr.msk.bf16.mxu0 %vm7328_vm0, %v9734_v0  ;;  %6695 = vmatprep.mubr.msk.bf16.mxu1 %vm7328_vm0, %v9734_v0 }
 0x16d   :  { %v1215_v58 = vpop.f32.mrb[68].mxu0  ;;  %v1825_v62 = vpop.f32.mrb[68].mxu1 }
 0x16e   :  { %v6361_v63 = vpop.f32.mrb[69].mxu0  ;;  %v6589_v2 = vpop.f32.mrb[69].mxu1  ;;  %v7934_v38 = vadd.f32 %v1825_v62, %v1215_v58 }
 0x16f   :  { %v1218_v4 = vpop.f32.mrb[70].mxu0  ;;  %v1828_v25 = vpop.f32.mrb[70].mxu1  ;;  %v790_v63 = vor.u32 %v788_v46, %v786_v26  ;;  %v794_v2 = vrot.slane %v792_v49, 1 }
 0x170   :  { %v6362_v15 = vpop.f32.mrb[71].mxu0  ;;  %v6590_v20 = vpop.f32.mrb[71].mxu1  ;;  %v7937_v17 = vadd.f32 %v1828_v25, %v1218_v4  ;;  %v7261_v4 = vld [vmem:[%s9731_s0 + $0x180] sm:$0xff]  }
 0x171   :  { %v795_v24 = vsel %vm415_vm1, %v790_v63, %v794_v2 }
 0x172   :  { %6468 = vmatmul.mubr.msk.bf16.gmra.mrb[176].mxu0 %vm879_vm2, %v779_v9  ;;  %6696 = vmatmul.mubr.msk.bf16.gmra.mrb[176].mxu1 %vm879_vm2, %v7257_v55 }
 0x173   :  { %6471 = vmatprep.mubr.msk.bf16.mxu0 %vm7328_vm0, %v9734_v0  ;;  %6699 = vmatprep.mubr.msk.bf16.mxu1 %vm7328_vm0, %v9734_v0 }
 0x175   :  { %v1223_v30 = vpop.f32.mrb[72].mxu0  ;;  %v1833_v40 = vpop.f32.mrb[72].mxu1 }
 0x176   :  { %v6365_v54 = vpop.f32.mrb[73].mxu0  ;;  %v6593_v13 = vpop.f32.mrb[73].mxu1  ;;  %v7948_v36 = vadd.f32 %v1833_v40, %v1223_v30  ;;  %v796_v30 = vshrl.u32 %v7260_v29, 16  ;;  %v800_v40 = vshll.u32 %v7261_v4, 16 }
 0x177   :  { %v1226_v42 = vpop.f32.mrb[74].mxu0  ;;  %v1836_v55 = vpop.f32.mrb[74].mxu1 }
 0x178   :  { %v6366_v58 = vpop.f32.mrb[75].mxu0  ;;  %v6594_v62 = vpop.f32.mrb[75].mxu1  ;;  %v7951_v52 = vadd.f32 %v1836_v55, %v1226_v42  ;;  %v798_v42 = vor.u32 %v796_v30, %v794_v2  ;;  %v802_v55 = vrot.slane %v800_v40, 1  ;;  %v7263_v40 = vld [vmem:[%s9731_s0 + $0x190] sm:$0xff]  }
 0x17a   :  { %6472 = vmatmul.mubr.msk.bf16.gmra.mrb[180].mxu0 %vm879_vm2, %v787_v44  ;;  %6700 = vmatmul.mubr.msk.bf16.gmra.mrb[180].mxu1 %vm879_vm2, %v7258_v10  ;;  %v7262_v44 = vld [vmem:[%s9731_s0 + $0x188] sm:$0xff]  }
 0x17b   :  { %6475 = vmatprep.mubr.msk.bf16.mxu0 %vm7328_vm0, %v9734_v0  ;;  %6703 = vmatprep.mubr.msk.bf16.mxu1 %vm7328_vm0, %v9734_v0 }
 0x17d   :  { %v1231_v25 = vpop.f32.mrb[76].mxu0  ;;  %v1841_v9 = vpop.f32.mrb[76].mxu1 }
 0x17e   :  { %v6369_v53 = vpop.f32.mrb[77].mxu0  ;;  %v6597_v12 = vpop.f32.mrb[77].mxu1  ;;  %v7962_v15 = vadd.f32 %v1841_v9, %v1231_v25  ;;  %v803_v9 = vsel %vm415_vm1, %v798_v42, %v802_v55 }
 0x17f   :  { %v1234_v20 = vpop.f32.mrb[78].mxu0  ;;  %v1844_v10 = vpop.f32.mrb[78].mxu1  ;;  %v804_v53 = vshrl.u32 %v7261_v4, 16  ;;  %v808_v12 = vshll.u32 %v7262_v44, 16 }
 0x180   :  { %9736 = vst [vmem:[#allocation2_spill] sm:$0xff] %v7962_v15  ;;  %v6370_v54 = vpop.f32.mrb[79].mxu0  ;;  %v6598_v13 = vpop.f32.mrb[79].mxu1  ;;  %v7965_v26 = vadd.f32 %v1844_v10, %v1234_v20 }
 0x181   :  { %v810_v30 = vrot.slane %v808_v12, 1 }
 0x182   :  { %9737 = vst [vmem:[#allocation3_spill] sm:$0xff] %v7965_v26  ;;  %6476 = vmatmul.mubr.msk.bf16.gmra.mrb[184].mxu0 %vm879_vm2, %v795_v24  ;;  %6704 = vmatmul.mubr.msk.bf16.gmra.mrb[184].mxu1 %vm879_vm2, %v7259_v56  ;;  %v806_v24 = vor.u32 %v804_v53, %v802_v55  ;;  %v8092_v26 = vld [vmem:[%s9731_s0 + $0x18] sm:$0xff]  }
 0x183   :  { %6479 = vmatprep.mubr.msk.bf16.mxu0 %vm7328_vm0, %v9734_v0  ;;  %6707 = vmatprep.mubr.msk.bf16.mxu1 %vm7328_vm0, %v9734_v0 }
 0x185   :  { %v1239_v46 = vpop.f32.mrb[80].mxu0  ;;  %v1849_v49 = vpop.f32.mrb[80].mxu1 }
 0x186   :  { %v6373_v58 = vpop.f32.mrb[81].mxu0  ;;  %v6601_v62 = vpop.f32.mrb[81].mxu1  ;;  %v7976_v63 = vadd.f32 %v1849_v49, %v1239_v46 }
 0x187   :  { %v1242_v25 = vpop.f32.mrb[82].mxu0  ;;  %v1852_v56 = vpop.f32.mrb[82].mxu1  ;;  %v811_v62 = vsel %vm415_vm1, %v806_v24, %v810_v30 }
 0x188   :  { %9738 = vst [vmem:[#allocation4_spill] sm:$0xff] %v7976_v63  ;;  %v6374_v20 = vpop.f32.mrb[83].mxu0  ;;  %v6602_v10 = vpop.f32.mrb[83].mxu1  ;;  %v7979_v2 = vadd.f32 %v1852_v56, %v1242_v25  ;;  %v812_v25 = vshrl.u32 %v7262_v44, 16  ;;  %v816_v56 = vshll.u32 %v7263_v40, 16 }
 0x189   :  { %v7264_v10 = vld [vmem:[%s9731_s0 + $0x198] sm:$0xff]  }
 0x18a   :  { %9739 = vst [vmem:[#allocation5_spill] sm:$0xff] %v7979_v2  ;;  %6480 = vmatmul.mubr.msk.bf16.gmra.mrb[188].mxu0 %vm879_vm2, %v803_v9  ;;  %6708 = vmatmul.mubr.msk.bf16.gmra.mrb[188].mxu1 %vm879_vm2, %v7260_v29  ;;  %v814_v53 = vor.u32 %v812_v25, %v810_v30  ;;  %v818_v12 = vrot.slane %v816_v56, 1  ;;  %v9744_v25 = vmov 0.0  }
 0x18b   :  { %6483 = vmatprep.mubr.msk.bf16.mxu0 %vm7328_vm0, %v9734_v0  ;;  %6711 = vmatprep.mubr.msk.bf16.mxu1 %vm7328_vm0, %v9734_v0 }
 0x18d   :  { %v1247_v54 = vpop.f32.mrb[84].mxu0  ;;  %v1857_v13 = vpop.f32.mrb[84].mxu1 }
 0x18e   :  { %v6377_v42 = vpop.f32.mrb[85].mxu0  ;;  %v6605_v46 = vpop.f32.mrb[85].mxu1  ;;  %v7990_v49 = vadd.f32 %v1857_v13, %v1247_v54 }
 0x18f   :  { %v1250_v58 = vpop.f32.mrb[86].mxu0  ;;  %v1860_v29 = vpop.f32.mrb[86].mxu1 }
 0x190   :  { %9740 = vst [vmem:[#allocation6_spill] sm:$0xff] %v7990_v49  ;;  %v6378_v9 = vpop.f32.mrb[87].mxu0  ;;  %v6606_v20 = vpop.f32.mrb[87].mxu1  ;;  %v7993_v55 = vadd.f32 %v1860_v29, %v1250_v58  ;;  %v819_v29 = vsel %vm415_vm1, %v814_v53, %v818_v12  ;;  %v7265_v53 = vld [vmem:[%s9731_s0 + $0x1a0] sm:$0xff]  }
 0x191   :  { %v824_v9 = vshll.u32 %v7264_v10, 16 }
 0x192   :  { %9741 = vst [vmem:[#allocation7_spill] sm:$0xff] %v7993_v55  ;;  %6484 = vmatmul.mubr.msk.bf16.gmra.mrb[192].mxu0 %vm879_vm2, %v811_v62  ;;  %6712 = vmatmul.mubr.msk.bf16.gmra.mrb[192].mxu1 %vm879_vm2, %v7261_v4  ;;  %v820_v62 = vshrl.u32 %v7263_v40, 16 }
 0x193   :  { %6487 = vmatprep.mubr.msk.bf16.mxu0 %vm7328_vm0, %v9734_v0  ;;  %6715 = vmatprep.mubr.msk.bf16.mxu1 %vm7328_vm0, %v9734_v0 }
 0x194   :  { %v822_v56 = vor.u32 %v820_v62, %v818_v12 }
 0x195   :  { %v1255_v24 = vpop.f32.mrb[88].mxu0  ;;  %v1865_v54 = vpop.f32.mrb[88].mxu1 }
 0x196   :  { %v6381_v13 = vpop.f32.mrb[89].mxu0  ;;  %v6609_v42 = vpop.f32.mrb[89].mxu1  ;;  %v8004_v46 = vadd.f32 %v1865_v54, %v1255_v24  ;;  %v826_v24 = vrot.slane %v824_v9, 1 }
 0x197   :  { %v1258_v58 = vpop.f32.mrb[90].mxu0  ;;  %v1868_v4 = vpop.f32.mrb[90].mxu1 }
 0x198   :  { %9742 = vst [vmem:[#allocation8_spill] sm:$0xff] %v8004_v46  ;;  %v6382_v20 = vpop.f32.mrb[91].mxu0  ;;  %v6610_v0 = vpop.f32.mrb[91].mxu1  ;;  %v8007_v30 = vadd.f32 %v1868_v4, %v1258_v58 }
 0x199   :  { %v828_v20 = vshrl.u32 %v7264_v10, 16 }
 0x19a   :  { %9743 = vst [vmem:[#allocation9_spill] sm:$0xff] %v8007_v30  ;;  %6488 = vmatmul.mubr.msk.bf16.gmra.mrb[196].mxu0 %vm879_vm2, %v819_v29  ;;  %6716 = vmatmul.mubr.msk.bf16.gmra.mrb[196].mxu1 %vm879_vm2, %v7262_v44  ;;  %v827_v29 = vsel %vm415_vm1, %v822_v56, %v826_v24  ;;  %v832_v30 = vshll.u32 %v7265_v53, 16  ;;  %v7266_v56 = vld [vmem:[%s9731_s0 + $0x1a8] sm:$0xff]  }
 0x19b   :  { %6491 = vmatprep.mubr.msk.bf16.mxu0 %vm7328_vm0, %v9744_v25  ;;  %6719 = vmatprep.mubr.msk.bf16.mxu1 %vm7328_vm0, %v9744_v25  ;;  %v830_v62 = vor.u32 %v828_v20, %v826_v24 }
 0x19c   :  { %v834_v9 = vrot.slane %v832_v30, 1 }
 0x19d   :  { %v1263_v54 = vpop.f32.mrb[92].mxu0  ;;  %v1873_v0 = vpop.f32.mrb[92].mxu1 }
 0x19e   :  { %v6385_v13 = vpop.f32.mrb[93].mxu0  ;;  %v6613_v42 = vpop.f32.mrb[93].mxu1  ;;  %v8018_v58 = vadd.f32 %v1873_v0, %v1263_v54 }
 0x19f   :  { %v1266_v4 = vpop.f32.mrb[94].mxu0  ;;  %v1876_v44 = vpop.f32.mrb[94].mxu1 }
 0x1a0   :  { %9745 = vst [vmem:[#allocation10_spill] sm:$0xff] %v8018_v58  ;;  %v6386_v46 = vpop.f32.mrb[95].mxu0  ;;  %v6614_v55 = vpop.f32.mrb[95].mxu1  ;;  %v8021_v12 = vadd.f32 %v1876_v44, %v1266_v4  ;;  %v835_v4 = vsel %vm415_vm1, %v830_v62, %v834_v9  ;;  %v836_v44 = vshrl.u32 %v7265_v53, 16 }
 0x1a1   :  { %v7267_v62 = vld [vmem:[%s9731_s0 + $0x1b0] ss:$0 sps:$4 sm:$0x77]  }
 0x1a2   :  { %9746 = vst [vmem:[#allocation11_spill] sm:$0xff] %v8021_v12  ;;  %6492 = vmatmul.mubr.msk.bf16.gmra.mrb[200].mxu0 %vm879_vm2, %v827_v29  ;;  %6720 = vmatmul.mubr.msk.bf16.gmra.mrb[200].mxu1 %vm879_vm2, %v7263_v40  ;;  %v840_v29 = vshll.u32 %v7266_v56, 16  ;;  %v838_v30 = vor.u32 %v836_v44, %v834_v9 }
 0x1a3   :  { %6495 = vmatprep.mubr.msk.bf16.mxu0 %vm7328_vm0, %v9744_v25  ;;  %6723 = vmatprep.mubr.msk.bf16.mxu1 %vm7328_vm0, %v9744_v25 }
 0x1a4   :  { %v842_v20 = vrot.slane %v840_v29, 1 }
 0x1a5   :  { %v1271_v46 = vpop.f32.mrb[96].mxu0  ;;  %v1881_v55 = vpop.f32.mrb[96].mxu1 }
 0x1a6   :  { %v6389_v54 = vpop.f32.mrb[97].mxu0  ;;  %v6617_v0 = vpop.f32.mrb[97].mxu1  ;;  %v8032_v13 = vadd.f32 %v1881_v55, %v1271_v46 }
 0x1a7   :  { %v1274_v42 = vpop.f32.mrb[98].mxu0  ;;  %v1884_v40 = vpop.f32.mrb[98].mxu1 }
 0x1a8   :  { %9747 = vst [vmem:[#allocation12_spill] sm:$0xff] %v8032_v13  ;;  %v6390_v12 = vpop.f32.mrb[99].mxu0  ;;  %v6618_v58 = vpop.f32.mrb[99].mxu1  ;;  %v8035_v24 = vadd.f32 %v1884_v40, %v1274_v42  ;;  %v843_v42 = vsel %vm415_vm1, %v838_v30, %v842_v20  ;;  %v844_v40 = vshrl.u32 %v7266_v56, 16  ;;  %v2127_v30 = vld [vmem:[%s9731_s0 + $0x8] sm:$0xc] }
 0x1aa   :  { %9748 = vst [vmem:[#allocation13_spill] sm:$0xff] %v8035_v24  ;;  %6496 = vmatmul.mubr.msk.bf16.gmra.mrb[204].mxu0 %vm879_vm2, %v835_v4  ;;  %6724 = vmatmul.mubr.msk.bf16.gmra.mrb[204].mxu1 %vm879_vm2, %v7264_v10  ;;  %v848_v4 = vshll.u32 %v7267_v62, 16  ;;  %v846_v44 = vor.u32 %v844_v40, %v842_v20 }
 0x1ab   :  { %6499 = vmatprep.mubr.msk.bf16.mxu0 %vm7328_vm0, %v9744_v25  ;;  %6727 = vmatprep.mubr.msk.bf16.mxu1 %vm7328_vm0, %v9744_v25 }
 0x1ac   :  { %v850_v29 = vrot.slane %v848_v4, 1 }
 0x1ad   :  { %v1279_v12 = vpop.f32.mrb[100].mxu0  ;;  %v1889_v58 = vpop.f32.mrb[100].mxu1 }
 0x1ae   :  { %v6393_v46 = vpop.f32.mrb[101].mxu0  ;;  %v6621_v55 = vpop.f32.mrb[101].mxu1  ;;  %v8046_v54 = vadd.f32 %v1889_v58, %v1279_v12 }
 0x1af   :  { %v1282_v0 = vpop.f32.mrb[102].mxu0  ;;  %v1892_v10 = vpop.f32.mrb[102].mxu1  ;;  %v8066_v46 = vld [vmem:[%s9731_s0 + $0x10] sm:$0xff]  }
 0x1b0   :  { %9749 = vst [vmem:[#allocation14_spill] sm:$0xff] %v8046_v54  ;;  %v6394_v24 = vpop.f32.mrb[103].mxu0  ;;  %v6622_v13 = vpop.f32.mrb[103].mxu1  ;;  %v8049_v9 = vadd.f32 %v1892_v10, %v1282_v0  ;;  %v851_v10 = vsel %vm415_vm1, %v846_v44, %v850_v29  ;;  %v852_v54 = vshrl.u32 %v7267_v62, 16  ;;  %v3786_v62 = vld [vmem:[%s9731_s0 + $0x8] sm:$0x8] }
 0x1b1   :  { %v2128_v13 = vld [vmem:[%s9731_s0 + $0xc] sm:$0xf] }
 0x1b2   :  { %9750 = vst [vmem:[#allocation15_spill] sm:$0xff] %v8049_v9  ;;  %6500 = vmatmul.mubr.msk.bf16.gmra.mrb[208].mxu0 %vm879_vm2, %v843_v42  ;;  %6728 = vmatmul.mubr.msk.bf16.gmra.mrb[208].mxu1 %vm879_vm2, %v7265_v53  ;;  %v5646_v42 = vcombine.low %v2127_v30, %v2128_v13 }
 0x1b3   :  { %6503 = vmatprep.mubr.msk.bf16.mxu0 %vm7328_vm0, %v9744_v25  ;;  %6731 = vmatprep.mubr.msk.bf16.mxu1 %vm7328_vm0, %v9744_v25 }
 0x1b4   :  { %v2523_v44 = vshrl.u32 %v5646_v42, 16  ;;  %v2526_v30 = vshll.u32 %v5646_v42, 16 }
 0x1b5   :  { %v1287_v24 = vpop.f32.mrb[104].mxu0  ;;  %v1897_v12 = vpop.f32.mrb[104].mxu1 }
 0x1b6   :  { %v6397_v58 = vpop.f32.mrb[105].mxu0  ;;  %v6625_v53 = vpop.f32.mrb[105].mxu1  ;;  %v8068_v55 = vadd.f32 %v1897_v12, %v1287_v24  ;;  %v2525_v2 = vrot.slane %v2523_v44, 2  ;;  %v2528_v63 = vrot.slane %v2526_v30, 3  ;;  %v3801_v44 = vrot.slane %v8066_v46, 3 }
 0x1b7   :  { %v1290_v20 = vpop.f32.mrb[106].mxu0  ;;  %v1900_v0 = vpop.f32.mrb[106].mxu1  ;;  %v2531_v58 = vshrl.u32 %v8066_v46, 16  ;;  %v2534_v53 = vshll.u32 %v8066_v46, 16  ;;  %v2540_v30 = vshrl.u32 %v8092_v26, 16 }
 0x1b8   :  { %9751 = vst [vmem:[#allocation16_spill] sm:$0xff] %v8068_v55  ;;  %v6398_v40 = vpop.f32.mrb[107].mxu0  ;;  %v6626_v4 = vpop.f32.mrb[107].mxu1  ;;  %v8071_v9 = vadd.f32 %v1900_v0, %v1290_v20  ;;  %v854_v20 = vor.u32 %v852_v54, %v850_v29 }
 0x1b9   :  { %v2533_v40 = vrot.slane %v2531_v58, 2  ;;  %v2536_v4 = vrot.slane %v2534_v53, 3  ;;  %v2529_v53 = vor.u32 %v2528_v63, %v2525_v2  ;;  %v2542_v2 = vrot.slane %v2540_v30, 2 }
 0x1ba   :  { %9752 = vst [vmem:[#allocation17_spill] sm:$0xff] %v8071_v9  ;;  %6504 = vmatmul.mubr.msk.bf16.gmra.mrb[212].mxu0 %vm879_vm2, %v851_v10  ;;  %6732 = vmatmul.mubr.msk.bf16.gmra.mrb[212].mxu1 %vm879_vm2, %v7266_v56  ;;  %v7268_v56 = vld [vmem:[%s9731_s0 + $0x1b0] ss:$0 sps:$4 sm:$0x33]   ;;  %v5768_v9 = vcombine.low %v3786_v62, %v2128_v13 }
 0x1bb   :  { %6507 = vmatprep.mubr.msk.bf16.mxu0 %vm7328_vm0, %v9744_v25  ;;  %6735 = vmatprep.mubr.msk.bf16.mxu1 %vm7328_vm0, %v9744_v25  ;;  %v2537_v13 = vor.u32 %v2536_v4, %v2533_v40  ;;  %v8112_v40 = vld [vmem:[%s9731_s0 + $0x20] sm:$0xff]  }
 0x1bc   :  { %v3800_v58 = vrot.slane %v5768_v9, 3  ;;  %v2552_v30 = vshll.u32 %v8112_v40, 16 }
 0x1bd   :  { %v1295_v24 = vpop.f32.mrb[108].mxu0  ;;  %v1905_v12 = vpop.f32.mrb[108].mxu1 }
 0x1be   :  { %v6401_v0 = vpop.f32.mrb[109].mxu0  ;;  %v6629_v10 = vpop.f32.mrb[109].mxu1  ;;  %v8087_v55 = vadd.f32 %v1905_v12, %v1295_v24  ;;  %v3802_v63 = vsel %vm3799_vm4, %v3800_v58, %v3801_v44  ;;  %v3803_v58 = vrot.slane %v8092_v26, 3 }
 0x1bf   :  { %v1298_v49 = vpop.f32.mrb[110].mxu0  ;;  %v1908_v42 = vpop.f32.mrb[110].mxu1  ;;  %v2538_v10 = vsel %vm2521_vm3, %v2529_v53, %v2537_v13  ;;  %v2549_v53 = vshrl.u32 %v8112_v40, 16 }
 0x1c0   :  { %v6402_v54 = vpop.f32.mrb[111].mxu0  ;;  %v6630_v29 = vpop.f32.mrb[111].mxu1  ;;  %v8094_v15 = vadd.f32 %v1908_v42, %v1298_v49  ;;  %v2543_v49 = vshll.u32 %v8092_v26, 16  ;;  %v8132_v26 = vld [vmem:[%s9731_s0 + $0x28] sm:$0xff]  }
 0x1c2   :  { %6508 = vmatmul.mubr.msk.bf16.gmra.mrb[216].mxu0 %vm879_vm2, %v854_v20  ;;  %6736 = vmatmul.mubr.msk.bf16.gmra.mrb[216].mxu1 %vm879_vm2, %v7268_v56  ;;  %v2545_v46 = vrot.slane %v2543_v49, 3 }
 0x1c3   :  { %6747 = vmatprep.mubr.msk.bf16.mxu0 %vm7328_vm0, %v9744_v25  ;;  %6975 = vmatprep.mubr.msk.bf16.mxu1 %vm7328_vm0, %v9744_v25 }
 0x1c4   :  { %v2546_v29 = vor.u32 %v2545_v46, %v2542_v2  ;;  %v2554_v2 = vrot.slane %v2552_v30, 3  ;;  %v2561_v30 = vshll.u32 %v8132_v26, 16 }
 0x1c5   :  { %v1303_v62 = vpop.f32.mrb[112].mxu0  ;;  %v1913_v24 = vpop.f32.mrb[112].mxu1 }
 0x1c6   :  { %v6405_v12 = vpop.f32.mrb[113].mxu0  ;;  %v6633_v20 = vpop.f32.mrb[113].mxu1  ;;  %v8105_v9 = vadd.f32 %v1913_v24, %v1303_v62 }
 0x1c7   :  { %v1306_v56 = vpop.f32.mrb[114].mxu0  ;;  %v1916_v0 = vpop.f32.mrb[114].mxu1 }
 0x1c8   :  { %9753 = vst [vmem:[#allocation18_spill] sm:$0xff] %v8105_v9  ;;  %v6406_v4 = vpop.f32.mrb[115].mxu0  ;;  %v6634_v42 = vpop.f32.mrb[115].mxu1  ;;  %v8114_v54 = vadd.f32 %v1916_v0, %v1306_v56 }
 0x1c9   :  { %v2551_v4 = vrot.slane %v2549_v53, 2  ;;  %v2558_v53 = vshrl.u32 %v8132_v26, 16 }
 0x1ca   :  { %9754 = vst [vmem:[#allocation19_spill] sm:$0xff] %v8114_v54  ;;  %6748 = vmatmul.mubr.msk.bf16.vlgmr.msra.gmra.mrb[220].mxu0 %vm879_vm2, %v2538_v10  ;;  %6976 = vmatmul.mubr.msk.bf16.vlgmr.msra.gmra.mrb[220].mxu1 %vm879_vm2, %v3802_v63  ;;  %v2547_v10 = vsel %vm2521_vm3, %v2537_v13, %v2546_v29  ;;  %v3804_v63 = vsel %vm3799_vm4, %v3801_v44, %v3803_v58  ;;  %v3805_v44 = vrot.slane %v8112_v40, 3  ;;  %v8152_v40 = vld [vmem:[%s9731_s0 + $0x30] sm:$0xff]  }
 0x1cb   :  { %6751 = vmatprep.mubr.msk.bf16.mxu0 %vm7328_vm0, %v9744_v25  ;;  %6979 = vmatprep.mubr.msk.bf16.mxu1 %vm7328_vm0, %v9744_v25  ;;  %v2555_v13 = vor.u32 %v2554_v2, %v2551_v4  ;;  %v2563_v4 = vrot.slane %v2561_v30, 3  ;;  %v2570_v30 = vshll.u32 %v8152_v40, 16 }
 0x1cd   :  { %v1311_v49 = vpop.f32.mrb[116].mxu0  ;;  %v1921_v62 = vpop.f32.mrb[116].mxu1 }
 0x1ce   :  { %v6409_v24 = vpop.f32.mrb[117].mxu0  ;;  %v6637_v12 = vpop.f32.mrb[117].mxu1  ;;  %v8125_v20 = vadd.f32 %v1921_v62, %v1311_v49 }
 0x1cf   :  { %v1314_v56 = vpop.f32.mrb[118].mxu0  ;;  %v1924_v0 = vpop.f32.mrb[118].mxu1 }
 0x1d0   :  { %9755 = vst [vmem:[#allocation20_spill] sm:$0xff] %v8125_v20  ;;  %v6410_v46 = vpop.f32.mrb[119].mxu0  ;;  %v6638_v42 = vpop.f32.mrb[119].mxu1  ;;  %v8134_v54 = vadd.f32 %v1924_v0, %v1314_v56 }
 0x1d1   :  { %v3806_v46 = vsel %vm3799_vm4, %v3803_v58, %v3805_v44  ;;  %v2560_v42 = vrot.slane %v2558_v53, 2  ;;  %v3807_v58 = vrot.slane %v8132_v26, 3  ;;  %v2567_v53 = vshrl.u32 %v8152_v40, 16  ;;  %v8172_v26 = vld [vmem:[%s9731_s0 + $0x38] sm:$0xff]  }
 0x1d2   :  { %9756 = vst [vmem:[#allocation21_spill] sm:$0xff] %v8134_v54  ;;  %6752 = vmatmul.mubr.msk.bf16.gmra.mrb[224].mxu0 %vm879_vm2, %v2547_v10  ;;  %6980 = vmatmul.mubr.msk.bf16.gmra.mrb[224].mxu1 %vm879_vm2, %v3804_v63  ;;  %v2556_v63 = vsel %vm2521_vm3, %v2546_v29, %v2555_v13 }
 0x1d3   :  { %6755 = vmatprep.mubr.msk.bf16.mxu0 %vm7328_vm0, %v9744_v25  ;;  %6983 = vmatprep.mubr.msk.bf16.mxu1 %vm7328_vm0, %v9744_v25  ;;  %v2564_v29 = vor.u32 %v2563_v4, %v2560_v42  ;;  %v2572_v42 = vrot.slane %v2570_v30, 3  ;;  %v2579_v30 = vshll.u32 %v8172_v26, 16 }
 0x1d5   :  { %v1319_v49 = vpop.f32.mrb[120].mxu0  ;;  %v1929_v62 = vpop.f32.mrb[120].mxu1 }
 0x1d6   :  { %v6413_v24 = vpop.f32.mrb[121].mxu0  ;;  %v6641_v12 = vpop.f32.mrb[121].mxu1  ;;  %v8145_v56 = vadd.f32 %v1929_v62, %v1319_v49 }
 0x1d7   :  { %v1322_v0 = vpop.f32.mrb[122].mxu0  ;;  %v1932_v10 = vpop.f32.mrb[122].mxu1 }
 0x1d8   :  { %9757 = vst [vmem:[#allocation22_spill] sm:$0xff] %v8145_v56  ;;  %v6414_v2 = vpop.f32.mrb[123].mxu0  ;;  %v6642_v54 = vpop.f32.mrb[123].mxu1  ;;  %v8154_v20 = vadd.f32 %v1932_v10, %v1322_v0 }
 0x1d9   :  { %v2569_v2 = vrot.slane %v2567_v53, 2  ;;  %v2576_v53 = vshrl.u32 %v8172_v26, 16 }
 0x1da   :  { %9758 = vst [vmem:[#allocation23_spill] sm:$0xff] %v8154_v20  ;;  %6756 = vmatmul.mubr.msk.bf16.gmra.mrb[228].mxu0 %vm879_vm2, %v2556_v63  ;;  %6984 = vmatmul.mubr.msk.bf16.gmra.mrb[228].mxu1 %vm879_vm2, %v3806_v46  ;;  %v2565_v63 = vsel %vm2521_vm3, %v2555_v13, %v2564_v29  ;;  %v3808_v46 = vsel %vm3799_vm4, %v3805_v44, %v3807_v58  ;;  %v3809_v44 = vrot.slane %v8152_v40, 3  ;;  %v8192_v40 = vld [vmem:[%s9731_s0 + $0x40] sm:$0xff]  }
 0x1db   :  { %6759 = vmatprep.mubr.msk.bf16.mxu0 %vm7328_vm0, %v9744_v25  ;;  %6987 = vmatprep.mubr.msk.bf16.mxu1 %vm7328_vm0, %v9744_v25  ;;  %v2573_v13 = vor.u32 %v2572_v42, %v2569_v2  ;;  %v2581_v2 = vrot.slane %v2579_v30, 3  ;;  %v2588_v30 = vshll.u32 %v8192_v40, 16 }
 0x1dd   :  { %v1327_v54 = vpop.f32.mrb[124].mxu0  ;;  %v1937_v49 = vpop.f32.mrb[124].mxu1 }
 0x1de   :  { %v6417_v62 = vpop.f32.mrb[125].mxu0  ;;  %v6645_v24 = vpop.f32.mrb[125].mxu1  ;;  %v8165_v12 = vadd.f32 %v1937_v49, %v1327_v54 }
 0x1df   :  { %v1330_v0 = vpop.f32.mrb[126].mxu0  ;;  %v1940_v10 = vpop.f32.mrb[126].mxu1 }
 0x1e0   :  { %9759 = vst [vmem:[#allocation24_spill] sm:$0xff] %v8165_v12  ;;  %v6418_v4 = vpop.f32.mrb[127].mxu0  ;;  %v6646_v20 = vpop.f32.mrb[127].mxu1  ;;  %v8174_v56 = vadd.f32 %v1940_v10, %v1330_v0 }
 0x1e1   :  { %v2578_v4 = vrot.slane %v2576_v53, 2  ;;  %v2585_v53 = vshrl.u32 %v8192_v40, 16 }
 0x1e2   :  { %9760 = vst [vmem:[#allocation25_spill] sm:$0xff] %v8174_v56  ;;  %6760 = vmatmul.mubr.msk.bf16.gmra.mrb[232].mxu0 %vm879_vm2, %v2565_v63  ;;  %6988 = vmatmul.mubr.msk.bf16.gmra.mrb[232].mxu1 %vm879_vm2, %v3808_v46  ;;  %v2574_v63 = vsel %vm2521_vm3, %v2564_v29, %v2573_v13  ;;  %v3810_v46 = vsel %vm3799_vm4, %v3807_v58, %v3809_v44  ;;  %v3811_v58 = vrot.slane %v8172_v26, 3  ;;  %v8212_v26 = vld [vmem:[%s9731_s0 + $0x48] sm:$0xff]  }
 0x1e3   :  { %6763 = vmatprep.mubr.msk.bf16.mxu0 %vm7328_vm0, %v9744_v25  ;;  %6991 = vmatprep.mubr.msk.bf16.mxu1 %vm7328_vm0, %v9744_v25  ;;  %v2582_v29 = vor.u32 %v2581_v2, %v2578_v4  ;;  %v2590_v4 = vrot.slane %v2588_v30, 3  ;;  %v2597_v30 = vshll.u32 %v8212_v26, 16 }
 0x1e5   :  { %v1335_v20 = vpop.f32.mrb[128].mxu0  ;;  %v1945_v54 = vpop.f32.mrb[128].mxu1 }
 0x1e6   :  { %v6421_v49 = vpop.f32.mrb[129].mxu0  ;;  %v6649_v62 = vpop.f32.mrb[129].mxu1  ;;  %v8185_v24 = vadd.f32 %v1945_v54, %v1335_v20 }
 0x1e7   :  { %v1338_v0 = vpop.f32.mrb[130].mxu0  ;;  %v1948_v10 = vpop.f32.mrb[130].mxu1 }
 0x1e8   :  { %9761 = vst [vmem:[#allocation26_spill] sm:$0xff] %v8185_v24  ;;  %v6422_v42 = vpop.f32.mrb[131].mxu0  ;;  %v6650_v56 = vpop.f32.mrb[131].mxu1  ;;  %v8194_v12 = vadd.f32 %v1948_v10, %v1338_v0 }
 0x1e9   :  { %v2587_v42 = vrot.slane %v2585_v53, 2  ;;  %v2594_v53 = vshrl.u32 %v8212_v26, 16 }
 0x1ea   :  { %9762 = vst [vmem:[#allocation27_spill] sm:$0xff] %v8194_v12  ;;  %6764 = vmatmul.mubr.msk.bf16.gmra.mrb[236].mxu0 %vm879_vm2, %v2574_v63  ;;  %6992 = vmatmul.mubr.msk.bf16.gmra.mrb[236].mxu1 %vm879_vm2, %v3810_v46  ;;  %v2583_v63 = vsel %vm2521_vm3, %v2573_v13, %v2582_v29  ;;  %v3812_v46 = vsel %vm3799_vm4, %v3809_v44, %v3811_v58  ;;  %v3813_v44 = vrot.slane %v8192_v40, 3  ;;  %v8232_v40 = vld [vmem:[%s9731_s0 + $0x50] sm:$0xff]  }
 0x1eb   :  { %6767 = vmatprep.mubr.msk.bf16.mxu0 %vm7328_vm0, %v9744_v25  ;;  %6995 = vmatprep.mubr.msk.bf16.mxu1 %vm7328_vm0, %v9744_v25  ;;  %v2591_v13 = vor.u32 %v2590_v4, %v2587_v42  ;;  %v2599_v42 = vrot.slane %v2597_v30, 3  ;;  %v2606_v30 = vshll.u32 %v8232_v40, 16 }
 0x1ed   :  { %v1343_v56 = vpop.f32.mrb[132].mxu0  ;;  %v1953_v20 = vpop.f32.mrb[132].mxu1 }
 0x1ee   :  { %v6425_v54 = vpop.f32.mrb[133].mxu0  ;;  %v6653_v49 = vpop.f32.mrb[133].mxu1  ;;  %v8205_v62 = vadd.f32 %v1953_v20, %v1343_v56 }
 0x1ef   :  { %v1346_v0 = vpop.f32.mrb[134].mxu0  ;;  %v1956_v10 = vpop.f32.mrb[134].mxu1 }
 0x1f0   :  { %9763 = vst [vmem:[#allocation28_spill] sm:$0xff] %v8205_v62  ;;  %v6426_v2 = vpop.f32.mrb[135].mxu0  ;;  %v6654_v12 = vpop.f32.mrb[135].mxu1  ;;  %v8214_v24 = vadd.f32 %v1956_v10, %v1346_v0 }
 0x1f1   :  { %v2596_v2 = vrot.slane %v2594_v53, 2  ;;  %v2603_v53 = vshrl.u32 %v8232_v40, 16 }
 0x1f2   :  { %9764 = vst [vmem:[#allocation29_spill] sm:$0xff] %v8214_v24  ;;  %6768 = vmatmul.mubr.msk.bf16.gmra.mrb[240].mxu0 %vm879_vm2, %v2583_v63  ;;  %6996 = vmatmul.mubr.msk.bf16.gmra.mrb[240].mxu1 %vm879_vm2, %v3812_v46  ;;  %v2592_v63 = vsel %vm2521_vm3, %v2582_v29, %v2591_v13  ;;  %v3814_v46 = vsel %vm3799_vm4, %v3811_v58, %v3813_v44  ;;  %v3815_v58 = vrot.slane %v8212_v26, 3  ;;  %v8252_v26 = vld [vmem:[%s9731_s0 + $0x58] sm:$0xff]  }
 0x1f3   :  { %6771 = vmatprep.mubr.msk.bf16.mxu0 %vm7328_vm0, %v9744_v25  ;;  %6999 = vmatprep.mubr.msk.bf16.mxu1 %vm7328_vm0, %v9744_v25  ;;  %v2600_v29 = vor.u32 %v2599_v42, %v2596_v2  ;;  %v2605_v2 = vrot.slane %v2603_v53, 2  ;;  %v2608_v42 = vrot.slane %v2606_v30, 3  ;;  %v2615_v53 = vshll.u32 %v8252_v26, 16 }
 0x1f4   :  { %v3817_v30 = vrot.slane %v8232_v40, 3 }
 0x1f5   :  { %v1351_v12 = vpop.f32.mrb[136].mxu0  ;;  %v1961_v56 = vpop.f32.mrb[136].mxu1 }
 0x1f6   :  { %v6429_v20 = vpop.f32.mrb[137].mxu0  ;;  %v6657_v54 = vpop.f32.mrb[137].mxu1  ;;  %v8225_v49 = vadd.f32 %v1961_v56, %v1351_v12 }
 0x1f7   :  { %v1354_v0 = vpop.f32.mrb[138].mxu0  ;;  %v1964_v10 = vpop.f32.mrb[138].mxu1 }
 0x1f8   :  { %9765 = vst [vmem:[#allocation30_spill] sm:$0xff] %v8225_v49  ;;  %v6430_v4 = vpop.f32.mrb[139].mxu0  ;;  %v6658_v24 = vpop.f32.mrb[139].mxu1  ;;  %v8234_v62 = vadd.f32 %v1964_v10, %v1354_v0 }
 0x1fa   :  { %9766 = vst [vmem:[#allocation31_spill] sm:$0xff] %v8234_v62  ;;  %6772 = vmatmul.mubr.msk.bf16.gmra.mrb[244].mxu0 %vm879_vm2, %v2592_v63  ;;  %7000 = vmatmul.mubr.msk.bf16.gmra.mrb[244].mxu1 %vm879_vm2, %v3814_v46  ;;  %v2601_v63 = vsel %vm2521_vm3, %v2591_v13, %v2600_v29  ;;  %v3816_v46 = vsel %vm3799_vm4, %v3813_v44, %v3815_v58  ;;  %v2612_v44 = vshrl.u32 %v8252_v26, 16 }
 0x1fb   :  { %6775 = vmatprep.mubr.msk.bf16.mxu0 %vm7328_vm0, %v9744_v25  ;;  %7003 = vmatprep.mubr.msk.bf16.mxu1 %vm7328_vm0, %v9744_v25  ;;  %v2609_v13 = vor.u32 %v2608_v42, %v2605_v2  ;;  %v3818_v2 = vsel %vm3799_vm4, %v3815_v58, %v3817_v30  ;;  %v8272_v42 = vld [vmem:[%s9731_s0 + $0x60] sm:$0xff]  }
 0x1fc   :  { %v2621_v58 = vshrl.u32 %v8272_v42, 16 }
 0x1fd   :  { %v1359_v24 = vpop.f32.mrb[140].mxu0  ;;  %v1969_v12 = vpop.f32.mrb[140].mxu1 }
 0x1fe   :  { %v6433_v56 = vpop.f32.mrb[141].mxu0  ;;  %v6661_v20 = vpop.f32.mrb[141].mxu1  ;;  %v8245_v54 = vadd.f32 %v1969_v12, %v1359_v24 }
 0x1ff   :  { %v1362_v0 = vpop.f32.mrb[142].mxu0  ;;  %v1972_v10 = vpop.f32.mrb[142].mxu1 }
 0x200   :  { %9767 = vst [vmem:[#allocation32_spill] sm:$0xff] %v8245_v54  ;;  %v6434_v4 = vpop.f32.mrb[143].mxu0  ;;  %v6662_v62 = vpop.f32.mrb[143].mxu1  ;;  %v8254_v49 = vadd.f32 %v1972_v10, %v1362_v0 }
 0x201   :  { %v2617_v4 = vrot.slane %v2615_v53, 3 }
 0x202   :  { %9768 = vst [vmem:[#allocation33_spill] sm:$0xff] %v8254_v49  ;;  %6776 = vmatmul.mubr.msk.bf16.gmra.mrb[248].mxu0 %vm879_vm2, %v2601_v63  ;;  %7004 = vmatmul.mubr.msk.bf16.gmra.mrb[248].mxu1 %vm879_vm2, %v3816_v46  ;;  %v2610_v63 = vsel %vm2521_vm3, %v2600_v29, %v2609_v13  ;;  %v2614_v46 = vrot.slane %v2612_v44, 2  ;;  %v3819_v29 = vrot.slane %v8252_v26, 3  ;;  %v2624_v44 = vshll.u32 %v8272_v42, 16 }
 0x203   :  { %6779 = vmatprep.mubr.msk.bf16.mxu0 %vm7328_vm0, %v9744_v25  ;;  %7007 = vmatprep.mubr.msk.bf16.mxu1 %vm7328_vm0, %v9744_v25 }
 0x204   :  { %v3820_v26 = vsel %vm3799_vm4, %v3817_v30, %v3819_v29  ;;  %v3821_v30 = vrot.slane %v8272_v42, 3  ;;  %v8312_v42 = vld [vmem:[%s9731_s0 + $0x70] sm:$0xff]  }
 0x205   :  { %v1367_v62 = vpop.f32.mrb[144].mxu0  ;;  %v1977_v24 = vpop.f32.mrb[144].mxu1 }
 0x206   :  { %v6437_v12 = vpop.f32.mrb[145].mxu0  ;;  %v6665_v56 = vpop.f32.mrb[145].mxu1  ;;  %v8265_v20 = vadd.f32 %v1977_v24, %v1367_v62  ;;  %v2618_v62 = vor.u32 %v2617_v4, %v2614_v46  ;;  %v2623_v46 = vrot.slane %v2621_v58, 2  ;;  %v2626_v4 = vrot.slane %v2624_v44, 3 }
 0x207   :  { %v1370_v0 = vpop.f32.mrb[146].mxu0  ;;  %v1980_v10 = vpop.f32.mrb[146].mxu1 }
 0x208   :  { %9769 = vst [vmem:[#allocation34_spill] sm:$0xff] %v8265_v20  ;;  %v6438_v40 = vpop.f32.mrb[147].mxu0  ;;  %v6666_v49 = vpop.f32.mrb[147].mxu1  ;;  %v8274_v54 = vadd.f32 %v1980_v10, %v1370_v0  ;;  %v2619_v0 = vsel %vm2521_vm3, %v2609_v13, %v2618_v62  ;;  %v2627_v13 = vor.u32 %v2626_v4, %v2623_v46 }
 0x20a   :  { %9770 = vst [vmem:[#allocation35_spill] sm:$0xff] %v8274_v54  ;;  %6780 = vmatmul.mubr.msk.bf16.gmra.mrb[252].mxu0 %vm879_vm2, %v2610_v63  ;;  %7008 = vmatmul.mubr.msk.bf16.gmra.mrb[252].mxu1 %vm879_vm2, %v3818_v2  ;;  %v8292_v2 = vld [vmem:[%s9731_s0 + $0x68] sm:$0xff]  }
 0x20b   :  { %6783 = vmatprep.mubr.msk.bf16.mxu0 %vm7328_vm0, %v9744_v25  ;;  %7011 = vmatprep.mubr.msk.bf16.mxu1 %vm7328_vm0, %v9744_v25  ;;  %v2630_v58 = vshrl.u32 %v8292_v2, 16  ;;  %v2633_v44 = vshll.u32 %v8292_v2, 16 }
 0x20d   :  { %v1375_v49 = vpop.f32.mrb[148].mxu0  ;;  %v1985_v53 = vpop.f32.mrb[148].mxu1  ;;  %v2635_v46 = vrot.slane %v2633_v44, 3  ;;  %v2642_v44 = vshll.u32 %v8312_v42, 16 }
 0x20e   :  { %v6441_v24 = vpop.f32.mrb[149].mxu0  ;;  %v6669_v12 = vpop.f32.mrb[149].mxu1  ;;  %v8285_v56 = vadd.f32 %v1985_v53, %v1375_v49 }
 0x20f   :  { %v1378_v10 = vpop.f32.mrb[150].mxu0  ;;  %v1988_v63 = vpop.f32.mrb[150].mxu1 }
 0x210   :  { %9771 = vst [vmem:[#allocation36_spill] sm:$0xff] %v8285_v56  ;;  %v6442_v40 = vpop.f32.mrb[151].mxu0  ;;  %v6670_v54 = vpop.f32.mrb[151].mxu1  ;;  %v8294_v20 = vadd.f32 %v1988_v63, %v1378_v10  ;;  %v2628_v10 = vsel %vm2521_vm3, %v2618_v62, %v2627_v13  ;;  %v3822_v63 = vsel %vm3799_vm4, %v3819_v29, %v3821_v30  ;;  %v3823_v29 = vrot.slane %v8292_v2, 3  ;;  %v8332_v2 = vld [vmem:[%s9731_s0 + $0x78] sm:$0xff]  }
 0x211   :  { %v2632_v40 = vrot.slane %v2630_v58, 2  ;;  %v2639_v58 = vshrl.u32 %v8312_v42, 16 }
 0x212   :  { %9772 = vst [vmem:[#allocation37_spill] sm:$0xff] %v8294_v20  ;;  %6784 = vmatmul.mubr.msk.bf16.gmra.mrb[0].mxu0 %vm879_vm2, %v2619_v0  ;;  %7012 = vmatmul.mubr.msk.bf16.gmra.mrb[0].mxu1 %vm879_vm2, %v3820_v26 }
 0x213   :  { %6787 = vmatprep.mubr.msk.bf16.mxu0 %vm7328_vm0, %v9744_v25  ;;  %7015 = vmatprep.mubr.msk.bf16.mxu1 %vm7328_vm0, %v9744_v25  ;;  %v2636_v62 = vor.u32 %v2635_v46, %v2632_v40  ;;  %v2644_v40 = vrot.slane %v2642_v44, 3  ;;  %v2651_v44 = vshll.u32 %v8332_v2, 16 }
 0x215   :  { %v1383_v54 = vpop.f32.mrb[152].mxu0  ;;  %v1993_v49 = vpop.f32.mrb[152].mxu1 }
 0x216   :  { %v6445_v53 = vpop.f32.mrb[153].mxu0  ;;  %v6673_v24 = vpop.f32.mrb[153].mxu1  ;;  %v8305_v12 = vadd.f32 %v1993_v49, %v1383_v54 }
 0x217   :  { %v1386_v0 = vpop.f32.mrb[154].mxu0  ;;  %v1996_v26 = vpop.f32.mrb[154].mxu1 }
 0x218   :  { %9773 = vst [vmem:[#allocation38_spill] sm:$0xff] %v8305_v12  ;;  %v6446_v4 = vpop.f32.mrb[155].mxu0  ;;  %v6674_v20 = vpop.f32.mrb[155].mxu1  ;;  %v8314_v56 = vadd.f32 %v1996_v26, %v1386_v0 }
 0x219   :  { %v2641_v4 = vrot.slane %v2639_v58, 2  ;;  %v2648_v58 = vshrl.u32 %v8332_v2, 16 }
 0x21a   :  { %9774 = vst [vmem:[#allocation39_spill] sm:$0xff] %v8314_v56  ;;  %6788 = vmatmul.mubr.msk.bf16.gmra.mrb[4].mxu0 %vm879_vm2, %v2628_v10  ;;  %7016 = vmatmul.mubr.msk.bf16.gmra.mrb[4].mxu1 %vm879_vm2, %v3822_v63  ;;  %v2637_v10 = vsel %vm2521_vm3, %v2627_v13, %v2636_v62  ;;  %v3824_v63 = vsel %vm3799_vm4, %v3821_v30, %v3823_v29  ;;  %v3825_v30 = vrot.slane %v8312_v42, 3  ;;  %v8352_v42 = vld [vmem:[%s9731_s0 + $0x80] sm:$0xff]  }
 0x21b   :  { %6791 = vmatprep.mubr.msk.bf16.mxu0 %vm7328_vm0, %v9744_v25  ;;  %7019 = vmatprep.mubr.msk.bf16.mxu1 %vm7328_vm0, %v9744_v25  ;;  %v2645_v13 = vor.u32 %v2644_v40, %v2641_v4  ;;  %v2653_v4 = vrot.slane %v2651_v44, 3  ;;  %v2660_v44 = vshll.u32 %v8352_v42, 16 }
 0x21d   :  { %v1391_v20 = vpop.f32.mrb[156].mxu0  ;;  %v2001_v54 = vpop.f32.mrb[156].mxu1 }
 0x21e   :  { %v6449_v49 = vpop.f32.mrb[157].mxu0  ;;  %v6677_v53 = vpop.f32.mrb[157].mxu1  ;;  %v8325_v24 = vadd.f32 %v2001_v54, %v1391_v20 }
 0x21f   :  { %v1394_v0 = vpop.f32.mrb[158].mxu0  ;;  %v2004_v26 = vpop.f32.mrb[158].mxu1 }
 0x220   :  { %9775 = vst [vmem:[#allocation40_spill] sm:$0xff] %v8325_v24  ;;  %v6450_v46 = vpop.f32.mrb[159].mxu0  ;;  %v6678_v56 = vpop.f32.mrb[159].mxu1  ;;  %v8334_v12 = vadd.f32 %v2004_v26, %v1394_v0 }
 0x221   :  { %v2650_v46 = vrot.slane %v2648_v58, 2  ;;  %v2657_v58 = vshrl.u32 %v8352_v42, 16 }
 0x222   :  { %9776 = vst [vmem:[#allocation41_spill] sm:$0xff] %v8334_v12  ;;  %6792 = vmatmul.mubr.msk.bf16.gmra.mrb[8].mxu0 %vm879_vm2, %v2637_v10  ;;  %7020 = vmatmul.mubr.msk.bf16.gmra.mrb[8].mxu1 %vm879_vm2, %v3824_v63  ;;  %v2646_v10 = vsel %vm2521_vm3, %v2636_v62, %v2645_v13  ;;  %v3826_v63 = vsel %vm3799_vm4, %v3823_v29, %v3825_v30  ;;  %v3827_v29 = vrot.slane %v8332_v2, 3  ;;  %v8372_v2 = vld [vmem:[%s9731_s0 + $0x88] sm:$0xff]  }
 0x223   :  { %6795 = vmatprep.mubr.msk.bf16.mxu0 %vm7328_vm0, %v9744_v25  ;;  %7023 = vmatprep.mubr.msk.bf16.mxu1 %vm7328_vm0, %v9744_v25  ;;  %v2654_v62 = vor.u32 %v2653_v4, %v2650_v46  ;;  %v2662_v46 = vrot.slane %v2660_v44, 3  ;;  %v2669_v44 = vshll.u32 %v8372_v2, 16 }
 0x225   :  { %v1399_v56 = vpop.f32.mrb[160].mxu0  ;;  %v2009_v20 = vpop.f32.mrb[160].mxu1 }
 0x226   :  { %v6453_v54 = vpop.f32.mrb[161].mxu0  ;;  %v6681_v49 = vpop.f32.mrb[161].mxu1  ;;  %v8345_v53 = vadd.f32 %v2009_v20, %v1399_v56 }
 0x227   :  { %v1402_v0 = vpop.f32.mrb[162].mxu0  ;;  %v2012_v26 = vpop.f32.mrb[162].mxu1 }
 0x228   :  { %9777 = vst [vmem:[#allocation42_spill] sm:$0xff] %v8345_v53  ;;  %v6454_v40 = vpop.f32.mrb[163].mxu0  ;;  %v6682_v12 = vpop.f32.mrb[163].mxu1  ;;  %v8354_v24 = vadd.f32 %v2012_v26, %v1402_v0 }
 0x229   :  { %v2659_v40 = vrot.slane %v2657_v58, 2  ;;  %v2666_v58 = vshrl.u32 %v8372_v2, 16 }
 0x22a   :  { %9778 = vst [vmem:[#allocation43_spill] sm:$0xff] %v8354_v24  ;;  %6796 = vmatmul.mubr.msk.bf16.gmra.mrb[12].mxu0 %vm879_vm2, %v2646_v10  ;;  %7024 = vmatmul.mubr.msk.bf16.gmra.mrb[12].mxu1 %vm879_vm2, %v3826_v63  ;;  %v2655_v10 = vsel %vm2521_vm3, %v2645_v13, %v2654_v62  ;;  %v3828_v63 = vsel %vm3799_vm4, %v3825_v30, %v3827_v29  ;;  %v3829_v30 = vrot.slane %v8352_v42, 3  ;;  %v8392_v42 = vld [vmem:[%s9731_s0 + $0x90] sm:$0xff]  }
 0x22b   :  { %6799 = vmatprep.mubr.msk.bf16.mxu0 %vm7328_vm0, %v9744_v25  ;;  %7027 = vmatprep.mubr.msk.bf16.mxu1 %vm7328_vm0, %v9744_v25  ;;  %v2663_v13 = vor.u32 %v2662_v46, %v2659_v40  ;;  %v2671_v40 = vrot.slane %v2669_v44, 3  ;;  %v2678_v44 = vshll.u32 %v8392_v42, 16 }
 0x22d   :  { %v1407_v12 = vpop.f32.mrb[164].mxu0  ;;  %v2017_v56 = vpop.f32.mrb[164].mxu1 }
 0x22e   :  { %v6457_v20 = vpop.f32.mrb[165].mxu0  ;;  %v6685_v54 = vpop.f32.mrb[165].mxu1  ;;  %v8365_v49 = vadd.f32 %v2017_v56, %v1407_v12 }
 0x22f   :  { %v1410_v0 = vpop.f32.mrb[166].mxu0  ;;  %v2020_v26 = vpop.f32.mrb[166].mxu1 }
 0x230   :  { %9779 = vst [vmem:[#allocation44_spill] sm:$0xff] %v8365_v49  ;;  %v6458_v4 = vpop.f32.mrb[167].mxu0  ;;  %v6686_v24 = vpop.f32.mrb[167].mxu1  ;;  %v8374_v53 = vadd.f32 %v2020_v26, %v1410_v0 }
 0x231   :  { %v2668_v4 = vrot.slane %v2666_v58, 2  ;;  %v2675_v58 = vshrl.u32 %v8392_v42, 16 }
 0x232   :  { %9780 = vst [vmem:[#allocation45_spill] sm:$0xff] %v8374_v53  ;;  %6800 = vmatmul.mubr.msk.bf16.gmra.mrb[16].mxu0 %vm879_vm2, %v2655_v10  ;;  %7028 = vmatmul.mubr.msk.bf16.gmra.mrb[16].mxu1 %vm879_vm2, %v3828_v63  ;;  %v2664_v10 = vsel %vm2521_vm3, %v2654_v62, %v2663_v13  ;;  %v3830_v63 = vsel %vm3799_vm4, %v3827_v29, %v3829_v30  ;;  %v3831_v29 = vrot.slane %v8372_v2, 3  ;;  %v8412_v2 = vld [vmem:[%s9731_s0 + $0x98] sm:$0xff]  }
 0x233   :  { %6803 = vmatprep.mubr.msk.bf16.mxu0 %vm7328_vm0, %v9744_v25  ;;  %7031 = vmatprep.mubr.msk.bf16.mxu1 %vm7328_vm0, %v9744_v25  ;;  %v2672_v62 = vor.u32 %v2671_v40, %v2668_v4  ;;  %v2680_v4 = vrot.slane %v2678_v44, 3  ;;  %v2687_v44 = vshll.u32 %v8412_v2, 16 }
 0x235   :  { %v1415_v24 = vpop.f32.mrb[168].mxu0  ;;  %v2025_v12 = vpop.f32.mrb[168].mxu1 }
 0x236   :  { %v6461_v56 = vpop.f32.mrb[169].mxu0  ;;  %v6689_v20 = vpop.f32.mrb[169].mxu1  ;;  %v8385_v54 = vadd.f32 %v2025_v12, %v1415_v24 }
 0x237   :  { %v1418_v0 = vpop.f32.mrb[170].mxu0  ;;  %v2028_v26 = vpop.f32.mrb[170].mxu1 }
 0x238   :  { %9781 = vst [vmem:[#allocation46_spill] sm:$0xff] %v8385_v54  ;;  %v6462_v46 = vpop.f32.mrb[171].mxu0  ;;  %v6690_v53 = vpop.f32.mrb[171].mxu1  ;;  %v8394_v49 = vadd.f32 %v2028_v26, %v1418_v0 }
 0x239   :  { %v2677_v46 = vrot.slane %v2675_v58, 2  ;;  %v2684_v58 = vshrl.u32 %v8412_v2, 16 }
 0x23a   :  { %9782 = vst [vmem:[#allocation47_spill] sm:$0xff] %v8394_v49  ;;  %6804 = vmatmul.mubr.msk.bf16.gmra.mrb[20].mxu0 %vm879_vm2, %v2664_v10  ;;  %7032 = vmatmul.mubr.msk.bf16.gmra.mrb[20].mxu1 %vm879_vm2, %v3830_v63  ;;  %v2673_v10 = vsel %vm2521_vm3, %v2663_v13, %v2672_v62  ;;  %v3832_v63 = vsel %vm3799_vm4, %v3829_v30, %v3831_v29  ;;  %v3833_v30 = vrot.slane %v8392_v42, 3  ;;  %v8432_v42 = vld [vmem:[%s9731_s0 + $0xa0] sm:$0xff]  }
 0x23b   :  { %6807 = vmatprep.mubr.msk.bf16.mxu0 %vm7328_vm0, %v9744_v25  ;;  %7035 = vmatprep.mubr.msk.bf16.mxu1 %vm7328_vm0, %v9744_v25  ;;  %v2681_v13 = vor.u32 %v2680_v4, %v2677_v46  ;;  %v2689_v46 = vrot.slane %v2687_v44, 3  ;;  %v2696_v44 = vshll.u32 %v8432_v42, 16 }
 0x23d   :  { %v1423_v53 = vpop.f32.mrb[172].mxu0  ;;  %v2033_v24 = vpop.f32.mrb[172].mxu1 }
 0x23e   :  { %v6465_v12 = vpop.f32.mrb[173].mxu0  ;;  %v6693_v56 = vpop.f32.mrb[173].mxu1  ;;  %v8405_v20 = vadd.f32 %v2033_v24, %v1423_v53 }
 0x23f   :  { %v1426_v0 = vpop.f32.mrb[174].mxu0  ;;  %v2036_v26 = vpop.f32.mrb[174].mxu1 }
 0x240   :  { %9783 = vst [vmem:[#allocation48_spill] sm:$0xff] %v8405_v20  ;;  %v6466_v40 = vpop.f32.mrb[175].mxu0  ;;  %v6694_v49 = vpop.f32.mrb[175].mxu1  ;;  %v8414_v54 = vadd.f32 %v2036_v26, %v1426_v0 }
 0x241   :  { %v2686_v40 = vrot.slane %v2684_v58, 2  ;;  %v2693_v58 = vshrl.u32 %v8432_v42, 16 }
 0x242   :  { %9784 = vst [vmem:[#allocation49_spill] sm:$0xff] %v8414_v54  ;;  %6808 = vmatmul.mubr.msk.bf16.gmra.mrb[24].mxu0 %vm879_vm2, %v2673_v10  ;;  %7036 = vmatmul.mubr.msk.bf16.gmra.mrb[24].mxu1 %vm879_vm2, %v3832_v63  ;;  %v2682_v10 = vsel %vm2521_vm3, %v2672_v62, %v2681_v13  ;;  %v3834_v63 = vsel %vm3799_vm4, %v3831_v29, %v3833_v30  ;;  %v3835_v29 = vrot.slane %v8412_v2, 3  ;;  %v8452_v2 = vld [vmem:[%s9731_s0 + $0xa8] sm:$0xff]  }
 0x243   :  { %6811 = vmatprep.mubr.msk.bf16.mxu0 %vm7328_vm0, %v9744_v25  ;;  %7039 = vmatprep.mubr.msk.bf16.mxu1 %vm7328_vm0, %v9744_v25  ;;  %v2690_v62 = vor.u32 %v2689_v46, %v2686_v40  ;;  %v2698_v40 = vrot.slane %v2696_v44, 3  ;;  %v2705_v44 = vshll.u32 %v8452_v2, 16 }
 0x245   :  { %v1431_v49 = vpop.f32.mrb[176].mxu0  ;;  %v2041_v53 = vpop.f32.mrb[176].mxu1 }
 0x246   :  { %v6469_v24 = vpop.f32.mrb[177].mxu0  ;;  %v6697_v12 = vpop.f32.mrb[177].mxu1  ;;  %v8425_v56 = vadd.f32 %v2041_v53, %v1431_v49 }
 0x247   :  { %v1434_v0 = vpop.f32.mrb[178].mxu0  ;;  %v2044_v26 = vpop.f32.mrb[178].mxu1 }
 0x248   :  { %9785 = vst [vmem:[#allocation50_spill] sm:$0xff] %v8425_v56  ;;  %v6470_v4 = vpop.f32.mrb[179].mxu0  ;;  %v6698_v54 = vpop.f32.mrb[179].mxu1  ;;  %v8434_v20 = vadd.f32 %v2044_v26, %v1434_v0 }
 0x249   :  { %v2695_v4 = vrot.slane %v2693_v58, 2  ;;  %v2702_v58 = vshrl.u32 %v8452_v2, 16 }
 0x24a   :  { %9786 = vst [vmem:[#allocation51_spill] sm:$0xff] %v8434_v20  ;;  %6812 = vmatmul.mubr.msk.bf16.gmra.mrb[28].mxu0 %vm879_vm2, %v2682_v10  ;;  %7040 = vmatmul.mubr.msk.bf16.gmra.mrb[28].mxu1 %vm879_vm2, %v3834_v63  ;;  %v2691_v10 = vsel %vm2521_vm3, %v2681_v13, %v2690_v62  ;;  %v3836_v63 = vsel %vm3799_vm4, %v3833_v30, %v3835_v29  ;;  %v3837_v30 = vrot.slane %v8432_v42, 3  ;;  %v8472_v42 = vld [vmem:[%s9731_s0 + $0xb0] sm:$0xff]  }
 0x24b   :  { %6815 = vmatprep.mubr.msk.bf16.mxu0 %vm7328_vm0, %v9744_v25  ;;  %7043 = vmatprep.mubr.msk.bf16.mxu1 %vm7328_vm0, %v9744_v25  ;;  %v2699_v13 = vor.u32 %v2698_v40, %v2695_v4  ;;  %v2707_v4 = vrot.slane %v2705_v44, 3  ;;  %v2714_v44 = vshll.u32 %v8472_v42, 16 }
 0x24d   :  { %v1439_v54 = vpop.f32.mrb[180].mxu0  ;;  %v2049_v49 = vpop.f32.mrb[180].mxu1 }
 0x24e   :  { %v6473_v53 = vpop.f32.mrb[181].mxu0  ;;  %v6701_v24 = vpop.f32.mrb[181].mxu1  ;;  %v8445_v12 = vadd.f32 %v2049_v49, %v1439_v54 }
 0x24f   :  { %v1442_v0 = vpop.f32.mrb[182].mxu0  ;;  %v2052_v26 = vpop.f32.mrb[182].mxu1 }
 0x250   :  { %9787 = vst [vmem:[#allocation52_spill] sm:$0xff] %v8445_v12  ;;  %v6474_v46 = vpop.f32.mrb[183].mxu0  ;;  %v6702_v20 = vpop.f32.mrb[183].mxu1  ;;  %v8454_v56 = vadd.f32 %v2052_v26, %v1442_v0 }
 0x251   :  { %v2704_v46 = vrot.slane %v2702_v58, 2  ;;  %v2711_v58 = vshrl.u32 %v8472_v42, 16 }
 0x252   :  { %9788 = vst [vmem:[#allocation53_spill] sm:$0xff] %v8454_v56  ;;  %6816 = vmatmul.mubr.msk.bf16.gmra.mrb[32].mxu0 %vm879_vm2, %v2691_v10  ;;  %7044 = vmatmul.mubr.msk.bf16.gmra.mrb[32].mxu1 %vm879_vm2, %v3836_v63  ;;  %v2700_v10 = vsel %vm2521_vm3, %v2690_v62, %v2699_v13  ;;  %v3838_v63 = vsel %vm3799_vm4, %v3835_v29, %v3837_v30  ;;  %v3839_v29 = vrot.slane %v8452_v2, 3  ;;  %v8492_v2 = vld [vmem:[%s9731_s0 + $0xb8] sm:$0xff]  }
 0x253   :  { %6819 = vmatprep.mubr.msk.bf16.mxu0 %vm7328_vm0, %v9744_v25  ;;  %7047 = vmatprep.mubr.msk.bf16.mxu1 %vm7328_vm0, %v9744_v25  ;;  %v2708_v62 = vor.u32 %v2707_v4, %v2704_v46  ;;  %v2716_v46 = vrot.slane %v2714_v44, 3  ;;  %v2723_v44 = vshll.u32 %v8492_v2, 16 }
 0x255   :  { %v1447_v20 = vpop.f32.mrb[184].mxu0  ;;  %v2057_v54 = vpop.f32.mrb[184].mxu1 }
 0x256   :  { %v8465_v49 = vadd.f32 %v2057_v54, %v1447_v20  ;;  %v6477_v53 = vpop.f32.mrb[185].mxu0  ;;  %v6705_v24 = vpop.f32.mrb[185].mxu1 }
 0x257   :  { %v1450_v0 = vpop.f32.mrb[186].mxu0  ;;  %v2060_v26 = vpop.f32.mrb[186].mxu1 }
 0x258   :  { %9789 = vst [vmem:[#allocation54_spill] sm:$0xff] %v8465_v49  ;;  %v8474_v40 = vadd.f32 %v2060_v26, %v1450_v0  ;;  %v6478_v56 = vpop.f32.mrb[187].mxu0  ;;  %v6706_v20 = vpop.f32.mrb[187].mxu1 }
 0x259   :  { %v3840_v20 = vsel %vm3799_vm4, %v3837_v30, %v3839_v29  ;;  %v3841_v30 = vrot.slane %v8472_v42, 3  ;;  %v8512_v42 = vld [vmem:[%s9731_s0 + $0xc0] sm:$0xff]  }
 0x25a   :  { %9790 = vst [vmem:[#allocation55_spill] sm:$0xff] %v8474_v40  ;;  %6820 = vmatmul.mubr.msk.bf16.gmra.mrb[36].mxu0 %vm879_vm2, %v2700_v10  ;;  %7048 = vmatmul.mubr.msk.bf16.gmra.mrb[36].mxu1 %vm879_vm2, %v3838_v63  ;;  %v2709_v63 = vsel %vm2521_vm3, %v2699_v13, %v2708_v62  ;;  %v2713_v40 = vrot.slane %v2711_v58, 2  ;;  %v2720_v58 = vshrl.u32 %v8492_v2, 16 }
 0x25b   :  { %6823 = vmatprep.mubr.msk.bf16.mxu0 %vm7328_vm0, %v9744_v25  ;;  %7051 = vmatprep.mubr.msk.bf16.mxu1 %vm7328_vm0, %v9744_v25 }
 0x25c   :  { %v2717_v13 = vor.u32 %v2716_v46, %v2713_v40  ;;  %v2725_v40 = vrot.slane %v2723_v44, 3  ;;  %v2732_v44 = vshll.u32 %v8512_v42, 16 }
 0x25d   :  { %v1455_v54 = vpop.f32.mrb[188].mxu0  ;;  %v2065_v56 = vpop.f32.mrb[188].mxu1 }
 0x25e   :  { %v8485_v53 = vadd.f32 %v2065_v56, %v1455_v54  ;;  %v6481_v24 = vpop.f32.mrb[189].mxu0  ;;  %v6709_v0 = vpop.f32.mrb[189].mxu1 }
 0x25f   :  { %v1458_v26 = vpop.f32.mrb[190].mxu0  ;;  %v2068_v10 = vpop.f32.mrb[190].mxu1 }
 0x260   :  { %9791 = vst [vmem:[#allocation56_spill] sm:$0xff] %v8485_v53  ;;  %v8494_v4 = vadd.f32 %v2068_v10, %v1458_v26  ;;  %v6482_v49 = vpop.f32.mrb[191].mxu0  ;;  %v6710_v54 = vpop.f32.mrb[191].mxu1 }
 0x261   :  { %v3842_v54 = vsel %vm3799_vm4, %v3839_v29, %v3841_v30  ;;  %v3843_v29 = vrot.slane %v8492_v2, 3  ;;  %v8532_v2 = vld [vmem:[%s9731_s0 + $0xc8] sm:$0xff]  }
 0x262   :  { %9792 = vst [vmem:[#allocation57_spill] sm:$0xff] %v8494_v4  ;;  %6824 = vmatmul.mubr.msk.bf16.gmra.mrb[40].mxu0 %vm879_vm2, %v2709_v63  ;;  %7052 = vmatmul.mubr.msk.bf16.gmra.mrb[40].mxu1 %vm879_vm2, %v3840_v20  ;;  %v2718_v20 = vsel %vm2521_vm3, %v2708_v62, %v2717_v13  ;;  %v2722_v4 = vrot.slane %v2720_v58, 2  ;;  %v2729_v58 = vshrl.u32 %v8512_v42, 16 }
 0x263   :  { %6827 = vmatprep.mubr.msk.bf16.mxu0 %vm7328_vm0, %v9744_v25  ;;  %7055 = vmatprep.mubr.msk.bf16.mxu1 %vm7328_vm0, %v9744_v25 }
 0x264   :  { %v2726_v62 = vor.u32 %v2725_v40, %v2722_v4  ;;  %v2734_v4 = vrot.slane %v2732_v44, 3  ;;  %v2741_v44 = vshll.u32 %v8532_v2, 16 }
 0x265   :  { %v1463_v56 = vpop.f32.mrb[192].mxu0  ;;  %v2073_v49 = vpop.f32.mrb[192].mxu1 }
 0x266   :  { %v8505_v24 = vadd.f32 %v2073_v49, %v1463_v56  ;;  %v6485_v0 = vpop.f32.mrb[193].mxu0  ;;  %v6713_v26 = vpop.f32.mrb[193].mxu1 }
 0x267   :  { %v1466_v10 = vpop.f32.mrb[194].mxu0  ;;  %v2076_v63 = vpop.f32.mrb[194].mxu1 }
 0x268   :  { %9793 = vst [vmem:[#allocation58_spill] sm:$0xff] %v8505_v24  ;;  %v8514_v46 = vadd.f32 %v2076_v63, %v1466_v10  ;;  %v6486_v53 = vpop.f32.mrb[195].mxu0  ;;  %v6714_v56 = vpop.f32.mrb[195].mxu1 }
 0x269   :  { %v3844_v56 = vsel %vm3799_vm4, %v3841_v30, %v3843_v29  ;;  %v3845_v30 = vrot.slane %v8512_v42, 3  ;;  %v8552_v42 = vld [vmem:[%s9731_s0 + $0xd0] sm:$0xff]  }
 0x26a   :  { %9794 = vst [vmem:[#allocation59_spill] sm:$0xff] %v8514_v46  ;;  %6828 = vmatmul.mubr.msk.bf16.gmra.mrb[44].mxu0 %vm879_vm2, %v2718_v20  ;;  %7056 = vmatmul.mubr.msk.bf16.gmra.mrb[44].mxu1 %vm879_vm2, %v3842_v54  ;;  %v2727_v54 = vsel %vm2521_vm3, %v2717_v13, %v2726_v62  ;;  %v2731_v46 = vrot.slane %v2729_v58, 2  ;;  %v2738_v58 = vshrl.u32 %v8532_v2, 16 }
 0x26b   :  { %6831 = vmatprep.mubr.msk.bf16.mxu0 %vm7328_vm0, %v9744_v25  ;;  %7059 = vmatprep.mubr.msk.bf16.mxu1 %vm7328_vm0, %v9744_v25 }
 0x26c   :  { %v2735_v13 = vor.u32 %v2734_v4, %v2731_v46  ;;  %v2743_v46 = vrot.slane %v2741_v44, 3  ;;  %v2750_v44 = vshll.u32 %v8552_v42, 16 }
 0x26d   :  { %v1471_v49 = vpop.f32.mrb[196].mxu0  ;;  %v2081_v53 = vpop.f32.mrb[196].mxu1 }
 0x26e   :  { %v8525_v0 = vadd.f32 %v2081_v53, %v1471_v49  ;;  %v6489_v26 = vpop.f32.mrb[197].mxu0  ;;  %v6717_v10 = vpop.f32.mrb[197].mxu1 }
 0x26f   :  { %v1474_v63 = vpop.f32.mrb[198].mxu0  ;;  %v2084_v20 = vpop.f32.mrb[198].mxu1 }
 0x270   :  { %9795 = vst [vmem:[#allocation60_spill] sm:$0xff] %v8525_v0  ;;  %v8534_v40 = vadd.f32 %v2084_v20, %v1474_v63  ;;  %v6490_v24 = vpop.f32.mrb[199].mxu0  ;;  %v6718_v49 = vpop.f32.mrb[199].mxu1 }
 0x271   :  { %v3846_v49 = vsel %vm3799_vm4, %v3843_v29, %v3845_v30  ;;  %v3847_v29 = vrot.slane %v8532_v2, 3  ;;  %v8572_v2 = vld [vmem:[%s9731_s0 + $0xd8] sm:$0xff]  }
 0x272   :  { %9796 = vst [vmem:[#allocation61_spill] sm:$0xff] %v8534_v40  ;;  %6832 = vmatmul.mubr.msk.bf16.gmra.mrb[48].mxu0 %vm879_vm2, %v2727_v54  ;;  %7060 = vmatmul.mubr.msk.bf16.gmra.mrb[48].mxu1 %vm879_vm2, %v3844_v56  ;;  %v2736_v56 = vsel %vm2521_vm3, %v2726_v62, %v2735_v13  ;;  %v2740_v40 = vrot.slane %v2738_v58, 2  ;;  %v2747_v58 = vshrl.u32 %v8552_v42, 16 }
 0x273   :  { %6835 = vmatprep.mubr.msk.bf16.mxu0 %vm7328_vm0, %v9744_v25  ;;  %7063 = vmatprep.mubr.msk.bf16.mxu1 %vm7328_vm0, %v9744_v25 }
 0x274   :  { %v2744_v62 = vor.u32 %v2743_v46, %v2740_v40  ;;  %v2752_v40 = vrot.slane %v2750_v44, 3  ;;  %v2759_v44 = vshll.u32 %v8572_v2, 16 }
 0x275   :  { %v1479_v53 = vpop.f32.mrb[200].mxu0  ;;  %v2089_v24 = vpop.f32.mrb[200].mxu1 }
 0x276   :  { %v8545_v26 = vadd.f32 %v2089_v24, %v1479_v53  ;;  %v6493_v10 = vpop.f32.mrb[201].mxu0  ;;  %v6721_v63 = vpop.f32.mrb[201].mxu1 }
 0x277   :  { %v1482_v20 = vpop.f32.mrb[202].mxu0  ;;  %v2092_v54 = vpop.f32.mrb[202].mxu1 }
 0x278   :  { %9797 = vst [vmem:[#allocation62_spill] sm:$0xff] %v8545_v26  ;;  %v8554_v4 = vadd.f32 %v2092_v54, %v1482_v20  ;;  %v6494_v0 = vpop.f32.mrb[203].mxu0  ;;  %v6722_v53 = vpop.f32.mrb[203].mxu1 }
 0x279   :  { %v3848_v53 = vsel %vm3799_vm4, %v3845_v30, %v3847_v29  ;;  %v3849_v30 = vrot.slane %v8552_v42, 3  ;;  %v8592_v42 = vld [vmem:[%s9731_s0 + $0xe0] sm:$0xff]  }
 0x27a   :  { %9798 = vst [vmem:[#allocation63_spill] sm:$0xff] %v8554_v4  ;;  %6836 = vmatmul.mubr.msk.bf16.gmra.mrb[52].mxu0 %vm879_vm2, %v2736_v56  ;;  %7064 = vmatmul.mubr.msk.bf16.gmra.mrb[52].mxu1 %vm879_vm2, %v3846_v49  ;;  %v2745_v49 = vsel %vm2521_vm3, %v2735_v13, %v2744_v62  ;;  %v2749_v4 = vrot.slane %v2747_v58, 2  ;;  %v2756_v58 = vshrl.u32 %v8572_v2, 16 }
 0x27b   :  { %6839 = vmatprep.mubr.msk.bf16.mxu0 %vm7328_vm0, %v9744_v25  ;;  %7067 = vmatprep.mubr.msk.bf16.mxu1 %vm7328_vm0, %v9744_v25 }
 0x27c   :  { %v2753_v13 = vor.u32 %v2752_v40, %v2749_v4  ;;  %v2761_v4 = vrot.slane %v2759_v44, 3  ;;  %v2768_v44 = vshll.u32 %v8592_v42, 16 }
 0x27d   :  { %v1487_v24 = vpop.f32.mrb[204].mxu0  ;;  %v2097_v0 = vpop.f32.mrb[204].mxu1 }
 0x27e   :  { %v8565_v10 = vadd.f32 %v2097_v0, %v1487_v24  ;;  %v6497_v63 = vpop.f32.mrb[205].mxu0  ;;  %v6725_v20 = vpop.f32.mrb[205].mxu1 }
 0x27f   :  { %v1490_v54 = vpop.f32.mrb[206].mxu0  ;;  %v2100_v56 = vpop.f32.mrb[206].mxu1 }
 0x280   :  { %9799 = vst [vmem:[#allocation64_spill] sm:$0xff] %v8565_v10  ;;  %v8574_v46 = vadd.f32 %v2100_v56, %v1490_v54  ;;  %v6498_v26 = vpop.f32.mrb[207].mxu0  ;;  %v6726_v24 = vpop.f32.mrb[207].mxu1 }
 0x281   :  { %v3850_v24 = vsel %vm3799_vm4, %v3847_v29, %v3849_v30  ;;  %v3851_v29 = vrot.slane %v8572_v2, 3  ;;  %v8612_v2 = vld [vmem:[%s9731_s0 + $0xe8] sm:$0xff]  }
 0x282   :  { %9800 = vst [vmem:[#allocation65_spill] sm:$0xff] %v8574_v46  ;;  %6840 = vmatmul.mubr.msk.bf16.gmra.mrb[56].mxu0 %vm879_vm2, %v2745_v49  ;;  %7068 = vmatmul.mubr.msk.bf16.gmra.mrb[56].mxu1 %vm879_vm2, %v3848_v53  ;;  %v2754_v53 = vsel %vm2521_vm3, %v2744_v62, %v2753_v13  ;;  %v2758_v46 = vrot.slane %v2756_v58, 2  ;;  %v2765_v58 = vshrl.u32 %v8592_v42, 16 }
 0x283   :  { %6843 = vmatprep.mubr.msk.bf16.mxu0 %vm7328_vm0, %v9744_v25  ;;  %7071 = vmatprep.mubr.msk.bf16.mxu1 %vm7328_vm0, %v9744_v25 }
 0x284   :  { %v2762_v62 = vor.u32 %v2761_v4, %v2758_v46  ;;  %v2770_v46 = vrot.slane %v2768_v44, 3  ;;  %v2777_v44 = vshll.u32 %v8612_v2, 16 }
 0x285   :  { %v1495_v0 = vpop.f32.mrb[208].mxu0  ;;  %v2105_v26 = vpop.f32.mrb[208].mxu1 }
 0x286   :  { %v8585_v63 = vadd.f32 %v2105_v26, %v1495_v0  ;;  %v6501_v20 = vpop.f32.mrb[209].mxu0  ;;  %v6729_v54 = vpop.f32.mrb[209].mxu1 }
 0x287   :  { %v1498_v56 = vpop.f32.mrb[210].mxu0  ;;  %v2108_v49 = vpop.f32.mrb[210].mxu1 }
 0x288   :  { %9801 = vst [vmem:[#allocation66_spill] sm:$0xff] %v8585_v63  ;;  %v8594_v40 = vadd.f32 %v2108_v49, %v1498_v56  ;;  %v6502_v10 = vpop.f32.mrb[211].mxu0  ;;  %v6730_v0 = vpop.f32.mrb[211].mxu1 }
 0x289   :  { %v3852_v0 = vsel %vm3799_vm4, %v3849_v30, %v3851_v29  ;;  %v3853_v30 = vrot.slane %v8592_v42, 3  ;;  %v8632_v42 = vld [vmem:[%s9731_s0 + $0xf0] sm:$0xff]  }
 0x28a   :  { %9802 = vst [vmem:[#allocation67_spill] sm:$0xff] %v8594_v40  ;;  %6844 = vmatmul.mubr.msk.bf16.gmra.mrb[60].mxu0 %vm879_vm2, %v2754_v53  ;;  %7072 = vmatmul.mubr.msk.bf16.gmra.mrb[60].mxu1 %vm879_vm2, %v3850_v24  ;;  %v2763_v24 = vsel %vm2521_vm3, %v2753_v13, %v2762_v62  ;;  %v2767_v40 = vrot.slane %v2765_v58, 2  ;;  %v2774_v58 = vshrl.u32 %v8612_v2, 16 }
 0x28b   :  { %6847 = vmatprep.mubr.msk.bf16.mxu0 %vm7328_vm0, %v9744_v25  ;;  %7075 = vmatprep.mubr.msk.bf16.mxu1 %vm7328_vm0, %v9744_v25 }
 0x28c   :  { %v2771_v13 = vor.u32 %v2770_v46, %v2767_v40  ;;  %v2779_v40 = vrot.slane %v2777_v44, 3  ;;  %v2786_v44 = vshll.u32 %v8632_v42, 16 }
 0x28d   :  { %v1503_v26 = vpop.f32.mrb[212].mxu0  ;;  %v2113_v10 = vpop.f32.mrb[212].mxu1 }
 0x28e   :  { %v8605_v20 = vadd.f32 %v2113_v10, %v1503_v26  ;;  %v6505_v54 = vpop.f32.mrb[213].mxu0  ;;  %v6733_v56 = vpop.f32.mrb[213].mxu1 }
 0x28f   :  { %v1506_v49 = vpop.f32.mrb[214].mxu0  ;;  %v2116_v53 = vpop.f32.mrb[214].mxu1 }
 0x290   :  { %9803 = vst [vmem:[#allocation68_spill] sm:$0xff] %v8605_v20  ;;  %v8614_v4 = vadd.f32 %v2116_v53, %v1506_v49  ;;  %v6506_v63 = vpop.f32.mrb[215].mxu0  ;;  %v6734_v26 = vpop.f32.mrb[215].mxu1 }
 0x291   :  { %v3854_v26 = vsel %vm3799_vm4, %v3851_v29, %v3853_v30  ;;  %v3855_v29 = vrot.slane %v8612_v2, 3 }
 0x292   :  { %9804 = vst [vmem:[#allocation69_spill] sm:$0xff] %v8614_v4  ;;  %6848 = vmatmul.mubr.msk.bf16.gmra.mrb[64].mxu0 %vm879_vm2, %v2763_v24  ;;  %7076 = vmatmul.mubr.msk.bf16.gmra.mrb[64].mxu1 %vm879_vm2, %v3852_v0  ;;  %v2772_v0 = vsel %vm2521_vm3, %v2762_v62, %v2771_v13  ;;  %v2776_v4 = vrot.slane %v2774_v58, 2  ;;  %v2783_v58 = vshrl.u32 %v8632_v42, 16 }
 0x293   :  { %6851 = vmatprep.mubr.msk.bf16.mxu0 %vm7328_vm0, %v9744_v25  ;;  %7079 = vmatprep.mubr.msk.bf16.mxu1 %vm7328_vm0, %v9744_v25  ;;  %v3856_v2 = vsel %vm3799_vm4, %v3853_v30, %v3855_v29  ;;  %v3857_v30 = vrot.slane %v8632_v42, 3 }
 0x294   :  { %v2780_v62 = vor.u32 %v2779_v40, %v2776_v4  ;;  %v2788_v40 = vrot.slane %v2786_v44, 3 }
 0x295   :  { %v1511_v10 = vpop.f32.mrb[216].mxu0  ;;  %v2121_v63 = vpop.f32.mrb[216].mxu1 }
 0x296   :  { %v8625_v54 = vadd.f32 %v2121_v63, %v1511_v10  ;;  %v6509_v56 = vpop.f32.mrb[217].mxu0  ;;  %v6737_v49 = vpop.f32.mrb[217].mxu1  ;;  %v2781_v4 = vsel %vm2521_vm3, %v2771_v13, %v2780_v62 }
 0x297   :  { %v1514_v53 = vpop.f32.mrb[218].mxu0  ;;  %v2124_v24 = vpop.f32.mrb[218].mxu1  ;;  %v8647_v56 = vld [vmem:[%s9732_s2] ss:$0 sm:$0xff] }
 0x298   :  { %9805 = vst [vmem:[#allocation70_spill] sm:$0xff] %v8625_v54  ;;  %v6510_v46 = vpop.f32.mrb[219].mxu0  ;;  %v6738_v20 = vpop.f32.mrb[219].mxu1 }
 0x299   :  { %v8654_v46 = vld [vmem:[%s9731_s0 + $0xf8] sm:$0xff]  }
 0x29a   :  { %6852 = vmatmul.mubr.msk.bf16.gmra.mrb[68].mxu0 %vm879_vm2, %v2772_v0  ;;  %7080 = vmatmul.mubr.msk.bf16.gmra.mrb[68].mxu1 %vm879_vm2, %v3854_v26  ;;  %v2785_v26 = vrot.slane %v2783_v58, 2 }
 0x29b   :  { %6855 = vmatprep.mubr.msk.bf16.mxu0 %vm7328_vm0, %v9744_v25  ;;  %7083 = vmatprep.mubr.msk.bf16.mxu1 %vm7328_vm0, %v9744_v25 }
 0x29c   :  { %v2789_v13 = vor.u32 %v2788_v40, %v2785_v26  ;;  %v3858_v40 = vsel %vm3799_vm4, %v3855_v29, %v3857_v30 }
 0x29d   :  { %v3239_v10 = vpop.f32.mrb[220].mxu0  ;;  %v4132_v63 = vpop.f32.mrb[220].mxu1 }
 0x29e   :  { %v3677_v20 = vadd.f32 %v3239_v10, %v7696_v3  ;;  %v6749_v49 = vpop.f32.mrb[221].mxu0  ;;  %v6977_v53 = vpop.f32.mrb[221].mxu1  ;;  %v2790_v42 = vsel %vm2521_vm3, %v2780_v62, %v2789_v13 }
 0x29f   :  { %v3242_v24 = vpop.f32.mrb[222].mxu0  ;;  %v4135_v0 = vpop.f32.mrb[222].mxu1 }
 0x2a0   :  { %v4570_v3 = vadd.f32 %v4132_v63, %v3677_v20  ;;  %v3678_v10 = vadd.f32 %v3242_v24, %v7699_v11  ;;  %v6750_v54 = vpop.f32.mrb[223].mxu0  ;;  %v6978_v12 = vpop.f32.mrb[223].mxu1  ;;  %v2792_v11 = vshrl.u32 %v8654_v46, 16 }
 0x2a1   :  { %v2795_v12 = vshll.u32 %v8654_v46, 16 }
 0x2a2   :  { %v4686_v49 = vadd.f32 %v8647_v56, %v4570_v3  ;;  %v4571_v53 = vadd.f32 %v4135_v0, %v3678_v10  ;;  %6856 = vmatmul.mubr.msk.bf16.gmra.mrb[72].mxu0 %vm879_vm2, %v2781_v4  ;;  %7084 = vmatmul.mubr.msk.bf16.gmra.mrb[72].mxu1 %vm879_vm2, %v3856_v2  ;;  %v2794_v10 = vrot.slane %v2792_v11, 2 }
 0x2a3   :  { %6859 = vmatprep.mubr.msk.bf16.mxu0 %vm7328_vm0, %v9744_v25  ;;  %7087 = vmatprep.mubr.msk.bf16.mxu1 %vm7328_vm0, %v9744_v25  ;;  %v2797_v9 = vrot.slane %v2795_v12, 3  ;;  %v3859_v12 = vrot.slane %v8654_v46, 3 }
 0x2a4   :  { %v4795_v54 = vmax.f32 %v4686_v49, 0.0  ;;  %v4687_v58 = vadd.f32 %v8647_v56, %v4571_v53  ;;  %v8674_v49 = vld [vmem:[%s9731_s0 + $0x100] sm:$0xff]  }
 0x2a5   :  { %v3247_v44 = vpop.f32.mrb[224].mxu0  ;;  %v4140_v63 = vpop.f32.mrb[224].mxu1  ;;  %v3860_v46 = vsel %vm3799_vm4, %v3857_v30, %v3859_v12 }
 0x2a6   :  { %v5938_v20 = vpack.c.bf16 %v4795_v54, %v4795_v54  ;;  %v4796_v24 = vmax.f32 %v4687_v58, 0.0  ;;  %v3679_v0 = vadd.f32 %v3247_v44, %v7710_v19  ;;  %v6753_v4 = vpop.f32.mrb[225].mxu0  ;;  %v6981_v2 = vpop.f32.mrb[225].mxu1  ;;  %v2801_v44 = vshrl.u32 %v8674_v49, 16 }
 0x2a7   :  { %v3250_v3 = vpop.f32.mrb[226].mxu0  ;;  %v4143_v26 = vpop.f32.mrb[226].mxu1 }
 0x2a8   :  { %5342 = vst.msk [vmem:[%s9733_s3] sm:$0xf] %vm5341_vm5, %v5938_v20  ;;  %v5939_v19 = vpack.c.bf16 %v4796_v24, %v4796_v24  ;;  %v4572_v53 = vadd.f32 %v4140_v63, %v3679_v0  ;;  %v3680_v54 = vadd.f32 %v3250_v3, %v7713_v27  ;;  %v6754_v58 = vpop.f32.mrb[227].mxu0  ;;  %v6982_v62 = vpop.f32.mrb[227].mxu1  ;;  %v2798_v27 = vor.u32 %v2797_v9, %v2794_v10 }
 0x2a9   :  { %v2804_v63 = vshll.u32 %v8674_v49, 16  ;;  %v2803_v10 = vrot.slane %v2801_v44, 2  ;;  %v8702_v58 = vld [vmem:[%s9731_s0 + $0x108] sm:$0xff]  }
 0x2aa   :  { %5343 = vst.msk [vmem:[%s9733_s3 + $0x4] sm:$0xf] %vm5341_vm5, %v5939_v19  ;;  %v4688_v29 = vadd.f32 %v8647_v56, %v4572_v53  ;;  %v4573_v11 = vadd.f32 %v4143_v26, %v3680_v54  ;;  %6860 = vmatmul.mubr.msk.bf16.gmra.mrb[76].mxu0 %vm879_vm2, %v2790_v42  ;;  %7088 = vmatmul.mubr.msk.bf16.gmra.mrb[76].mxu1 %vm879_vm2, %v3858_v40 }
 0x2ab   :  { %6863 = vmatprep.mubr.msk.bf16.mxu0 %vm7328_vm0, %v9744_v25  ;;  %7091 = vmatprep.mubr.msk.bf16.mxu1 %vm7328_vm0, %v9744_v25  ;;  %v2799_v9 = vsel %vm2521_vm3, %v2789_v13, %v2798_v27  ;;  %v2806_v54 = vrot.slane %v2804_v63, 3  ;;  %v3861_v63 = vrot.slane %v8674_v49, 3 }
 0x2ac   :  { %v4797_v20 = vmax.f32 %v4688_v29, 0.0  ;;  %v4689_v24 = vadd.f32 %v8647_v56, %v4573_v11 }
 0x2ad   :  { %v3255_v0 = vpop.f32.mrb[228].mxu0  ;;  %v4148_v4 = vpop.f32.mrb[228].mxu1  ;;  %v3862_v49 = vsel %vm3799_vm4, %v3859_v12, %v3861_v63 }
 0x2ae   :  { %v5940_v2 = vpack.c.bf16 %v4797_v20, %v4797_v20  ;;  %v4798_v3 = vmax.f32 %v4689_v24, 0.0  ;;  %v3681_v26 = vadd.f32 %v3255_v0, %v7724_v35  ;;  %v6757_v42 = vpop.f32.mrb[229].mxu0  ;;  %v6985_v40 = vpop.f32.mrb[229].mxu1  ;;  %v2810_v20 = vshrl.u32 %v8702_v58, 16 }
 0x2af   :  { %v3258_v19 = vpop.f32.mrb[230].mxu0  ;;  %v4151_v53 = vpop.f32.mrb[230].mxu1  ;;  %v2813_v24 = vshll.u32 %v8702_v58, 16 }
 0x2b0   :  { %5344 = vst.msk [vmem:[%s9733_s3 + $0x8] sm:$0xf] %vm5341_vm5, %v5940_v2  ;;  %v5941_v35 = vpack.c.bf16 %v4798_v3, %v4798_v3  ;;  %v4574_v62 = vadd.f32 %v4148_v4, %v3681_v26  ;;  %v3682_v29 = vadd.f32 %v3258_v19, %v7727_v43  ;;  %v6758_v11 = vpop.f32.mrb[231].mxu0  ;;  %v6986_v13 = vpop.f32.mrb[231].mxu1  ;;  %v2807_v43 = vor.u32 %v2806_v54, %v2803_v10 }
 0x2b1   :  { %v2812_v54 = vrot.slane %v2810_v20, 2 }
 0x2b2   :  { %5345 = vst.msk [vmem:[%s9733_s3 + $0xc] sm:$0xf] %vm5341_vm5, %v5941_v35  ;;  %v4690_v30 = vadd.f32 %v8647_v56, %v4574_v62  ;;  %v4575_v44 = vadd.f32 %v4151_v53, %v3682_v29  ;;  %6864 = vmatmul.mubr.msk.bf16.gmra.mrb[80].mxu0 %vm879_vm2, %v2799_v9  ;;  %7092 = vmatmul.mubr.msk.bf16.gmra.mrb[80].mxu1 %vm879_vm2, %v3860_v46  ;;  %v2815_v35 = vrot.slane %v2813_v24, 3  ;;  %v8730_v62 = vld [vmem:[%s9731_s0 + $0x110] sm:$0xff]  }
 0x2b3   :  { %6867 = vmatprep.mubr.msk.bf16.mxu0 %vm7328_vm0, %v9744_v25  ;;  %7095 = vmatprep.mubr.msk.bf16.mxu1 %vm7328_vm0, %v9744_v25  ;;  %v2808_v10 = vsel %vm2521_vm3, %v2798_v27, %v2807_v43  ;;  %v2819_v20 = vshrl.u32 %v8730_v62, 16  ;;  %v2822_v24 = vshll.u32 %v8730_v62, 16 }
 0x2b4   :  { %v4799_v0 = vmax.f32 %v4690_v30, 0.0  ;;  %v4691_v4 = vadd.f32 %v8647_v56, %v4575_v44  ;;  %v3863_v44 = vrot.slane %v8702_v58, 3 }
 0x2b5   :  { %v3263_v2 = vpop.f32.mrb[232].mxu0  ;;  %v4156_v3 = vpop.f32.mrb[232].mxu1 }
 0x2b6   :  { %v5942_v26 = vpack.c.bf16 %v4799_v0, %v4799_v0  ;;  %v4800_v42 = vmax.f32 %v4691_v4, 0.0  ;;  %v3683_v40 = vadd.f32 %v3263_v2, %v7738_v51  ;;  %v6761_v19 = vpop.f32.mrb[233].mxu0  ;;  %v6989_v53 = vpop.f32.mrb[233].mxu1  ;;  %v3864_v58 = vsel %vm3799_vm4, %v3861_v63, %v3863_v44 }
 0x2b7   :  { %v3266_v9 = vpop.f32.mrb[234].mxu0  ;;  %v4159_v46 = vpop.f32.mrb[234].mxu1 }
 0x2b8   :  { %5346 = vst.msk [vmem:[%s9733_s3 + $0x10] sm:$0xf] %vm5341_vm5, %v5942_v26  ;;  %v5943_v51 = vpack.c.bf16 %v4800_v42, %v4800_v42  ;;  %v4576_v29 = vadd.f32 %v4156_v3, %v3683_v40  ;;  %v3684_v11 = vadd.f32 %v3266_v9, %v7741_v59  ;;  %v6762_v13 = vpop.f32.mrb[235].mxu0  ;;  %v6990_v27 = vpop.f32.mrb[235].mxu1  ;;  %v2816_v59 = vor.u32 %v2815_v35, %v2812_v54  ;;  %v8758_v35 = vld [vmem:[%s9731_s0 + $0x118] sm:$0xff]  }
 0x2b9   :  { %v2824_v54 = vrot.slane %v2822_v24, 3  ;;  %v3865_v27 = vrot.slane %v8730_v62, 3 }
 0x2ba   :  { %5347 = vst.msk [vmem:[%s9733_s3 + $0x14] sm:$0xf] %vm5341_vm5, %v5943_v51  ;;  %v4692_v12 = vadd.f32 %v8647_v56, %v4576_v29  ;;  %v4577_v30 = vadd.f32 %v4159_v46, %v3684_v11  ;;  %6868 = vmatmul.mubr.msk.bf16.gmra.mrb[84].mxu0 %vm879_vm2, %v2808_v10  ;;  %7096 = vmatmul.mubr.msk.bf16.gmra.mrb[84].mxu1 %vm879_vm2, %v3862_v49  ;;  %v2821_v49 = vrot.slane %v2819_v20, 2 }
 0x2bb   :  { %6871 = vmatprep.mubr.msk.bf16.mxu0 %vm7328_vm0, %v9744_v25  ;;  %7099 = vmatprep.mubr.msk.bf16.mxu1 %vm7328_vm0, %v9744_v25  ;;  %v2817_v10 = vsel %vm2521_vm3, %v2807_v43, %v2816_v59  ;;  %v3866_v62 = vsel %vm3799_vm4, %v3863_v44, %v3865_v27 }
 0x2bc   :  { %v4801_v0 = vmax.f32 %v4692_v12, 0.0  ;;  %v4693_v4 = vadd.f32 %v8647_v56, %v4577_v30  ;;  %v2828_v12 = vshrl.u32 %v8758_v35, 16  ;;  %v2831_v30 = vshll.u32 %v8758_v35, 16 }
 0x2bd   :  { %v3271_v2 = vpop.f32.mrb[236].mxu0  ;;  %v4164_v3 = vpop.f32.mrb[236].mxu1 }
 0x2be   :  { %v5944_v26 = vpack.c.bf16 %v4801_v0, %v4801_v0  ;;  %v4802_v42 = vmax.f32 %v4693_v4, 0.0  ;;  %v3685_v40 = vadd.f32 %v3271_v2, %v7752_v5  ;;  %v6765_v19 = vpop.f32.mrb[237].mxu0  ;;  %v6993_v53 = vpop.f32.mrb[237].mxu1 }
 0x2bf   :  { %v3274_v9 = vpop.f32.mrb[238].mxu0  ;;  %v4167_v46 = vpop.f32.mrb[238].mxu1 }
 0x2c0   :  { %5348 = vst.msk [vmem:[%s9733_s3 + $0x18] sm:$0xf] %vm5341_vm5, %v5944_v26  ;;  %v5945_v5 = vpack.c.bf16 %v4802_v42, %v4802_v42  ;;  %v4578_v51 = vadd.f32 %v4164_v3, %v3685_v40  ;;  %v3686_v29 = vadd.f32 %v3274_v9, %v7755_v14  ;;  %v6766_v11 = vpop.f32.mrb[239].mxu0  ;;  %v6994_v43 = vpop.f32.mrb[239].mxu1  ;;  %v2825_v14 = vor.u32 %v2824_v54, %v2821_v49 }
 0x2c2   :  { %5349 = vst.msk [vmem:[%s9733_s3 + $0x1c] sm:$0xf] %vm5341_vm5, %v5945_v5  ;;  %v4694_v63 = vadd.f32 %v8647_v56, %v4578_v51  ;;  %v4579_v13 = vadd.f32 %v4167_v46, %v3686_v29  ;;  %6872 = vmatmul.mubr.msk.bf16.gmra.mrb[88].mxu0 %vm879_vm2, %v2817_v10  ;;  %7100 = vmatmul.mubr.msk.bf16.gmra.mrb[88].mxu1 %vm879_vm2, %v3864_v58  ;;  %v2830_v46 = vrot.slane %v2828_v12, 2  ;;  %v2833_v10 = vrot.slane %v2831_v30, 3  ;;  %v8786_v58 = vld [vmem:[%s9731_s0 + $0x120] sm:$0xff]  }
 0x2c3   :  { %6875 = vmatprep.mubr.msk.bf16.mxu0 %vm7328_vm0, %v9744_v25  ;;  %7103 = vmatprep.mubr.msk.bf16.mxu1 %vm7328_vm0, %v9744_v25  ;;  %v2826_v9 = vsel %vm2521_vm3, %v2816_v59, %v2825_v14  ;;  %v3867_v29 = vrot.slane %v8758_v35, 3  ;;  %v2837_v11 = vshrl.u32 %v8786_v58, 16  ;;  %v2840_v43 = vshll.u32 %v8786_v58, 16 }
 0x2c4   :  { %v4803_v20 = vmax.f32 %v4694_v63, 0.0  ;;  %v4695_v24 = vadd.f32 %v8647_v56, %v4579_v13 }
 0x2c5   :  { %v3279_v0 = vpop.f32.mrb[240].mxu0  ;;  %v4172_v4 = vpop.f32.mrb[240].mxu1  ;;  %v3868_v35 = vsel %vm3799_vm4, %v3865_v27, %v3867_v29 }
 0x2c6   :  { %v5946_v2 = vpack.c.bf16 %v4803_v20, %v4803_v20  ;;  %v4804_v3 = vmax.f32 %v4695_v24, 0.0  ;;  %v3687_v26 = vadd.f32 %v3279_v0, %v7766_v23  ;;  %v6769_v42 = vpop.f32.mrb[241].mxu0  ;;  %v6997_v40 = vpop.f32.mrb[241].mxu1 }
 0x2c7   :  { %v3282_v19 = vpop.f32.mrb[242].mxu0  ;;  %v4175_v53 = vpop.f32.mrb[242].mxu1  ;;  %v2839_v40 = vrot.slane %v2837_v11, 2 }
 0x2c8   :  { %5350 = vst.msk [vmem:[%s9733_s3 + $0x20] sm:$0xf] %vm5341_vm5, %v5946_v2  ;;  %v5947_v23 = vpack.c.bf16 %v4804_v3, %v4804_v3  ;;  %v4580_v49 = vadd.f32 %v4172_v4, %v3687_v26  ;;  %v3688_v54 = vadd.f32 %v3282_v19, %v7769_v32  ;;  %v6770_v5 = vpop.f32.mrb[243].mxu0  ;;  %v6998_v59 = vpop.f32.mrb[243].mxu1  ;;  %v2834_v32 = vor.u32 %v2833_v10, %v2830_v46 }
 0x2c9   :  { %v2842_v19 = vrot.slane %v2840_v43, 3 }
 0x2ca   :  { %5351 = vst.msk [vmem:[%s9733_s3 + $0x24] sm:$0xf] %vm5341_vm5, %v5947_v23  ;;  %v4696_v44 = vadd.f32 %v8647_v56, %v4580_v49  ;;  %v4581_v51 = vadd.f32 %v4175_v53, %v3688_v54  ;;  %6876 = vmatmul.mubr.msk.bf16.gmra.mrb[92].mxu0 %vm879_vm2, %v2826_v9  ;;  %7104 = vmatmul.mubr.msk.bf16.gmra.mrb[92].mxu1 %vm879_vm2, %v3866_v62  ;;  %v8814_v53 = vld [vmem:[%s9731_s0 + $0x128] sm:$0xff]   ;;  %v3869_v23 = vrot.slane %v8786_v58, 3 }
 0x2cb   :  { %6879 = vmatprep.mubr.msk.bf16.mxu0 %vm7328_vm0, %v9744_v25  ;;  %7107 = vmatprep.mubr.msk.bf16.mxu1 %vm7328_vm0, %v9744_v25  ;;  %v2835_v42 = vsel %vm2521_vm3, %v2825_v14, %v2834_v32  ;;  %v2846_v49 = vshrl.u32 %v8814_v53, 16  ;;  %v2849_v54 = vshll.u32 %v8814_v53, 16 }
 0x2cc   :  { %v4805_v63 = vmax.f32 %v4696_v44, 0.0  ;;  %v4697_v13 = vadd.f32 %v8647_v56, %v4581_v51  ;;  %v3870_v58 = vsel %vm3799_vm4, %v3867_v29, %v3869_v23 }
 0x2cd   :  { %v3287_v12 = vpop.f32.mrb[244].mxu0  ;;  %v4180_v30 = vpop.f32.mrb[244].mxu1 }
 0x2ce   :  { %v5948_v20 = vpack.c.bf16 %v4805_v63, %v4805_v63  ;;  %v4806_v24 = vmax.f32 %v4697_v13, 0.0  ;;  %v3689_v0 = vadd.f32 %v3287_v12, %v7780_v41  ;;  %v6773_v4 = vpop.f32.mrb[245].mxu0  ;;  %v7001_v2 = vpop.f32.mrb[245].mxu1 }
 0x2cf   :  { %v3290_v3 = vpop.f32.mrb[246].mxu0  ;;  %v4183_v26 = vpop.f32.mrb[246].mxu1  ;;  %v2851_v4 = vrot.slane %v2849_v54, 3  ;;  %v8842_v2 = vld [vmem:[%s9731_s0 + $0x130] sm:$0xff]  }
 0x2d0   :  { %5352 = vst.msk [vmem:[%s9733_s3 + $0x28] sm:$0xf] %vm5341_vm5, %v5948_v20  ;;  %v5949_v41 = vpack.c.bf16 %v4806_v24, %v4806_v24  ;;  %v4582_v9 = vadd.f32 %v4180_v30, %v3689_v0  ;;  %v3690_v62 = vadd.f32 %v3290_v3, %v7783_v50  ;;  %v6774_v46 = vpop.f32.mrb[247].mxu0  ;;  %v7002_v14 = vpop.f32.mrb[247].mxu1  ;;  %v2843_v50 = vor.u32 %v2842_v19, %v2839_v40 }
 0x2d1   :  { %v2848_v0 = vrot.slane %v2846_v49, 2  ;;  %v3871_v40 = vrot.slane %v8814_v53, 3  ;;  %v2855_v19 = vshrl.u32 %v8842_v2, 16 }
 0x2d2   :  { %5353 = vst.msk [vmem:[%s9733_s3 + $0x2c] sm:$0xf] %vm5341_vm5, %v5949_v41  ;;  %v4698_v27 = vadd.f32 %v8647_v56, %v4582_v9  ;;  %v4583_v10 = vadd.f32 %v4183_v26, %v3690_v62  ;;  %6880 = vmatmul.mubr.msk.bf16.gmra.mrb[96].mxu0 %vm879_vm2, %v2835_v42  ;;  %7108 = vmatmul.mubr.msk.bf16.gmra.mrb[96].mxu1 %vm879_vm2, %v3868_v35  ;;  %v2858_v41 = vshll.u32 %v8842_v2, 16 }
 0x2d3   :  { %6883 = vmatprep.mubr.msk.bf16.mxu0 %vm7328_vm0, %v9744_v25  ;;  %7111 = vmatprep.mubr.msk.bf16.mxu1 %vm7328_vm0, %v9744_v25  ;;  %v2844_v24 = vsel %vm2521_vm3, %v2834_v32, %v2843_v50  ;;  %v3872_v53 = vsel %vm3799_vm4, %v3869_v23, %v3871_v40 }
 0x2d4   :  { %v4807_v5 = vmax.f32 %v4698_v27, 0.0  ;;  %v4699_v59 = vadd.f32 %v8647_v56, %v4583_v10 }
 0x2d5   :  { %v3295_v44 = vpop.f32.mrb[248].mxu0  ;;  %v4188_v51 = vpop.f32.mrb[248].mxu1 }
 0x2d6   :  { %v5950_v11 = vpack.c.bf16 %v4807_v5, %v4807_v5  ;;  %v4808_v43 = vmax.f32 %v4699_v59, 0.0  ;;  %v3691_v63 = vadd.f32 %v3295_v44, %v7794_v60  ;;  %v6777_v13 = vpop.f32.mrb[249].mxu0  ;;  %v7005_v12 = vpop.f32.mrb[249].mxu1 }
 0x2d7   :  { %v3298_v30 = vpop.f32.mrb[250].mxu0  ;;  %v4191_v20 = vpop.f32.mrb[250].mxu1 }
 0x2d8   :  { %5354 = vst.msk [vmem:[%s9733_s3 + $0x30] sm:$0xf] %vm5341_vm5, %v5950_v11  ;;  %v5951_v60 = vpack.c.bf16 %v4808_v43, %v4808_v43  ;;  %v4584_v3 = vadd.f32 %v4188_v51, %v3691_v63  ;;  %v3692_v26 = vadd.f32 %v3298_v30, %v7797_v7  ;;  %v6778_v42 = vpop.f32.mrb[251].mxu0  ;;  %v7006_v32 = vpop.f32.mrb[251].mxu1  ;;  %v2852_v7 = vor.u32 %v2851_v4, %v2848_v0  ;;  %v8870_v63 = vld [vmem:[%s9731_s0 + $0x138] sm:$0xff]  }
 0x2d9   :  { %v2857_v11 = vrot.slane %v2855_v19, 2  ;;  %v2860_v43 = vrot.slane %v2858_v41, 3  ;;  %v2867_v0 = vshll.u32 %v8870_v63, 16 }
 0x2da   :  { %5355 = vst.msk [vmem:[%s9733_s3 + $0x34] sm:$0xf] %vm5341_vm5, %v5951_v60  ;;  %v4700_v29 = vadd.f32 %v8647_v56, %v4584_v3  ;;  %v4585_v35 = vadd.f32 %v4191_v20, %v3692_v26  ;;  %6884 = vmatmul.mubr.msk.bf16.gmra.mrb[100].mxu0 %vm879_vm2, %v2844_v24  ;;  %7112 = vmatmul.mubr.msk.bf16.gmra.mrb[100].mxu1 %vm879_vm2, %v3870_v58  ;;  %v3873_v24 = vrot.slane %v8842_v2, 3  ;;  %v2864_v58 = vshrl.u32 %v8870_v63, 16 }
 0x2db   :  { %6887 = vmatprep.mubr.msk.bf16.mxu0 %vm7328_vm0, %v9744_v25  ;;  %7115 = vmatprep.mubr.msk.bf16.mxu1 %vm7328_vm0, %v9744_v25  ;;  %v2853_v51 = vsel %vm2521_vm3, %v2843_v50, %v2852_v7 }
 0x2dc   :  { %v4809_v9 = vmax.f32 %v4700_v29, 0.0  ;;  %v4701_v62 = vadd.f32 %v8647_v56, %v4585_v35  ;;  %v3874_v2 = vsel %vm3799_vm4, %v3871_v40, %v3873_v24 }
 0x2dd   :  { %v3303_v46 = vpop.f32.mrb[252].mxu0  ;;  %v4196_v14 = vpop.f32.mrb[252].mxu1 }
 0x2de   :  { %v5952_v27 = vpack.c.bf16 %v4809_v9, %v4809_v9  ;;  %v4810_v10 = vmax.f32 %v4701_v62, 0.0  ;;  %v3693_v49 = vadd.f32 %v3303_v46, %v7808_v18  ;;  %v6781_v54 = vpop.f32.mrb[253].mxu0  ;;  %v7009_v5 = vpop.f32.mrb[253].mxu1  ;;  %v2866_v46 = vrot.slane %v2864_v58, 2 }
 0x2df   :  { %v3306_v59 = vpop.f32.mrb[254].mxu0  ;;  %v4199_v44 = vpop.f32.mrb[254].mxu1 }
 0x2e0   :  { %5356 = vst.msk [vmem:[%s9733_s3 + $0x38] sm:$0xf] %vm5341_vm5, %v5952_v27  ;;  %v5953_v18 = vpack.c.bf16 %v4810_v10, %v4810_v10  ;;  %v4586_v13 = vadd.f32 %v4196_v14, %v3693_v49  ;;  %v3694_v12 = vadd.f32 %v3306_v59, %v7811_v28  ;;  %v6782_v30 = vpop.f32.mrb[255].mxu0  ;;  %v7010_v50 = vpop.f32.mrb[255].mxu1  ;;  %v2861_v28 = vor.u32 %v2860_v43, %v2857_v11  ;;  %v8898_v27 = vld [vmem:[%s9731_s0 + $0x140] sm:$0xff]  }
 0x2e1   :  { %v2869_v14 = vrot.slane %v2867_v0, 3  ;;  %v3875_v59 = vrot.slane %v8870_v63, 3 }
 0x2e2   :  { %5357 = vst.msk [vmem:[%s9733_s3 + $0x3c] sm:$0xf] %vm5341_vm5, %v5953_v18  ;;  %v4702_v23 = vadd.f32 %v8647_v56, %v4586_v13  ;;  %v4587_v20 = vadd.f32 %v4199_v44, %v3694_v12  ;;  %6888 = vmatmul.mubr.msk.bf16.gmra.mrb[104].mxu0 %vm879_vm2, %v2853_v51  ;;  %7116 = vmatmul.mubr.msk.bf16.gmra.mrb[104].mxu1 %vm879_vm2, %v3872_v53  ;;  %v2873_v44 = vshrl.u32 %v8898_v27, 16  ;;  %v2876_v51 = vshll.u32 %v8898_v27, 16 }
 0x2e3   :  { %6891 = vmatprep.mubr.msk.bf16.mxu0 %vm7328_vm0, %v9744_v25  ;;  %7119 = vmatprep.mubr.msk.bf16.mxu1 %vm7328_vm0, %v9744_v25  ;;  %v2862_v62 = vsel %vm2521_vm3, %v2852_v7, %v2861_v28  ;;  %v3876_v63 = vsel %vm3799_vm4, %v3873_v24, %v3875_v59 }
 0x2e4   :  { %v4811_v4 = vmax.f32 %v4702_v23, 0.0  ;;  %v4703_v60 = vadd.f32 %v8647_v56, %v4587_v20 }
 0x2e5   :  { %v3311_v3 = vpop.f32.mrb[0].mxu0  ;;  %v4204_v26 = vpop.f32.mrb[0].mxu1 }
 0x2e6   :  { %v5954_v42 = vpack.c.bf16 %v4811_v4, %v4811_v4  ;;  %v4812_v32 = vmax.f32 %v4703_v60, 0.0  ;;  %v3695_v29 = vadd.f32 %v3311_v3, %v7822_v39  ;;  %v6785_v35 = vpop.f32.mrb[1].mxu0  ;;  %v7013_v19 = vpop.f32.mrb[1].mxu1  ;;  %v2875_v4 = vrot.slane %v2873_v44, 2  ;;  %v8926_v3 = vld [vmem:[%s9731_s0 + $0x148] sm:$0xff]  }
 0x2e7   :  { %v3314_v41 = vpop.f32.mrb[2].mxu0  ;;  %v4207_v9 = vpop.f32.mrb[2].mxu1  ;;  %v2878_v60 = vrot.slane %v2876_v51, 3  ;;  %v3877_v35 = vrot.slane %v8898_v27, 3  ;;  %v2882_v19 = vshrl.u32 %v8926_v3, 16 }
 0x2e8   :  { %5358 = vst.msk [vmem:[%s9733_s3 + $0x40] sm:$0xf] %vm5341_vm5, %v5954_v42  ;;  %v5955_v39 = vpack.c.bf16 %v4812_v32, %v4812_v32  ;;  %v4588_v10 = vadd.f32 %v4204_v26, %v3695_v29  ;;  %v3696_v49 = vadd.f32 %v3314_v41, %v7825_v48  ;;  %v6786_v54 = vpop.f32.mrb[3].mxu0  ;;  %v7014_v7 = vpop.f32.mrb[3].mxu1  ;;  %v2870_v48 = vor.u32 %v2869_v14, %v2866_v46 }
 0x2e9   :  { %v2885_v41 = vshll.u32 %v8926_v3, 16  ;;  %v3878_v27 = vsel %vm3799_vm4, %v3875_v59, %v3877_v35  ;;  %v2884_v44 = vrot.slane %v2882_v19, 2  ;;  %v8982_v19 = vld [vmem:[%s9731_s0 + $0x158] sm:$0xff]  }
 0x2ea   :  { %5359 = vst.msk [vmem:[%s9733_s3 + $0x44] sm:$0xf] %vm5341_vm5, %v5955_v39  ;;  %v4704_v40 = vadd.f32 %v8647_v56, %v4588_v10  ;;  %v4589_v5 = vadd.f32 %v4207_v9, %v3696_v49  ;;  %6892 = vmatmul.mubr.msk.bf16.gmra.mrb[108].mxu0 %vm879_vm2, %v2862_v62  ;;  %7120 = vmatmul.mubr.msk.bf16.gmra.mrb[108].mxu1 %vm879_vm2, %v3874_v2 }
 0x2eb   :  { %6895 = vmatprep.mubr.msk.bf16.mxu0 %vm7328_vm0, %v9744_v25  ;;  %7123 = vmatprep.mubr.msk.bf16.mxu1 %vm7328_vm0, %v9744_v25  ;;  %v2871_v0 = vsel %vm2521_vm3, %v2861_v28, %v2870_v48  ;;  %v2887_v51 = vrot.slane %v2885_v41, 3 }
 0x2ec   :  { %v4813_v53 = vmax.f32 %v4704_v40, 0.0  ;;  %v4705_v11 = vadd.f32 %v8647_v56, %v4589_v5 }
 0x2ed   :  { %v3319_v43 = vpop.f32.mrb[4].mxu0  ;;  %v4212_v18 = vpop.f32.mrb[4].mxu1 }
 0x2ee   :  { %v5956_v13 = vpack.c.bf16 %v4813_v53, %v4813_v53  ;;  %v4814_v12 = vmax.f32 %v4705_v11, 0.0  ;;  %v3697_v30 = vadd.f32 %v3319_v43, %v7836_v61  ;;  %v6789_v50 = vpop.f32.mrb[5].mxu0  ;;  %v7017_v23 = vpop.f32.mrb[5].mxu1  ;;  %v8954_v53 = vld [vmem:[%s9731_s0 + $0x150] sm:$0xff]  }
 0x2ef   :  { %v3322_v20 = vpop.f32.mrb[6].mxu0  ;;  %v4215_v58 = vpop.f32.mrb[6].mxu1  ;;  %v2894_v50 = vshll.u32 %v8954_v53, 16 }
 0x2f0   :  { %5360 = vst.msk [vmem:[%s9733_s3 + $0x48] sm:$0xf] %vm5341_vm5, %v5956_v13  ;;  %v5957_v61 = vpack.c.bf16 %v4814_v12, %v4814_v12  ;;  %v4590_v26 = vadd.f32 %v4212_v18, %v3697_v30  ;;  %v3698_v42 = vadd.f32 %v3322_v20, %v7839_v8  ;;  %v6790_v32 = vpop.f32.mrb[7].mxu0  ;;  %v7018_v28 = vpop.f32.mrb[7].mxu1  ;;  %v2879_v8 = vor.u32 %v2878_v60, %v2875_v4 }
 0x2f1   :  { %v3879_v12 = vrot.slane %v8926_v3, 3  ;;  %v2891_v30 = vshrl.u32 %v8954_v53, 16 }
 0x2f2   :  { %5361 = vst.msk [vmem:[%s9733_s3 + $0x4c] sm:$0xf] %vm5341_vm5, %v5957_v61  ;;  %v4706_v24 = vadd.f32 %v8647_v56, %v4590_v26  ;;  %v4591_v29 = vadd.f32 %v4215_v58, %v3698_v42  ;;  %6896 = vmatmul.mubr.msk.bf16.gmra.mrb[112].mxu0 %vm879_vm2, %v2871_v0  ;;  %7124 = vmatmul.mubr.msk.bf16.gmra.mrb[112].mxu1 %vm879_vm2, %v3876_v63 }
 0x2f3   :  { %6899 = vmatprep.mubr.msk.bf16.mxu0 %vm7328_vm0, %v9744_v25  ;;  %7127 = vmatprep.mubr.msk.bf16.mxu1 %vm7328_vm0, %v9744_v25  ;;  %v2880_v5 = vsel %vm2521_vm3, %v2870_v48, %v2879_v8  ;;  %v3880_v3 = vsel %vm3799_vm4, %v3877_v35, %v3879_v12 }
 0x2f4   :  { %v4815_v9 = vmax.f32 %v4706_v24, 0.0  ;;  %v4707_v62 = vadd.f32 %v8647_v56, %v4591_v29  ;;  %v2893_v24 = vrot.slane %v2891_v30, 2  ;;  %v2896_v29 = vrot.slane %v2894_v50, 3 }
 0x2f5   :  { %v3327_v2 = vpop.f32.mrb[8].mxu0  ;;  %v4220_v46 = vpop.f32.mrb[8].mxu1 }
 0x2f6   :  { %v5958_v14 = vpack.c.bf16 %v4815_v9, %v4815_v9  ;;  %v4816_v39 = vmax.f32 %v4707_v62, 0.0  ;;  %v3699_v10 = vadd.f32 %v3327_v2, %v7850_v21  ;;  %v6793_v49 = vpop.f32.mrb[9].mxu0  ;;  %v7021_v54 = vpop.f32.mrb[9].mxu1 }
 0x2f7   :  { %v3330_v7 = vpop.f32.mrb[10].mxu0  ;;  %v4223_v40 = vpop.f32.mrb[10].mxu1 }
 0x2f8   :  { %5362 = vst.msk [vmem:[%s9733_s3 + $0x50] sm:$0xf] %vm5341_vm5, %v5958_v14  ;;  %v5959_v21 = vpack.c.bf16 %v4816_v39, %v4816_v39  ;;  %v4592_v11 = vadd.f32 %v4220_v46, %v3699_v10  ;;  %v3700_v43 = vadd.f32 %v3330_v7, %v7853_v33  ;;  %v6794_v18 = vpop.f32.mrb[11].mxu0  ;;  %v7022_v48 = vpop.f32.mrb[11].mxu1  ;;  %v2888_v33 = vor.u32 %v2887_v51, %v2884_v44 }
 0x2f9   :  { %v3881_v46 = vrot.slane %v8954_v53, 3  ;;  %v2900_v14 = vshrl.u32 %v8982_v19, 16  ;;  %v2903_v39 = vshll.u32 %v8982_v19, 16 }
 0x2fa   :  { %5363 = vst.msk [vmem:[%s9733_s3 + $0x54] sm:$0xf] %vm5341_vm5, %v5959_v21  ;;  %v4708_v59 = vadd.f32 %v8647_v56, %v4592_v11  ;;  %v4593_v13 = vadd.f32 %v4223_v40, %v3700_v43  ;;  %6900 = vmatmul.mubr.msk.bf16.gmra.mrb[116].mxu0 %vm879_vm2, %v2880_v5  ;;  %7128 = vmatmul.mubr.msk.bf16.gmra.mrb[116].mxu1 %vm879_vm2, %v3878_v27 }
 0x2fb   :  { %6903 = vmatprep.mubr.msk.bf16.mxu0 %vm7328_vm0, %v9744_v25  ;;  %7131 = vmatprep.mubr.msk.bf16.mxu1 %vm7328_vm0, %v9744_v25  ;;  %v2889_v28 = vsel %vm2521_vm3, %v2879_v8, %v2888_v33  ;;  %v3882_v53 = vsel %vm3799_vm4, %v3879_v12, %v3881_v46  ;;  %v2902_v18 = vrot.slane %v2900_v14, 2  ;;  %v2905_v48 = vrot.slane %v2903_v39, 3 }
 0x2fc   :  { %v4817_v23 = vmax.f32 %v4708_v59, 0.0  ;;  %v4709_v20 = vadd.f32 %v8647_v56, %v4593_v13  ;;  %v9010_v59 = vld [vmem:[%s9731_s0 + $0x160] sm:$0xff]  }
 0x2fd   :  { %v3335_v58 = vpop.f32.mrb[12].mxu0  ;;  %v4228_v0 = vpop.f32.mrb[12].mxu1  ;;  %v3885_v39 = vrot.slane %v9010_v59, 3 }
 0x2fe   :  { %v5960_v63 = vpack.c.bf16 %v4817_v23, %v4817_v23  ;;  %v4818_v4 = vmax.f32 %v4709_v20, 0.0  ;;  %v3701_v60 = vadd.f32 %v3335_v58, %v7864_v45  ;;  %v6797_v61 = vpop.f32.mrb[13].mxu0  ;;  %v7025_v26 = vpop.f32.mrb[13].mxu1  ;;  %v3883_v20 = vrot.slane %v8982_v19, 3 }
 0x2ff   :  { %v3338_v42 = vpop.f32.mrb[14].mxu0  ;;  %v4231_v32 = vpop.f32.mrb[14].mxu1  ;;  %v2909_v58 = vshrl.u32 %v9010_v59, 16 }
 0x300   :  { %5364 = vst.msk [vmem:[%s9733_s3 + $0x58] sm:$0xf] %vm5341_vm5, %v5960_v63  ;;  %v5961_v45 = vpack.c.bf16 %v4818_v4, %v4818_v4  ;;  %v4594_v41 = vadd.f32 %v4228_v0, %v3701_v60  ;;  %v3702_v9 = vadd.f32 %v3338_v42, %v7867_v57  ;;  %v6798_v62 = vpop.f32.mrb[15].mxu0  ;;  %v7026_v8 = vpop.f32.mrb[15].mxu1  ;;  %v2897_v57 = vor.u32 %v2896_v29, %v2893_v24 }
 0x301   :  { %v2912_v0 = vshll.u32 %v9010_v59, 16  ;;  %v3884_v19 = vsel %vm3799_vm4, %v3881_v46, %v3883_v20  ;;  %v9038_v62 = vld [vmem:[%s9731_s0 + $0x168] sm:$0xff]  }
 0x302   :  { %5365 = vst.msk [vmem:[%s9733_s3 + $0x5c] sm:$0xf] %vm5341_vm5, %v5961_v45  ;;  %v4710_v35 = vadd.f32 %v8647_v56, %v4594_v41  ;;  %v4595_v2 = vadd.f32 %v4231_v32, %v3702_v9  ;;  %6904 = vmatmul.mubr.msk.bf16.gmra.mrb[120].mxu0 %vm879_vm2, %v2889_v28  ;;  %7132 = vmatmul.mubr.msk.bf16.gmra.mrb[120].mxu1 %vm879_vm2, %v3880_v3  ;;  %v2911_v41 = vrot.slane %v2909_v58, 2 }
 0x303   :  { %6907 = vmatprep.mubr.msk.bf16.mxu0 %vm7328_vm0, %v9744_v25  ;;  %7135 = vmatprep.mubr.msk.bf16.mxu1 %vm7328_vm0, %v9744_v25  ;;  %v2898_v43 = vsel %vm2521_vm3, %v2888_v33, %v2897_v57  ;;  %v2914_v9 = vrot.slane %v2912_v0, 3 }
 0x304   :  { %v4819_v10 = vmax.f32 %v4710_v35, 0.0  ;;  %v4711_v49 = vadd.f32 %v8647_v56, %v4595_v2 }
 0x305   :  { %v3343_v54 = vpop.f32.mrb[16].mxu0  ;;  %v4236_v7 = vpop.f32.mrb[16].mxu1 }
 0x306   :  { %v5962_v40 = vpack.c.bf16 %v4819_v10, %v4819_v10  ;;  %v4820_v5 = vmax.f32 %v4711_v49, 0.0  ;;  %v3703_v27 = vadd.f32 %v3343_v54, %v7878_v6  ;;  %v6801_v44 = vpop.f32.mrb[17].mxu0  ;;  %v7029_v51 = vpop.f32.mrb[17].mxu1  ;;  %v2918_v10 = vshrl.u32 %v9038_v62, 16 }
 0x307   :  { %v3346_v21 = vpop.f32.mrb[18].mxu0  ;;  %v4239_v11 = vpop.f32.mrb[18].mxu1  ;;  %v2921_v49 = vshll.u32 %v9038_v62, 16 }
 0x308   :  { %5366 = vst.msk [vmem:[%s9733_s3 + $0x60] sm:$0xf] %vm5341_vm5, %v5962_v40  ;;  %v5963_v6 = vpack.c.bf16 %v4820_v5, %v4820_v5  ;;  %v4596_v13 = vadd.f32 %v4236_v7, %v3703_v27  ;;  %v3704_v30 = vadd.f32 %v3346_v21, %v7881_v22  ;;  %v6802_v50 = vpop.f32.mrb[19].mxu0  ;;  %v7030_v33 = vpop.f32.mrb[19].mxu1  ;;  %v2906_v22 = vor.u32 %v2905_v48, %v2902_v18 }
 0x309   :  { %v3886_v48 = vsel %vm3799_vm4, %v3883_v20, %v3885_v39  ;;  %v2920_v59 = vrot.slane %v2918_v10, 2  ;;  %v3887_v20 = vrot.slane %v9038_v62, 3  ;;  %v9099_v62 = vld [vmem:[%s9731_s0 + $0x178] sm:$0xff]  }
 0x30a   :  { %5367 = vst.msk [vmem:[%s9733_s3 + $0x64] sm:$0xf] %vm5341_vm5, %v5963_v6  ;;  %v4712_v12 = vadd.f32 %v8647_v56, %v4596_v13  ;;  %v4597_v23 = vadd.f32 %v4239_v11, %v3704_v30  ;;  %6908 = vmatmul.mubr.msk.bf16.gmra.mrb[124].mxu0 %vm879_vm2, %v2898_v43  ;;  %7136 = vmatmul.mubr.msk.bf16.gmra.mrb[124].mxu1 %vm879_vm2, %v3882_v53  ;;  %v2923_v6 = vrot.slane %v2921_v49, 3  ;;  %v9066_v13 = vld [vmem:[%s9731_s0 + $0x170] sm:$0xff]  }
 0x30b   :  { %6911 = vmatprep.mubr.msk.bf16.mxu0 %vm7328_vm0, %v9744_v25  ;;  %7139 = vmatprep.mubr.msk.bf16.mxu1 %vm7328_vm0, %v9744_v25  ;;  %v2907_v45 = vsel %vm2521_vm3, %v2897_v57, %v2906_v22  ;;  %v2927_v58 = vshrl.u32 %v9066_v13, 16  ;;  %v2930_v0 = vshll.u32 %v9066_v13, 16 }
 0x30c   :  { %v4821_v63 = vmax.f32 %v4712_v12, 0.0  ;;  %v4713_v4 = vadd.f32 %v8647_v56, %v4597_v23 }
 0x30d   :  { %v3351_v60 = vpop.f32.mrb[20].mxu0  ;;  %v4244_v61 = vpop.f32.mrb[20].mxu1 }
 0x30e   :  { %v5964_v26 = vpack.c.bf16 %v4821_v63, %v4821_v63  ;;  %v4822_v42 = vmax.f32 %v4713_v4, 0.0  ;;  %v3705_v32 = vadd.f32 %v3351_v60, %v7892_v37  ;;  %v6805_v28 = vpop.f32.mrb[21].mxu0  ;;  %v7033_v3 = vpop.f32.mrb[21].mxu1 }
 0x30f   :  { %v3354_v24 = vpop.f32.mrb[22].mxu0  ;;  %v4247_v29 = vpop.f32.mrb[22].mxu1 }
 0x310   :  { %5368 = vst.msk [vmem:[%s9733_s3 + $0x68] sm:$0xf] %vm5341_vm5, %v5964_v26  ;;  %v5965_v37 = vpack.c.bf16 %v4822_v42, %v4822_v42  ;;  %v4598_v8 = vadd.f32 %v4244_v61, %v3705_v32  ;;  %v3706_v35 = vadd.f32 %v3354_v24, %v7895_v47  ;;  %v6806_v2 = vpop.f32.mrb[23].mxu0  ;;  %v7034_v57 = vpop.f32.mrb[23].mxu1  ;;  %v2915_v47 = vor.u32 %v2914_v9, %v2911_v41 }
 0x311   :  { %v2929_v41 = vrot.slane %v2927_v58, 2  ;;  %v2932_v9 = vrot.slane %v2930_v0, 3 }
 0x312   :  { %5369 = vst.msk [vmem:[%s9733_s3 + $0x6c] sm:$0xf] %vm5341_vm5, %v5965_v37  ;;  %v4714_v46 = vadd.f32 %v8647_v56, %v4598_v8  ;;  %v4599_v14 = vadd.f32 %v4247_v29, %v3706_v35  ;;  %6912 = vmatmul.mubr.msk.bf16.gmra.mrb[128].mxu0 %vm879_vm2, %v2907_v45  ;;  %7140 = vmatmul.mubr.msk.bf16.gmra.mrb[128].mxu1 %vm879_vm2, %v3884_v19 }
 0x313   :  { %6915 = vmatprep.mubr.msk.bf16.mxu0 %vm7328_vm0, %v9744_v25  ;;  %7143 = vmatprep.mubr.msk.bf16.mxu1 %vm7328_vm0, %v9744_v25  ;;  %v2916_v18 = vsel %vm2521_vm3, %v2906_v22, %v2915_v47  ;;  %v3888_v19 = vsel %vm3799_vm4, %v3885_v39, %v3887_v20  ;;  %v2939_v39 = vshll.u32 %v9099_v62, 16 }
 0x314   :  { %v4823_v54 = vmax.f32 %v4714_v46, 0.0  ;;  %v4715_v7 = vadd.f32 %v8647_v56, %v4599_v14  ;;  %v3889_v14 = vrot.slane %v9066_v13, 3 }
 0x315   :  { %v3359_v40 = vpop.f32.mrb[24].mxu0  ;;  %v4252_v5 = vpop.f32.mrb[24].mxu1 }
 0x316   :  { %v5966_v27 = vpack.c.bf16 %v4823_v54, %v4823_v54  ;;  %v4824_v44 = vmax.f32 %v4715_v7, 0.0  ;;  %v3707_v51 = vadd.f32 %v3359_v40, %v7906_v1  ;;  %v6809_v21 = vpop.f32.mrb[25].mxu0  ;;  %v7037_v11 = vpop.f32.mrb[25].mxu1 }
 0x317   :  { %v3362_v43 = vpop.f32.mrb[26].mxu0  ;;  %v4255_v53 = vpop.f32.mrb[26].mxu1 }
 0x318   :  { %5370 = vst.msk [vmem:[%s9733_s3 + $0x70] sm:$0xf] %vm5341_vm5, %v5966_v27  ;;  %v5967_v1 = vpack.c.bf16 %v4824_v44, %v4824_v44  ;;  %v4600_v30 = vadd.f32 %v4252_v5, %v3707_v51  ;;  %v3708_v50 = vadd.f32 %v3362_v43, %v7909_v16  ;;  %v6810_v33 = vpop.f32.mrb[27].mxu0  ;;  %v7038_v12 = vpop.f32.mrb[27].mxu1  ;;  %v2924_v16 = vor.u32 %v2923_v6, %v2920_v59  ;;  %v9127_v59 = vld [vmem:[%s9731_s0 + $0x180] sm:$0xff]  }
 0x319   :  { %v3891_v12 = vrot.slane %v9099_v62, 3 }
 0x31a   :  { %5371 = vst.msk [vmem:[%s9733_s3 + $0x74] sm:$0xf] %vm5341_vm5, %v5967_v1  ;;  %v4716_v23 = vadd.f32 %v8647_v56, %v4600_v30  ;;  %v4601_v22 = vadd.f32 %v4255_v53, %v3708_v50  ;;  %6916 = vmatmul.mubr.msk.bf16.gmra.mrb[132].mxu0 %vm879_vm2, %v2916_v18  ;;  %7144 = vmatmul.mubr.msk.bf16.gmra.mrb[132].mxu1 %vm879_vm2, %v3886_v48  ;;  %v9090_v56 = vld [vmem:[%s9732_s2] ss:$0 sm:$0xff]  ;;  %v2941_v48 = vrot.slane %v2939_v39, 3 }
 0x31b   :  { %6919 = vmatprep.mubr.msk.bf16.mxu0 %vm7328_vm0, %v9744_v25  ;;  %7147 = vmatprep.mubr.msk.bf16.mxu1 %vm7328_vm0, %v9744_v25  ;;  %v2925_v45 = vsel %vm2521_vm3, %v2915_v47, %v2924_v16  ;;  %v2936_v47 = vshrl.u32 %v9099_v62, 16  ;;  %v3890_v53 = vsel %vm3799_vm4, %v3887_v20, %v3889_v14 }
 0x31c   :  { %v4825_v63 = vmax.f32 %v4716_v23, 0.0  ;;  %v4717_v4 = vadd.f32 %v9090_v56, %v4601_v22  ;;  %v2945_v23 = vshrl.u32 %v9127_v59, 16  ;;  %v2948_v22 = vshll.u32 %v9127_v59, 16 }
 0x31d   :  { %v3367_v60 = vpop.f32.mrb[28].mxu0  ;;  %v4260_v61 = vpop.f32.mrb[28].mxu1  ;;  %v2938_v18 = vrot.slane %v2936_v47, 2 }
 0x31e   :  { %v5968_v26 = vpack.c.bf16 %v4825_v63, %v4825_v63  ;;  %v4826_v42 = vmax.f32 %v4717_v4, 0.0  ;;  %v3709_v32 = vadd.f32 %v3367_v60, %v7920_v34  ;;  %v6813_v28 = vpop.f32.mrb[29].mxu0  ;;  %v7041_v3 = vpop.f32.mrb[29].mxu1 }
 0x31f   :  { %v3370_v24 = vpop.f32.mrb[30].mxu0  ;;  %v4263_v29 = vpop.f32.mrb[30].mxu1  ;;  %v3892_v3 = vsel %vm3799_vm4, %v3889_v14, %v3891_v12 }
 0x320   :  { %5372 = vst.msk [vmem:[%s9733_s3 + $0x78] sm:$0xf] %vm5341_vm5, %v5968_v26  ;;  %v5969_v34 = vpack.c.bf16 %v4826_v42, %v4826_v42  ;;  %v4602_v37 = vadd.f32 %v4260_v61, %v3709_v32  ;;  %v3710_v8 = vadd.f32 %v3370_v24, %v7923_v31  ;;  %v6814_v35 = vpop.f32.mrb[31].mxu0  ;;  %v7042_v2 = vpop.f32.mrb[31].mxu1  ;;  %v2933_v31 = vor.u32 %v2932_v9, %v2929_v41 }
 0x321   :  { %v2947_v24 = vrot.slane %v2945_v23, 2 }
 0x322   :  { %5373 = vst.msk [vmem:[%s9733_s3 + $0x7c] sm:$0xf] %vm5341_vm5, %v5969_v34  ;;  %v4718_v57 = vadd.f32 %v9090_v56, %v4602_v37  ;;  %v4603_v46 = vadd.f32 %v4263_v29, %v3710_v8  ;;  %6920 = vmatmul.mubr.msk.bf16.gmra.mrb[136].mxu0 %vm879_vm2, %v2925_v45  ;;  %7148 = vmatmul.mubr.msk.bf16.gmra.mrb[136].mxu1 %vm879_vm2, %v3888_v19  ;;  %v2950_v29 = vrot.slane %v2948_v22, 3  ;;  %v9155_v45 = vld [vmem:[%s9731_s0 + $0x188] sm:$0xff]   ;;  %v3893_v8 = vrot.slane %v9127_v59, 3 }
 0x323   :  { %6923 = vmatprep.mubr.msk.bf16.mxu0 %vm7328_vm0, %v9744_v25  ;;  %7151 = vmatprep.mubr.msk.bf16.mxu1 %vm7328_vm0, %v9744_v25  ;;  %v2934_v43 = vsel %vm2521_vm3, %v2924_v16, %v2933_v31  ;;  %v2954_v35 = vshrl.u32 %v9155_v45, 16  ;;  %v2957_v2 = vshll.u32 %v9155_v45, 16 }
 0x324   :  { %v4827_v10 = vmax.f32 %v4718_v57, 0.0  ;;  %v4719_v49 = vadd.f32 %v9090_v56, %v4603_v46 }
 0x325   :  { %v3375_v54 = vpop.f32.mrb[32].mxu0  ;;  %v4268_v7 = vpop.f32.mrb[32].mxu1 }
 0x326   :  { %v5970_v40 = vpack.c.bf16 %v4827_v10, %v4827_v10  ;;  %v4828_v5 = vmax.f32 %v4719_v49, 0.0  ;;  %v3711_v27 = vadd.f32 %v3375_v54, %v7934_v38  ;;  %v6817_v44 = vpop.f32.mrb[33].mxu0  ;;  %v7045_v51 = vpop.f32.mrb[33].mxu1  ;;  %v9806_v10 = vld [vmem:[#allocation2_spill] sm:$0xff] }
 0x327   :  { %v3378_v21 = vpop.f32.mrb[34].mxu0  ;;  %v4271_v11 = vpop.f32.mrb[34].mxu1  ;;  %v3894_v44 = vsel %vm3799_vm4, %v3891_v12, %v3893_v8  ;;  %v2956_v51 = vrot.slane %v2954_v35, 2 }
 0x328   :  { %5374 = vst.msk [vmem:[%s9733_s3 + $0x80] sm:$0xf] %vm5341_vm5, %v5970_v40  ;;  %v5971_v38 = vpack.c.bf16 %v4828_v5, %v4828_v5  ;;  %v4604_v6 = vadd.f32 %v4268_v7, %v3711_v27  ;;  %v3712_v13 = vadd.f32 %v3378_v21, %v7937_v17  ;;  %v6818_v1 = vpop.f32.mrb[35].mxu0  ;;  %v7046_v30 = vpop.f32.mrb[35].mxu1  ;;  %v2942_v17 = vor.u32 %v2941_v48, %v2938_v18  ;;  %v9807_v18 = vld [vmem:[#allocation3_spill] sm:$0xff] }
 0x329   :  { %v2959_v21 = vrot.slane %v2957_v2, 3  ;;  %v3895_v30 = vrot.slane %v9155_v45, 3  ;;  %v9809_v45 = vld [vmem:[#allocation5_spill] sm:$0xff] }
 0x32a   :  { %5375 = vst.msk [vmem:[%s9733_s3 + $0x84] sm:$0xf] %vm5341_vm5, %v5971_v38  ;;  %v4720_v50 = vadd.f32 %v9090_v56, %v4604_v6  ;;  %v4605_v33 = vadd.f32 %v4271_v11, %v3712_v13  ;;  %6924 = vmatmul.mubr.msk.bf16.gmra.mrb[140].mxu0 %vm879_vm2, %v2934_v43  ;;  %7152 = vmatmul.mubr.msk.bf16.gmra.mrb[140].mxu1 %vm879_vm2, %v3890_v53  ;;  %v9183_v11 = vld [vmem:[%s9731_s0 + $0x190] sm:$0xff]  }
 0x32b   :  { %6927 = vmatprep.mubr.msk.bf16.mxu0 %vm7328_vm0, %v9744_v25  ;;  %7155 = vmatprep.mubr.msk.bf16.mxu1 %vm7328_vm0, %v9744_v25  ;;  %v2943_v28 = vsel %vm2521_vm3, %v2933_v31, %v2942_v17  ;;  %v2960_v1 = vor.u32 %v2959_v21, %v2956_v51  ;;  %v9239_v51 = vld [vmem:[%s9731_s0 + $0x1a0] sm:$0xff]  }
 0x32c   :  { %v4829_v16 = vmax.f32 %v4720_v50, 0.0  ;;  %v4721_v20 = vadd.f32 %v9090_v56, %v4605_v33  ;;  %v2963_v50 = vshrl.u32 %v9183_v11, 16  ;;  %v2966_v33 = vshll.u32 %v9183_v11, 16 }
 0x32d   :  { %v3383_v58 = vpop.f32.mrb[36].mxu0  ;;  %v4276_v0 = vpop.f32.mrb[36].mxu1 }
 0x32e   :  { %v5972_v63 = vpack.c.bf16 %v4829_v16, %v4829_v16  ;;  %v4830_v4 = vmax.f32 %v4721_v20, 0.0  ;;  %v3713_v60 = vadd.f32 %v3383_v58, %v7948_v36  ;;  %v6821_v61 = vpop.f32.mrb[37].mxu0  ;;  %v7049_v26 = vpop.f32.mrb[37].mxu1  ;;  %v9808_v58 = vld [vmem:[#allocation4_spill] sm:$0xff] }
 0x32f   :  { %v3386_v42 = vpop.f32.mrb[38].mxu0  ;;  %v4279_v32 = vpop.f32.mrb[38].mxu1 }
 0x330   :  { %5376 = vst.msk [vmem:[%s9733_s3 + $0x88] sm:$0xf] %vm5341_vm5, %v5972_v63  ;;  %v5973_v36 = vpack.c.bf16 %v4830_v4, %v4830_v4  ;;  %v4606_v19 = vadd.f32 %v4276_v0, %v3713_v60  ;;  %v3714_v41 = vadd.f32 %v3386_v42, %v7951_v52  ;;  %v6822_v9 = vpop.f32.mrb[39].mxu0  ;;  %v7050_v62 = vpop.f32.mrb[39].mxu1  ;;  %v2951_v52 = vor.u32 %v2950_v29, %v2947_v24 }
 0x331   :  { %v3896_v42 = vsel %vm3799_vm4, %v3893_v8, %v3895_v30 }
 0x332   :  { %5377 = vst.msk [vmem:[%s9733_s3 + $0x8c] sm:$0xf] %vm5341_vm5, %v5973_v36  ;;  %v4722_v34 = vadd.f32 %v9090_v56, %v4606_v19  ;;  %v4607_v37 = vadd.f32 %v4279_v32, %v3714_v41  ;;  %6928 = vmatmul.mubr.msk.bf16.gmra.mrb[144].mxu0 %vm879_vm2, %v2943_v28  ;;  %7156 = vmatmul.mubr.msk.bf16.gmra.mrb[144].mxu1 %vm879_vm2, %v3892_v3  ;;  %v2965_v32 = vrot.slane %v2963_v50, 2  ;;  %v2968_v28 = vrot.slane %v2966_v33, 3  ;;  %v9211_v3 = vld [vmem:[%s9731_s0 + $0x198] sm:$0xff]  }
 0x333   :  { %6931 = vmatprep.mubr.msk.bf16.mxu0 %vm7328_vm0, %v9744_v25  ;;  %7159 = vmatprep.mubr.msk.bf16.mxu1 %vm7328_vm0, %v9744_v25  ;;  %v2952_v27 = vsel %vm2521_vm3, %v2942_v17, %v2951_v52  ;;  %v2961_v26 = vsel %vm2521_vm3, %v2951_v52, %v2960_v1  ;;  %v2972_v52 = vshrl.u32 %v9211_v3, 16  ;;  %v2975_v8 = vshll.u32 %v9211_v3, 16 }
 0x334   :  { %v4831_v57 = vmax.f32 %v4722_v34, 0.0  ;;  %v4723_v46 = vadd.f32 %v9090_v56, %v4607_v37  ;;  %v2969_v34 = vor.u32 %v2968_v28, %v2965_v32  ;;  %v3897_v37 = vrot.slane %v9183_v11, 3  ;;  %v9267_v32 = vld [vmem:[%s9731_s0 + $0x1a8] sm:$0xff]  }
 0x335   :  { %v3391_v31 = vpop.f32.mrb[40].mxu0  ;;  %v4284_v14 = vpop.f32.mrb[40].mxu1 }
 0x336   :  { %v5974_v47 = vpack.c.bf16 %v4831_v57, %v4831_v57  ;;  %v4832_v39 = vmax.f32 %v4723_v46, 0.0  ;;  %v3715_v49 = vadd.f32 %v3391_v31, %v9806_v10  ;;  %v6825_v54 = vpop.f32.mrb[41].mxu0  ;;  %v7053_v7 = vpop.f32.mrb[41].mxu1 }
 0x337   :  { %v3394_v40 = vpop.f32.mrb[42].mxu0  ;;  %v4287_v5 = vpop.f32.mrb[42].mxu1 }
 0x338   :  { %5378 = vst.msk [vmem:[%s9733_s3 + $0x90] sm:$0xf] %vm5341_vm5, %v5974_v47  ;;  %v5975_v43 = vpack.c.bf16 %v4832_v39, %v4832_v39  ;;  %v4608_v53 = vadd.f32 %v4284_v14, %v3715_v49  ;;  %v3716_v48 = vadd.f32 %v3394_v40, %v9807_v18  ;;  %v6826_v59 = vpop.f32.mrb[43].mxu0  ;;  %v7054_v38 = vpop.f32.mrb[43].mxu1  ;;  %v9810_v47 = vld [vmem:[#allocation6_spill] sm:$0xff]  ;;  %v2970_v40 = vsel %vm2521_vm3, %v2960_v1, %v2969_v34 }
 0x339   :  { %v2981_v1 = vshrl.u32 %v9239_v51, 16 }
 0x33a   :  { %5379 = vst.msk [vmem:[%s9733_s3 + $0x94] sm:$0xf] %vm5341_vm5, %v5975_v43  ;;  %v4724_v6 = vadd.f32 %v9090_v56, %v4608_v53  ;;  %v4609_v13 = vadd.f32 %v4287_v5, %v3716_v48  ;;  %6932 = vmatmul.mubr.msk.bf16.gmra.mrb[148].mxu0 %vm879_vm2, %v2952_v27  ;;  %7160 = vmatmul.mubr.msk.bf16.gmra.mrb[148].mxu1 %vm879_vm2, %v3894_v44  ;;  %v2974_v27 = vrot.slane %v2972_v52, 2  ;;  %v2977_v44 = vrot.slane %v2975_v8, 3  ;;  %v9811_v43 = vld [vmem:[#allocation7_spill] sm:$0xff] }
 0x33b   :  { %6935 = vmatprep.mubr.msk.bf16.mxu0 %vm7328_vm0, %v9744_v25  ;;  %7163 = vmatprep.mubr.msk.bf16.mxu1 %vm7328_vm0, %v9744_v25  ;;  %v3898_v5 = vsel %vm3799_vm4, %v3895_v30, %v3897_v37  ;;  %v2984_v30 = vshll.u32 %v9239_v51, 16 }
 0x33c   :  { %v4833_v17 = vmax.f32 %v4724_v6, 0.0  ;;  %v4725_v12 = vadd.f32 %v9090_v56, %v4609_v13  ;;  %v2978_v6 = vor.u32 %v2977_v44, %v2974_v27  ;;  %v3899_v13 = vrot.slane %v9211_v3, 3  ;;  %v9295_v27 = vld [vmem:[%s9731_s0 + $0x1b0] sm:$0xff]  }
 0x33d   :  { %v3399_v23 = vpop.f32.mrb[44].mxu0  ;;  %v4292_v22 = vpop.f32.mrb[44].mxu1 }
 0x33e   :  { %v5976_v16 = vpack.c.bf16 %v4833_v17, %v4833_v17  ;;  %v4834_v20 = vmax.f32 %v4725_v12, 0.0  ;;  %v3717_v0 = vadd.f32 %v3399_v23, %v9808_v58  ;;  %v6829_v63 = vpop.f32.mrb[45].mxu0  ;;  %v7057_v4 = vpop.f32.mrb[45].mxu1 }
 0x33f   :  { %v3402_v60 = vpop.f32.mrb[46].mxu0  ;;  %v4295_v61 = vpop.f32.mrb[46].mxu1 }
 0x340   :  { %5380 = vst.msk [vmem:[%s9733_s3 + $0x98] sm:$0xf] %vm5341_vm5, %v5976_v16  ;;  %v5977_v24 = vpack.c.bf16 %v4834_v20, %v4834_v20  ;;  %v4610_v29 = vadd.f32 %v4292_v22, %v3717_v0  ;;  %v3718_v36 = vadd.f32 %v3402_v60, %v9809_v45  ;;  %v6830_v19 = vpop.f32.mrb[47].mxu0  ;;  %v7058_v41 = vpop.f32.mrb[47].mxu1  ;;  %v9812_v16 = vld [vmem:[#allocation8_spill] sm:$0xff]  ;;  %v2979_v60 = vsel %vm2521_vm3, %v2969_v34, %v2978_v6 }
 0x341   :  { %v2990_v34 = vshrl.u32 %v9267_v32, 16 }
 0x342   :  { %5381 = vst.msk [vmem:[%s9733_s3 + $0x9c] sm:$0xf] %vm5341_vm5, %v5977_v24  ;;  %v4726_v9 = vadd.f32 %v9090_v56, %v4610_v29  ;;  %v4611_v62 = vadd.f32 %v4295_v61, %v3718_v36  ;;  %6936 = vmatmul.mubr.msk.bf16.gmra.mrb[152].mxu0 %vm879_vm2, %v2961_v26  ;;  %7164 = vmatmul.mubr.msk.bf16.gmra.mrb[152].mxu1 %vm879_vm2, %v3896_v42  ;;  %v2983_v26 = vrot.slane %v2981_v1, 2  ;;  %v2986_v42 = vrot.slane %v2984_v30, 3  ;;  %v9813_v24 = vld [vmem:[#allocation9_spill] sm:$0xff] }
 0x343   :  { %6939 = vmatprep.mubr.msk.bf16.mxu0 %vm7328_vm0, %v9744_v25  ;;  %7167 = vmatprep.mubr.msk.bf16.mxu1 %vm7328_vm0, %v9744_v25  ;;  %v3900_v61 = vsel %vm3799_vm4, %v3897_v37, %v3899_v13  ;;  %v2993_v37 = vshll.u32 %v9267_v32, 16 }
 0x344   :  { %v4835_v35 = vmax.f32 %v4726_v9, 0.0  ;;  %v4727_v2 = vadd.f32 %v9090_v56, %v4611_v62  ;;  %v2987_v9 = vor.u32 %v2986_v42, %v2983_v26  ;;  %v3901_v62 = vrot.slane %v9239_v51, 3  ;;  %v9323_v26 = vld [vmem:[%s9731_s0 + $0x1b8] sm:$0x1f]  }
 0x345   :  { %v3407_v57 = vpop.f32.mrb[48].mxu0  ;;  %v4300_v46 = vpop.f32.mrb[48].mxu1 }
 0x346   :  { %v5978_v31 = vpack.c.bf16 %v4835_v35, %v4835_v35  ;;  %v4836_v14 = vmax.f32 %v4727_v2, 0.0  ;;  %v3719_v39 = vadd.f32 %v3407_v57, %v9810_v47  ;;  %v6833_v10 = vpop.f32.mrb[49].mxu0  ;;  %v7061_v49 = vpop.f32.mrb[49].mxu1 }
 0x347   :  { %v3410_v54 = vpop.f32.mrb[50].mxu0  ;;  %v4303_v7 = vpop.f32.mrb[50].mxu1 }
 0x348   :  { %5382 = vst.msk [vmem:[%s9733_s3 + $0xa0] sm:$0xf] %vm5341_vm5, %v5978_v31  ;;  %v5979_v21 = vpack.c.bf16 %v4836_v14, %v4836_v14  ;;  %v4612_v11 = vadd.f32 %v4300_v46, %v3719_v39  ;;  %v3720_v53 = vadd.f32 %v3410_v54, %v9811_v43  ;;  %v6834_v18 = vpop.f32.mrb[51].mxu0  ;;  %v7062_v48 = vpop.f32.mrb[51].mxu1  ;;  %v9814_v31 = vld [vmem:[#allocation10_spill] sm:$0xff]  ;;  %v2988_v54 = vsel %vm2521_vm3, %v2978_v6, %v2987_v9 }
 0x349   :  { %v2999_v6 = vshrl.u32 %v9295_v27, 16 }
 0x34a   :  { %5383 = vst.msk [vmem:[%s9733_s3 + $0xa4] sm:$0xf] %vm5341_vm5, %v5979_v21  ;;  %v4728_v59 = vadd.f32 %v9090_v56, %v4612_v11  ;;  %v4613_v38 = vadd.f32 %v4303_v7, %v3720_v53  ;;  %6940 = vmatmul.mubr.msk.bf16.gmra.mrb[156].mxu0 %vm879_vm2, %v2970_v40  ;;  %7168 = vmatmul.mubr.msk.bf16.gmra.mrb[156].mxu1 %vm879_vm2, %v3898_v5  ;;  %v2992_v40 = vrot.slane %v2990_v34, 2  ;;  %v2995_v5 = vrot.slane %v2993_v37, 3  ;;  %v9815_v21 = vld [vmem:[#allocation11_spill] sm:$0xff] }
 0x34b   :  { %6943 = vmatprep.mubr.msk.bf16.mxu0 %vm7328_vm0, %v9744_v25  ;;  %7171 = vmatprep.mubr.msk.bf16.mxu1 %vm7328_vm0, %v9744_v25  ;;  %v3902_v7 = vsel %vm3799_vm4, %v3899_v13, %v3901_v62  ;;  %v3002_v13 = vshll.u32 %v9295_v27, 16 }
 0x34c   :  { %v4837_v50 = vmax.f32 %v4728_v59, 0.0  ;;  %v4729_v33 = vadd.f32 %v9090_v56, %v4613_v38  ;;  %v2996_v59 = vor.u32 %v2995_v5, %v2992_v40  ;;  %v3903_v38 = vrot.slane %v9267_v32, 3 }
 0x34d   :  { %v3415_v17 = vpop.f32.mrb[52].mxu0  ;;  %v4308_v12 = vpop.f32.mrb[52].mxu1 }
 0x34e   :  { %v5980_v23 = vpack.c.bf16 %v4837_v50, %v4837_v50  ;;  %v4838_v22 = vmax.f32 %v4729_v33, 0.0  ;;  %v3721_v20 = vadd.f32 %v3415_v17, %v9812_v16  ;;  %v6837_v58 = vpop.f32.mrb[53].mxu0  ;;  %v7065_v0 = vpop.f32.mrb[53].mxu1 }
 0x34f   :  { %v3418_v63 = vpop.f32.mrb[54].mxu0  ;;  %v4311_v4 = vpop.f32.mrb[54].mxu1 }
 0x350   :  { %5384 = vst.msk [vmem:[%s9733_s3 + $0xa8] sm:$0xf] %vm5341_vm5, %v5980_v23  ;;  %v5981_v28 = vpack.c.bf16 %v4838_v22, %v4838_v22  ;;  %v4614_v3 = vadd.f32 %v4308_v12, %v3721_v20  ;;  %v3722_v29 = vadd.f32 %v3418_v63, %v9813_v24  ;;  %v6838_v45 = vpop.f32.mrb[55].mxu0  ;;  %v7066_v36 = vpop.f32.mrb[55].mxu1  ;;  %v9816_v23 = vld [vmem:[#allocation12_spill] sm:$0xff]  ;;  %v2997_v63 = vsel %vm2521_vm3, %v2987_v9, %v2996_v59 }
 0x351   :  { %v3008_v9 = vshrl.u32 %v9323_v26, 16 }
 0x352   :  { %5385 = vst.msk [vmem:[%s9733_s3 + $0xac] sm:$0xf] %vm5341_vm5, %v5981_v28  ;;  %v4730_v19 = vadd.f32 %v9090_v56, %v4614_v3  ;;  %v4615_v41 = vadd.f32 %v4311_v4, %v3722_v29  ;;  %6944 = vmatmul.mubr.msk.bf16.gmra.mrb[160].mxu0 %vm879_vm2, %v2979_v60  ;;  %7172 = vmatmul.mubr.msk.bf16.gmra.mrb[160].mxu1 %vm879_vm2, %v3900_v61  ;;  %v3001_v60 = vrot.slane %v2999_v6, 2  ;;  %v3004_v61 = vrot.slane %v3002_v13, 3  ;;  %v9817_v28 = vld [vmem:[#allocation13_spill] sm:$0xff] }
 0x353   :  { %6947 = vmatprep.mubr.msk.bf16.mxu0 %vm7328_vm0, %v9744_v25  ;;  %7175 = vmatprep.mubr.msk.bf16.mxu1 %vm7328_vm0, %v9744_v25  ;;  %v3904_v4 = vsel %vm3799_vm4, %v3901_v62, %v3903_v38  ;;  %v3011_v62 = vshll.u32 %v9323_v26, 16 }
 0x354   :  { %v4839_v52 = vmax.f32 %v4730_v19, 0.0  ;;  %v4731_v8 = vadd.f32 %v9090_v56, %v4615_v41  ;;  %v3005_v19 = vor.u32 %v3004_v61, %v3001_v60  ;;  %v3905_v41 = vrot.slane %v9295_v27, 3  ;;  %v9819_v27 = vld [vmem:[#allocation15_spill] sm:$0xff] }
 0x355   :  { %v3423_v35 = vpop.f32.mrb[56].mxu0  ;;  %v4316_v2 = vpop.f32.mrb[56].mxu1 }
 0x356   :  { %v5982_v57 = vpack.c.bf16 %v4839_v52, %v4839_v52  ;;  %v4840_v46 = vmax.f32 %v4731_v8, 0.0  ;;  %v3723_v14 = vadd.f32 %v3423_v35, %v9814_v31  ;;  %v6841_v47 = vpop.f32.mrb[57].mxu0  ;;  %v7069_v39 = vpop.f32.mrb[57].mxu1 }
 0x357   :  { %v3426_v10 = vpop.f32.mrb[58].mxu0  ;;  %v4319_v49 = vpop.f32.mrb[58].mxu1 }
 0x358   :  { %5386 = vst.msk [vmem:[%s9733_s3 + $0xb0] sm:$0xf] %vm5341_vm5, %v5982_v57  ;;  %v5983_v44 = vpack.c.bf16 %v4840_v46, %v4840_v46  ;;  %v4616_v51 = vadd.f32 %v4316_v2, %v3723_v14  ;;  %v3724_v11 = vadd.f32 %v3426_v10, %v9815_v21  ;;  %v6842_v43 = vpop.f32.mrb[59].mxu0  ;;  %v7070_v53 = vpop.f32.mrb[59].mxu1  ;;  %v9818_v57 = vld [vmem:[#allocation14_spill] sm:$0xff]  ;;  %v3006_v10 = vsel %vm2521_vm3, %v2996_v59, %v3005_v19 }
 0x35a   :  { %5387 = vst.msk [vmem:[%s9733_s3 + $0xb4] sm:$0xf] %vm5341_vm5, %v5983_v44  ;;  %v4732_v18 = vadd.f32 %v9090_v56, %v4616_v51  ;;  %v4617_v48 = vadd.f32 %v4319_v49, %v3724_v11  ;;  %6948 = vmatmul.mubr.msk.bf16.gmra.mrb[164].mxu0 %vm879_vm2, %v2988_v54  ;;  %7176 = vmatmul.mubr.msk.bf16.gmra.mrb[164].mxu1 %vm879_vm2, %v3902_v7  ;;  %v3010_v54 = vrot.slane %v3008_v9, 2  ;;  %v3013_v7 = vrot.slane %v3011_v62, 3 }
 0x35b   :  { %6951 = vmatprep.mubr.msk.bf16.mxu0 %vm7328_vm0, %v9744_v25  ;;  %7179 = vmatprep.mubr.msk.bf16.mxu1 %vm7328_vm0, %v9744_v25  ;;  %v3906_v49 = vsel %vm3799_vm4, %v3903_v38, %v3905_v41 }
 0x35c   :  { %v4841_v1 = vmax.f32 %v4732_v18, 0.0  ;;  %v4733_v30 = vadd.f32 %v9090_v56, %v4617_v48  ;;  %v3014_v53 = vor.u32 %v3013_v7, %v3010_v54  ;;  %v3907_v18 = vrot.slane %v9323_v26, 3 }
 0x35d   :  { %v3431_v50 = vpop.f32.mrb[60].mxu0  ;;  %v4324_v33 = vpop.f32.mrb[60].mxu1 }
 0x35e   :  { %v5984_v17 = vpack.c.bf16 %v4841_v1, %v4841_v1  ;;  %v4842_v12 = vmax.f32 %v4733_v30, 0.0  ;;  %v3725_v22 = vadd.f32 %v3431_v50, %v9816_v23  ;;  %v6845_v16 = vpop.f32.mrb[61].mxu0  ;;  %v7073_v20 = vpop.f32.mrb[61].mxu1  ;;  %v9820_v30 = vld [vmem:[#allocation16_spill] sm:$0xff] }
 0x35f   :  { %v3434_v58 = vpop.f32.mrb[62].mxu0  ;;  %v4327_v0 = vpop.f32.mrb[62].mxu1  ;;  %v3908_v16 = vsel %vm3799_vm4, %v3905_v41, %v3907_v18 }
 0x360   :  { %5388 = vst.msk [vmem:[%s9733_s3 + $0xb8] sm:$0xf] %vm5341_vm5, %v5984_v17  ;;  %v5985_v42 = vpack.c.bf16 %v4842_v12, %v4842_v12  ;;  %v4618_v32 = vadd.f32 %v4324_v33, %v3725_v22  ;;  %v3726_v3 = vadd.f32 %v3434_v58, %v9817_v28  ;;  %v6846_v24 = vpop.f32.mrb[63].mxu0  ;;  %v7074_v29 = vpop.f32.mrb[63].mxu1  ;;  %v3015_v22 = vsel %vm2521_vm3, %v3005_v19, %v3014_v53 }
 0x362   :  { %5389 = vst.msk [vmem:[%s9733_s3 + $0xbc] sm:$0xf] %vm5341_vm5, %v5985_v42  ;;  %v4734_v45 = vadd.f32 %v9090_v56, %v4618_v32  ;;  %v4619_v36 = vadd.f32 %v4327_v0, %v3726_v3  ;;  %6952 = vmatmul.mubr.msk.bf16.gmra.mrb[168].mxu0 %vm879_vm2, %v2997_v63  ;;  %7180 = vmatmul.mubr.msk.bf16.gmra.mrb[168].mxu1 %vm879_vm2, %v3904_v4  ;;  %v9821_v0 = vld [vmem:[#allocation17_spill] sm:$0xff] }
 0x363   :  { %6955 = vmatprep.mubr.msk.bf16.mxu0 %vm7328_vm0, %v9744_v25  ;;  %7183 = vmatprep.mubr.msk.bf16.mxu1 %vm7328_vm0, %v9744_v25 }
 0x364   :  { %v4843_v34 = vmax.f32 %v4734_v45, 0.0  ;;  %v4735_v37 = vadd.f32 %v9090_v56, %v4619_v36 }
 0x365   :  { %v3439_v52 = vpop.f32.mrb[64].mxu0  ;;  %v4332_v8 = vpop.f32.mrb[64].mxu1 }
 0x366   :  { %v5986_v35 = vpack.c.bf16 %v4843_v34, %v4843_v34  ;;  %v4844_v2 = vmax.f32 %v4735_v37, 0.0  ;;  %v3727_v46 = vadd.f32 %v3439_v52, %v9818_v57  ;;  %v6849_v31 = vpop.f32.mrb[65].mxu0  ;;  %v7077_v14 = vpop.f32.mrb[65].mxu1 }
 0x367   :  { %v3442_v47 = vpop.f32.mrb[66].mxu0  ;;  %v4335_v39 = vpop.f32.mrb[66].mxu1  ;;  %v9822_v14 = vld [vmem:[#allocation18_spill] sm:$0xff] }
 0x368   :  { %5390 = vst.msk [vmem:[%s9733_s3 + $0xc0] sm:$0xf] %vm5341_vm5, %v5986_v35  ;;  %v5987_v40 = vpack.c.bf16 %v4844_v2, %v4844_v2  ;;  %v4620_v5 = vadd.f32 %v4332_v8, %v3727_v46  ;;  %v3728_v44 = vadd.f32 %v3442_v47, %v9819_v27  ;;  %v6850_v51 = vpop.f32.mrb[67].mxu0  ;;  %v7078_v21 = vpop.f32.mrb[67].mxu1 }
 0x36a   :  { %5391 = vst.msk [vmem:[%s9733_s3 + $0xc4] sm:$0xf] %vm5341_vm5, %v5987_v40  ;;  %v4736_v11 = vadd.f32 %v9090_v56, %v4620_v5  ;;  %v4621_v43 = vadd.f32 %v4335_v39, %v3728_v44  ;;  %6956 = vmatmul.mubr.msk.bf16.gmra.mrb[172].mxu0 %vm879_vm2, %v3006_v10  ;;  %7184 = vmatmul.mubr.msk.bf16.gmra.mrb[172].mxu1 %vm879_vm2, %v3906_v49  ;;  %v9823_v5 = vld [vmem:[#allocation19_spill] sm:$0xff] }
 0x36b   :  { %6959 = vmatprep.mubr.msk.bf16.mxu0 %vm7328_vm0, %v9744_v25  ;;  %7187 = vmatprep.mubr.msk.bf16.mxu1 %vm7328_vm0, %v9744_v25 }
 0x36c   :  { %v4845_v48 = vmax.f32 %v4736_v11, 0.0  ;;  %v4737_v59 = vadd.f32 %v9090_v56, %v4621_v43 }
 0x36d   :  { %v3447_v38 = vpop.f32.mrb[68].mxu0  ;;  %v4340_v6 = vpop.f32.mrb[68].mxu1 }
 0x36e   :  { %v5988_v13 = vpack.c.bf16 %v4845_v48, %v4845_v48  ;;  %v4846_v1 = vmax.f32 %v4737_v59, 0.0  ;;  %v3729_v50 = vadd.f32 %v3447_v38, %v9820_v30  ;;  %v6853_v33 = vpop.f32.mrb[69].mxu0  ;;  %v7081_v17 = vpop.f32.mrb[69].mxu1 }
 0x36f   :  { %v3450_v12 = vpop.f32.mrb[70].mxu0  ;;  %v4343_v23 = vpop.f32.mrb[70].mxu1 }
 0x370   :  { %5392 = vst.msk [vmem:[%s9733_s3 + $0xc8] sm:$0xf] %vm5341_vm5, %v5988_v13  ;;  %v5989_v20 = vpack.c.bf16 %v4846_v1, %v4846_v1  ;;  %v4622_v58 = vadd.f32 %v4340_v6, %v3729_v50  ;;  %v3730_v63 = vadd.f32 %v3450_v12, %v9821_v0  ;;  %v6854_v4 = vpop.f32.mrb[71].mxu0  ;;  %v7082_v60 = vpop.f32.mrb[71].mxu1  ;;  %v9824_v6 = vld [vmem:[#allocation20_spill] sm:$0xff] }
 0x372   :  { %5393 = vst.msk [vmem:[%s9733_s3 + $0xcc] sm:$0xf] %vm5341_vm5, %v5989_v20  ;;  %v4738_v61 = vadd.f32 %v9090_v56, %v4622_v58  ;;  %v4623_v26 = vadd.f32 %v4343_v23, %v3730_v63  ;;  %6960 = vmatmul.mubr.msk.bf16.gmra.mrb[176].mxu0 %vm879_vm2, %v3015_v22  ;;  %7188 = vmatmul.mubr.msk.bf16.gmra.mrb[176].mxu1 %vm879_vm2, %v3908_v16  ;;  %v9825_v23 = vld [vmem:[#allocation21_spill] sm:$0xff] }
 0x373   :  { %6963 = vmatprep.mubr.msk.bf16.mxu0 %vm7328_vm0, %v9744_v25  ;;  %7191 = vmatprep.mubr.msk.bf16.mxu1 %vm7328_vm0, %v9744_v25 }
 0x374   :  { %v4847_v42 = vmax.f32 %v4738_v61, 0.0  ;;  %v4739_v32 = vadd.f32 %v9090_v56, %v4623_v26 }
 0x375   :  { %v3455_v28 = vpop.f32.mrb[72].mxu0  ;;  %v4348_v3 = vpop.f32.mrb[72].mxu1 }
 0x376   :  { %v5990_v24 = vpack.c.bf16 %v4847_v42, %v4847_v42  ;;  %v4848_v29 = vmax.f32 %v4739_v32, 0.0  ;;  %v3731_v45 = vadd.f32 %v3455_v28, %v8087_v55  ;;  %v6857_v36 = vpop.f32.mrb[73].mxu0  ;;  %v7085_v19 = vpop.f32.mrb[73].mxu1  ;;  %v9826_v32 = vld [vmem:[#allocation22_spill] sm:$0xff] }
 0x377   :  { %v3458_v41 = vpop.f32.mrb[74].mxu0  ;;  %v4351_v9 = vpop.f32.mrb[74].mxu1 }
 0x378   :  { %5394 = vst.msk [vmem:[%s9733_s3 + $0xd0] sm:$0xf] %vm5341_vm5, %v5990_v24  ;;  %v5991_v62 = vpack.c.bf16 %v4848_v29, %v4848_v29  ;;  %v4624_v25 = vadd.f32 %v4348_v3, %v3731_v45  ;;  %v3732_v34 = vadd.f32 %v3458_v41, %v8094_v15  ;;  %v6858_v37 = vpop.f32.mrb[75].mxu0  ;;  %v7086_v52 = vpop.f32.mrb[75].mxu1  ;;  %v9827_v41 = vld [vmem:[#allocation23_spill] sm:$0xff] }
 0x37a   :  { %5395 = vst.msk [vmem:[%s9733_s3 + $0xd4] sm:$0xf] %vm5341_vm5, %v5991_v62  ;;  %v4740_v55 = vadd.f32 %v9090_v56, %v4624_v25  ;;  %v4625_v8 = vadd.f32 %v4351_v9, %v3732_v34  ;;  %6964 = vmatmul.mubr.msk.bf16.gmra.mrb[180].mxu0 %vm879_vm2, %v3014_v53  ;;  %7192 = vmatmul.mubr.msk.bf16.gmra.mrb[180].mxu1 %vm879_vm2, %v3907_v18 }
 0x37c   :  { %v4849_v35 = vmax.f32 %v4740_v55, 0.0  ;;  %v4741_v2 = vadd.f32 %v9090_v56, %v4625_v8 }
 0x37d   :  { %v3463_v57 = vpop.f32.mrb[76].mxu0  ;;  %v4356_v46 = vpop.f32.mrb[76].mxu1 }
 0x37e   :  { %v5992_v15 = vpack.c.bf16 %v4849_v35, %v4849_v35  ;;  %v4850_v31 = vmax.f32 %v4741_v2, 0.0  ;;  %v3733_v47 = vadd.f32 %v3463_v57, %v9822_v14  ;;  %v6861_v39 = vpop.f32.mrb[77].mxu0  ;;  %v7089_v10 = vpop.f32.mrb[77].mxu1 }
 0x37f   :  { %v3466_v49 = vpop.f32.mrb[78].mxu0  ;;  %v4359_v54 = vpop.f32.mrb[78].mxu1 }
 0x380   :  { %5396 = vst.msk [vmem:[%s9733_s3 + $0xd8] sm:$0xf] %vm5341_vm5, %v5992_v15  ;;  %v5993_v7 = vpack.c.bf16 %v4850_v31, %v4850_v31  ;;  %v4626_v40 = vadd.f32 %v4356_v46, %v3733_v47  ;;  %v3734_v27 = vadd.f32 %v3466_v49, %v9823_v5  ;;  %v6862_v44 = vpop.f32.mrb[79].mxu0  ;;  %v7090_v51 = vpop.f32.mrb[79].mxu1  ;;  %v9828_v46 = vld [vmem:[#allocation24_spill] sm:$0xff] }
 0x382   :  { %5397 = vst.msk [vmem:[%s9733_s3 + $0xdc] sm:$0xf] %vm5341_vm5, %v5993_v7  ;;  %v4742_v21 = vadd.f32 %v9090_v56, %v4626_v40  ;;  %v4627_v11 = vadd.f32 %v4359_v54, %v3734_v27  ;;  %v9829_v54 = vld [vmem:[#allocation25_spill] sm:$0xff] }
 0x384   :  { %v4851_v43 = vmax.f32 %v4742_v21, 0.0  ;;  %v4743_v53 = vadd.f32 %v9090_v56, %v4627_v11 }
 0x385   :  { %v3471_v18 = vpop.f32.mrb[80].mxu0  ;;  %v4364_v48 = vpop.f32.mrb[80].mxu1 }
 0x386   :  { %v5994_v59 = vpack.c.bf16 %v4851_v43, %v4851_v43  ;;  %v4852_v38 = vmax.f32 %v4743_v53, 0.0  ;;  %v3735_v13 = vadd.f32 %v3471_v18, %v9824_v6  ;;  %v6865_v1 = vpop.f32.mrb[81].mxu0  ;;  %v7093_v30 = vpop.f32.mrb[81].mxu1 }
 0x387   :  { %v3474_v50 = vpop.f32.mrb[82].mxu0  ;;  %v4367_v33 = vpop.f32.mrb[82].mxu1 }
 0x388   :  { %5398 = vst.msk [vmem:[%s9733_s3 + $0xe0] sm:$0xf] %vm5341_vm5, %v5994_v59  ;;  %v5995_v17 = vpack.c.bf16 %v4852_v38, %v4852_v38  ;;  %v4628_v12 = vadd.f32 %v4364_v48, %v3735_v13  ;;  %v3736_v22 = vadd.f32 %v3474_v50, %v9825_v23  ;;  %v6866_v16 = vpop.f32.mrb[83].mxu0  ;;  %v7094_v20 = vpop.f32.mrb[83].mxu1  ;;  %v9830_v48 = vld [vmem:[#allocation26_spill] sm:$0xff] }
 0x38a   :  { %5399 = vst.msk [vmem:[%s9733_s3 + $0xe4] sm:$0xf] %vm5341_vm5, %v5995_v17  ;;  %v4744_v58 = vadd.f32 %v9090_v56, %v4628_v12  ;;  %v4629_v0 = vadd.f32 %v4367_v33, %v3736_v22  ;;  %v9831_v33 = vld [vmem:[#allocation27_spill] sm:$0xff] }
 0x38c   :  { %v4853_v63 = vmax.f32 %v4744_v58, 0.0  ;;  %v4745_v4 = vadd.f32 %v9090_v56, %v4629_v0 }
 0x38d   :  { %v3479_v60 = vpop.f32.mrb[84].mxu0  ;;  %v4372_v61 = vpop.f32.mrb[84].mxu1 }
 0x38e   :  { %v5996_v26 = vpack.c.bf16 %v4853_v63, %v4853_v63  ;;  %v4854_v42 = vmax.f32 %v4745_v4, 0.0  ;;  %v3737_v28 = vadd.f32 %v3479_v60, %v9826_v32  ;;  %v6869_v3 = vpop.f32.mrb[85].mxu0  ;;  %v7097_v24 = vpop.f32.mrb[85].mxu1 }
 0x38f   :  { %v3482_v29 = vpop.f32.mrb[86].mxu0  ;;  %v4375_v45 = vpop.f32.mrb[86].mxu1 }
 0x390   :  { %5400 = vst.msk [vmem:[%s9733_s3 + $0xe8] sm:$0xf] %vm5341_vm5, %v5996_v26  ;;  %v5997_v36 = vpack.c.bf16 %v4854_v42, %v4854_v42  ;;  %v4630_v19 = vadd.f32 %v4372_v61, %v3737_v28  ;;  %v3738_v9 = vadd.f32 %v3482_v29, %v9827_v41  ;;  %v6870_v62 = vpop.f32.mrb[87].mxu0  ;;  %v7098_v25 = vpop.f32.mrb[87].mxu1  ;;  %v9832_v61 = vld [vmem:[#allocation28_spill] sm:$0xff] }
 0x392   :  { %5401 = vst.msk [vmem:[%s9733_s3 + $0xec] sm:$0xf] %vm5341_vm5, %v5997_v36  ;;  %v4746_v34 = vadd.f32 %v9090_v56, %v4630_v19  ;;  %v4631_v37 = vadd.f32 %v4375_v45, %v3738_v9  ;;  %v9833_v45 = vld [vmem:[#allocation29_spill] sm:$0xff] }
 0x394   :  { %v4855_v52 = vmax.f32 %v4746_v34, 0.0  ;;  %v4747_v55 = vadd.f32 %v9090_v56, %v4631_v37 }
 0x395   :  { %v3487_v8 = vpop.f32.mrb[88].mxu0  ;;  %v4380_v35 = vpop.f32.mrb[88].mxu1 }
 0x396   :  { %v5998_v2 = vpack.c.bf16 %v4855_v52, %v4855_v52  ;;  %v4856_v57 = vmax.f32 %v4747_v55, 0.0  ;;  %v3739_v15 = vadd.f32 %v3487_v8, %v9828_v46  ;;  %v6873_v31 = vpop.f32.mrb[89].mxu0  ;;  %v7101_v14 = vpop.f32.mrb[89].mxu1 }
 0x397   :  { %v3490_v47 = vpop.f32.mrb[90].mxu0  ;;  %v4383_v39 = vpop.f32.mrb[90].mxu1 }
 0x398   :  { %5402 = vst.msk [vmem:[%s9733_s3 + $0xf0] sm:$0xf] %vm5341_vm5, %v5998_v2  ;;  %v5999_v10 = vpack.c.bf16 %v4856_v57, %v4856_v57  ;;  %v4632_v49 = vadd.f32 %v4380_v35, %v3739_v15  ;;  %v3740_v7 = vadd.f32 %v3490_v47, %v9829_v54  ;;  %v6874_v40 = vpop.f32.mrb[91].mxu0  ;;  %v7102_v5 = vpop.f32.mrb[91].mxu1  ;;  %v9834_v35 = vld [vmem:[#allocation30_spill] sm:$0xff] }
 0x399   :  { %v9485_v54 = vld [vmem:[%s9732_s2] ss:$0 sm:$0xff] }
 0x39a   :  { %5403 = vst.msk [vmem:[%s9733_s3 + $0xf4] sm:$0xf] %vm5341_vm5, %v5999_v10  ;;  %v4748_v27 = vadd.f32 %v9090_v56, %v4632_v49  ;;  %v4633_v44 = vadd.f32 %v4383_v39, %v3740_v7  ;;  %v9835_v39 = vld [vmem:[#allocation31_spill] sm:$0xff] }
 0x39c   :  { %v4857_v51 = vmax.f32 %v4748_v27, 0.0  ;;  %v4749_v21 = vadd.f32 %v9090_v56, %v4633_v44 }
 0x39d   :  { %v3495_v11 = vpop.f32.mrb[92].mxu0  ;;  %v4388_v43 = vpop.f32.mrb[92].mxu1 }
 0x39e   :  { %v6000_v53 = vpack.c.bf16 %v4857_v51, %v4857_v51  ;;  %v4858_v18 = vmax.f32 %v4749_v21, 0.0  ;;  %v3741_v59 = vadd.f32 %v3495_v11, %v9830_v48  ;;  %v6877_v38 = vpop.f32.mrb[93].mxu0  ;;  %v7105_v6 = vpop.f32.mrb[93].mxu1 }
 0x39f   :  { %v3498_v13 = vpop.f32.mrb[94].mxu0  ;;  %v4391_v1 = vpop.f32.mrb[94].mxu1 }
 0x3a0   :  { %5404 = vst.msk [vmem:[%s9733_s3 + $0xf8] sm:$0xf] %vm5341_vm5, %v6000_v53  ;;  %v6001_v30 = vpack.c.bf16 %v4858_v18, %v4858_v18  ;;  %v4634_v50 = vadd.f32 %v4388_v43, %v3741_v59  ;;  %v3742_v17 = vadd.f32 %v3498_v13, %v9831_v33  ;;  %v6878_v12 = vpop.f32.mrb[95].mxu0  ;;  %v7106_v23 = vpop.f32.mrb[95].mxu1  ;;  %v9836_v43 = vld [vmem:[#allocation32_spill] sm:$0xff] }
 0x3a2   :  { %5405 = vst.msk [vmem:[%s9733_s3 + $0xfc] sm:$0xf] %vm5341_vm5, %v6001_v30  ;;  %v4750_v22 = vadd.f32 %v9090_v56, %v4634_v50  ;;  %v4635_v16 = vadd.f32 %v4391_v1, %v3742_v17  ;;  %v9837_v1 = vld [vmem:[#allocation33_spill] sm:$0xff] }
 0x3a4   :  { %v4859_v20 = vmax.f32 %v4750_v22, 0.0  ;;  %v4751_v58 = vadd.f32 %v9090_v56, %v4635_v16 }
 0x3a5   :  { %v3503_v0 = vpop.f32.mrb[96].mxu0  ;;  %v4396_v63 = vpop.f32.mrb[96].mxu1 }
 0x3a6   :  { %v6002_v4 = vpack.c.bf16 %v4859_v20, %v4859_v20  ;;  %v4860_v60 = vmax.f32 %v4751_v58, 0.0  ;;  %v3743_v26 = vadd.f32 %v3503_v0, %v9832_v61  ;;  %v6881_v42 = vpop.f32.mrb[97].mxu0  ;;  %v7109_v32 = vpop.f32.mrb[97].mxu1 }
 0x3a7   :  { %v3506_v28 = vpop.f32.mrb[98].mxu0  ;;  %v4399_v3 = vpop.f32.mrb[98].mxu1 }
 0x3a8   :  { %5406 = vst.msk [vmem:[%s9733_s3 + $0x100] sm:$0xf] %vm5341_vm5, %v6002_v4  ;;  %v6003_v24 = vpack.c.bf16 %v4860_v60, %v4860_v60  ;;  %v4636_v29 = vadd.f32 %v4396_v63, %v3743_v26  ;;  %v3744_v36 = vadd.f32 %v3506_v28, %v9833_v45  ;;  %v6882_v19 = vpop.f32.mrb[99].mxu0  ;;  %v7110_v41 = vpop.f32.mrb[99].mxu1  ;;  %v9838_v63 = vld [vmem:[#allocation34_spill] sm:$0xff] }
 0x3aa   :  { %5407 = vst.msk [vmem:[%s9733_s3 + $0x104] sm:$0xf] %vm5341_vm5, %v6003_v24  ;;  %v4752_v9 = vadd.f32 %v9090_v56, %v4636_v29  ;;  %v4637_v62 = vadd.f32 %v4399_v3, %v3744_v36  ;;  %v9839_v3 = vld [vmem:[#allocation35_spill] sm:$0xff] }
 0x3ac   :  { %v4861_v25 = vmax.f32 %v4752_v9, 0.0  ;;  %v4753_v34 = vadd.f32 %v9090_v56, %v4637_v62 }
 0x3ad   :  { %v3511_v37 = vpop.f32.mrb[100].mxu0  ;;  %v4404_v52 = vpop.f32.mrb[100].mxu1 }
 0x3ae   :  { %v6004_v55 = vpack.c.bf16 %v4861_v25, %v4861_v25  ;;  %v4862_v8 = vmax.f32 %v4753_v34, 0.0  ;;  %v3745_v2 = vadd.f32 %v3511_v37, %v9834_v35  ;;  %v6885_v57 = vpop.f32.mrb[101].mxu0  ;;  %v7113_v46 = vpop.f32.mrb[101].mxu1 }
 0x3af   :  { %v3514_v15 = vpop.f32.mrb[102].mxu0  ;;  %v4407_v31 = vpop.f32.mrb[102].mxu1 }
 0x3b0   :  { %5408 = vst.msk [vmem:[%s9733_s3 + $0x108] sm:$0xf] %vm5341_vm5, %v6004_v55  ;;  %v6005_v14 = vpack.c.bf16 %v4862_v8, %v4862_v8  ;;  %v4638_v47 = vadd.f32 %v4404_v52, %v3745_v2  ;;  %v3746_v10 = vadd.f32 %v3514_v15, %v9835_v39  ;;  %v6886_v56 = vpop.f32.mrb[103].mxu0  ;;  %v7114_v49 = vpop.f32.mrb[103].mxu1  ;;  %v9840_v52 = vld [vmem:[#allocation36_spill] sm:$0xff] }
 0x3b2   :  { %5409 = vst.msk [vmem:[%s9733_s3 + $0x10c] sm:$0xf] %vm5341_vm5, %v6005_v14  ;;  %v4754_v7 = vadd.f32 %v9485_v54, %v4638_v47  ;;  %v4639_v40 = vadd.f32 %v4407_v31, %v3746_v10  ;;  %v9841_v31 = vld [vmem:[#allocation37_spill] sm:$0xff] }
 0x3b4   :  { %v4863_v5 = vmax.f32 %v4754_v7, 0.0  ;;  %v4755_v27 = vadd.f32 %v9485_v54, %v4639_v40 }
 0x3b5   :  { %v3519_v44 = vpop.f32.mrb[104].mxu0  ;;  %v4412_v51 = vpop.f32.mrb[104].mxu1 }
 0x3b6   :  { %v6006_v21 = vpack.c.bf16 %v4863_v5, %v4863_v5  ;;  %v4864_v11 = vmax.f32 %v4755_v27, 0.0  ;;  %v3747_v53 = vadd.f32 %v3519_v44, %v9836_v43  ;;  %v6889_v18 = vpop.f32.mrb[105].mxu0  ;;  %v7117_v48 = vpop.f32.mrb[105].mxu1 }
 0x3b7   :  { %v3522_v59 = vpop.f32.mrb[106].mxu0  ;;  %v4415_v38 = vpop.f32.mrb[106].mxu1 }
 0x3b8   :  { %5410 = vst.msk [vmem:[%s9733_s3 + $0x110] sm:$0xf] %vm5341_vm5, %v6006_v21  ;;  %v6007_v6 = vpack.c.bf16 %v4864_v11, %v4864_v11  ;;  %v4640_v13 = vadd.f32 %v4412_v51, %v3747_v53  ;;  %v3748_v30 = vadd.f32 %v3522_v59, %v9837_v1  ;;  %v6890_v50 = vpop.f32.mrb[107].mxu0  ;;  %v7118_v33 = vpop.f32.mrb[107].mxu1  ;;  %v9842_v51 = vld [vmem:[#allocation38_spill] sm:$0xff] }
 0x3ba   :  { %5411 = vst.msk [vmem:[%s9733_s3 + $0x114] sm:$0xf] %vm5341_vm5, %v6007_v6  ;;  %v4756_v17 = vadd.f32 %v9485_v54, %v4640_v13  ;;  %v4641_v12 = vadd.f32 %v4415_v38, %v3748_v30  ;;  %v9843_v38 = vld [vmem:[#allocation39_spill] sm:$0xff] }
 0x3bc   :  { %v4865_v23 = vmax.f32 %v4756_v17, 0.0  ;;  %v4757_v22 = vadd.f32 %v9485_v54, %v4641_v12 }
 0x3bd   :  { %v3527_v16 = vpop.f32.mrb[108].mxu0  ;;  %v4420_v20 = vpop.f32.mrb[108].mxu1 }
 0x3be   :  { %v6008_v58 = vpack.c.bf16 %v4865_v23, %v4865_v23  ;;  %v4866_v0 = vmax.f32 %v4757_v22, 0.0  ;;  %v3749_v4 = vadd.f32 %v3527_v16, %v9838_v63  ;;  %v6893_v60 = vpop.f32.mrb[109].mxu0  ;;  %v7121_v61 = vpop.f32.mrb[109].mxu1 }
 0x3bf   :  { %v3530_v26 = vpop.f32.mrb[110].mxu0  ;;  %v4423_v42 = vpop.f32.mrb[110].mxu1 }
 0x3c0   :  { %5412 = vst.msk [vmem:[%s9733_s3 + $0x118] sm:$0xf] %vm5341_vm5, %v6008_v58  ;;  %v6009_v32 = vpack.c.bf16 %v4866_v0, %v4866_v0  ;;  %v4642_v28 = vadd.f32 %v4420_v20, %v3749_v4  ;;  %v3750_v24 = vadd.f32 %v3530_v26, %v9839_v3  ;;  %v6894_v29 = vpop.f32.mrb[111].mxu0  ;;  %v7122_v45 = vpop.f32.mrb[111].mxu1  ;;  %v9844_v20 = vld [vmem:[#allocation40_spill] sm:$0xff] }
 0x3c2   :  { %5413 = vst.msk [vmem:[%s9733_s3 + $0x11c] sm:$0xf] %vm5341_vm5, %v6009_v32  ;;  %v4758_v36 = vadd.f32 %v9485_v54, %v4642_v28  ;;  %v4643_v19 = vadd.f32 %v4423_v42, %v3750_v24  ;;  %v9845_v42 = vld [vmem:[#allocation41_spill] sm:$0xff] }
 0x3c4   :  { %v4867_v41 = vmax.f32 %v4758_v36, 0.0  ;;  %v4759_v9 = vadd.f32 %v9485_v54, %v4643_v19 }
 0x3c5   :  { %v3535_v62 = vpop.f32.mrb[112].mxu0  ;;  %v4428_v25 = vpop.f32.mrb[112].mxu1 }
 0x3c6   :  { %v6010_v34 = vpack.c.bf16 %v4867_v41, %v4867_v41  ;;  %v4868_v37 = vmax.f32 %v4759_v9, 0.0  ;;  %v3751_v55 = vadd.f32 %v3535_v62, %v9840_v52  ;;  %v6897_v8 = vpop.f32.mrb[113].mxu0  ;;  %v7125_v35 = vpop.f32.mrb[113].mxu1 }
 0x3c7   :  { %v3538_v2 = vpop.f32.mrb[114].mxu0  ;;  %v4431_v57 = vpop.f32.mrb[114].mxu1 }
 0x3c8   :  { %5414 = vst.msk [vmem:[%s9733_s3 + $0x120] sm:$0xf] %vm5341_vm5, %v6010_v34  ;;  %v6011_v46 = vpack.c.bf16 %v4868_v37, %v4868_v37  ;;  %v4644_v15 = vadd.f32 %v4428_v25, %v3751_v55  ;;  %v3752_v14 = vadd.f32 %v3538_v2, %v9841_v31  ;;  %v6898_v47 = vpop.f32.mrb[115].mxu0  ;;  %v7126_v39 = vpop.f32.mrb[115].mxu1  ;;  %v9846_v25 = vld [vmem:[#allocation42_spill] sm:$0xff] }
 0x3ca   :  { %5415 = vst.msk [vmem:[%s9733_s3 + $0x124] sm:$0xf] %vm5341_vm5, %v6011_v46  ;;  %v4760_v10 = vadd.f32 %v9485_v54, %v4644_v15  ;;  %v4645_v56 = vadd.f32 %v4431_v57, %v3752_v14  ;;  %v9847_v57 = vld [vmem:[#allocation43_spill] sm:$0xff] }
 0x3cc   :  { %v4869_v49 = vmax.f32 %v4760_v10, 0.0  ;;  %v4761_v7 = vadd.f32 %v9485_v54, %v4645_v56 }
 0x3cd   :  { %v3543_v40 = vpop.f32.mrb[116].mxu0  ;;  %v4436_v5 = vpop.f32.mrb[116].mxu1 }
 0x3ce   :  { %v6012_v27 = vpack.c.bf16 %v4869_v49, %v4869_v49  ;;  %v4870_v44 = vmax.f32 %v4761_v7, 0.0  ;;  %v3753_v21 = vadd.f32 %v3543_v40, %v9842_v51  ;;  %v6901_v11 = vpop.f32.mrb[117].mxu0  ;;  %v7129_v43 = vpop.f32.mrb[117].mxu1 }
 0x3cf   :  { %v3546_v53 = vpop.f32.mrb[118].mxu0  ;;  %v4439_v18 = vpop.f32.mrb[118].mxu1 }
 0x3d0   :  { %5416 = vst.msk [vmem:[%s9733_s3 + $0x128] sm:$0xf] %vm5341_vm5, %v6012_v27  ;;  %v6013_v48 = vpack.c.bf16 %v4870_v44, %v4870_v44  ;;  %v4646_v59 = vadd.f32 %v4436_v5, %v3753_v21  ;;  %v3754_v6 = vadd.f32 %v3546_v53, %v9843_v38  ;;  %v6902_v13 = vpop.f32.mrb[119].mxu0  ;;  %v7130_v1 = vpop.f32.mrb[119].mxu1  ;;  %v9848_v5 = vld [vmem:[#allocation44_spill] sm:$0xff] }
 0x3d2   :  { %5417 = vst.msk [vmem:[%s9733_s3 + $0x12c] sm:$0xf] %vm5341_vm5, %v6013_v48  ;;  %v4762_v30 = vadd.f32 %v9485_v54, %v4646_v59  ;;  %v4647_v50 = vadd.f32 %v4439_v18, %v3754_v6  ;;  %v9849_v18 = vld [vmem:[#allocation45_spill] sm:$0xff] }
 0x3d4   :  { %v4871_v33 = vmax.f32 %v4762_v30, 0.0  ;;  %v4763_v17 = vadd.f32 %v9485_v54, %v4647_v50 }
 0x3d5   :  { %v3551_v12 = vpop.f32.mrb[120].mxu0  ;;  %v4444_v23 = vpop.f32.mrb[120].mxu1 }
 0x3d6   :  { %v6014_v22 = vpack.c.bf16 %v4871_v33, %v4871_v33  ;;  %v4872_v16 = vmax.f32 %v4763_v17, 0.0  ;;  %v3755_v58 = vadd.f32 %v3551_v12, %v9844_v20  ;;  %v6905_v0 = vpop.f32.mrb[121].mxu0  ;;  %v7133_v63 = vpop.f32.mrb[121].mxu1 }
 0x3d7   :  { %v3554_v4 = vpop.f32.mrb[122].mxu0  ;;  %v4447_v60 = vpop.f32.mrb[122].mxu1 }
 0x3d8   :  { %5418 = vst.msk [vmem:[%s9733_s3 + $0x130] sm:$0xf] %vm5341_vm5, %v6014_v22  ;;  %v6015_v61 = vpack.c.bf16 %v4872_v16, %v4872_v16  ;;  %v4648_v26 = vadd.f32 %v4444_v23, %v3755_v58  ;;  %v3756_v32 = vadd.f32 %v3554_v4, %v9845_v42  ;;  %v6906_v28 = vpop.f32.mrb[123].mxu0  ;;  %v7134_v3 = vpop.f32.mrb[123].mxu1  ;;  %v9850_v23 = vld [vmem:[#allocation46_spill] sm:$0xff] }
 0x3da   :  { %5419 = vst.msk [vmem:[%s9733_s3 + $0x134] sm:$0xf] %vm5341_vm5, %v6015_v61  ;;  %v4764_v24 = vadd.f32 %v9485_v54, %v4648_v26  ;;  %v4649_v29 = vadd.f32 %v4447_v60, %v3756_v32  ;;  %v9851_v60 = vld [vmem:[#allocation47_spill] sm:$0xff] }
 0x3dc   :  { %v4873_v45 = vmax.f32 %v4764_v24, 0.0  ;;  %v4765_v36 = vadd.f32 %v9485_v54, %v4649_v29 }
 0x3dd   :  { %v3559_v19 = vpop.f32.mrb[124].mxu0  ;;  %v4452_v41 = vpop.f32.mrb[124].mxu1 }
 0x3de   :  { %v6016_v9 = vpack.c.bf16 %v4873_v45, %v4873_v45  ;;  %v4874_v62 = vmax.f32 %v4765_v36, 0.0  ;;  %v3757_v34 = vadd.f32 %v3559_v19, %v9846_v25  ;;  %v6909_v37 = vpop.f32.mrb[125].mxu0  ;;  %v7137_v52 = vpop.f32.mrb[125].mxu1 }
 0x3df   :  { %v3562_v55 = vpop.f32.mrb[126].mxu0  ;;  %v4455_v8 = vpop.f32.mrb[126].mxu1 }
 0x3e0   :  { %5420 = vst.msk [vmem:[%s9733_s3 + $0x138] sm:$0xf] %vm5341_vm5, %v6016_v9  ;;  %v6017_v35 = vpack.c.bf16 %v4874_v62, %v4874_v62  ;;  %v4650_v2 = vadd.f32 %v4452_v41, %v3757_v34  ;;  %v3758_v46 = vadd.f32 %v3562_v55, %v9847_v57  ;;  %v6910_v15 = vpop.f32.mrb[127].mxu0  ;;  %v7138_v31 = vpop.f32.mrb[127].mxu1  ;;  %v9852_v41 = vld [vmem:[#allocation48_spill] sm:$0xff] }
 0x3e2   :  { %5421 = vst.msk [vmem:[%s9733_s3 + $0x13c] sm:$0xf] %vm5341_vm5, %v6017_v35  ;;  %v4766_v14 = vadd.f32 %v9485_v54, %v4650_v2  ;;  %v4651_v47 = vadd.f32 %v4455_v8, %v3758_v46  ;;  %v9853_v8 = vld [vmem:[#allocation49_spill] sm:$0xff] }
 0x3e4   :  { %v4875_v39 = vmax.f32 %v4766_v14, 0.0  ;;  %v4767_v10 = vadd.f32 %v9485_v54, %v4651_v47 }
 0x3e5   :  { %v3567_v56 = vpop.f32.mrb[128].mxu0  ;;  %v4460_v49 = vpop.f32.mrb[128].mxu1 }
 0x3e6   :  { %v6018_v7 = vpack.c.bf16 %v4875_v39, %v4875_v39  ;;  %v4876_v40 = vmax.f32 %v4767_v10, 0.0  ;;  %v3759_v27 = vadd.f32 %v3567_v56, %v9848_v5  ;;  %v6913_v44 = vpop.f32.mrb[129].mxu0  ;;  %v7141_v51 = vpop.f32.mrb[129].mxu1 }
 0x3e7   :  { %v3570_v21 = vpop.f32.mrb[130].mxu0  ;;  %v4463_v11 = vpop.f32.mrb[130].mxu1 }
 0x3e8   :  { %5422 = vst.msk [vmem:[%s9733_s3 + $0x140] sm:$0xf] %vm5341_vm5, %v6018_v7  ;;  %v6019_v43 = vpack.c.bf16 %v4876_v40, %v4876_v40  ;;  %v4652_v53 = vadd.f32 %v4460_v49, %v3759_v27  ;;  %v3760_v48 = vadd.f32 %v3570_v21, %v9849_v18  ;;  %v6914_v59 = vpop.f32.mrb[131].mxu0  ;;  %v7142_v38 = vpop.f32.mrb[131].mxu1  ;;  %v9854_v49 = vld [vmem:[#allocation50_spill] sm:$0xff] }
 0x3ea   :  { %5423 = vst.msk [vmem:[%s9733_s3 + $0x144] sm:$0xf] %vm5341_vm5, %v6019_v43  ;;  %v4768_v6 = vadd.f32 %v9485_v54, %v4652_v53  ;;  %v4653_v13 = vadd.f32 %v4463_v11, %v3760_v48  ;;  %v9855_v11 = vld [vmem:[#allocation51_spill] sm:$0xff] }
 0x3ec   :  { %v4877_v1 = vmax.f32 %v4768_v6, 0.0  ;;  %v4769_v30 = vadd.f32 %v9485_v54, %v4653_v13 }
 0x3ed   :  { %v3575_v50 = vpop.f32.mrb[132].mxu0  ;;  %v4468_v33 = vpop.f32.mrb[132].mxu1 }
 0x3ee   :  { %v6020_v17 = vpack.c.bf16 %v4877_v1, %v4877_v1  ;;  %v4878_v12 = vmax.f32 %v4769_v30, 0.0  ;;  %v3761_v22 = vadd.f32 %v3575_v50, %v9850_v23  ;;  %v6917_v16 = vpop.f32.mrb[133].mxu0  ;;  %v7145_v20 = vpop.f32.mrb[133].mxu1 }
 0x3ef   :  { %v3578_v58 = vpop.f32.mrb[134].mxu0  ;;  %v4471_v0 = vpop.f32.mrb[134].mxu1 }
 0x3f0   :  { %5424 = vst.msk [vmem:[%s9733_s3 + $0x148] sm:$0xf] %vm5341_vm5, %v6020_v17  ;;  %v6021_v63 = vpack.c.bf16 %v4878_v12, %v4878_v12  ;;  %v4654_v4 = vadd.f32 %v4468_v33, %v3761_v22  ;;  %v3762_v61 = vadd.f32 %v3578_v58, %v9851_v60  ;;  %v6918_v26 = vpop.f32.mrb[135].mxu0  ;;  %v7146_v42 = vpop.f32.mrb[135].mxu1  ;;  %v9856_v33 = vld [vmem:[#allocation52_spill] sm:$0xff] }
 0x3f2   :  { %5425 = vst.msk [vmem:[%s9733_s3 + $0x14c] sm:$0xf] %vm5341_vm5, %v6021_v63  ;;  %v4770_v32 = vadd.f32 %v9485_v54, %v4654_v4  ;;  %v4655_v28 = vadd.f32 %v4471_v0, %v3762_v61  ;;  %v9857_v0 = vld [vmem:[#allocation53_spill] sm:$0xff] }
 0x3f4   :  { %v4879_v3 = vmax.f32 %v4770_v32, 0.0  ;;  %v4771_v24 = vadd.f32 %v9485_v54, %v4655_v28 }
 0x3f5   :  { %v3583_v29 = vpop.f32.mrb[136].mxu0  ;;  %v4476_v45 = vpop.f32.mrb[136].mxu1 }
 0x3f6   :  { %v6022_v36 = vpack.c.bf16 %v4879_v3, %v4879_v3  ;;  %v4880_v19 = vmax.f32 %v4771_v24, 0.0  ;;  %v3763_v9 = vadd.f32 %v3583_v29, %v9852_v41  ;;  %v6921_v62 = vpop.f32.mrb[137].mxu0  ;;  %v7149_v25 = vpop.f32.mrb[137].mxu1 }
 0x3f7   :  { %v3586_v34 = vpop.f32.mrb[138].mxu0  ;;  %v4479_v37 = vpop.f32.mrb[138].mxu1 }
 0x3f8   :  { %5426 = vst.msk [vmem:[%s9733_s3 + $0x150] sm:$0xf] %vm5341_vm5, %v6022_v36  ;;  %v6023_v52 = vpack.c.bf16 %v4880_v19, %v4880_v19  ;;  %v4656_v55 = vadd.f32 %v4476_v45, %v3763_v9  ;;  %v3764_v35 = vadd.f32 %v3586_v34, %v9853_v8  ;;  %v6922_v2 = vpop.f32.mrb[139].mxu0  ;;  %v7150_v57 = vpop.f32.mrb[139].mxu1  ;;  %v9858_v45 = vld [vmem:[#allocation54_spill] sm:$0xff] }
 0x3fa   :  { %5427 = vst.msk [vmem:[%s9733_s3 + $0x154] sm:$0xf] %vm5341_vm5, %v6023_v52  ;;  %v4772_v46 = vadd.f32 %v9485_v54, %v4656_v55  ;;  %v4657_v15 = vadd.f32 %v4479_v37, %v3764_v35  ;;  %v9859_v37 = vld [vmem:[#allocation55_spill] sm:$0xff] }
 0x3fc   :  { %v4881_v31 = vmax.f32 %v4772_v46, 0.0  ;;  %v4773_v14 = vadd.f32 %v9485_v54, %v4657_v15 }
 0x3fd   :  { %v3591_v47 = vpop.f32.mrb[140].mxu0  ;;  %v4484_v39 = vpop.f32.mrb[140].mxu1 }
 0x3fe   :  { %v6024_v10 = vpack.c.bf16 %v4881_v31, %v4881_v31  ;;  %v4882_v56 = vmax.f32 %v4773_v14, 0.0  ;;  %v3765_v7 = vadd.f32 %v3591_v47, %v9854_v49  ;;  %v6925_v40 = vpop.f32.mrb[141].mxu0  ;;  %v7153_v5 = vpop.f32.mrb[141].mxu1 }
 0x3ff   :  { %v3594_v27 = vpop.f32.mrb[142].mxu0  ;;  %v4487_v44 = vpop.f32.mrb[142].mxu1 }
 0x400   :  { %5428 = vst.msk [vmem:[%s9733_s3 + $0x158] sm:$0xf] %vm5341_vm5, %v6024_v10  ;;  %v6025_v51 = vpack.c.bf16 %v4882_v56, %v4882_v56  ;;  %v4658_v21 = vadd.f32 %v4484_v39, %v3765_v7  ;;  %v3766_v43 = vadd.f32 %v3594_v27, %v9855_v11  ;;  %v6926_v53 = vpop.f32.mrb[143].mxu0  ;;  %v7154_v18 = vpop.f32.mrb[143].mxu1  ;;  %v9860_v39 = vld [vmem:[#allocation56_spill] sm:$0xff] }
 0x402   :  { %5429 = vst.msk [vmem:[%s9733_s3 + $0x15c] sm:$0xf] %vm5341_vm5, %v6025_v51  ;;  %v4774_v48 = vadd.f32 %v9485_v54, %v4658_v21  ;;  %v4659_v59 = vadd.f32 %v4487_v44, %v3766_v43  ;;  %v9861_v44 = vld [vmem:[#allocation57_spill] sm:$0xff] }
 0x404   :  { %v4883_v38 = vmax.f32 %v4774_v48, 0.0  ;;  %v4775_v6 = vadd.f32 %v9485_v54, %v4659_v59 }
 0x405   :  { %v3599_v13 = vpop.f32.mrb[144].mxu0  ;;  %v4492_v1 = vpop.f32.mrb[144].mxu1 }
 0x406   :  { %v6026_v30 = vpack.c.bf16 %v4883_v38, %v4883_v38  ;;  %v4884_v50 = vmax.f32 %v4775_v6, 0.0  ;;  %v3767_v17 = vadd.f32 %v3599_v13, %v9856_v33  ;;  %v6929_v12 = vpop.f32.mrb[145].mxu0  ;;  %v7157_v23 = vpop.f32.mrb[145].mxu1 }
 0x407   :  { %v3602_v22 = vpop.f32.mrb[146].mxu0  ;;  %v4495_v16 = vpop.f32.mrb[146].mxu1 }
 0x408   :  { %5430 = vst.msk [vmem:[%s9733_s3 + $0x160] sm:$0xf] %vm5341_vm5, %v6026_v30  ;;  %v6027_v20 = vpack.c.bf16 %v4884_v50, %v4884_v50  ;;  %v4660_v58 = vadd.f32 %v4492_v1, %v3767_v17  ;;  %v3768_v63 = vadd.f32 %v3602_v22, %v9857_v0  ;;  %v6930_v4 = vpop.f32.mrb[147].mxu0  ;;  %v7158_v60 = vpop.f32.mrb[147].mxu1  ;;  %v9862_v1 = vld [vmem:[#allocation58_spill] sm:$0xff] }
 0x40a   :  { %5431 = vst.msk [vmem:[%s9733_s3 + $0x164] sm:$0xf] %vm5341_vm5, %v6027_v20  ;;  %v4776_v61 = vadd.f32 %v9485_v54, %v4660_v58  ;;  %v4661_v26 = vadd.f32 %v4495_v16, %v3768_v63  ;;  %v9863_v16 = vld [vmem:[#allocation59_spill] sm:$0xff] }
 0x40c   :  { %v4885_v42 = vmax.f32 %v4776_v61, 0.0  ;;  %v4777_v32 = vadd.f32 %v9485_v54, %v4661_v26 }
 0x40d   :  { %v3607_v28 = vpop.f32.mrb[148].mxu0  ;;  %v4500_v3 = vpop.f32.mrb[148].mxu1 }
 0x40e   :  { %v6028_v24 = vpack.c.bf16 %v4885_v42, %v4885_v42  ;;  %v4886_v29 = vmax.f32 %v4777_v32, 0.0  ;;  %v3769_v36 = vadd.f32 %v3607_v28, %v9858_v45  ;;  %v6933_v19 = vpop.f32.mrb[149].mxu0  ;;  %v7161_v41 = vpop.f32.mrb[149].mxu1 }
 0x40f   :  { %v3610_v9 = vpop.f32.mrb[150].mxu0  ;;  %v4503_v62 = vpop.f32.mrb[150].mxu1 }
 0x410   :  { %5432 = vst.msk [vmem:[%s9733_s3 + $0x168] sm:$0xf] %vm5341_vm5, %v6028_v24  ;;  %v6029_v25 = vpack.c.bf16 %v4886_v29, %v4886_v29  ;;  %v4662_v34 = vadd.f32 %v4500_v3, %v3769_v36  ;;  %v3770_v52 = vadd.f32 %v3610_v9, %v9859_v37  ;;  %v6934_v55 = vpop.f32.mrb[151].mxu0  ;;  %v7162_v8 = vpop.f32.mrb[151].mxu1  ;;  %v9864_v3 = vld [vmem:[#allocation60_spill] sm:$0xff] }
 0x412   :  { %5433 = vst.msk [vmem:[%s9733_s3 + $0x16c] sm:$0xf] %vm5341_vm5, %v6029_v25  ;;  %v4778_v35 = vadd.f32 %v9485_v54, %v4662_v34  ;;  %v4663_v2 = vadd.f32 %v4503_v62, %v3770_v52  ;;  %v9865_v62 = vld [vmem:[#allocation61_spill] sm:$0xff] }
 0x414   :  { %v4887_v57 = vmax.f32 %v4778_v35, 0.0  ;;  %v4779_v46 = vadd.f32 %v9485_v54, %v4663_v2 }
 0x415   :  { %v3615_v15 = vpop.f32.mrb[152].mxu0  ;;  %v4508_v31 = vpop.f32.mrb[152].mxu1 }
 0x416   :  { %v6030_v14 = vpack.c.bf16 %v4887_v57, %v4887_v57  ;;  %v4888_v47 = vmax.f32 %v4779_v46, 0.0  ;;  %v3771_v10 = vadd.f32 %v3615_v15, %v9860_v39  ;;  %v6937_v56 = vpop.f32.mrb[153].mxu0  ;;  %v7165_v49 = vpop.f32.mrb[153].mxu1 }
 0x417   :  { %v3618_v7 = vpop.f32.mrb[154].mxu0  ;;  %v4511_v40 = vpop.f32.mrb[154].mxu1 }
 0x418   :  { %5434 = vst.msk [vmem:[%s9733_s3 + $0x170] sm:$0xf] %vm5341_vm5, %v6030_v14  ;;  %v6031_v5 = vpack.c.bf16 %v4888_v47, %v4888_v47  ;;  %v4664_v27 = vadd.f32 %v4508_v31, %v3771_v10  ;;  %v3772_v51 = vadd.f32 %v3618_v7, %v9861_v44  ;;  %v6938_v21 = vpop.f32.mrb[155].mxu0  ;;  %v7166_v11 = vpop.f32.mrb[155].mxu1  ;;  %v9866_v31 = vld [vmem:[#allocation62_spill] sm:$0xff] }
 0x41a   :  { %5435 = vst.msk [vmem:[%s9733_s3 + $0x174] sm:$0xf] %vm5341_vm5, %v6031_v5  ;;  %v4780_v43 = vadd.f32 %v9485_v54, %v4664_v27  ;;  %v4665_v53 = vadd.f32 %v4511_v40, %v3772_v51  ;;  %v9867_v40 = vld [vmem:[#allocation63_spill] sm:$0xff] }
 0x41c   :  { %v4889_v18 = vmax.f32 %v4780_v43, 0.0  ;;  %v4781_v48 = vadd.f32 %v9485_v54, %v4665_v53 }
 0x41d   :  { %v3623_v59 = vpop.f32.mrb[156].mxu0  ;;  %v4516_v38 = vpop.f32.mrb[156].mxu1 }
 0x41e   :  { %v6032_v6 = vpack.c.bf16 %v4889_v18, %v4889_v18  ;;  %v4890_v13 = vmax.f32 %v4781_v48, 0.0  ;;  %v3773_v30 = vadd.f32 %v3623_v59, %v9862_v1  ;;  %v6941_v50 = vpop.f32.mrb[157].mxu0  ;;  %v7169_v33 = vpop.f32.mrb[157].mxu1 }
 0x41f   :  { %v3626_v17 = vpop.f32.mrb[158].mxu0  ;;  %v4519_v12 = vpop.f32.mrb[158].mxu1 }
 0x420   :  { %5436 = vst.msk [vmem:[%s9733_s3 + $0x178] sm:$0xf] %vm5341_vm5, %v6032_v6  ;;  %v6033_v23 = vpack.c.bf16 %v4890_v13, %v4890_v13  ;;  %v4666_v22 = vadd.f32 %v4516_v38, %v3773_v30  ;;  %v3774_v20 = vadd.f32 %v3626_v17, %v9863_v16  ;;  %v6942_v58 = vpop.f32.mrb[159].mxu0  ;;  %v7170_v0 = vpop.f32.mrb[159].mxu1  ;;  %v9868_v38 = vld [vmem:[#allocation64_spill] sm:$0xff] }
 0x422   :  { %5437 = vst.msk [vmem:[%s9733_s3 + $0x17c] sm:$0xf] %vm5341_vm5, %v6033_v23  ;;  %v4782_v63 = vadd.f32 %v9485_v54, %v4666_v22  ;;  %v4667_v4 = vadd.f32 %v4519_v12, %v3774_v20  ;;  %v9869_v12 = vld [vmem:[#allocation65_spill] sm:$0xff] }
 0x424   :  { %v4891_v60 = vmax.f32 %v4782_v63, 0.0  ;;  %v4783_v61 = vadd.f32 %v9485_v54, %v4667_v4 }
 0x425   :  { %v3631_v26 = vpop.f32.mrb[160].mxu0  ;;  %v4524_v42 = vpop.f32.mrb[160].mxu1 }
 0x426   :  { %v6034_v32 = vpack.c.bf16 %v4891_v60, %v4891_v60  ;;  %v4892_v28 = vmax.f32 %v4783_v61, 0.0  ;;  %v3775_v24 = vadd.f32 %v3631_v26, %v9864_v3  ;;  %v6945_v29 = vpop.f32.mrb[161].mxu0  ;;  %v7173_v45 = vpop.f32.mrb[161].mxu1 }
 0x427   :  { %v3634_v36 = vpop.f32.mrb[162].mxu0  ;;  %v4527_v19 = vpop.f32.mrb[162].mxu1 }
 0x428   :  { %5438 = vst.msk [vmem:[%s9733_s3 + $0x180] sm:$0xf] %vm5341_vm5, %v6034_v32  ;;  %v6035_v41 = vpack.c.bf16 %v4892_v28, %v4892_v28  ;;  %v4668_v9 = vadd.f32 %v4524_v42, %v3775_v24  ;;  %v3776_v25 = vadd.f32 %v3634_v36, %v9865_v62  ;;  %v6946_v34 = vpop.f32.mrb[163].mxu0  ;;  %v7174_v37 = vpop.f32.mrb[163].mxu1  ;;  %v9870_v42 = vld [vmem:[#allocation66_spill] sm:$0xff] }
 0x42a   :  { %5439 = vst.msk [vmem:[%s9733_s3 + $0x184] sm:$0xf] %vm5341_vm5, %v6035_v41  ;;  %v4784_v52 = vadd.f32 %v9485_v54, %v4668_v9  ;;  %v4669_v55 = vadd.f32 %v4527_v19, %v3776_v25  ;;  %v9871_v19 = vld [vmem:[#allocation67_spill] sm:$0xff] }
 0x42c   :  { %v4893_v8 = vmax.f32 %v4784_v52, 0.0  ;;  %v4785_v35 = vadd.f32 %v9485_v54, %v4669_v55 }
 0x42d   :  { %v3639_v2 = vpop.f32.mrb[164].mxu0  ;;  %v4532_v57 = vpop.f32.mrb[164].mxu1 }
 0x42e   :  { %v6036_v46 = vpack.c.bf16 %v4893_v8, %v4893_v8  ;;  %v4894_v15 = vmax.f32 %v4785_v35, 0.0  ;;  %v3777_v14 = vadd.f32 %v3639_v2, %v9866_v31  ;;  %v6949_v47 = vpop.f32.mrb[165].mxu0  ;;  %v7177_v39 = vpop.f32.mrb[165].mxu1 }
 0x42f   :  { %v3642_v10 = vpop.f32.mrb[166].mxu0  ;;  %v4535_v56 = vpop.f32.mrb[166].mxu1 }
 0x430   :  { %5440 = vst.msk [vmem:[%s9733_s3 + $0x188] sm:$0xf] %vm5341_vm5, %v6036_v46  ;;  %v6037_v49 = vpack.c.bf16 %v4894_v15, %v4894_v15  ;;  %v4670_v7 = vadd.f32 %v4532_v57, %v3777_v14  ;;  %v3778_v5 = vadd.f32 %v3642_v10, %v9867_v40  ;;  %v6950_v27 = vpop.f32.mrb[167].mxu0  ;;  %v7178_v44 = vpop.f32.mrb[167].mxu1  ;;  %v9872_v57 = vld [vmem:[#allocation68_spill] sm:$0xff] }
 0x432   :  { %5441 = vst.msk [vmem:[%s9733_s3 + $0x18c] sm:$0xf] %vm5341_vm5, %v6037_v49  ;;  %v4786_v51 = vadd.f32 %v9485_v54, %v4670_v7  ;;  %v4671_v21 = vadd.f32 %v4535_v56, %v3778_v5  ;;  %v9873_v56 = vld [vmem:[#allocation69_spill] sm:$0xff] }
 0x434   :  { %v4895_v11 = vmax.f32 %v4786_v51, 0.0  ;;  %v4787_v43 = vadd.f32 %v9485_v54, %v4671_v21 }
 0x435   :  { %v3647_v53 = vpop.f32.mrb[168].mxu0  ;;  %v4540_v18 = vpop.f32.mrb[168].mxu1 }
 0x436   :  { %v6038_v48 = vpack.c.bf16 %v4895_v11, %v4895_v11  ;;  %v4896_v59 = vmax.f32 %v4787_v43, 0.0  ;;  %v3779_v6 = vadd.f32 %v3647_v53, %v9868_v38  ;;  %v6953_v13 = vpop.f32.mrb[169].mxu0  ;;  %v7181_v1 = vpop.f32.mrb[169].mxu1 }
 0x437   :  { %v3650_v30 = vpop.f32.mrb[170].mxu0  ;;  %v4543_v50 = vpop.f32.mrb[170].mxu1 }
 0x438   :  { %5442 = vst.msk [vmem:[%s9733_s3 + $0x190] sm:$0xf] %vm5341_vm5, %v6038_v48  ;;  %v6039_v33 = vpack.c.bf16 %v4896_v59, %v4896_v59  ;;  %v4672_v17 = vadd.f32 %v4540_v18, %v3779_v6  ;;  %v3780_v23 = vadd.f32 %v3650_v30, %v9869_v12  ;;  %v6954_v22 = vpop.f32.mrb[171].mxu0  ;;  %v7182_v16 = vpop.f32.mrb[171].mxu1  ;;  %v9874_v18 = vld [vmem:[#allocation70_spill] sm:$0xff] }
 0x43a   :  { %5443 = vst.msk [vmem:[%s9733_s3 + $0x194] sm:$0xf] %vm5341_vm5, %v6039_v33  ;;  %v4788_v20 = vadd.f32 %v9485_v54, %v4672_v17  ;;  %v4673_v58 = vadd.f32 %v4543_v50, %v3780_v23 }
 0x43c   :  { %v4897_v0 = vmax.f32 %v4788_v20, 0.0  ;;  %v4789_v63 = vadd.f32 %v9485_v54, %v4673_v58 }
 0x43d   :  { %v3655_v4 = vpop.f32.mrb[172].mxu0  ;;  %v4548_v60 = vpop.f32.mrb[172].mxu1 }
 0x43e   :  { %v6040_v61 = vpack.c.bf16 %v4897_v0, %v4897_v0  ;;  %v4898_v26 = vmax.f32 %v4789_v63, 0.0  ;;  %v3781_v32 = vadd.f32 %v3655_v4, %v9870_v42  ;;  %v6957_v28 = vpop.f32.mrb[173].mxu0  ;;  %v7185_v3 = vpop.f32.mrb[173].mxu1 }
 0x43f   :  { %v3658_v24 = vpop.f32.mrb[174].mxu0  ;;  %v4551_v29 = vpop.f32.mrb[174].mxu1 }
 0x440   :  { %5444 = vst.msk [vmem:[%s9733_s3 + $0x198] sm:$0xf] %vm5341_vm5, %v6040_v61  ;;  %v6041_v45 = vpack.c.bf16 %v4898_v26, %v4898_v26  ;;  %v4674_v36 = vadd.f32 %v4548_v60, %v3781_v32  ;;  %v3782_v41 = vadd.f32 %v3658_v24, %v9871_v19  ;;  %v6958_v9 = vpop.f32.mrb[175].mxu0  ;;  %v7186_v62 = vpop.f32.mrb[175].mxu1 }
 0x442   :  { %5445 = vst.msk [vmem:[%s9733_s3 + $0x19c] sm:$0xf] %vm5341_vm5, %v6041_v45  ;;  %v4790_v25 = vadd.f32 %v9485_v54, %v4674_v36  ;;  %v4675_v34 = vadd.f32 %v4551_v29, %v3782_v41 }
 0x444   :  { %v4899_v37 = vmax.f32 %v4790_v25, 0.0  ;;  %v4791_v52 = vadd.f32 %v9485_v54, %v4675_v34 }
 0x445   :  { %v3663_v55 = vpop.f32.mrb[176].mxu0  ;;  %v4556_v8 = vpop.f32.mrb[176].mxu1 }
 0x446   :  { %v6042_v35 = vpack.c.bf16 %v4899_v37, %v4899_v37  ;;  %v4900_v2 = vmax.f32 %v4791_v52, 0.0  ;;  %v3783_v46 = vadd.f32 %v3663_v55, %v9872_v57  ;;  %v6961_v15 = vpop.f32.mrb[177].mxu0  ;;  %v7189_v31 = vpop.f32.mrb[177].mxu1 }
 0x447   :  { %v3666_v14 = vpop.f32.mrb[178].mxu0  ;;  %v4559_v47 = vpop.f32.mrb[178].mxu1 }
 0x448   :  { %5446 = vst.msk [vmem:[%s9733_s3 + $0x1a0] sm:$0xf] %vm5341_vm5, %v6042_v35  ;;  %v6043_v39 = vpack.c.bf16 %v4900_v2, %v4900_v2  ;;  %v4676_v10 = vadd.f32 %v4556_v8, %v3783_v46  ;;  %v3784_v49 = vadd.f32 %v3666_v14, %v9873_v56  ;;  %v6962_v7 = vpop.f32.mrb[179].mxu0  ;;  %v7190_v40 = vpop.f32.mrb[179].mxu1 }
 0x44a   :  { %5447 = vst.msk [vmem:[%s9733_s3 + $0x1a4] sm:$0xf] %vm5341_vm5, %v6043_v39  ;;  %v4792_v5 = vadd.f32 %v9485_v54, %v4676_v10  ;;  %v4677_v27 = vadd.f32 %v4559_v47, %v3784_v49 }
 0x44c   :  { %v4901_v44 = vmax.f32 %v4792_v5, 0.0  ;;  %v4793_v51 = vadd.f32 %v9485_v54, %v4677_v27 }
 0x44d   :  { %v3671_v21 = vpop.f32.mrb[180].mxu0  ;;  %v4564_v11 = vpop.f32.mrb[180].mxu1 }
 0x44e   :  { %v6044_v43 = vpack.c.bf16 %v4901_v44, %v4901_v44  ;;  %v4902_v53 = vmax.f32 %v4793_v51, 0.0  ;;  %v3785_v48 = vadd.f32 %v3671_v21, %v9874_v18  ;;  %v6965_v59 = vpop.f32.mrb[181].mxu0  ;;  %v7193_v38 = vpop.f32.mrb[181].mxu1 }
 0x44f   :  { %v3674_v6 = vpop.f32.mrb[182].mxu0  ;;  %v4567_v13 = vpop.f32.mrb[182].mxu1 }
 0x450   :  { %5448 = vst.msk [vmem:[%s9733_s3 + $0x1a8] sm:$0xf] %vm5341_vm5, %v6044_v43  ;;  %v6045_v1 = vpack.c.bf16 %v4902_v53, %v4902_v53  ;;  %v4678_v30 = vadd.f32 %v4564_v11, %v3785_v48  ;;  %v6966_v50 = vpop.f32.mrb[183].mxu0  ;;  %v7194_v33 = vpop.f32.mrb[183].mxu1 }
 0x452   :  { %5449 = vst.msk [vmem:[%s9733_s3 + $0x1ac] sm:$0xf] %vm5341_vm5, %v6045_v1  ;;  %v4794_v17 = vadd.f32 %v9485_v54, %v4678_v30 }
 0x454   :  { %v4903_v12 = vmax.f32 %v4794_v17, 0.0 }
 0x456   :  { %v6046_v23 = vpack.c.bf16 %v4903_v12, %v4903_v12 }
 0x458   :  { %5451 = vst.msk [vmem:[%s9733_s3 + $0x1b0] sm:$0x3] %vm5450_vm6, %v6046_v23 }

// kernel: dqn_forward.4
= control target key start
LH: loop header
LB: loop body
LE: loop exit
PB: predicated region body
PF: predicated region fallthrough
CT: control target
= control target key end

     0   :  { %v7939_v0 = vmov 0.0   ;;  %vm5734_vm0 = vmmov 0   ;;  %vm149_vm1 = vsmask.f32 7424  ;;  %vm1039_vm2 = vsmask.f32 6400  ;;  %s7928_s1 = inlined_call_operand.vmem [shape: bf16[4,128,64], index: 1, kind: input, shape index: {}]   ;;  %s7929_s0 = inlined_call_operand.vmem [shape: bf16[224,128], index: 0, kind: input, shape index: {}]   ;;  %s7930_s3 = inlined_call_operand.vmem [shape: bf16[9,64,64], index: 3, kind: input, shape index: {}]   ;;  %s7931_s2 = inlined_call_operand.vmem [shape: f32[1,64], index: 2, kind: input, shape index: {}]   ;;  %s7932_s4 = inlined_call_operand.vmem [shape: f32[1,64], index: 4, kind: input, shape index: {}]   ;;  %s7933_s5 = inlined_call_operand.vmem [shape: bf16[224,64], index: 5, kind: output, shape index: {}]  }
   0x1   :  { %4805 = vmatprep.subr.bf16.mxu0 %v7939_v0  ;;  %5617 = vmatprep.subr.bf16.mxu1 %v7939_v0  ;;  %v5636_v1 = vld [vmem:[%s7928_s1 + $0x40] sm:$0xff]   ;;  %v5637_v2 = vld [vmem:[%s7928_s1 + $0x48] sm:$0xff]   ;;  %v5638_v3 = vld [vmem:[%s7928_s1 + $0x50] sm:$0xff]   ;;  %vm766_vm3 = vcmask 1046528   ;;  %vm1389_vm4 = vcmask 523264   ;;  %vm2305_vm6 = vcmask 1042432  }
   0x2   :  { %4821 = vmatprep.mubr.msk.bf16.mxu0 %vm5734_vm0, %v7939_v0  ;;  %4849 = vmatprep.mubr.msk.bf16.mxu1 %vm5734_vm0, %v7939_v0  ;;  %v5639_v4 = vld [vmem:[%s7928_s1 + $0x58] sm:$0xff]   ;;  %v5640_v5 = vld [vmem:[%s7928_s1 + $0x60] sm:$0xff]   ;;  %v5808_v8 = vld [vmem:[%s7929_s0 + $0x8] sm:$0xff]   ;;  %vm2567_vm5 = vsmask.f32 2304  ;;  %vm2929_vm7 = vcmask 1041408  }
   0x3   :  { %4806 = vmatpush3.bf16.msra.mxu0 %v5636_v1  ;;  %5625 = vmatpush3.bf16.msra.mxu1 %v5636_v1  ;;  %v5796_v6 = vld [vmem:[%s7929_s0] sm:$0xff]   ;;  %v5801_v7 = vld [vmem:[%s7929_s0 + $0x38] sm:$0xff]   ;;  %v5641_v9 = vld [vmem:[%s7928_s1 + $0x68] sm:$0xff]   ;;  %v158_v15 = vshll.u32 %v5808_v8, 16  ;;  %v162_v27 = vshrl.u32 %v5808_v8, 16  ;;  %vm3194_vm9 = vcmask 1045504  }
   0x4   :  { %4807 = vmatprep.subr.bf16.mxu0 %v7939_v0  ;;  %5618 = vmatprep.subr.bf16.mxu1 %v7939_v0  ;;  %v153_v10 = vshll.u32 %v5796_v6, 16  ;;  %v5817_v11 = vld [vmem:[%s7929_s0 + $0x40] sm:$0xff]   ;;  %v206_v12 = vshll.u32 %v5801_v7, 16  ;;  %v5642_v13 = vld [vmem:[%s7928_s1 + $0x70] sm:$0xff]   ;;  %v151_v14 = vshrl.u32 %v5796_v6, 16  ;;  %v210_v17 = vshrl.u32 %v5801_v7, 16 }
   0x5   :  { %v214_v19 = vshll.u32 %v5817_v11, 16  ;;  %v5643_v20 = vld [vmem:[%s7928_s1 + $0x78] sm:$0xff]   ;;  %v160_v21 = vrot.slane %v158_v15, 1  ;;  %v5839_v22 = vld [vmem:[%s7929_s0 + $0x10] sm:$0xff]   ;;  %v5845_v26 = vld [vmem:[%s7929_s0 + $0x48] sm:$0xff]   ;;  %v218_v32 = vshrl.u32 %v5817_v11, 16 }
   0x6   :  { %v155_v16 = vrot.slane %v153_v10, 1  ;;  %v5828_v18 = vrot.slane %v206_v12, 1  ;;  %v5648_v28 = vld [vmem:[%s7928_s1] sm:$0xff]   ;;  %v166_v29 = vshll.u32 %v5839_v22, 16  ;;  %v222_v33 = vshll.u32 %v5845_v26, 16  ;;  %v5862_v34 = vld [vmem:[%s7929_s0 + $0x18] sm:$0xff]  }
   0x7   :  { %4808 = vmatpush3.bf16.msra.mxu0 %v5637_v2  ;;  %5626 = vmatpush3.bf16.msra.mxu1 %v5637_v2  ;;  %v216_v25 = vrot.slane %v214_v19, 1  ;;  %v5659_v35 = vld [vmem:[%s7928_s1 + $0x80] sm:$0xff]   ;;  %v5871_v36 = vld [vmem:[%s7929_s0 + $0x50] sm:$0xff]   ;;  %v5649_v37 = vld [vmem:[%s7928_s1 + $0x8] sm:$0xff]   ;;  %v164_v38 = vor.u32 %v162_v27, %v160_v21  ;;  %v174_v42 = vshll.u32 %v5862_v34, 16  ;;  %v170_v48 = vshrl.u32 %v5839_v22, 16 }
   0x8   :  { %4809 = vmatprep.subr.bf16.mxu0 %v7939_v0  ;;  %5619 = vmatprep.subr.bf16.mxu1 %v7939_v0  ;;  %v156_v23 = vor.u32 %v155_v16, %v151_v14  ;;  %v212_v24 = vor.u32 %v210_v17, %v5828_v18  ;;  %v168_v39 = vrot.slane %v166_v29, 1  ;;  %v224_v41 = vrot.slane %v222_v33, 1  ;;  %v5660_v43 = vld [vmem:[%s7928_s1 + $0x88] sm:$0xff]   ;;  %v5652_v44 = vld [vmem:[%s7928_s1 + $0x10] sm:$0xff]   ;;  %v5898_v50 = vld [vmem:[%s7929_s0 + $0x20] sm:$0xff]  }
   0x9   :  { %v220_v40 = vor.u32 %v218_v32, %v216_v25  ;;  %v230_v45 = vshll.u32 %v5871_v36, 16  ;;  %v226_v49 = vshrl.u32 %v5845_v26, 16  ;;  %v176_v51 = vrot.slane %v174_v42, 1  ;;  %v5655_v52 = vld [vmem:[%s7928_s1 + $0x18] sm:$0xff]   ;;  %v5664_v55 = vld [vmem:[%s7928_s1 + $0x90] sm:$0xff]   ;;  %v5919_v58 = vld [vmem:[%s7929_s0 + $0x28] sm:$0xff]  }
   0xa   :  { %v161_v30 = vsel %vm149_vm1, %v156_v23, %v160_v21  ;;  %v217_v31 = vsel %vm149_vm1, %v212_v24, %v216_v25  ;;  %v169_v46 = vsel %vm149_vm1, %v164_v38, %v168_v39  ;;  %v5906_v53 = vld [vmem:[%s7929_s0 + $0x58] sm:$0xff]   ;;  %v172_v56 = vor.u32 %v170_v48, %v168_v39  ;;  %v5929_v63 = vld [vmem:[%s7929_s0 + $0x60] sm:$0xff]   ;;  %v5661_v15 = vld [vmem:[%s7928_s1 + $0x28] sm:$0xff]  }
   0xb   :  { %4810 = vmatpush3.bf16.msra.mxu0 %v5638_v3  ;;  %5627 = vmatpush3.bf16.msra.mxu1 %v5638_v3  ;;  %v225_v47 = vsel %vm149_vm1, %v220_v40, %v224_v41  ;;  %v232_v54 = vrot.slane %v230_v45, 1  ;;  %v228_v57 = vor.u32 %v226_v49, %v224_v41  ;;  %v178_v59 = vshrl.u32 %v5862_v34, 16  ;;  %v5658_v3 = vld [vmem:[%s7928_s1 + $0x20] sm:$0xff]   ;;  %v5665_v23 = vld [vmem:[%s7928_s1 + $0x30] sm:$0xff]   ;;  %v5670_v41 = vld [vmem:[%s7928_s1 + $0x38] sm:$0xff]  }
   0xc   :  { %4811 = vmatprep.subr.bf16.mxu0 %v7939_v0  ;;  %5620 = vmatprep.subr.bf16.mxu1 %v7939_v0  ;;  %v182_v60 = vshll.u32 %v5898_v50, 16  ;;  %v234_v61 = vshrl.u32 %v5871_v36, 16  ;;  %v238_v62 = vshll.u32 %v5906_v53, 16  ;;  %v177_v1 = vsel %vm149_vm1, %v172_v56, %v176_v51  ;;  %v5669_v17 = vld [vmem:[%s7928_s1 + $0xa0] sm:$0xff]   ;;  %v5963_v24 = vld [vmem:[%s7929_s0 + $0x30] sm:$0xff]  }
   0xd   :  { %v233_v2 = vsel %vm149_vm1, %v228_v57, %v232_v54  ;;  %v246_v10 = vshll.u32 %v5929_v63, 16  ;;  %v180_v12 = vor.u32 %v178_v59, %v176_v51  ;;  %v186_v16 = vshrl.u32 %v5898_v50, 16  ;;  %v5668_v29 = vld [vmem:[%s7929_s0 + $0x68] ss:$0 sps:$4 sm:$0x11]   ;;  %v5985_v33 = vld [vmem:[%s7929_s0 + $0xc] sm:$0xff]  }
   0xe   :  { %v240_v14 = vrot.slane %v238_v62, 1  ;;  %v250_v32 = vshrl.u32 %v5929_v63, 16  ;;  %v198_v40 = vshll.u32 %v5963_v24, 16  ;;  %v5672_v42 = vld [vmem:[%s7928_s1 + $0xb0] sm:$0xff]   ;;  %v5674_v51 = vld [vmem:[%s7928_s1 + $0xb8] sm:$0xff]   ;;  %vm3752_vm10 = vcmask 1044480  }
   0xf   :  { %4812 = vmatpush3.bf16.msra.mxu0 %v5639_v4  ;;  %5628 = vmatpush3.bf16.msra.mxu1 %v5639_v4  ;;  %v190_v4 = vshll.u32 %v5919_v58, 16  ;;  %v248_v21 = vrot.slane %v246_v10, 1  ;;  %v6006_v45 = vld [vmem:[%s7929_s0 + $0x14] sm:$0xff]   ;;  %vm3454_vm8 = vsmask.f32 5376  ;;  %vm4160_vm11 = vcmask 519168  }
  0x10   :  { %4813 = vmatprep.subr.bf16.mxu0 %v7939_v0  ;;  %5621 = vmatprep.subr.bf16.mxu1 %v7939_v0  ;;  %v200_v57 = vrot.slane %v198_v40, 1 }
  0x11   :  { %v192_v19 = vrot.slane %v190_v4, 1  ;;  %v252_v59 = vor.u32 %v250_v32, %v248_v21 }
  0x13   :  { %4814 = vmatpush3.bf16.msra.mxu0 %v5640_v5  ;;  %5629 = vmatpush3.bf16.msra.mxu1 %v5640_v5  ;;  %v5666_v5 = vld [vmem:[%s7928_s1 + $0x98] sm:$0xff]  }
  0x14   :  { %4815 = vmatprep.subr.bf16.mxu0 %v7939_v0  ;;  %5622 = vmatprep.subr.bf16.mxu1 %v7939_v0 }
  0x17   :  { %4816 = vmatpush3.bf16.msra.mxu0 %v5641_v9  ;;  %5630 = vmatpush3.bf16.msra.mxu1 %v5641_v9  ;;  %v184_v9 = vrot.slane %v182_v60, 1  ;;  %v6020_v60 = vld [vmem:[%s7929_s0 + $0x1c] sm:$0xff]  }
  0x18   :  { %4817 = vmatprep.subr.bf16.mxu0 %v7939_v0  ;;  %5623 = vmatprep.subr.bf16.mxu1 %v7939_v0 }
  0x19   :  { %v185_v25 = vsel %vm149_vm1, %v180_v12, %v184_v9  ;;  %v188_v38 = vor.u32 %v186_v16, %v184_v9  ;;  %v1070_v9 = vshll.u32 %v6020_v60, 16 }
  0x1b   :  { %4818 = vmatpush3.bf16.msra.mxu0 %v5642_v13  ;;  %5631 = vmatpush3.bf16.msra.mxu1 %v5642_v13  ;;  %v236_v13 = vor.u32 %v234_v61, %v232_v54  ;;  %v193_v48 = vsel %vm149_vm1, %v188_v38, %v192_v19  ;;  %v1052_v54 = vshll.u32 %v5985_v33, 16  ;;  %v1061_v61 = vshll.u32 %v6006_v45, 16 }
  0x1c   :  { %4819 = vmatprep.subr.bf16.mxu0 %v7939_v0  ;;  %5624 = vmatprep.subr.bf16.mxu1 %v7939_v0 }
  0x1d   :  { %v241_v27 = vsel %vm149_vm1, %v236_v13, %v240_v14  ;;  %v1063_v4 = vrot.slane %v1061_v61, 2  ;;  %v6112_v61 = vld [vmem:[%s7929_s0 + $0x3c] sm:$0xff]  }
  0x1f   :  { %4820 = vmatpush3.bf16.msra.mxu0 %v5643_v20  ;;  %5632 = vmatpush3.bf16.msra.mxu1 %v5643_v20  ;;  %v242_v20 = vshrl.u32 %v5906_v53, 16 }
  0x20   :  { %4873 = vmatprep.subr.bf16.mxu1 %v7939_v0  ;;  %4941 = vmatprep.subr.bf16.mxu0 %v7939_v0 }
  0x21   :  { %v244_v39 = vor.u32 %v242_v20, %v240_v14  ;;  %v1072_v14 = vrot.slane %v1070_v9, 2 }
  0x22   :  { %4822 = vmatmul.mubr.bf16.vlgmr.msra.gmra.mrb[0].mxu0 %v161_v30  ;;  %4850 = vmatmul.mubr.bf16.vlgmr.msra.gmra.mrb[0].mxu1 %v217_v31  ;;  %v5671_v30 = vld [vmem:[%s7928_s1 + $0xa8] sm:$0xff]  }
  0x23   :  { %4874 = vmatpush3.bf16.msra.mxu1 %v5648_v28  ;;  %4825 = vmatprep.mubr.msk.bf16.mxu0 %vm5734_vm0, %v7939_v0  ;;  %v194_v28 = vshrl.u32 %v5919_v58, 16  ;;  %v5977_v31 = vld [vmem:[%s7929_s0 + $0x4] sm:$0xfe]   ;;  %v249_v49 = vsel %vm149_vm1, %v244_v39, %v248_v21  ;;  %v6061_v39 = vld [vmem:[%s7929_s0 + $0x2c] sm:$0xff]  }
  0x24   :  { %4875 = vmatprep.subr.bf16.mxu1 %v7939_v0  ;;  %4853 = vmatprep.mubr.msk.bf16.mxu1 %vm5734_vm0, %v7939_v0 }
  0x25   :  { %4942 = vmatpush3.bf16.msra.mxu0 %v5659_v35  ;;  %v1041_v35 = vshrl.u32 %v5977_v31, 16  ;;  %v196_v56 = vor.u32 %v194_v28, %v192_v19 }
  0x26   :  { %4943 = vmatprep.subr.bf16.mxu0 %v7939_v0 }
  0x27   :  { %4876 = vmatpush3.bf16.msra.mxu1 %v5649_v37  ;;  %v1044_v37 = vshll.u32 %v5977_v31, 16 }
  0x28   :  { %4877 = vmatprep.subr.bf16.mxu1 %v7939_v0 }
  0x29   :  { %4944 = vmatpush3.bf16.msra.mxu0 %v5660_v43  ;;  %v1049_v43 = vshrl.u32 %v5985_v33, 16 }
  0x2a   :  { %4826 = vmatmul.mubr.bf16.gmra.mrb[4].mxu0 %v169_v46  ;;  %4854 = vmatmul.mubr.bf16.gmra.mrb[4].mxu1 %v225_v47  ;;  %v1043_v46 = vrot.slane %v1041_v35, 1  ;;  %v1046_v47 = vrot.slane %v1044_v37, 2  ;;  %v5673_v37 = vld [vmem:[%s7928_s1 + $0xc0] sm:$0xff]  }
  0x2b   :  { %4878 = vmatpush3.bf16.msra.mxu1 %v5652_v44  ;;  %4829 = vmatprep.mubr.msk.bf16.mxu0 %vm5734_vm0, %v7939_v0  ;;  %v254_v44 = vshll.u32 %v5668_v29, 16 }
  0x2c   :  { %4857 = vmatprep.mubr.msk.bf16.mxu1 %vm5734_vm0, %v7939_v0  ;;  %4879 = vmatprep.subr.bf16.mxu1 %v7939_v0 }
  0x2d   :  { %4945 = vmatprep.subr.bf16.mxu0 %v7939_v0  ;;  %v256_v62 = vrot.slane %v254_v44, 1  ;;  %v1088_v44 = vshll.u32 %v6061_v39, 16 }
  0x2e   :  { %4946 = vmatpush3.bf16.msra.mxu0 %v5664_v55  ;;  %v1058_v55 = vshrl.u32 %v6006_v45, 16 }
  0x2f   :  { %4880 = vmatpush3.bf16.msra.mxu1 %v5655_v52  ;;  %4947 = vmatprep.subr.bf16.mxu0 %v7939_v0  ;;  %v1051_v52 = vrot.slane %v1049_v43, 1  ;;  %v257_v19 = vsel %vm149_vm1, %v252_v59, %v256_v62  ;;  %v1085_v43 = vshrl.u32 %v6061_v39, 16 }
  0x30   :  { %4881 = vmatprep.subr.bf16.mxu1 %v7939_v0 }
  0x32   :  { %4830 = vmatmul.mubr.bf16.gmra.mrb[8].mxu0 %v177_v1  ;;  %4858 = vmatmul.mubr.bf16.gmra.mrb[8].mxu1 %v233_v2  ;;  %v1047_v1 = vor.u32 %v1046_v47, %v1043_v46  ;;  %v1054_v2 = vrot.slane %v1052_v54, 2  ;;  %v1090_v46 = vrot.slane %v1088_v44, 2  ;;  %v5680_v47 = vld [vmem:[%s7928_s1 + $0xd0] sm:$0xff]  }
  0x33   :  { %4833 = vmatprep.mubr.msk.bf16.mxu0 %vm5734_vm0, %v7939_v0  ;;  %4861 = vmatprep.mubr.msk.bf16.mxu1 %vm5734_vm0, %v7939_v0 }
  0x34   :  { %4882 = vmatpush3.bf16.msra.mxu1 %v5658_v3  ;;  %4948 = vmatpush3.bf16.msra.mxu0 %v5666_v5  ;;  %v1060_v3 = vrot.slane %v1058_v55, 1  ;;  %v1067_v5 = vshrl.u32 %v6020_v60, 16  ;;  %v1055_v10 = vor.u32 %v1054_v2, %v1051_v52  ;;  %v5683_v55 = vld [vmem:[%s7928_s1 + $0xd8] sm:$0xff]   ;;  %v1103_v2 = vshrl.u32 %v6112_v61, 16 }
  0x35   :  { %4883 = vmatprep.subr.bf16.mxu1 %v7939_v0  ;;  %4949 = vmatprep.subr.bf16.mxu0 %v7939_v0 }
  0x36   :  { %v1064_v12 = vor.u32 %v1063_v4, %v1060_v3  ;;  %v1069_v13 = vrot.slane %v1067_v5, 1  ;;  %v6032_v16 = vsel %vm1039_vm2, %v1047_v1, %v1055_v10  ;;  %v772_v1 = vrot.slane %v6020_v60, 1  ;;  %v5688_v4 = vld [vmem:[%s7928_s1 + $0xe8] sm:$0xff]   ;;  %v5690_v60 = vld [vmem:[%s7928_s1 + $0xf0] sm:$0xff]  }
  0x37   :  { %v1106_v3 = vshll.u32 %v6112_v61, 16 }
  0x38   :  { %4884 = vmatpush3.bf16.msra.mxu1 %v5661_v15  ;;  %4950 = vmatpush3.bf16.msra.mxu0 %v5669_v17  ;;  %v202_v15 = vshrl.u32 %v5963_v24, 16  ;;  %v201_v17 = vsel %vm149_vm1, %v196_v56, %v200_v57  ;;  %v6037_v20 = vsel %vm1039_vm2, %v1055_v10, %v1064_v12  ;;  %v1073_v21 = vor.u32 %v1072_v14, %v1069_v13 }
  0x39   :  { %4885 = vmatprep.subr.bf16.mxu1 %v7939_v0  ;;  %4951 = vmatprep.subr.bf16.mxu0 %v7939_v0  ;;  %v1108_v5 = vrot.slane %v1106_v3, 2  ;;  %v5699_v3 = vld [vmem:[%s7930_s3 + $0x30] sm:$0xff]  }
  0x3a   :  { %4834 = vmatmul.mubr.bf16.gmra.mrb[12].mxu0 %v185_v25  ;;  %4862 = vmatmul.mubr.bf16.gmra.mrb[12].mxu1 %v241_v27  ;;  %v6045_v25 = vsel %vm1039_vm2, %v1064_v12, %v1073_v21  ;;  %v204_v27 = vor.u32 %v202_v15, %v200_v57  ;;  %v6136_v12 = vld [vmem:[%s7929_s0 + $0x44] sm:$0xff]  }
  0x3b   :  { %4837 = vmatprep.mubr.msk.bf16.mxu0 %vm5734_vm0, %v7939_v0  ;;  %4865 = vmatprep.mubr.msk.bf16.mxu1 %vm5734_vm0, %v7939_v0  ;;  %v1112_v15 = vshrl.u32 %v6136_v12, 16 }
  0x3c   :  { %4886 = vmatpush3.bf16.msra.mxu1 %v5665_v23  ;;  %4952 = vmatpush3.bf16.msra.mxu0 %v5671_v30  ;;  %v6042_v23 = vld [vmem:[%s7929_s0 + $0x24] sm:$0xff]   ;;  %v209_v35 = vsel %vm149_vm1, %v204_v27, %v5828_v18  ;;  %v767_v18 = vrot.slane %v5977_v31, 1 }
  0x3d   :  { %4887 = vmatprep.subr.bf16.mxu1 %v7939_v0  ;;  %4953 = vmatprep.subr.bf16.mxu0 %v7939_v0  ;;  %v1076_v28 = vshrl.u32 %v6042_v23, 16  ;;  %v1079_v29 = vshll.u32 %v6042_v23, 16  ;;  %v774_v14 = vrot.slane %v6042_v23, 1  ;;  %v5689_v23 = vld [vmem:[%s7929_s0 + $0x4c] sm:$0xff]  }
  0x3f   :  { %v1078_v30 = vrot.slane %v1076_v28, 1  ;;  %v1081_v32 = vrot.slane %v1079_v29, 2  ;;  %v775_v27 = vsel %vm766_vm3, %v772_v1, %v774_v14 }
  0x40   :  { %4888 = vmatpush3.bf16.msra.mxu1 %v5670_v41  ;;  %4954 = vmatpush3.bf16.msra.mxu0 %v5672_v42  ;;  %v768_v41 = vrot.slane %v5985_v33, 1  ;;  %v5677_v42 = vld [vmem:[%s7928_s1 + $0xc8] sm:$0xff]  }
  0x41   :  { %5009 = vmatprep.subr.bf16.mxu1 %v7939_v0  ;;  %4955 = vmatprep.subr.bf16.mxu0 %v7939_v0  ;;  %v1082_v38 = vor.u32 %v1081_v32, %v1078_v30  ;;  %v776_v30 = vrot.slane %v6061_v39, 1  ;;  %v1121_v32 = vshrl.u32 %v5689_v23, 16 }
  0x42   :  { %4838 = vmatmul.mubr.bf16.gmra.mrb[16].mxu0 %v193_v48  ;;  %4866 = vmatmul.mubr.bf16.gmra.mrb[16].mxu1 %v249_v49  ;;  %v769_v31 = vsel %vm766_vm3, %v767_v18, %v768_v41  ;;  %v6087_v48 = vld [vmem:[%s7929_s0 + $0x34] sm:$0xff]  }
  0x43   :  { %4841 = vmatprep.mubr.msk.bf16.mxu0 %vm5734_vm0, %v7939_v0  ;;  %4869 = vmatprep.mubr.msk.bf16.mxu1 %vm5734_vm0, %v7939_v0  ;;  %v6064_v40 = vsel %vm1039_vm2, %v1073_v21, %v1082_v38  ;;  %v1094_v52 = vshrl.u32 %v6087_v48, 16  ;;  %v1097_v54 = vshll.u32 %v6087_v48, 16  ;;  %v777_v18 = vsel %vm766_vm3, %v774_v14, %v776_v30 }
  0x44   :  { %4956 = vmatpush3.bf16.msra.mxu0 %v5674_v51  ;;  %v770_v51 = vrot.slane %v6006_v45, 1  ;;  %v5685_v45 = vld [vmem:[%s7928_s1 + $0xe0] sm:$0xff]   ;;  %v778_v39 = vrot.slane %v6087_v48, 1 }
  0x45   :  { %5077 = vmatprep.subr.bf16.mxu0 %v7939_v0  ;;  %v1099_v56 = vrot.slane %v1097_v54, 2 }
  0x46   :  { %v771_v57 = vsel %vm766_vm3, %v768_v41, %v770_v51  ;;  %v773_v9 = vsel %vm766_vm3, %v770_v51, %v772_v1 }
  0x4a   :  { %4842 = vmatmul.mubr.bf16.gmra.mrb[20].mxu0 %v201_v17  ;;  %4870 = vmatmul.mubr.bf16.gmra.mrb[20].mxu1 %v257_v19  ;;  %v1115_v17 = vshll.u32 %v6136_v12, 16  ;;  %v5693_v19 = vld [vmem:[%s7928_s1 + $0xf8] sm:$0xff]  }
  0x4b   :  { %4845 = vmatprep.mubr.msk.bf16.mxu0 %vm5734_vm0, %v7939_v0  ;;  %4889 = vmatprep.mubr.msk.bf16.mxu1 %vm5734_vm0, %v7939_v0 }
  0x4c   :  { %v1117_v21 = vrot.slane %v1115_v17, 2 }
  0x52   :  { %4846 = vmatmul.mubr.bf16.gmra.mrb[24].mxu0 %v209_v35  ;;  %4890 = vmatmul.mubr.bf16.vlgmr.msra.gmra.mrb[24].mxu1 %v5796_v6  ;;  %v1087_v6 = vrot.slane %v1085_v43, 1  ;;  %v1124_v35 = vshll.u32 %v5689_v23, 16 }
  0x53   :  { %5010 = vmatpush3.bf16.msra.mxu1 %v5673_v37  ;;  %4893 = vmatprep.mubr.msk.bf16.mxu1 %vm5734_vm0, %v7939_v0  ;;  %v1123_v37 = vrot.slane %v1121_v32, 1 }
  0x54   :  { %4957 = vmatprep.mubr.msk.bf16.mxu0 %vm5734_vm0, %v7939_v0  ;;  %5011 = vmatprep.subr.bf16.mxu1 %v7939_v0  ;;  %v1091_v33 = vor.u32 %v1090_v46, %v1087_v6 }
  0x56   :  { %v6090_v49 = vsel %vm1039_vm2, %v1082_v38, %v1091_v33  ;;  %v1126_v38 = vrot.slane %v1124_v35, 2 }
  0x57   :  { %5012 = vmatpush3.bf16.msra.mxu1 %v5677_v42 }
  0x58   :  { %5013 = vmatprep.subr.bf16.mxu1 %v7939_v0  ;;  %v1127_v41 = vor.u32 %v1126_v38, %v1123_v37 }
  0x5a   :  { %4894 = vmatmul.mubr.bf16.gmra.mrb[28].mxu1 %v5808_v8  ;;  %4958 = vmatmul.mubr.bf16.vlgmr.msra.gmra.mrb[28].mxu0 %v769_v31  ;;  %v1096_v8 = vrot.slane %v1094_v52, 1  ;;  %v779_v31 = vsel %vm766_vm3, %v776_v30, %v778_v39 }
  0x5b   :  { %4897 = vmatprep.mubr.msk.bf16.mxu1 %vm5734_vm0, %v7939_v0  ;;  %4961 = vmatprep.mubr.msk.bf16.mxu0 %vm5734_vm0, %v7939_v0 }
  0x5c   :  { %5014 = vmatpush3.bf16.msra.mxu1 %v5680_v47  ;;  %v1100_v59 = vor.u32 %v1099_v56, %v1096_v8  ;;  %v780_v47 = vrot.slane %v6112_v61, 1  ;;  %v6229_v56 = vld [vmem:[%s7929_s0 + $0x64] sm:$0xff]  }
  0x5d   :  { %5015 = vmatprep.subr.bf16.mxu1 %v7939_v0 }
  0x5e   :  { %v6115_v62 = vsel %vm1039_vm2, %v1091_v33, %v1100_v59  ;;  %v781_v48 = vsel %vm766_vm3, %v778_v39, %v780_v47 }
  0x60   :  { %5016 = vmatpush3.bf16.msra.mxu1 %v5683_v55  ;;  %v6217_v55 = vld [vmem:[%s7929_s0 + $0x5c] sm:$0xff]  }
  0x61   :  { %5017 = vmatprep.subr.bf16.mxu1 %v7939_v0 }
  0x62   :  { %4898 = vmatmul.mubr.bf16.gmra.mrb[32].mxu1 %v5839_v22  ;;  %4962 = vmatmul.mubr.bf16.gmra.mrb[32].mxu0 %v771_v57  ;;  %v1105_v22 = vrot.slane %v1103_v2, 1 }
  0x63   :  { %4901 = vmatprep.mubr.msk.bf16.mxu1 %vm5734_vm0, %v7939_v0  ;;  %4965 = vmatprep.mubr.msk.bf16.mxu0 %vm5734_vm0, %v7939_v0 }
  0x64   :  { %5018 = vmatpush3.bf16.msra.mxu1 %v5685_v45  ;;  %v1109_v10 = vor.u32 %v1108_v5, %v1105_v22  ;;  %v1142_v22 = vshll.u32 %v6217_v55, 16 }
  0x65   :  { %5019 = vmatprep.subr.bf16.mxu1 %v7939_v0 }
  0x66   :  { %v6140_v13 = vsel %vm1039_vm2, %v1100_v59, %v1109_v10  ;;  %v5695_v59 = vld [vmem:[%s7929_s0 + $0x6c] ss:$0 sps:$4 sm:$0x11]   ;;  %v1144_v14 = vrot.slane %v1142_v22, 2 }
  0x68   :  { %5020 = vmatpush3.bf16.msra.mxu1 %v5688_v4  ;;  %v1139_v4 = vshrl.u32 %v6217_v55, 16 }
  0x69   :  { %5021 = vmatprep.subr.bf16.mxu1 %v7939_v0 }
  0x6a   :  { %4902 = vmatmul.mubr.bf16.gmra.mrb[36].mxu1 %v5862_v34  ;;  %4966 = vmatmul.mubr.bf16.gmra.mrb[36].mxu0 %v773_v9  ;;  %v1114_v34 = vrot.slane %v1112_v15, 1 }
  0x6b   :  { %4905 = vmatprep.mubr.msk.bf16.mxu1 %vm5734_vm0, %v7939_v0  ;;  %4969 = vmatprep.mubr.msk.bf16.mxu0 %vm5734_vm0, %v7939_v0 }
  0x6c   :  { %5022 = vmatpush3.bf16.msra.mxu1 %v5690_v60  ;;  %v1118_v28 = vor.u32 %v1117_v21, %v1114_v34  ;;  %v1148_v34 = vshrl.u32 %v6229_v56, 16 }
  0x6d   :  { %5023 = vmatprep.subr.bf16.mxu1 %v7939_v0 }
  0x6e   :  { %v6159_v29 = vsel %vm1039_vm2, %v1109_v10, %v1118_v28  ;;  %v6173_v42 = vsel %vm1039_vm2, %v1118_v28, %v1127_v41  ;;  %v1150_v30 = vrot.slane %v1148_v34, 1 }
  0x70   :  { %5024 = vmatpush3.bf16.msra.mxu1 %v5693_v19 }
  0x71   :  { %5137 = vmatprep.subr.bf16.mxu1 %v7939_v0 }
  0x72   :  { %4906 = vmatmul.mubr.bf16.gmra.mrb[40].mxu1 %v5898_v50  ;;  %4970 = vmatmul.mubr.bf16.gmra.mrb[40].mxu0 %v775_v27  ;;  %v5691_v50 = vld [vmem:[%s7929_s0 + $0x54] sm:$0xff]   ;;  %v1151_v27 = vshll.u32 %v6229_v56, 16 }
  0x73   :  { %4909 = vmatprep.mubr.msk.bf16.mxu1 %vm5734_vm0, %v7939_v0  ;;  %4973 = vmatprep.mubr.msk.bf16.mxu0 %vm5734_vm0, %v7939_v0  ;;  %v1130_v43 = vshrl.u32 %v5691_v50, 16  ;;  %v1133_v44 = vshll.u32 %v5691_v50, 16 }
  0x74   :  { %v1153_v38 = vrot.slane %v1151_v27, 2 }
  0x75   :  { %v1132_v6 = vrot.slane %v1130_v43, 1  ;;  %v1135_v46 = vrot.slane %v1133_v44, 2 }
  0x76   :  { %v1154_v39 = vor.u32 %v1153_v38, %v1150_v30 }
  0x77   :  { %v6182_v33 = vor.u32 %v1135_v46, %v1132_v6 }
  0x7a   :  { %4910 = vmatmul.mubr.bf16.gmra.mrb[44].mxu1 %v5919_v58  ;;  %4974 = vmatmul.mubr.bf16.gmra.mrb[44].mxu0 %v777_v18  ;;  %v6186_v58 = vsel %vm1039_vm2, %v1127_v41, %v6182_v33  ;;  %v5696_v18 = vld [vmem:[%s7929_s0 + $0x6c] ss:$0 sps:$4 sm:$0x33]  }
  0x7b   :  { %4913 = vmatprep.mubr.msk.bf16.mxu1 %vm5734_vm0, %v7939_v0  ;;  %4977 = vmatprep.mubr.msk.bf16.mxu0 %vm5734_vm0, %v7939_v0  ;;  %v1157_v43 = vshrl.u32 %v5696_v18, 16  ;;  %v1160_v44 = vshll.u32 %v5696_v18, 16 }
  0x82   :  { %4914 = vmatmul.mubr.bf16.gmra.mrb[48].mxu1 %v5963_v24  ;;  %4978 = vmatmul.mubr.bf16.gmra.mrb[48].mxu0 %v779_v31  ;;  %v782_v24 = vrot.slane %v6136_v12, 1 }
  0x83   :  { %4917 = vmatprep.mubr.msk.bf16.mxu1 %vm5734_vm0, %v7939_v0  ;;  %4981 = vmatprep.mubr.msk.bf16.mxu0 %vm5734_vm0, %v7939_v0 }
  0x84   :  { %v783_v51 = vsel %vm766_vm3, %v780_v47, %v782_v24 }
  0x8a   :  { %4918 = vmatmul.mubr.bf16.gmra.mrb[52].mxu1 %v5801_v7  ;;  %4982 = vmatmul.mubr.bf16.gmra.mrb[52].mxu0 %v781_v48  ;;  %v784_v7 = vrot.slane %v5689_v23, 1  ;;  %v1159_v48 = vrot.slane %v1157_v43, 1 }
  0x8b   :  { %4921 = vmatprep.mubr.msk.bf16.mxu1 %vm5734_vm0, %v7939_v0  ;;  %4985 = vmatprep.mubr.msk.bf16.mxu0 %vm5734_vm0, %v7939_v0 }
  0x8c   :  { %v785_v52 = vsel %vm766_vm3, %v782_v24, %v784_v7  ;;  %v1162_v24 = vrot.slane %v1160_v44, 2 }
  0x92   :  { %4922 = vmatmul.mubr.bf16.gmra.mrb[56].mxu1 %v5817_v11  ;;  %4986 = vmatmul.mubr.bf16.gmra.mrb[56].mxu0 %v783_v51  ;;  %v786_v11 = vrot.slane %v5691_v50, 1 }
  0x93   :  { %4925 = vmatprep.mubr.msk.bf16.mxu1 %vm5734_vm0, %v7939_v0  ;;  %4989 = vmatprep.mubr.msk.bf16.mxu0 %vm5734_vm0, %v7939_v0 }
  0x94   :  { %v787_v54 = vsel %vm766_vm3, %v784_v7, %v786_v11  ;;  %v5700_v7 = vld [vmem:[%s7930_s3] sm:$0xff]  }
  0x9a   :  { %4926 = vmatmul.mubr.bf16.gmra.mrb[60].mxu1 %v5845_v26  ;;  %4990 = vmatmul.mubr.bf16.gmra.mrb[60].mxu0 %v785_v52  ;;  %v788_v26 = vrot.slane %v6217_v55, 1  ;;  %v5702_v55 = vld [vmem:[%s7930_s3 + $0x8] sm:$0xff]  }
  0x9b   :  { %4929 = vmatprep.mubr.msk.bf16.mxu1 %vm5734_vm0, %v7939_v0  ;;  %4993 = vmatprep.mubr.msk.bf16.mxu0 %vm5734_vm0, %v7939_v0 }
  0x9c   :  { %v789_v8 = vsel %vm766_vm3, %v786_v11, %v788_v26 }
  0xa2   :  { %4930 = vmatmul.mubr.bf16.gmra.mrb[64].mxu1 %v5871_v36  ;;  %4994 = vmatmul.mubr.bf16.gmra.mrb[64].mxu0 %v787_v54  ;;  %v790_v36 = vrot.slane %v6229_v56, 1  ;;  %v1163_v54 = vor.u32 %v1162_v24, %v1159_v48 }
  0xa3   :  { %4933 = vmatprep.mubr.msk.bf16.mxu1 %vm5734_vm0, %v7939_v0  ;;  %4997 = vmatprep.mubr.msk.bf16.mxu0 %vm5734_vm0, %v7939_v0 }
  0xa4   :  { %v791_v57 = vsel %vm766_vm3, %v788_v26, %v790_v36 }
  0xaa   :  { %4934 = vmatmul.mubr.bf16.gmra.mrb[68].mxu1 %v5906_v53  ;;  %4998 = vmatmul.mubr.bf16.gmra.mrb[68].mxu0 %v789_v8  ;;  %v792_v53 = vrot.slane %v5695_v59, 1  ;;  %v1164_v59 = vsel %vm1039_vm2, %v1154_v39, %v1163_v54 }
  0xab   :  { %4937 = vmatprep.mubr.msk.bf16.mxu1 %vm5734_vm0, %v7939_v0  ;;  %5001 = vmatprep.mubr.msk.bf16.mxu0 %vm5734_vm0, %v7939_v0 }
  0xac   :  { %v793_v45 = vsel %vm766_vm3, %v790_v36, %v792_v53 }
  0xb2   :  { %4938 = vmatmul.mubr.bf16.gmra.mrb[72].mxu1 %v5929_v63  ;;  %5002 = vmatmul.mubr.bf16.gmra.mrb[72].mxu0 %v791_v57  ;;  %v5697_v63 = vld [vmem:[%s7930_s3 + $0x20] sm:$0xff]  }
  0xb3   :  { %5005 = vmatprep.mubr.msk.bf16.mxu0 %vm5734_vm0, %v7939_v0  ;;  %5025 = vmatprep.mubr.msk.bf16.mxu1 %vm5734_vm0, %v7939_v0 }
  0xb4   :  { %5078 = vmatpush3.bf16.msra.mxu0 %v5697_v63 }
  0xb5   :  { %5079 = vmatprep.subr.bf16.mxu0 %v7939_v0 }
  0xba   :  { %5006 = vmatmul.mubr.bf16.gmra.mrb[76].mxu0 %v793_v45  ;;  %5026 = vmatmul.mubr.bf16.vlgmr.msra.gmra.mrb[76].mxu1 %v6032_v16  ;;  %v5698_v16 = vld [vmem:[%s7930_s3 + $0x28] sm:$0xff]   ;;  %v5703_v45 = vld [vmem:[%s7930_s3 + $0x10] sm:$0xff]  }
  0xbb   :  { %5029 = vmatprep.mubr.msk.bf16.mxu1 %vm5734_vm0, %v7939_v0  ;;  %5085 = vmatprep.mubr.msk.bf16.mxu0 %vm5734_vm0, %v7939_v0 }
  0xbc   :  { %5080 = vmatpush3.bf16.msra.mxu0 %v5698_v16  ;;  %5138 = vmatpush3.bf16.msra.mxu1 %v5700_v7 }
  0xbd   :  { %5081 = vmatprep.subr.bf16.mxu0 %v7939_v0  ;;  %5139 = vmatprep.subr.bf16.mxu1 %v7939_v0 }
  0xc0   :  { %5082 = vmatpush3.bf16.msra.mxu0 %v5699_v3  ;;  %5140 = vmatpush3.bf16.msra.mxu1 %v5702_v55 }
  0xc1   :  { %5083 = vmatprep.subr.bf16.mxu0 %v7939_v0  ;;  %5141 = vmatprep.subr.bf16.mxu1 %v7939_v0 }
  0xc2   :  { %5030 = vmatmul.mubr.bf16.gmra.mrb[80].mxu1 %v6037_v20 }
  0xc3   :  { %5033 = vmatprep.mubr.msk.bf16.mxu1 %vm5734_vm0, %v7939_v0 }
  0xc4   :  { %5142 = vmatpush3.bf16.msra.mxu1 %v5703_v45 }
  0xc5   :  { %5143 = vmatprep.subr.bf16.mxu1 %v7939_v0 }
  0xca   :  { %5034 = vmatmul.mubr.bf16.gmra.mrb[84].mxu1 %v6045_v25 }
  0xcb   :  { %5037 = vmatprep.mubr.msk.bf16.mxu1 %vm5734_vm0, %v7939_v0 }
  0xd2   :  { %5038 = vmatmul.mubr.bf16.gmra.mrb[88].mxu1 %v6064_v40 }
  0xd3   :  { %5041 = vmatprep.mubr.msk.bf16.mxu1 %vm5734_vm0, %v7939_v0 }
  0xda   :  { %5042 = vmatmul.mubr.bf16.gmra.mrb[92].mxu1 %v6090_v49 }
  0xdb   :  { %5045 = vmatprep.mubr.msk.bf16.mxu1 %vm5734_vm0, %v7939_v0 }
  0xe2   :  { %5046 = vmatmul.mubr.bf16.gmra.mrb[96].mxu1 %v6115_v62 }
  0xe3   :  { %5049 = vmatprep.mubr.msk.bf16.mxu1 %vm5734_vm0, %v7939_v0 }
  0xea   :  { %5050 = vmatmul.mubr.bf16.gmra.mrb[100].mxu1 %v6140_v13  ;;  %v1141_v13 = vrot.slane %v1139_v4, 1 }
  0xeb   :  { %5053 = vmatprep.mubr.msk.bf16.mxu1 %vm5734_vm0, %v7939_v0 }
  0xec   :  { %v1145_v21 = vor.u32 %v1144_v14, %v1141_v13 }
  0xee   :  { %v1146_v37 = vsel %vm1039_vm2, %v6182_v33, %v1145_v21  ;;  %v1155_v47 = vsel %vm1039_vm2, %v1145_v21, %v1154_v39 }
  0xf2   :  { %5054 = vmatmul.mubr.bf16.gmra.mrb[104].mxu1 %v6159_v29 }
  0xf3   :  { %5057 = vmatprep.mubr.msk.bf16.mxu1 %vm5734_vm0, %v7939_v0 }
  0xf5   :  { %v6281_v20 = vpop.f32.mrb[0].mxu1  ;;  %v6283_v25 = vpop.f32.mrb[0].mxu0 }
  0xf6   :  { %v4851_v40 = vpop.f32.mrb[1].mxu1  ;;  %v4823_v49 = vpop.f32.mrb[1].mxu0 }
  0xf7   :  { %v6285_v61 = vpop.f32.mrb[2].mxu1  ;;  %v6287_v62 = vpop.f32.mrb[2].mxu0  ;;  %v5701_v40 = vld [vmem:[%s7930_s3 + $0x38] sm:$0xff]  }
  0xf8   :  { %v4852_v1 = vpop.f32.mrb[3].mxu1  ;;  %v4824_v2 = vpop.f32.mrb[3].mxu0  ;;  %5084 = vmatpush3.bf16.msra.mxu0 %v5701_v40  ;;  %v5704_v49 = vld [vmem:[%s7930_s3 + $0x18] sm:$0xff]  }
  0xf9   :  { %5197 = vmatprep.subr.bf16.mxu0 %v7939_v0  ;;  %5144 = vmatpush3.bf16.msra.mxu1 %v5704_v49 }
  0xfa   :  { %5058 = vmatmul.mubr.bf16.gmra.mrb[108].mxu1 %v6173_v42  ;;  %5257 = vmatprep.subr.bf16.mxu1 %v7939_v0 }
  0xfb   :  { %5061 = vmatprep.mubr.msk.bf16.mxu1 %vm5734_vm0, %v7939_v0 }
  0xfd   :  { %v6298_v5 = vpop.f32.mrb[4].mxu1  ;;  %v6300_v9 = vpop.f32.mrb[4].mxu0 }
  0xfe   :  { %v4855_v10 = vpop.f32.mrb[5].mxu1  ;;  %v4827_v60 = vpop.f32.mrb[5].mxu0 }
  0xff   :  { %v6302_v12 = vpop.f32.mrb[6].mxu1  ;;  %v6304_v15 = vpop.f32.mrb[6].mxu0 }
 0x100   :  { %v4856_v17 = vpop.f32.mrb[7].mxu1  ;;  %v4828_v19 = vpop.f32.mrb[7].mxu0 }
 0x102   :  { %5062 = vmatmul.mubr.bf16.gmra.mrb[112].mxu1 %v6186_v58 }
 0x103   :  { %5065 = vmatprep.mubr.msk.bf16.mxu1 %vm5734_vm0, %v7939_v0 }
 0x105   :  { %v6311_v28 = vpop.f32.mrb[8].mxu1  ;;  %v6313_v23 = vpop.f32.mrb[8].mxu0 }
 0x106   :  { %v4859_v29 = vpop.f32.mrb[9].mxu1  ;;  %v4831_v32 = vpop.f32.mrb[9].mxu0 }
 0x107   :  { %v6315_v35 = vpop.f32.mrb[10].mxu1  ;;  %v6322_v41 = vpop.f32.mrb[10].mxu0 }
 0x108   :  { %v4860_v50 = vpop.f32.mrb[11].mxu1  ;;  %v4832_v42 = vpop.f32.mrb[11].mxu0 }
 0x10a   :  { %5066 = vmatmul.mubr.bf16.gmra.mrb[116].mxu1 %v1146_v37 }
 0x10b   :  { %5069 = vmatprep.mubr.msk.bf16.mxu1 %vm5734_vm0, %v7939_v0 }
 0x10d   :  { %v6326_v6 = vpop.f32.mrb[12].mxu1  ;;  %v6328_v46 = vpop.f32.mrb[12].mxu0 }
 0x10e   :  { %v4863_v31 = vpop.f32.mrb[13].mxu1  ;;  %v4835_v33 = vpop.f32.mrb[13].mxu0 }
 0x10f   :  { %v6330_v58 = vpop.f32.mrb[14].mxu1  ;;  %v6333_v51 = vpop.f32.mrb[14].mxu0 }
 0x110   :  { %v4864_v52 = vpop.f32.mrb[15].mxu1  ;;  %v4836_v11 = vpop.f32.mrb[15].mxu0 }
 0x112   :  { %5070 = vmatmul.mubr.bf16.gmra.mrb[120].mxu1 %v1155_v47 }
 0x113   :  { %5073 = vmatprep.mubr.msk.bf16.mxu1 %vm5734_vm0, %v7939_v0 }
 0x115   :  { %v6344_v26 = vpop.f32.mrb[16].mxu1  ;;  %v6346_v8 = vpop.f32.mrb[16].mxu0 }
 0x116   :  { %v4867_v56 = vpop.f32.mrb[17].mxu1  ;;  %v4839_v36 = vpop.f32.mrb[17].mxu0 }
 0x117   :  { %v6349_v57 = vpop.f32.mrb[18].mxu1  ;;  %v6352_v53 = vpop.f32.mrb[18].mxu0 }
 0x118   :  { %v4868_v63 = vpop.f32.mrb[19].mxu1  ;;  %v4840_v16 = vpop.f32.mrb[19].mxu0 }
 0x11a   :  { %5074 = vmatmul.mubr.bf16.gmra.mrb[124].mxu1 %v1164_v59 }
 0x11b   :  { %5145 = vmatprep.mubr.msk.bf16.mxu1 %vm5734_vm0, %v7939_v0 }
 0x11d   :  { %v6367_v1 = vpop.f32.mrb[20].mxu1  ;;  %v6369_v2 = vpop.f32.mrb[20].mxu0 }
 0x11e   :  { %v4871_v3 = vpop.f32.mrb[21].mxu1  ;;  %v4843_v4 = vpop.f32.mrb[21].mxu0 }
 0x11f   :  { %v6372_v22 = vpop.f32.mrb[22].mxu1  ;;  %v6374_v10 = vpop.f32.mrb[22].mxu0 }
 0x120   :  { %v4872_v60 = vpop.f32.mrb[23].mxu1  ;;  %v4844_v13 = vpop.f32.mrb[23].mxu0 }
 0x125   :  { %v551_v14 = vpop.f32.mrb[24].mxu1  ;;  %v6376_v17 = vpop.f32.mrb[24].mxu0 }
 0x126   :  { %v552_v19 = vadd.f32 %v551_v14, %v6283_v25  ;;  %v4891_v34 = vpop.f32.mrb[25].mxu1  ;;  %v4847_v21 = vpop.f32.mrb[25].mxu0 }
 0x127   :  { %v554_v27 = vpop.f32.mrb[26].mxu1  ;;  %v6379_v29 = vpop.f32.mrb[26].mxu0 }
 0x128   :  { %v555_v30 = vadd.f32 %v554_v27, %v6287_v62  ;;  %v4892_v32 = vpop.f32.mrb[27].mxu1  ;;  %v4848_v37 = vpop.f32.mrb[27].mxu0 }
 0x12d   :  { %v559_v38 = vpop.f32.mrb[28].mxu1  ;;  %v889_v18 = vpop.f32.mrb[28].mxu0 }
 0x12e   :  { %v560_v50 = vadd.f32 %v559_v38, %v6300_v9  ;;  %v6383_v42 = vadd.f32 %v889_v18, %v552_v19  ;;  %v4895_v39 = vpop.f32.mrb[29].mxu1  ;;  %v4959_v43 = vpop.f32.mrb[29].mxu0 }
 0x12f   :  { %v562_v44 = vpop.f32.mrb[30].mxu1  ;;  %v892_v31 = vpop.f32.mrb[30].mxu0 }
 0x130   :  { %v563_v25 = vadd.f32 %v562_v44, %v6304_v15  ;;  %v6386_v33 = vadd.f32 %v892_v31, %v555_v30  ;;  %v4896_v47 = vpop.f32.mrb[31].mxu1  ;;  %v4960_v48 = vpop.f32.mrb[31].mxu0 }
 0x135   :  { %v567_v24 = vpop.f32.mrb[32].mxu1  ;;  %v897_v62 = vpop.f32.mrb[32].mxu0 }
 0x136   :  { %v568_v7 = vadd.f32 %v567_v24, %v6313_v23  ;;  %v4899_v52 = vpop.f32.mrb[33].mxu1  ;;  %v4963_v11 = vpop.f32.mrb[33].mxu0  ;;  %v6389_v54 = vadd.f32 %v897_v62, %v560_v50 }
 0x137   :  { %v570_v9 = vpop.f32.mrb[34].mxu1  ;;  %v900_v55 = vpop.f32.mrb[34].mxu0 }
 0x138   :  { %v571_v56 = vadd.f32 %v570_v9, %v6322_v41  ;;  %v4900_v36 = vpop.f32.mrb[35].mxu1  ;;  %v4964_v59 = vpop.f32.mrb[35].mxu0  ;;  %v6392_v45 = vadd.f32 %v900_v55, %v563_v25 }
 0x13d   :  { %v575_v15 = vpop.f32.mrb[36].mxu1  ;;  %v905_v63 = vpop.f32.mrb[36].mxu0 }
 0x13e   :  { %v576_v16 = vadd.f32 %v575_v15, %v6328_v46  ;;  %v4903_v40 = vpop.f32.mrb[37].mxu1  ;;  %v4967_v49 = vpop.f32.mrb[37].mxu0  ;;  %v6395_v3 = vadd.f32 %v905_v63, %v568_v7 }
 0x13f   :  { %v578_v23 = vpop.f32.mrb[38].mxu1  ;;  %v908_v4 = vpop.f32.mrb[38].mxu0 }
 0x140   :  { %v579_v60 = vadd.f32 %v578_v23, %v6333_v51  ;;  %v4904_v13 = vpop.f32.mrb[39].mxu1  ;;  %v4968_v14 = vpop.f32.mrb[39].mxu0  ;;  %v6398_v19 = vadd.f32 %v908_v4, %v571_v56 }
 0x145   :  { %v583_v41 = vpop.f32.mrb[40].mxu1  ;;  %v913_v34 = vpop.f32.mrb[40].mxu0 }
 0x146   :  { %v584_v21 = vadd.f32 %v583_v41, %v6346_v8  ;;  %v4907_v27 = vpop.f32.mrb[41].mxu1  ;;  %v4971_v30 = vpop.f32.mrb[41].mxu0  ;;  %v6401_v32 = vadd.f32 %v913_v34, %v576_v16 }
 0x147   :  { %v586_v46 = vpop.f32.mrb[42].mxu1  ;;  %v916_v37 = vpop.f32.mrb[42].mxu0 }
 0x148   :  { %v587_v38 = vadd.f32 %v586_v46, %v6352_v53  ;;  %v4908_v18 = vpop.f32.mrb[43].mxu1  ;;  %v4972_v50 = vpop.f32.mrb[43].mxu0  ;;  %v6404_v39 = vadd.f32 %v916_v37, %v579_v60 }
 0x14d   :  { %v591_v51 = vpop.f32.mrb[44].mxu1  ;;  %v921_v43 = vpop.f32.mrb[44].mxu0 }
 0x14e   :  { %v592_v44 = vadd.f32 %v591_v51, %v6369_v2  ;;  %v4911_v31 = vpop.f32.mrb[45].mxu1  ;;  %v4975_v25 = vpop.f32.mrb[45].mxu0  ;;  %v6407_v47 = vadd.f32 %v921_v43, %v584_v21 }
 0x14f   :  { %v594_v8 = vpop.f32.mrb[46].mxu1  ;;  %v924_v48 = vpop.f32.mrb[46].mxu0 }
 0x150   :  { %v595_v24 = vadd.f32 %v594_v8, %v6374_v10  ;;  %v4912_v62 = vpop.f32.mrb[47].mxu1  ;;  %v4976_v7 = vpop.f32.mrb[47].mxu0  ;;  %v6410_v52 = vadd.f32 %v924_v48, %v587_v38 }
 0x155   :  { %v599_v53 = vpop.f32.mrb[48].mxu1  ;;  %v929_v11 = vpop.f32.mrb[48].mxu0 }
 0x156   :  { %v600_v9 = vadd.f32 %v599_v53, %v6376_v17  ;;  %v4915_v55 = vpop.f32.mrb[49].mxu1  ;;  %v4979_v56 = vpop.f32.mrb[49].mxu0  ;;  %v6413_v36 = vadd.f32 %v929_v11, %v592_v44 }
 0x157   :  { %v602_v2 = vpop.f32.mrb[50].mxu1  ;;  %v932_v59 = vpop.f32.mrb[50].mxu0 }
 0x158   :  { %v603_v15 = vadd.f32 %v602_v2, %v6379_v29  ;;  %v4916_v63 = vpop.f32.mrb[51].mxu1  ;;  %v4980_v16 = vpop.f32.mrb[51].mxu0  ;;  %v6416_v40 = vadd.f32 %v932_v59, %v595_v24 }
 0x15d   :  { %v607_v10 = vpop.f32.mrb[52].mxu1  ;;  %v937_v49 = vpop.f32.mrb[52].mxu0 }
 0x15e   :  { %v608_v23 = vadd.f32 %v607_v10, %v6281_v20  ;;  %v4919_v4 = vpop.f32.mrb[53].mxu1  ;;  %v4983_v60 = vpop.f32.mrb[53].mxu0  ;;  %v6419_v13 = vadd.f32 %v937_v49, %v600_v9 }
 0x15f   :  { %v610_v17 = vpop.f32.mrb[54].mxu1  ;;  %v940_v14 = vpop.f32.mrb[54].mxu0  ;;  %v5735_v4 = vmov 0  }
 0x160   :  { %v611_v41 = vadd.f32 %v610_v17, %v6285_v61  ;;  %v4920_v34 = vpop.f32.mrb[55].mxu1  ;;  %v4984_v21 = vpop.f32.mrb[55].mxu0  ;;  %v6422_v27 = vadd.f32 %v940_v14, %v603_v15  ;;  %1390 = vst.msk [vmem:[#allocation2 + $0x68] sm:$0xff] %vm1389_vm4, %v5735_v4 }
 0x165   :  { %v615_v29 = vpop.f32.mrb[56].mxu1  ;;  %v945_v30 = vpop.f32.mrb[56].mxu0 }
 0x166   :  { %v616_v46 = vadd.f32 %v615_v29, %v6298_v5  ;;  %v4923_v37 = vpop.f32.mrb[57].mxu1  ;;  %v4987_v38 = vpop.f32.mrb[57].mxu0  ;;  %v6425_v18 = vadd.f32 %v945_v30, %v608_v23 }
 0x167   :  { %v618_v20 = vpop.f32.mrb[58].mxu1  ;;  %v948_v50 = vpop.f32.mrb[58].mxu0 }
 0x168   :  { %v619_v51 = vadd.f32 %v618_v20, %v6302_v12  ;;  %v4924_v43 = vpop.f32.mrb[59].mxu1  ;;  %v4988_v44 = vpop.f32.mrb[59].mxu0  ;;  %v6428_v31 = vadd.f32 %v948_v50, %v611_v41 }
 0x16d   :  { %v623_v61 = vpop.f32.mrb[60].mxu1  ;;  %v953_v25 = vpop.f32.mrb[60].mxu0 }
 0x16e   :  { %v624_v8 = vadd.f32 %v623_v61, %v6311_v28  ;;  %v4927_v48 = vpop.f32.mrb[61].mxu1  ;;  %v4991_v24 = vpop.f32.mrb[61].mxu0  ;;  %v6431_v62 = vadd.f32 %v953_v25, %v616_v46 }
 0x16f   :  { %v626_v5 = vpop.f32.mrb[62].mxu1  ;;  %v956_v7 = vpop.f32.mrb[62].mxu0 }
 0x170   :  { %v627_v53 = vadd.f32 %v626_v5, %v6315_v35  ;;  %v4928_v11 = vpop.f32.mrb[63].mxu1  ;;  %v4992_v9 = vpop.f32.mrb[63].mxu0  ;;  %v6434_v55 = vadd.f32 %v956_v7, %v619_v51  ;;  %v6458_v7 = vld [vmem:[%s7931_s2] ss:$0 sm:$0xff] }
 0x175   :  { %v631_v12 = vpop.f32.mrb[64].mxu1  ;;  %v961_v56 = vpop.f32.mrb[64].mxu0 }
 0x176   :  { %v632_v2 = vadd.f32 %v631_v12, %v6326_v6  ;;  %v4931_v59 = vpop.f32.mrb[65].mxu1  ;;  %v4995_v15 = vpop.f32.mrb[65].mxu0  ;;  %v6437_v63 = vadd.f32 %v961_v56, %v624_v8 }
 0x177   :  { %v634_v28 = vpop.f32.mrb[66].mxu1  ;;  %v964_v16 = vpop.f32.mrb[66].mxu0 }
 0x178   :  { %v635_v10 = vadd.f32 %v634_v28, %v6330_v58  ;;  %v4932_v49 = vpop.f32.mrb[67].mxu1  ;;  %v4996_v23 = vpop.f32.mrb[67].mxu0  ;;  %v6440_v35 = vadd.f32 %v964_v16, %v627_v53 }
 0x17d   :  { %v639_v60 = vpop.f32.mrb[68].mxu1  ;;  %v969_v17 = vpop.f32.mrb[68].mxu0 }
 0x17e   :  { %v640_v6 = vadd.f32 %v639_v60, %v6344_v26  ;;  %v4935_v14 = vpop.f32.mrb[69].mxu1  ;;  %v4999_v41 = vpop.f32.mrb[69].mxu0  ;;  %v6444_v34 = vadd.f32 %v969_v17, %v632_v2 }
 0x17f   :  { %v642_v21 = vpop.f32.mrb[70].mxu1  ;;  %v972_v29 = vpop.f32.mrb[70].mxu0 }
 0x180   :  { %v643_v58 = vadd.f32 %v642_v21, %v6349_v57  ;;  %v4936_v30 = vpop.f32.mrb[71].mxu1  ;;  %v5000_v46 = vpop.f32.mrb[71].mxu0  ;;  %v6447_v37 = vadd.f32 %v972_v29, %v635_v10 }
 0x181   :  { %v5708_v30 = vld [vmem:[%s7930_s3 + $0x60] sm:$0xff]  }
 0x185   :  { %v647_v38 = vpop.f32.mrb[72].mxu1  ;;  %v977_v20 = vpop.f32.mrb[72].mxu0 }
 0x186   :  { %v648_v50 = vadd.f32 %v647_v38, %v6367_v1  ;;  %v4939_v51 = vpop.f32.mrb[73].mxu1  ;;  %v5003_v43 = vpop.f32.mrb[73].mxu0  ;;  %v6450_v44 = vadd.f32 %v977_v20, %v640_v6 }
 0x187   :  { %v650_v26 = vpop.f32.mrb[74].mxu1  ;;  %v980_v61 = vpop.f32.mrb[74].mxu0 }
 0x188   :  { %v651_v25 = vadd.f32 %v650_v26, %v6372_v22  ;;  %v4940_v8 = vpop.f32.mrb[75].mxu1  ;;  %v5004_v48 = vpop.f32.mrb[75].mxu0  ;;  %v6453_v24 = vadd.f32 %v980_v61, %v643_v58 }
 0x18d   :  { %v985_v57 = vpop.f32.mrb[76].mxu0  ;;  %v1260_v5 = vpop.f32.mrb[76].mxu1 }
 0x18e   :  { %v1363_v1 = vadd.f32 %v1260_v5, %v6383_v42  ;;  %v5007_v53 = vpop.f32.mrb[77].mxu0  ;;  %v5027_v11 = vpop.f32.mrb[77].mxu1  ;;  %v6461_v9 = vadd.f32 %v985_v57, %v648_v50  ;;  %v5711_v57 = vld [vmem:[%s7930_s3 + $0x70] sm:$0xff]  }
 0x18f   :  { %v988_v12 = vpop.f32.mrb[78].mxu0  ;;  %v1263_v56 = vpop.f32.mrb[78].mxu1 }
 0x190   :  { %v1398_v22 = vadd.f32 %v6458_v7, %v1363_v1  ;;  %v1364_v2 = vadd.f32 %v1263_v56, %v6386_v33  ;;  %v5028_v59 = vpop.f32.mrb[79].mxu1  ;;  %v5008_v15 = vpop.f32.mrb[79].mxu0  ;;  %v6465_v28 = vadd.f32 %v988_v12, %v651_v25 }
 0x192   :  { %v1399_v16 = vadd.f32 %v6458_v7, %v1364_v2  ;;  %v1424_v10 = vmax.f32 %v1398_v22, 0.0 }
 0x194   :  { %v1425_v49 = vmax.f32 %v1399_v16, 0.0 }
 0x195   :  { %v1268_v23 = vpop.f32.mrb[80].mxu1 }
 0x196   :  { %v1450_v42 = vpack.c.bf16 %v1425_v49, %v1424_v10  ;;  %v1365_v4 = vadd.f32 %v1268_v23, %v6389_v54  ;;  %v5031_v60 = vpop.f32.mrb[81].mxu1 }
 0x197   :  { %v1271_v17 = vpop.f32.mrb[82].mxu1 }
 0x198   :  { %1463 = vst.msk [vmem:[#allocation2] sm:$0xff] %vm1389_vm4, %v1450_v42  ;;  %v1400_v6 = vadd.f32 %v6458_v7, %v1365_v4  ;;  %v1366_v33 = vadd.f32 %v1271_v17, %v6392_v45  ;;  %v5032_v14 = vpop.f32.mrb[83].mxu1 }
 0x19a   :  { %v1401_v41 = vadd.f32 %v6458_v7, %v1366_v33  ;;  %v1426_v21 = vmax.f32 %v1400_v6, 0.0  ;;  %v5705_v6 = vld [vmem:[%s7930_s3 + $0x40] sm:$0xff]  }
 0x19c   :  { %v1427_v29 = vmax.f32 %v1401_v41, 0.0 }
 0x19d   :  { %v1276_v58 = vpop.f32.mrb[84].mxu1 }
 0x19e   :  { %v1451_v46 = vpack.c.bf16 %v1427_v29, %v1426_v21  ;;  %v1367_v54 = vadd.f32 %v1276_v58, %v6395_v3  ;;  %v5035_v38 = vpop.f32.mrb[85].mxu1  ;;  %v5710_v3 = vld [vmem:[%s7930_s3 + $0x68] sm:$0xff]  }
 0x19f   :  { %v1279_v20 = vpop.f32.mrb[86].mxu1  ;;  %v1476_v50 = vld [vmem:[#allocation2] sm:$0xff] }
 0x1a0   :  { %1464 = vst.msk [vmem:[#allocation2 + $0x8] sm:$0xff] %vm1389_vm4, %v1451_v46  ;;  %v1402_v45 = vadd.f32 %v6458_v7, %v1367_v54  ;;  %v1368_v51 = vadd.f32 %v1279_v20, %v6398_v19  ;;  %v5036_v43 = vpop.f32.mrb[87].mxu1  ;;  %5146 = vmatmul.mubr.msk.bf16.vlgmr.msra.gmra.mrb[128].mxu1 %vm1389_vm4, %v1476_v50  ;;  %v1510_v61 = vshll.u32 %v1476_v50, 16  ;;  %v6488_v25 = vld [vmem:[#allocation2] sm:$0xe0]  ;;  %v1508_v22 = vshrl.u32 %v1476_v50, 16 }
 0x1a1   :  { %5149 = vmatprep.mubr.msk.bf16.mxu1 %vm5734_vm0, %v7939_v0  ;;  %5258 = vmatpush3.bf16.msra.mxu1 %v5708_v30  ;;  %v2569_v5 = vshrl.u32 %v6488_v25, 16  ;;  %v2572_v1 = vshll.u32 %v6488_v25, 16  ;;  %v5706_v50 = vld [vmem:[%s7930_s3 + $0x48] sm:$0xff]  }
 0x1a2   :  { %v1403_v26 = vadd.f32 %v6458_v7, %v1368_v51  ;;  %5259 = vmatprep.subr.bf16.mxu1 %v7939_v0  ;;  %v1428_v8 = vmax.f32 %v1402_v45, 0.0  ;;  %v1512_v11 = vrot.slane %v1510_v61, 1 }
 0x1a3   :  { %v2571_v42 = vrot.slane %v2569_v5, 5  ;;  %v2574_v4 = vrot.slane %v2572_v1, 6 }
 0x1a4   :  { %v1429_v19 = vmax.f32 %v1403_v26, 0.0  ;;  %v1513_v60 = vor.u32 %v1512_v11, %v1508_v22 }
 0x1a5   :  { %v1284_v48 = vpop.f32.mrb[88].mxu1  ;;  %5260 = vmatpush3.bf16.msra.mxu1 %v5710_v3  ;;  %v2575_v30 = vor.u32 %v2574_v4, %v2571_v42 }
 0x1a6   :  { %v1452_v53 = vpack.c.bf16 %v1429_v19, %v1428_v8  ;;  %v1369_v12 = vadd.f32 %v1284_v48, %v6401_v32  ;;  %v5039_v56 = vpop.f32.mrb[89].mxu1  ;;  %5261 = vmatprep.subr.bf16.mxu1 %v7939_v0  ;;  %v5712_v32 = vld [vmem:[%s7930_s3 + $0x78] sm:$0xff]  }
 0x1a7   :  { %v1287_v2 = vpop.f32.mrb[90].mxu1  ;;  %v6497_v59 = vld [vmem:[#allocation2 + $0x8] sm:$0xff]  ;;  %v5707_v56 = vld [vmem:[%s7930_s3 + $0x50] sm:$0xff]  }
 0x1a8   :  { %1465 = vst.msk [vmem:[#allocation2 + $0x10] sm:$0xff] %vm1389_vm4, %v1452_v53  ;;  %v1404_v15 = vadd.f32 %v6458_v7, %v1369_v12  ;;  %v1370_v16 = vadd.f32 %v1287_v2, %v6404_v39  ;;  %v5040_v10 = vpop.f32.mrb[91].mxu1  ;;  %v1515_v49 = vshll.u32 %v6497_v59, 16  ;;  %v1519_v23 = vshrl.u32 %v6497_v59, 16  ;;  %5150 = vmatmul.mubr.msk.bf16.gmra.mrb[132].mxu1 %vm1389_vm4, %v6497_v59 }
 0x1a9   :  { %5153 = vmatprep.mubr.msk.bf16.mxu1 %vm5734_vm0, %v7939_v0  ;;  %5262 = vmatpush3.bf16.msra.mxu1 %v5711_v57  ;;  %v7937_v45 = vrot.slane %v6497_v59, 1  ;;  %v7938_v3 = vrot.slane %v6497_v59, 5  ;;  %v7936_v1 = vrot.slane %v6497_v59, 6 }
 0x1aa   :  { %v1405_v39 = vadd.f32 %v6458_v7, %v1370_v16  ;;  %v1517_v17 = vrot.slane %v1515_v49, 1  ;;  %5263 = vmatprep.subr.bf16.mxu1 %v7939_v0  ;;  %v2579_v33 = vrot.slane %v1519_v23, 5  ;;  %v2582_v14 = vrot.slane %v1515_v49, 6 }
 0x1ab   :  { %v1430_v41 = vmax.f32 %v1404_v15, 0.0 }
 0x1ac   :  { %v1431_v21 = vmax.f32 %v1405_v39, 0.0  ;;  %v1518_v29 = vsel %vm149_vm1, %v1513_v60, %v1517_v17  ;;  %v2583_v46 = vor.u32 %v2582_v14, %v2579_v33  ;;  %v1521_v11 = vor.u32 %v1519_v23, %v1517_v17  ;;  %v5709_v14 = vld [vmem:[%s7930_s3 + $0x58] sm:$0xff]  }
 0x1ad   :  { %v1292_v58 = vpop.f32.mrb[92].mxu1  ;;  %5086 = vmatmul.mubr.msk.bf16.vlgmr.msra.gmra.mrb[80].mxu0 %vm1389_vm4, %v1518_v29  ;;  %5264 = vmatpush3.bf16.msra.mxu1 %v5712_v32 }
 0x1ae   :  { %v1453_v54 = vpack.c.bf16 %v1431_v21, %v1430_v41  ;;  %v1371_v38 = vadd.f32 %v1292_v58, %v6407_v47  ;;  %v5043_v20 = vpop.f32.mrb[93].mxu1  ;;  %5198 = vmatpush3.bf16.msra.mxu0 %v5705_v6  ;;  %5089 = vmatprep.mubr.msk.bf16.mxu0 %vm5734_vm0, %v7939_v0  ;;  %v6531_v47 = vsel %vm2567_vm5, %v2575_v30, %v2583_v46 }
 0x1af   :  { %v1295_v51 = vpop.f32.mrb[94].mxu1  ;;  %v6525_v43 = vld [vmem:[#allocation2 + $0x10] sm:$0xff]  ;;  %5199 = vmatprep.subr.bf16.mxu0 %v7939_v0  ;;  %5377 = vmatprep.subr.bf16.mxu1 %v7939_v0 }
 0x1b0   :  { %7946 = vst [vmem:[#allocation3_spill] sm:$0xff] %v6525_v43  ;;  %1466 = vst.msk [vmem:[#allocation2 + $0x18] sm:$0xff] %vm1389_vm4, %v1453_v54  ;;  %v1406_v26 = vadd.f32 %v6458_v7, %v1371_v38  ;;  %v1372_v61 = vadd.f32 %v1295_v51, %v6410_v52  ;;  %v5044_v8 = vpop.f32.mrb[95].mxu1  ;;  %v1523_v19 = vshll.u32 %v6525_v43, 16  ;;  %v1527_v48 = vshrl.u32 %v6525_v43, 16  ;;  %5154 = vmatmul.mubr.msk.bf16.gmra.mrb[136].mxu1 %vm1389_vm4, %v6525_v43 }
 0x1b1   :  { %v2022_v57 = vrot.slane %v6525_v43, 1  ;;  %5157 = vmatprep.mubr.msk.bf16.mxu1 %vm5734_vm0, %v7939_v0  ;;  %v2309_v5 = vrot.slane %v6525_v43, 5  ;;  %v2933_v53 = vrot.slane %v6525_v43, 6  ;;  %v7934_v29 = vrot.slane %v6525_v43, 3 }
 0x1b2   :  { %v1407_v52 = vadd.f32 %v6458_v7, %v1372_v61  ;;  %v1525_v12 = vrot.slane %v1523_v19, 1  ;;  %5200 = vmatpush3.bf16.msra.mxu0 %v5706_v50  ;;  %v2588_v22 = vrot.slane %v1527_v48, 5  ;;  %v2591_v10 = vrot.slane %v1523_v19, 6 }
 0x1b3   :  { %5201 = vmatprep.subr.bf16.mxu0 %v7939_v0  ;;  %v6554_v2 = vsel %vm2305_vm6, %v7938_v3, %v2309_v5  ;;  %v6559_v15 = vsel %vm766_vm3, %v7937_v45, %v2022_v57  ;;  %v6564_v16 = vsel %vm2929_vm7, %v7936_v1, %v2933_v53  ;;  %v1432_v49 = vmax.f32 %v1406_v26, 0.0 }
 0x1b4   :  { %v1433_v23 = vmax.f32 %v1407_v52, 0.0  ;;  %v1526_v32 = vsel %vm149_vm1, %v1521_v11, %v1525_v12  ;;  %v2592_v4 = vor.u32 %v2591_v10, %v2588_v22  ;;  %v3463_v60 = vrot.slane %v1527_v48, 2 }
 0x1b5   :  { %v1300_v42 = vpop.f32.mrb[96].mxu1  ;;  %5090 = vmatmul.mubr.msk.bf16.gmra.mrb[84].mxu0 %vm1389_vm4, %v1526_v32  ;;  %v3464_v39 = vrot.slane %v1523_v19, 3  ;;  %v1529_v51 = vor.u32 %v1527_v48, %v1525_v12  ;;  %v7935_v52 = vrot.slane %v6525_v43, 2 }
 0x1b6   :  { %v1454_v17 = vpack.c.bf16 %v1433_v23, %v1432_v49  ;;  %v1373_v6 = vadd.f32 %v1300_v42, %v6413_v36  ;;  %v5047_v33 = vpop.f32.mrb[97].mxu1  ;;  %5093 = vmatprep.mubr.msk.bf16.mxu0 %vm5734_vm0, %v7939_v0  ;;  %5202 = vmatpush3.bf16.msra.mxu0 %v5707_v56  ;;  %v6579_v58 = vsel %vm2567_vm5, %v2583_v46, %v2592_v4 }
 0x1b7   :  { %v1303_v41 = vpop.f32.mrb[98].mxu1  ;;  %v6574_v21 = vld [vmem:[#allocation2 + $0x18] sm:$0xff]  ;;  %5203 = vmatprep.subr.bf16.mxu0 %v7939_v0  ;;  %v6581_v36 = vor.u32 %v3464_v39, %v3463_v60 }
 0x1b8   :  { %1467 = vst.msk [vmem:[#allocation2 + $0x20] sm:$0xff] %vm1389_vm4, %v1454_v17  ;;  %v1408_v30 = vadd.f32 %v6458_v7, %v1373_v6  ;;  %v1374_v54 = vadd.f32 %v1303_v41, %v6416_v40  ;;  %v5048_v38 = vpop.f32.mrb[99].mxu1  ;;  %v1531_v20 = vshll.u32 %v6574_v21, 16  ;;  %v1535_v50 = vshrl.u32 %v6574_v21, 16  ;;  %5158 = vmatmul.mubr.msk.bf16.gmra.mrb[140].mxu1 %vm1389_vm4, %v6574_v21 }
 0x1b9   :  { %7947 = vst [vmem:[#allocation4_spill] sm:$0xff] %v6581_v36  ;;  %v2024_v46 = vrot.slane %v6574_v21, 1  ;;  %5161 = vmatprep.mubr.msk.bf16.mxu1 %vm5734_vm0, %v7939_v0  ;;  %v2311_v26 = vrot.slane %v6574_v21, 5  ;;  %v2935_v61 = vrot.slane %v6574_v21, 6  ;;  %v3756_v39 = vrot.slane %v6574_v21, 3 }
 0x1ba   :  { %v1409_v40 = vadd.f32 %v6458_v7, %v1374_v54  ;;  %v1533_v8 = vrot.slane %v1531_v20, 1  ;;  %5204 = vmatpush3.bf16.msra.mxu0 %v5709_v14  ;;  %v2597_v19 = vrot.slane %v1535_v50, 5  ;;  %v2600_v56 = vrot.slane %v1531_v20, 6 }
 0x1bb   :  { %5317 = vmatprep.subr.bf16.mxu0 %v7939_v0  ;;  %v6599_v11 = vsel %vm2305_vm6, %v2309_v5, %v2311_v26  ;;  %v6602_v48 = vsel %vm766_vm3, %v2022_v57, %v2024_v46  ;;  %v6605_v12 = vsel %vm2929_vm7, %v2933_v53, %v2935_v61  ;;  %v1434_v22 = vmax.f32 %v1408_v30, 0.0 }
 0x1bc   :  { %v1435_v10 = vmax.f32 %v1409_v40, 0.0  ;;  %v1534_v49 = vsel %vm149_vm1, %v1529_v51, %v1533_v8  ;;  %v3467_v23 = vrot.slane %v1535_v50, 2  ;;  %v2601_v42 = vor.u32 %v2600_v56, %v2597_v19 }
 0x1bd   :  { %v1308_v32 = vpop.f32.mrb[100].mxu1  ;;  %5094 = vmatmul.mubr.msk.bf16.gmra.mrb[88].mxu0 %vm1389_vm4, %v1534_v49  ;;  %v3468_v60 = vrot.slane %v1531_v20, 3  ;;  %v3198_v5 = vrot.slane %v6574_v21, 2 }
 0x1be   :  { %v1455_v57 = vpack.c.bf16 %v1435_v10, %v1434_v22  ;;  %v1375_v17 = vadd.f32 %v1308_v32, %v6419_v13  ;;  %v5051_v53 = vpop.f32.mrb[101].mxu1  ;;  %5097 = vmatprep.mubr.msk.bf16.mxu0 %vm5734_vm0, %v7939_v0  ;;  %v6617_v14 = vsel %vm2567_vm5, %v2592_v4, %v2601_v42  ;;  %v6627_v13 = vsel %vm3752_vm10, %v7934_v29, %v3756_v39 }
 0x1bf   :  { %v1311_v6 = vpop.f32.mrb[102].mxu1  ;;  %v6614_v33 = vld [vmem:[#allocation2 + $0x20] sm:$0xff]  ;;  %v3469_v41 = vor.u32 %v3468_v60, %v3467_v23  ;;  %v6622_v21 = vsel %vm3194_vm9, %v7935_v52, %v3198_v5  ;;  %7949 = vst [vmem:[#allocation6_spill] sm:$0xff] %v6627_v13  ;;  %v1537_v22 = vor.u32 %v1535_v50, %v1533_v8  ;;  %v7954_v13 = vmov 0.0  }
 0x1c0   :  { %7948 = vst [vmem:[#allocation5_spill] sm:$0xff] %v6622_v21  ;;  %1468 = vst.msk [vmem:[#allocation2 + $0x28] sm:$0xff] %vm1389_vm4, %v1455_v57  ;;  %v1410_v30 = vadd.f32 %v6458_v7, %v1375_v17  ;;  %v1376_v54 = vadd.f32 %v1311_v6, %v6422_v27  ;;  %v5052_v38 = vpop.f32.mrb[103].mxu1  ;;  %v1539_v4 = vshll.u32 %v6614_v33, 16  ;;  %v1543_v20 = vshrl.u32 %v6614_v33, 16  ;;  %5162 = vmatmul.mubr.msk.bf16.gmra.mrb[144].mxu1 %vm1389_vm4, %v6614_v33 }
 0x1c1   :  { %v2026_v51 = vrot.slane %v6614_v33, 1  ;;  %5165 = vmatprep.mubr.msk.bf16.mxu1 %vm5734_vm0, %v7939_v0  ;;  %v2313_v40 = vrot.slane %v6614_v33, 5  ;;  %v2937_v19 = vrot.slane %v6614_v33, 6  ;;  %v6643_v27 = vsel %vm3454_vm8, %v6581_v36, %v3469_v41 }
 0x1c2   :  { %7950 = vst [vmem:[#allocation7_spill] sm:$0xff] %v6643_v27  ;;  %v1411_v56 = vadd.f32 %v6458_v7, %v1376_v54  ;;  %v1541_v10 = vrot.slane %v1539_v4, 1  ;;  %v2606_v49 = vrot.slane %v1543_v20, 5  ;;  %v2609_v57 = vrot.slane %v1539_v4, 6 }
 0x1c3   :  { %v6647_v23 = vsel %vm2305_vm6, %v2311_v26, %v2313_v40  ;;  %v6650_v32 = vsel %vm766_vm3, %v2024_v46, %v2026_v51  ;;  %v6653_v60 = vsel %vm2929_vm7, %v2935_v61, %v2937_v19  ;;  %v1436_v17 = vmax.f32 %v1410_v30, 0.0 }
 0x1c4   :  { %v1437_v53 = vmax.f32 %v1411_v56, 0.0  ;;  %v1542_v6 = vsel %vm149_vm1, %v1537_v22, %v1541_v10  ;;  %v3471_v38 = vrot.slane %v1543_v20, 2  ;;  %v2610_v50 = vor.u32 %v2609_v57, %v2606_v49 }
 0x1c5   :  { %v1316_v29 = vpop.f32.mrb[104].mxu1  ;;  %5098 = vmatmul.mubr.msk.bf16.gmra.mrb[92].mxu0 %vm1389_vm4, %v1542_v6  ;;  %v3472_v8 = vrot.slane %v1539_v4, 3  ;;  %v3200_v26 = vrot.slane %v6614_v33, 2  ;;  %v3758_v54 = vrot.slane %v6614_v33, 3 }
 0x1c6   :  { %v1456_v46 = vpack.c.bf16 %v1437_v53, %v1436_v17  ;;  %v1377_v52 = vadd.f32 %v1316_v29, %v6425_v18  ;;  %v5055_v61 = vpop.f32.mrb[105].mxu1  ;;  %5101 = vmatprep.mubr.msk.bf16.mxu0 %vm5734_vm0, %v7939_v0  ;;  %v6665_v22 = vsel %vm2567_vm5, %v2601_v42, %v2610_v50  ;;  %v1545_v53 = vor.u32 %v1543_v20, %v1541_v10 }
 0x1c7   :  { %v1319_v30 = vpop.f32.mrb[106].mxu1  ;;  %v6662_v56 = vld [vmem:[#allocation2 + $0x28] sm:$0xff]  ;;  %v3473_v6 = vor.u32 %v3472_v8, %v3471_v38  ;;  %v6668_v4 = vsel %vm3194_vm9, %v3198_v5, %v3200_v26  ;;  %v6671_v49 = vsel %vm3752_vm10, %v3756_v39, %v3758_v54 }
 0x1c8   :  { %7951 = vst [vmem:[#allocation8_spill] sm:$0xff] %v6668_v4  ;;  %7952 = vst [vmem:[#allocation9_spill] sm:$0xff] %v6671_v49  ;;  %v1412_v18 = vadd.f32 %v6458_v7, %v1377_v52  ;;  %v1378_v29 = vadd.f32 %v1319_v30, %v6428_v31  ;;  %v5056_v33 = vpop.f32.mrb[107].mxu1  ;;  %v1547_v57 = vshll.u32 %v6662_v56, 16  ;;  %v1551_v17 = vshrl.u32 %v6662_v56, 16  ;;  %5166 = vmatmul.mubr.msk.bf16.gmra.mrb[148].mxu1 %vm1389_vm4, %v6662_v56 }
 0x1c9   :  { %1469 = vst.msk [vmem:[#allocation2 + $0x30] sm:$0xff] %vm1389_vm4, %v1456_v46  ;;  %v2028_v42 = vrot.slane %v6662_v56, 1  ;;  %5169 = vmatprep.mubr.msk.bf16.mxu1 %vm5734_vm0, %v7939_v0  ;;  %v2315_v5 = vrot.slane %v6662_v56, 5  ;;  %v2939_v39 = vrot.slane %v6662_v56, 6  ;;  %v6686_v52 = vsel %vm3454_vm8, %v3469_v41, %v3473_v6 }
 0x1ca   :  { %7953 = vst [vmem:[#allocation10_spill] sm:$0xff] %v6686_v52  ;;  %v1413_v31 = vadd.f32 %v6458_v7, %v1378_v29  ;;  %v1549_v38 = vrot.slane %v1547_v57, 1  ;;  %v2615_v8 = vrot.slane %v1551_v17, 5  ;;  %v2618_v33 = vrot.slane %v1547_v57, 6 }
 0x1cb   :  { %v6690_v46 = vsel %vm2305_vm6, %v2313_v40, %v2315_v5  ;;  %v6693_v61 = vsel %vm766_vm3, %v2026_v51, %v2028_v42  ;;  %v6696_v30 = vsel %vm2929_vm7, %v2937_v19, %v2939_v39  ;;  %v1438_v1 = vmax.f32 %v1412_v18, 0.0 }
 0x1cc   :  { %v1439_v45 = vmax.f32 %v1413_v31, 0.0  ;;  %v1550_v41 = vsel %vm149_vm1, %v1545_v53, %v1549_v38  ;;  %v3475_v3 = vrot.slane %v1551_v17, 2  ;;  %v2619_v20 = vor.u32 %v2618_v33, %v2615_v8 }
 0x1cd   :  { %v1324_v0 = vpop.f32.mrb[108].mxu1  ;;  %5102 = vmatmul.mubr.msk.bf16.gmra.mrb[96].mxu0 %vm1389_vm4, %v1550_v41  ;;  %v3476_v10 = vrot.slane %v1547_v57, 3  ;;  %v3202_v40 = vrot.slane %v6662_v56, 2  ;;  %v3760_v29 = vrot.slane %v6662_v56, 3 }
 0x1ce   :  { %v1457_v51 = vpack.c.bf16 %v1439_v45, %v1438_v1  ;;  %v1379_v49 = vadd.f32 %v1324_v0, %v6431_v62  ;;  %v5059_v19 = vpop.f32.mrb[109].mxu1  ;;  %5105 = vmatprep.mubr.msk.bf16.mxu0 %vm5734_vm0, %v7954_v13  ;;  %v6708_v53 = vsel %vm2567_vm5, %v2610_v50, %v2619_v20 }
 0x1cf   :  { %v1327_v18 = vpop.f32.mrb[110].mxu1  ;;  %v3477_v41 = vor.u32 %v3476_v10, %v3475_v3  ;;  %v6711_v57 = vsel %vm3194_vm9, %v3200_v26, %v3202_v40  ;;  %v6714_v8 = vsel %vm3752_vm10, %v3758_v54, %v3760_v29 }
 0x1d0   :  { %v6705_v31 = vld [vmem:[#allocation2 + $0x30] sm:$0xff]  ;;  %7955 = vst [vmem:[#allocation11_spill] sm:$0xff] %v6711_v57  ;;  %7956 = vst [vmem:[#allocation12_spill] sm:$0xff] %v6714_v8  ;;  %v1414_v0 = vadd.f32 %v6458_v7, %v1379_v49  ;;  %v1380_v62 = vadd.f32 %v1327_v18, %v6434_v55  ;;  %v5060_v45 = vpop.f32.mrb[111].mxu1  ;;  %v1553_v49 = vor.u32 %v1551_v17, %v1549_v38 }
 0x1d1   :  { %1470 = vst.msk [vmem:[#allocation2 + $0x38] sm:$0xff] %vm1389_vm4, %v1457_v51  ;;  %v1555_v1 = vshll.u32 %v6705_v31, 16  ;;  %v1559_v56 = vshrl.u32 %v6705_v31, 16  ;;  %5170 = vmatmul.mubr.msk.bf16.gmra.mrb[152].mxu1 %vm1389_vm4, %v6705_v31  ;;  %v2030_v3 = vrot.slane %v6705_v31, 1  ;;  %v2317_v50 = vrot.slane %v6705_v31, 5 }
 0x1d2   :  { %5173 = vmatprep.mubr.msk.bf16.mxu1 %vm5734_vm0, %v7954_v13  ;;  %v2941_v26 = vrot.slane %v6705_v31, 6  ;;  %v6729_v54 = vsel %vm3454_vm8, %v3473_v6, %v3477_v41  ;;  %v1415_v55 = vadd.f32 %v6458_v7, %v1380_v62  ;;  %v1440_v8 = vmax.f32 %v1414_v0, 0.0 }
 0x1d3   :  { %7957 = vst [vmem:[#allocation13_spill] sm:$0xff] %v6729_v54  ;;  %v1557_v33 = vrot.slane %v1555_v1, 1  ;;  %v2624_v10 = vrot.slane %v1559_v56, 5  ;;  %v6733_v51 = vsel %vm2305_vm6, %v2315_v5, %v2317_v50  ;;  %v6736_v19 = vsel %vm766_vm3, %v2028_v42, %v2030_v3 }
 0x1d4   :  { %v6739_v18 = vsel %vm2929_vm7, %v2939_v39, %v2941_v26  ;;  %v2627_v45 = vrot.slane %v1555_v1, 6  ;;  %v1441_v57 = vmax.f32 %v1415_v55, 0.0  ;;  %v3479_v4 = vrot.slane %v1559_v56, 2 }
 0x1d5   :  { %v1558_v6 = vsel %vm149_vm1, %v1553_v49, %v1557_v33  ;;  %v1332_v54 = vpop.f32.mrb[112].mxu1  ;;  %v3480_v38 = vrot.slane %v1555_v1, 3  ;;  %v3204_v5 = vrot.slane %v6705_v31, 2  ;;  %v3762_v62 = vrot.slane %v6705_v31, 3 }
 0x1d6   :  { %5106 = vmatmul.mubr.msk.bf16.gmra.mrb[100].mxu0 %vm1389_vm4, %v1558_v6  ;;  %v2628_v17 = vor.u32 %v2627_v45, %v2624_v10  ;;  %v1458_v42 = vpack.c.bf16 %v1441_v57, %v1440_v8  ;;  %v1381_v21 = vadd.f32 %v1332_v54, %v6437_v63  ;;  %v5063_v39 = vpop.f32.mrb[113].mxu1 }
 0x1d7   :  { %5109 = vmatprep.mubr.msk.bf16.mxu0 %vm5734_vm0, %v7954_v13  ;;  %v1335_v0 = vpop.f32.mrb[114].mxu1  ;;  %v3481_v6 = vor.u32 %v3480_v38, %v3479_v4  ;;  %v6754_v1 = vsel %vm3194_vm9, %v3202_v40, %v3204_v5  ;;  %v6757_v10 = vsel %vm3752_vm10, %v3760_v29, %v3762_v62  ;;  %v1561_v29 = vor.u32 %v1559_v56, %v1557_v33 }
 0x1d8   :  { %v6748_v55 = vld [vmem:[#allocation2 + $0x38] sm:$0xff]  ;;  %v6751_v49 = vsel %vm2567_vm5, %v2619_v20, %v2628_v17  ;;  %7958 = vst [vmem:[#allocation14_spill] sm:$0xff] %v6754_v1  ;;  %7959 = vst [vmem:[#allocation15_spill] sm:$0xff] %v6757_v10  ;;  %v1416_v63 = vadd.f32 %v6458_v7, %v1381_v21  ;;  %v1382_v31 = vadd.f32 %v1335_v0, %v6440_v35  ;;  %v5064_v57 = vpop.f32.mrb[115].mxu1 }
 0x1d9   :  { %1471 = vst.msk [vmem:[#allocation2 + $0x40] sm:$0xff] %vm1389_vm4, %v1458_v42  ;;  %v1563_v8 = vshll.u32 %v6748_v55, 16  ;;  %v1567_v54 = vshrl.u32 %v6748_v55, 16  ;;  %5174 = vmatmul.mubr.msk.bf16.gmra.mrb[156].mxu1 %vm1389_vm4, %v6748_v55  ;;  %v2032_v4 = vrot.slane %v6748_v55, 1  ;;  %v2319_v20 = vrot.slane %v6748_v55, 5 }
 0x1da   :  { %5177 = vmatprep.mubr.msk.bf16.mxu1 %vm5734_vm0, %v7954_v13  ;;  %v2943_v40 = vrot.slane %v6748_v55, 6  ;;  %v6772_v21 = vsel %vm3454_vm8, %v3477_v41, %v3481_v6  ;;  %v1417_v35 = vadd.f32 %v6458_v7, %v1382_v31  ;;  %v1442_v10 = vmax.f32 %v1416_v63, 0.0 }
 0x1db   :  { %7960 = vst [vmem:[#allocation16_spill] sm:$0xff] %v6772_v21  ;;  %v1565_v45 = vrot.slane %v1563_v8, 1  ;;  %v2633_v38 = vrot.slane %v1567_v54, 5  ;;  %v6776_v42 = vsel %vm2305_vm6, %v2317_v50, %v2319_v20  ;;  %v6779_v39 = vsel %vm766_vm3, %v2030_v3, %v2032_v4 }
 0x1dc   :  { %v6782_v0 = vsel %vm2929_vm7, %v2941_v26, %v2943_v40  ;;  %v2636_v57 = vrot.slane %v1563_v8, 6  ;;  %v1443_v1 = vmax.f32 %v1417_v35, 0.0  ;;  %v3483_v21 = vrot.slane %v1567_v54, 2 }
 0x1dd   :  { %v1566_v41 = vsel %vm149_vm1, %v1561_v29, %v1565_v45  ;;  %v1340_v52 = vpop.f32.mrb[116].mxu1  ;;  %v3484_v33 = vrot.slane %v1563_v8, 3  ;;  %v3206_v50 = vrot.slane %v6748_v55, 2  ;;  %v3764_v31 = vrot.slane %v6748_v55, 3 }
 0x1de   :  { %5110 = vmatmul.mubr.msk.bf16.gmra.mrb[104].mxu0 %vm1389_vm4, %v1566_v41  ;;  %v2637_v56 = vor.u32 %v2636_v57, %v2633_v38  ;;  %v1459_v3 = vpack.c.bf16 %v1443_v1, %v1442_v10  ;;  %v1383_v43 = vadd.f32 %v1340_v52, %v6444_v34  ;;  %v5067_v26 = vpop.f32.mrb[117].mxu1 }
 0x1df   :  { %5113 = vmatprep.mubr.msk.bf16.mxu0 %vm5734_vm0, %v7954_v13  ;;  %v1343_v63 = vpop.f32.mrb[118].mxu1  ;;  %v3485_v41 = vor.u32 %v3484_v33, %v3483_v21  ;;  %v6797_v8 = vsel %vm3194_vm9, %v3204_v5, %v3206_v50  ;;  %v6800_v38 = vsel %vm3752_vm10, %v3762_v62, %v3764_v31  ;;  %v1569_v21 = vor.u32 %v1567_v54, %v1565_v45 }
 0x1e0   :  { %v6791_v35 = vld [vmem:[#allocation2 + $0x40] sm:$0xff]  ;;  %v6794_v29 = vsel %vm2567_vm5, %v2628_v17, %v2637_v56  ;;  %7962 = vst [vmem:[#allocation18_spill] sm:$0xff] %v6797_v8  ;;  %7963 = vst [vmem:[#allocation19_spill] sm:$0xff] %v6800_v38  ;;  %v1418_v34 = vadd.f32 %v6458_v7, %v1383_v43  ;;  %v1384_v52 = vadd.f32 %v1343_v63, %v6447_v37  ;;  %v5068_v55 = vpop.f32.mrb[119].mxu1 }
 0x1e1   :  { %7961 = vst [vmem:[#allocation17_spill] sm:$0xff] %v6794_v29  ;;  %1472 = vst.msk [vmem:[#allocation2 + $0x48] sm:$0xff] %vm1389_vm4, %v1459_v3  ;;  %v1571_v1 = vshll.u32 %v6791_v35, 16  ;;  %v1575_v10 = vshrl.u32 %v6791_v35, 16  ;;  %5178 = vmatmul.mubr.msk.bf16.gmra.mrb[160].mxu1 %vm1389_vm4, %v6791_v35  ;;  %v2034_v17 = vrot.slane %v6791_v35, 1  ;;  %v2321_v5 = vrot.slane %v6791_v35, 5 }
 0x1e2   :  { %5181 = vmatprep.mubr.msk.bf16.mxu1 %vm5734_vm0, %v7954_v13  ;;  %v2945_v62 = vrot.slane %v6791_v35, 6  ;;  %v6815_v43 = vsel %vm3454_vm8, %v3481_v6, %v3485_v41  ;;  %v1419_v37 = vadd.f32 %v6458_v7, %v1384_v52  ;;  %v1444_v38 = vmax.f32 %v1418_v34, 0.0 }
 0x1e3   :  { %7964 = vst [vmem:[#allocation20_spill] sm:$0xff] %v6815_v43  ;;  %v1573_v57 = vrot.slane %v1571_v1, 1  ;;  %v2642_v33 = vrot.slane %v1575_v10, 5  ;;  %v6819_v3 = vsel %vm2305_vm6, %v2319_v20, %v2321_v5  ;;  %v6822_v26 = vsel %vm766_vm3, %v2032_v4, %v2034_v17 }
 0x1e4   :  { %v6825_v63 = vsel %vm2929_vm7, %v2943_v40, %v2945_v62  ;;  %v2645_v55 = vrot.slane %v1571_v1, 6  ;;  %v1445_v8 = vmax.f32 %v1419_v37, 0.0  ;;  %v3487_v43 = vrot.slane %v1575_v10, 2 }
 0x1e5   :  { %v1574_v6 = vsel %vm149_vm1, %v1569_v21, %v1573_v57  ;;  %v1348_v27 = vpop.f32.mrb[120].mxu1  ;;  %v3488_v45 = vrot.slane %v1571_v1, 3  ;;  %v3208_v20 = vrot.slane %v6791_v35, 2  ;;  %v3766_v52 = vrot.slane %v6791_v35, 3 }
 0x1e6   :  { %5114 = vmatmul.mubr.msk.bf16.gmra.mrb[108].mxu0 %vm1389_vm4, %v1574_v6  ;;  %v2646_v54 = vor.u32 %v2645_v55, %v2642_v33  ;;  %v1460_v4 = vpack.c.bf16 %v1445_v8, %v1444_v38  ;;  %v1385_v36 = vadd.f32 %v1348_v27, %v6450_v44  ;;  %v5071_v40 = vpop.f32.mrb[121].mxu1 }
 0x1e7   :  { %5117 = vmatprep.mubr.msk.bf16.mxu0 %vm5734_vm0, %v7954_v13  ;;  %v1351_v34 = vpop.f32.mrb[122].mxu1  ;;  %v3489_v6 = vor.u32 %v3488_v45, %v3487_v43  ;;  %v6840_v1 = vsel %vm3194_vm9, %v3206_v50, %v3208_v20  ;;  %v6843_v33 = vsel %vm3752_vm10, %v3764_v31, %v3766_v52  ;;  %v1577_v43 = vor.u32 %v1575_v10, %v1573_v57 }
 0x1e8   :  { %v6834_v37 = vld [vmem:[#allocation2 + $0x48] sm:$0xff]  ;;  %v6837_v21 = vsel %vm2567_vm5, %v2637_v56, %v2646_v54  ;;  %7966 = vst [vmem:[#allocation22_spill] sm:$0xff] %v6840_v1  ;;  %7967 = vst [vmem:[#allocation23_spill] sm:$0xff] %v6843_v33  ;;  %v1420_v44 = vadd.f32 %v6458_v7, %v1385_v36  ;;  %v1386_v27 = vadd.f32 %v1351_v34, %v6453_v24  ;;  %v5072_v35 = vpop.f32.mrb[123].mxu1 }
 0x1e9   :  { %7965 = vst [vmem:[#allocation21_spill] sm:$0xff] %v6837_v21  ;;  %1473 = vst.msk [vmem:[#allocation2 + $0x50] sm:$0xff] %vm1389_vm4, %v1460_v4  ;;  %v1579_v8 = vshll.u32 %v6834_v37, 16  ;;  %v1583_v38 = vshrl.u32 %v6834_v37, 16  ;;  %5182 = vmatmul.mubr.msk.bf16.gmra.mrb[164].mxu1 %vm1389_vm4, %v6834_v37  ;;  %v2036_v56 = vrot.slane %v6834_v37, 1  ;;  %v2323_v50 = vrot.slane %v6834_v37, 5 }
 0x1ea   :  { %5185 = vmatprep.mubr.msk.bf16.mxu1 %vm5734_vm0, %v7954_v13  ;;  %v2947_v31 = vrot.slane %v6834_v37, 6  ;;  %v6858_v36 = vsel %vm3454_vm8, %v3485_v41, %v3489_v6  ;;  %v1421_v24 = vadd.f32 %v6458_v7, %v1386_v27  ;;  %v1446_v33 = vmax.f32 %v1420_v44, 0.0 }
 0x1eb   :  { %7968 = vst [vmem:[#allocation24_spill] sm:$0xff] %v6858_v36  ;;  %v1581_v55 = vrot.slane %v1579_v8, 1  ;;  %v2651_v45 = vrot.slane %v1583_v38, 5  ;;  %v6862_v4 = vsel %vm2305_vm6, %v2321_v5, %v2323_v50  ;;  %v6865_v40 = vsel %vm766_vm3, %v2034_v17, %v2036_v56 }
 0x1ec   :  { %v6868_v34 = vsel %vm2929_vm7, %v2945_v62, %v2947_v31  ;;  %v2654_v35 = vrot.slane %v1579_v8, 6  ;;  %v1447_v1 = vmax.f32 %v1421_v24, 0.0  ;;  %v3491_v36 = vrot.slane %v1583_v38, 2 }
 0x1ed   :  { %v1582_v41 = vsel %vm149_vm1, %v1577_v43, %v1581_v55  ;;  %v1356_v21 = vpop.f32.mrb[124].mxu1  ;;  %v3492_v57 = vrot.slane %v1579_v8, 3  ;;  %v3210_v5 = vrot.slane %v6834_v37, 2  ;;  %v3768_v27 = vrot.slane %v6834_v37, 3 }
 0x1ee   :  { %5118 = vmatmul.mubr.msk.bf16.gmra.mrb[112].mxu0 %vm1389_vm4, %v1582_v41  ;;  %v2655_v10 = vor.u32 %v2654_v35, %v2651_v45  ;;  %v1461_v17 = vpack.c.bf16 %v1447_v1, %v1446_v33  ;;  %v1387_v29 = vadd.f32 %v1356_v21, %v6461_v9  ;;  %v5075_v62 = vpop.f32.mrb[125].mxu1 }
 0x1ef   :  { %5121 = vmatprep.mubr.msk.bf16.mxu0 %vm5734_vm0, %v7954_v13  ;;  %v1359_v44 = vpop.f32.mrb[126].mxu1  ;;  %v3493_v41 = vor.u32 %v3492_v57, %v3491_v36  ;;  %v6883_v8 = vsel %vm3194_vm9, %v3208_v20, %v3210_v5  ;;  %v6886_v45 = vsel %vm3752_vm10, %v3766_v52, %v3768_v27  ;;  %v1585_v36 = vor.u32 %v1583_v38, %v1581_v55 }
 0x1f0   :  { %v6877_v24 = vld [vmem:[#allocation2 + $0x50] sm:$0xff]  ;;  %v6880_v43 = vsel %vm2567_vm5, %v2646_v54, %v2655_v10  ;;  %7970 = vst [vmem:[#allocation26_spill] sm:$0xff] %v6883_v8  ;;  %7971 = vst [vmem:[#allocation27_spill] sm:$0xff] %v6886_v45  ;;  %v1422_v9 = vadd.f32 %v6458_v7, %v1387_v29  ;;  %v1388_v37 = vadd.f32 %v1359_v44, %v6465_v28  ;;  %v5076_v21 = vpop.f32.mrb[127].mxu1 }
 0x1f1   :  { %7969 = vst [vmem:[#allocation25_spill] sm:$0xff] %v6880_v43  ;;  %1474 = vst.msk [vmem:[#allocation2 + $0x58] sm:$0xff] %vm1389_vm4, %v1461_v17  ;;  %v1587_v1 = vshll.u32 %v6877_v24, 16  ;;  %v1591_v33 = vshrl.u32 %v6877_v24, 16  ;;  %5186 = vmatmul.mubr.msk.bf16.gmra.mrb[168].mxu1 %vm1389_vm4, %v6877_v24  ;;  %v2038_v54 = vrot.slane %v6877_v24, 1  ;;  %v2325_v20 = vrot.slane %v6877_v24, 5 }
 0x1f2   :  { %5189 = vmatprep.mubr.msk.bf16.mxu1 %vm5734_vm0, %v7954_v13  ;;  %v2949_v52 = vrot.slane %v6877_v24, 6  ;;  %v6901_v29 = vsel %vm3454_vm8, %v3489_v6, %v3493_v41  ;;  %v1423_v28 = vadd.f32 %v6458_v7, %v1388_v37  ;;  %v1448_v45 = vmax.f32 %v1422_v9, 0.0 }
 0x1f3   :  { %7972 = vst [vmem:[#allocation28_spill] sm:$0xff] %v6901_v29  ;;  %v1589_v35 = vrot.slane %v1587_v1, 1  ;;  %v2660_v57 = vrot.slane %v1591_v33, 5  ;;  %v6905_v17 = vsel %vm2305_vm6, %v2323_v50, %v2325_v20  ;;  %v6908_v62 = vsel %vm766_vm3, %v2036_v56, %v2038_v54 }
 0x1f4   :  { %v6911_v44 = vsel %vm2929_vm7, %v2947_v31, %v2949_v52  ;;  %v2663_v21 = vrot.slane %v1587_v1, 6  ;;  %v1449_v8 = vmax.f32 %v1423_v28, 0.0  ;;  %v3495_v29 = vrot.slane %v1591_v33, 2 }
 0x1f5   :  { %7973 = vst [vmem:[#allocation29_spill] sm:$0xff] %v6911_v44  ;;  %v1590_v6 = vsel %vm149_vm1, %v1585_v36, %v1589_v35  ;;  %v3496_v38 = vrot.slane %v1587_v1, 3  ;;  %v3212_v55 = vrot.slane %v6877_v24, 2  ;;  %v3770_v50 = vrot.slane %v6877_v24, 3 }
 0x1f6   :  { %5122 = vmatmul.mubr.msk.bf16.gmra.mrb[116].mxu0 %vm1389_vm4, %v1590_v6  ;;  %v2664_v7 = vor.u32 %v2663_v21, %v2660_v57  ;;  %v1462_v37 = vpack.c.bf16 %v1449_v8, %v1448_v45  ;;  %v1593_v56 = vor.u32 %v1591_v33, %v1589_v35 }
 0x1f7   :  { %5125 = vmatprep.mubr.msk.bf16.mxu0 %vm5734_vm0, %v7954_v13  ;;  %v3497_v28 = vor.u32 %v3496_v38, %v3495_v29  ;;  %v6925_v36 = vsel %vm3194_vm9, %v3210_v5, %v3212_v55  ;;  %v6928_v1 = vsel %vm3752_vm10, %v3768_v27, %v3770_v50 }
 0x1f8   :  { %v6919_v31 = vld [vmem:[#allocation2 + $0x58] sm:$0xff]  ;;  %v6922_v9 = vsel %vm2567_vm5, %v2655_v10, %v2664_v7  ;;  %7975 = vst [vmem:[#allocation31_spill] sm:$0xff] %v6925_v36  ;;  %7976 = vst [vmem:[#allocation32_spill] sm:$0xff] %v6928_v1 }
 0x1f9   :  { %7974 = vst [vmem:[#allocation30_spill] sm:$0xff] %v6922_v9  ;;  %1475 = vst.msk [vmem:[#allocation2 + $0x60] sm:$0xff] %vm1389_vm4, %v1462_v37  ;;  %v1595_v24 = vshll.u32 %v6919_v31, 16  ;;  %v1599_v8 = vshrl.u32 %v6919_v31, 16  ;;  %5190 = vmatmul.mubr.msk.bf16.gmra.mrb[172].mxu1 %vm1389_vm4, %v6919_v31  ;;  %v2040_v45 = vrot.slane %v6919_v31, 1  ;;  %v7944_v10 = vrot.slane %v6919_v31, 5 }
 0x1fa   :  { %5193 = vmatprep.mubr.msk.bf16.mxu1 %vm5734_vm0, %v7954_v13  ;;  %v2951_v5 = vrot.slane %v6919_v31, 6  ;;  %v6941_v27 = vsel %vm3454_vm8, %v3493_v41, %v3497_v28  ;;  %v3214_v33 = vrot.slane %v6919_v31, 2  ;;  %v3772_v29 = vrot.slane %v6919_v31, 3 }
 0x1fb   :  { %7977 = vst [vmem:[#allocation33_spill] sm:$0xff] %v6941_v27  ;;  %v1597_v35 = vrot.slane %v1595_v24, 1  ;;  %v6948_v57 = vsel %vm2305_vm6, %v2325_v20, %v7944_v10  ;;  %v6951_v21 = vsel %vm766_vm3, %v2038_v54, %v2040_v45  ;;  %v2669_v6 = vrot.slane %v1599_v8, 5 }
 0x1fc   :  { %v6954_v38 = vsel %vm2929_vm7, %v2949_v52, %v2951_v5  ;;  %v2672_v37 = vrot.slane %v1595_v24, 6  ;;  %v3499_v41 = vrot.slane %v1599_v8, 2  ;;  %v3500_v1 = vrot.slane %v1595_v24, 3 }
 0x1fd   :  { %7978 = vst [vmem:[#allocation34_spill] sm:$0xff] %v6954_v38  ;;  %v1598_v36 = vsel %vm149_vm1, %v1593_v56, %v1597_v35  ;;  %v6958_v27 = vsel %vm3194_vm9, %v3212_v55, %v3214_v33  ;;  %v6961_v9 = vsel %vm3752_vm10, %v3770_v50, %v3772_v29 }
 0x1fe   :  { %7979 = vst [vmem:[#allocation35_spill] sm:$0xff] %v6958_v27  ;;  %7980 = vst [vmem:[#allocation36_spill] sm:$0xff] %v6961_v9  ;;  %5126 = vmatmul.mubr.msk.bf16.gmra.mrb[120].mxu0 %vm1389_vm4, %v1598_v36  ;;  %v2673_v20 = vor.u32 %v2672_v37, %v2669_v6  ;;  %v3501_v54 = vor.u32 %v3500_v1, %v3499_v41  ;;  %v6979_v1 = vld [vmem:[#allocation2 + $0x68] sm:$0x7f]  ;;  %v1601_v37 = vor.u32 %v1599_v8, %v1597_v35 }
 0x1ff   :  { %5129 = vmatprep.mubr.msk.bf16.mxu0 %vm5734_vm0, %v7954_v13  ;;  %v2306_v8 = vrot.slane %v6488_v25, 5  ;;  %v7984_v25 = vrot.slane %v6497_v59, 5 }
 0x200   :  { %v1488_v52 = vld [vmem:[#allocation2 + $0x60] sm:$0xf]  ;;  %v6971_v56 = vsel %vm2567_vm5, %v2664_v7, %v2673_v20  ;;  %v6974_v55 = vsel %vm3454_vm8, %v3497_v28, %v3501_v54 }
 0x201   :  { %v6966_v10 = vld [vmem:[#allocation2 + $0x60] sm:$0x1f]  ;;  %7981 = vst [vmem:[#allocation37_spill] sm:$0xff] %v6971_v56  ;;  %7982 = vst [vmem:[#allocation38_spill] sm:$0xff] %v6974_v55  ;;  %5194 = vmatmul.mubr.msk.bf16.gmra.mrb[176].mxu1 %vm1389_vm4, %v1488_v52  ;;  %v3776_v56 = vrot.slane %v6979_v1, 3 }
 0x202   :  { %v6968_v38 = vld [vmem:[#allocation2 + $0x60] sm:$0xff]  ;;  %v1603_v50 = vshll.u32 %v6966_v10, 16  ;;  %v2042_v36 = vrot.slane %v6966_v10, 1  ;;  %5265 = vmatprep.mubr.msk.bf16.mxu1 %vm5734_vm0, %v7954_v13 }
 0x203   :  { %v7945_v24 = vrot.slane %v6968_v38, 6  ;;  %v2676_v6 = vshrl.u32 %v6968_v38, 16  ;;  %v2679_v7 = vshll.u32 %v6968_v38, 16 }
 0x204   :  { %v1605_v41 = vrot.slane %v1603_v50, 1  ;;  %v6990_v52 = vsel %vm766_vm3, %v2040_v45, %v2042_v36  ;;  %v5716_v45 = vld [vmem:[%s7930_s3 + $0xa0] sm:$0xff]  }
 0x205   :  { %v6995_v9 = vsel %vm2929_vm7, %v2951_v5, %v7945_v24  ;;  %v2678_v27 = vrot.slane %v2676_v6, 5  ;;  %v2681_v55 = vrot.slane %v2679_v7, 6  ;;  %v3503_v44 = vrot.slane %v2676_v6, 2 }
 0x206   :  { %v1606_v43 = vsel %vm149_vm1, %v1601_v37, %v1605_v41  ;;  %v3504_v28 = vrot.slane %v2679_v7, 3  ;;  %v7983_v5 = vrot.slane %v6968_v38, 2  ;;  %v3774_v24 = vrot.slane %v6968_v38, 3 }
 0x207   :  { %5130 = vmatmul.mubr.msk.bf16.gmra.mrb[124].mxu0 %vm1389_vm4, %v1606_v43  ;;  %v7004_v35 = vor.u32 %v2681_v55, %v2678_v27  ;;  %v2308_v43 = vsel %vm2305_vm6, %v2306_v8, %v7984_v25  ;;  %v1607_v7 = vshrl.u32 %v6966_v10, 16  ;;  %v7985_v8 = vrot.slane %v6497_v59, 1  ;;  %v5721_v10 = vld [vmem:[%s7930_s3 + $0xc0] sm:$0xff]  }
 0x208   :  { %v7009_v50 = vsel %vm3194_vm9, %v3214_v33, %v7983_v5  ;;  %5133 = vmatprep.mubr.msk.bf16.mxu0 %vm5734_vm0, %v7954_v13  ;;  %v7014_v6 = vor.u32 %v3504_v28, %v3503_v44  ;;  %v7024_v55 = vsel %vm3752_vm10, %v3772_v29, %v3774_v24  ;;  %v7029_v33 = vsel %vm3752_vm10, %v3774_v24, %v3776_v56  ;;  %v5718_v29 = vld [vmem:[%s7930_s3 + $0xa8] sm:$0xff]   ;;  %v1996_v24 = vld [vmem:[#allocation2] sm:$0xfe]  ;;  %v5720_v28 = vld [vmem:[%s7930_s3 + $0xb8] sm:$0xff]  }
 0x209   :  { %v7021_v27 = vsel %vm2567_vm5, %v2673_v20, %v7004_v35  ;;  %5266 = vmatmul.mubr.msk.bf16.vlgmr.msra.gmra.mrb[180].mxu1 %vm1389_vm4, %v2308_v43  ;;  %v1609_v20 = vor.u32 %v1607_v7, %v1605_v41  ;;  %v2019_v37 = vrot.slane %v1996_v24, 1  ;;  %v5713_v41 = vld [vmem:[%s7930_s3 + $0x80] sm:$0xff]   ;;  %v5715_v5 = vld [vmem:[%s7930_s3 + $0x90] sm:$0xff]  }
 0x20a   :  { %v7034_v44 = vsel %vm3454_vm8, %v3501_v54, %v7014_v6  ;;  %5269 = vmatprep.mubr.msk.bf16.mxu1 %vm5734_vm0, %v7954_v13  ;;  %5378 = vmatpush3.bf16.msra.mxu1 %v5716_v45  ;;  %v5719_v54 = vld [vmem:[%s7930_s3 + $0xb0] sm:$0xff]  }
 0x20b   :  { %5379 = vmatprep.subr.bf16.mxu1 %v7954_v13  ;;  %v2021_v45 = vsel %vm766_vm3, %v2019_v37, %v7985_v8 }
 0x20e   :  { %5380 = vmatpush3.bf16.msra.mxu1 %v5718_v29  ;;  %v5723_v29 = vld [vmem:[%s7930_s3 + $0xd0] sm:$0xff]  }
 0x20f   :  { %5134 = vmatmul.mubr.msk.bf16.gmra.mrb[128].mxu0 %vm1389_vm4, %v1609_v20  ;;  %5381 = vmatprep.subr.bf16.mxu1 %v7954_v13 }
 0x210   :  { %5205 = vmatprep.mubr.msk.bf16.mxu0 %vm5734_vm0, %v7954_v13 }
 0x211   :  { %5270 = vmatmul.mubr.msk.bf16.gmra.mrb[184].mxu1 %vm1389_vm4, %v6554_v2  ;;  %v5714_v2 = vld [vmem:[%s7930_s3 + $0x88] sm:$0xff]  }
 0x212   :  { %5273 = vmatprep.mubr.msk.bf16.mxu1 %vm5734_vm0, %v7954_v13  ;;  %5382 = vmatpush3.bf16.msra.mxu1 %v5719_v54 }
 0x213   :  { %5383 = vmatprep.subr.bf16.mxu1 %v7954_v13 }
 0x216   :  { %5384 = vmatpush3.bf16.msra.mxu1 %v5720_v28 }
 0x217   :  { %5206 = vmatmul.mubr.msk.bf16.vlgmr.msra.gmra.mrb[132].mxu0 %vm1389_vm4, %v2021_v45  ;;  %5497 = vmatprep.subr.bf16.mxu1 %v7954_v13 }
 0x218   :  { %5318 = vmatpush3.bf16.msra.mxu0 %v5713_v41  ;;  %5209 = vmatprep.mubr.msk.bf16.mxu0 %vm5734_vm0, %v7954_v13  ;;  %v5725_v41 = vld [vmem:[%s7930_s3 + $0xd8] sm:$0xff]  }
 0x219   :  { %5319 = vmatprep.subr.bf16.mxu0 %v7954_v13  ;;  %5274 = vmatmul.mubr.msk.bf16.gmra.mrb[188].mxu1 %vm1389_vm4, %v6599_v11  ;;  %v5717_v11 = vld [vmem:[%s7930_s3 + $0x98] sm:$0xff]  }
 0x21a   :  { %5277 = vmatprep.mubr.msk.bf16.mxu1 %vm5734_vm0, %v7954_v13 }
 0x21c   :  { %5320 = vmatpush3.bf16.msra.mxu0 %v5714_v2 }
 0x21d   :  { %5321 = vmatprep.subr.bf16.mxu0 %v7954_v13 }
 0x21f   :  { %5210 = vmatmul.mubr.msk.bf16.gmra.mrb[136].mxu0 %vm1389_vm4, %v6559_v15  ;;  %v2329_v15 = vrot.slane %v6968_v38, 5 }
 0x220   :  { %5213 = vmatprep.mubr.msk.bf16.mxu0 %vm5734_vm0, %v7954_v13  ;;  %5322 = vmatpush3.bf16.msra.mxu0 %v5715_v5 }
 0x221   :  { %5323 = vmatprep.subr.bf16.mxu0 %v7954_v13  ;;  %5278 = vmatmul.mubr.msk.bf16.gmra.mrb[192].mxu1 %vm1389_vm4, %v6647_v23 }
 0x222   :  { %5281 = vmatprep.mubr.msk.bf16.mxu1 %vm5734_vm0, %v7954_v13 }
 0x224   :  { %5324 = vmatpush3.bf16.msra.mxu0 %v5717_v11 }
 0x225   :  { %5437 = vmatprep.subr.bf16.mxu0 %v7954_v13 }
 0x227   :  { %5214 = vmatmul.mubr.msk.bf16.gmra.mrb[140].mxu0 %vm1389_vm4, %v6602_v48  ;;  %v7986_v48 = vrot.slane %v6919_v31, 5  ;;  %v5728_v31 = vld [vmem:[%s7930_s3 + $0xf8] sm:$0xff]  }
 0x228   :  { %5217 = vmatprep.mubr.msk.bf16.mxu0 %vm5734_vm0, %v7954_v13 }
 0x229   :  { %5282 = vmatmul.mubr.msk.bf16.gmra.mrb[196].mxu1 %vm1389_vm4, %v6690_v46  ;;  %v2330_v23 = vsel %vm2305_vm6, %v7986_v48, %v2329_v15 }
 0x22a   :  { %5285 = vmatprep.mubr.msk.bf16.mxu1 %vm5734_vm0, %v7954_v13 }
 0x22f   :  { %5218 = vmatmul.mubr.msk.bf16.gmra.mrb[144].mxu0 %vm1389_vm4, %v6650_v32  ;;  %v2281_v32 = vld [vmem:[#allocation2 + $0x68] sm:$0x1] }
 0x230   :  { %5221 = vmatprep.mubr.msk.bf16.mxu0 %vm5734_vm0, %v7954_v13  ;;  %v2331_v46 = vrot.slane %v2281_v32, 5 }
 0x231   :  { %5286 = vmatmul.mubr.msk.bf16.gmra.mrb[200].mxu1 %vm1389_vm4, %v6733_v51  ;;  %v2917_v51 = vld [vmem:[#allocation2] sm:$0xc0] }
 0x232   :  { %5289 = vmatprep.mubr.msk.bf16.mxu1 %vm5734_vm0, %v7954_v13 }
 0x237   :  { %5222 = vmatmul.mubr.msk.bf16.gmra.mrb[148].mxu0 %vm1389_vm4, %v6693_v61  ;;  %v2332_v61 = vsel %vm2305_vm6, %v2329_v15, %v2331_v46 }
 0x238   :  { %5225 = vmatprep.mubr.msk.bf16.mxu0 %vm5734_vm0, %v7954_v13 }
 0x239   :  { %5290 = vmatmul.mubr.msk.bf16.gmra.mrb[204].mxu1 %vm1389_vm4, %v6776_v42  ;;  %v5724_v42 = vld [vmem:[%s7930_s3 + $0xe0] sm:$0xff]  }
 0x23a   :  { %5293 = vmatprep.mubr.msk.bf16.mxu1 %vm5734_vm0, %v7954_v13 }
 0x23f   :  { %5226 = vmatmul.mubr.msk.bf16.gmra.mrb[152].mxu0 %vm1389_vm4, %v6736_v19  ;;  %v2930_v19 = vrot.slane %v2917_v51, 6 }
 0x240   :  { %5229 = vmatprep.mubr.msk.bf16.mxu0 %vm5734_vm0, %v7954_v13 }
 0x241   :  { %5294 = vmatmul.mubr.msk.bf16.gmra.mrb[208].mxu1 %vm1389_vm4, %v6819_v3 }
 0x242   :  { %5297 = vmatprep.mubr.msk.bf16.mxu1 %vm5734_vm0, %v7954_v13 }
 0x247   :  { %5230 = vmatmul.mubr.msk.bf16.gmra.mrb[156].mxu0 %vm1389_vm4, %v6779_v39  ;;  %v7987_v39 = vrot.slane %v6497_v59, 6  ;;  %v5727_v59 = vld [vmem:[%s7930_s3 + $0xf0] sm:$0xff]  }
 0x248   :  { %5233 = vmatprep.mubr.msk.bf16.mxu0 %vm5734_vm0, %v7954_v13 }
 0x249   :  { %5298 = vmatmul.mubr.msk.bf16.gmra.mrb[212].mxu1 %vm1389_vm4, %v6862_v4  ;;  %v2932_v3 = vsel %vm2929_vm7, %v2930_v19, %v7987_v39 }
 0x24a   :  { %5301 = vmatprep.mubr.msk.bf16.mxu1 %vm5734_vm0, %v7954_v13 }
 0x24f   :  { %5234 = vmatmul.mubr.msk.bf16.gmra.mrb[160].mxu0 %vm1389_vm4, %v6822_v26  ;;  %v5726_v26 = vld [vmem:[%s7930_s3 + $0xe8] sm:$0xff]  }
 0x250   :  { %5237 = vmatprep.mubr.msk.bf16.mxu0 %vm5734_vm0, %v7954_v13 }
 0x251   :  { %5302 = vmatmul.mubr.msk.bf16.gmra.mrb[216].mxu1 %vm1389_vm4, %v6905_v17 }
 0x252   :  { %5305 = vmatprep.mubr.msk.bf16.mxu1 %vm5734_vm0, %v7954_v13 }
 0x257   :  { %5238 = vmatmul.mubr.msk.bf16.gmra.mrb[164].mxu0 %vm1389_vm4, %v6865_v40 }
 0x258   :  { %5241 = vmatprep.mubr.msk.bf16.mxu0 %vm5734_vm0, %v7954_v13 }
 0x259   :  { %5306 = vmatmul.mubr.msk.bf16.gmra.mrb[220].mxu1 %vm1389_vm4, %v6948_v57 }
 0x25a   :  { %5309 = vmatprep.mubr.msk.bf16.mxu1 %vm5734_vm0, %v7954_v13 }
 0x25f   :  { %5242 = vmatmul.mubr.msk.bf16.gmra.mrb[168].mxu0 %vm1389_vm4, %v6908_v62 }
 0x260   :  { %5245 = vmatprep.mubr.msk.bf16.mxu0 %vm5734_vm0, %v7954_v13 }
 0x261   :  { %5310 = vmatmul.mubr.msk.bf16.gmra.mrb[224].mxu1 %vm1389_vm4, %v2330_v23 }
 0x262   :  { %5313 = vmatprep.mubr.msk.bf16.mxu1 %vm5734_vm0, %v7954_v13 }
 0x267   :  { %5246 = vmatmul.mubr.msk.bf16.gmra.mrb[172].mxu0 %vm1389_vm4, %v6951_v21 }
 0x268   :  { %5249 = vmatprep.mubr.msk.bf16.mxu0 %vm5734_vm0, %v7954_v13 }
 0x269   :  { %5314 = vmatmul.mubr.msk.bf16.gmra.mrb[228].mxu1 %vm1389_vm4, %v2332_v61 }
 0x26a   :  { %5385 = vmatprep.mubr.msk.bf16.mxu1 %vm5734_vm0, %v7954_v13 }
 0x26f   :  { %5250 = vmatmul.mubr.msk.bf16.gmra.mrb[176].mxu0 %vm1389_vm4, %v6990_v52  ;;  %v5722_v52 = vld [vmem:[%s7930_s3 + $0xc8] sm:$0xff]  }
 0x270   :  { %5253 = vmatprep.mubr.msk.bf16.mxu0 %vm5734_vm0, %v7954_v13 }
 0x271   :  { %5386 = vmatmul.mubr.msk.bf16.vlgmr.msra.gmra.mrb[232].mxu1 %vm1389_vm4, %v2932_v3 }
 0x272   :  { %5389 = vmatprep.mubr.msk.bf16.mxu1 %vm5734_vm0, %v7954_v13  ;;  %5498 = vmatpush3.bf16.msra.mxu1 %v5724_v42 }
 0x273   :  { %5499 = vmatprep.subr.bf16.mxu1 %v7954_v13  ;;  %v1894_v4 = vpop.f32.mrb[128].mxu1 }
 0x274   :  { %v5147_v40 = vpop.f32.mrb[129].mxu1 }
 0x275   :  { %v1897_v17 = vpop.f32.mrb[130].mxu1 }
 0x276   :  { %5500 = vmatpush3.bf16.msra.mxu1 %v5726_v26  ;;  %v5148_v62 = vpop.f32.mrb[131].mxu1 }
 0x277   :  { %5254 = vmatmul.mubr.msk.bf16.gmra.mrb[180].mxu0 %vm1389_vm4, %v2042_v36  ;;  %5501 = vmatprep.subr.bf16.mxu1 %v7954_v13 }
 0x278   :  { %5325 = vmatprep.mubr.msk.bf16.mxu0 %vm5734_vm0, %v7954_v13 }
 0x279   :  { %5390 = vmatmul.mubr.msk.bf16.gmra.mrb[236].mxu1 %vm1389_vm4, %v6564_v16 }
 0x27a   :  { %5393 = vmatprep.mubr.msk.bf16.mxu1 %vm5734_vm0, %v7954_v13  ;;  %5502 = vmatpush3.bf16.msra.mxu1 %v5727_v59 }
 0x27b   :  { %5503 = vmatprep.subr.bf16.mxu1 %v7954_v13  ;;  %v1902_v57 = vpop.f32.mrb[132].mxu1 }
 0x27c   :  { %v5151_v21 = vpop.f32.mrb[133].mxu1 }
 0x27d   :  { %v1905_v36 = vpop.f32.mrb[134].mxu1 }
 0x27e   :  { %5504 = vmatpush3.bf16.msra.mxu1 %v5728_v31  ;;  %v5152_v16 = vpop.f32.mrb[135].mxu1 }
 0x27f   :  { %5326 = vmatmul.mubr.msk.bf16.vlgmr.msra.gmra.mrb[184].mxu0 %vm1389_vm4, %v6531_v47 }
 0x280   :  { %5438 = vmatpush3.bf16.msra.mxu0 %v5721_v10  ;;  %5329 = vmatprep.mubr.msk.bf16.mxu0 %vm5734_vm0, %v7954_v13  ;;  %v1707_v25 = vpop.f32.mrb[80].mxu0 }
 0x281   :  { %5439 = vmatprep.subr.bf16.mxu0 %v7954_v13  ;;  %5394 = vmatmul.mubr.msk.bf16.gmra.mrb[240].mxu1 %vm1389_vm4, %v6605_v12  ;;  %v5087_v43 = vpop.f32.mrb[81].mxu0  ;;  %v7217_v47 = vadd.f32 %v1894_v4, %v1707_v25 }
 0x282   :  { %5397 = vmatprep.mubr.msk.bf16.mxu1 %vm5734_vm0, %v7954_v13  ;;  %v1710_v7 = vpop.f32.mrb[82].mxu0 }
 0x283   :  { %v5088_v20 = vpop.f32.mrb[83].mxu0  ;;  %v1910_v54 = vpop.f32.mrb[136].mxu1  ;;  %v7223_v24 = vadd.f32 %v1897_v17, %v1710_v7 }
 0x284   :  { %5440 = vmatpush3.bf16.msra.mxu0 %v5722_v52  ;;  %v5155_v28 = vpop.f32.mrb[137].mxu1 }
 0x285   :  { %5441 = vmatprep.subr.bf16.mxu0 %v7954_v13  ;;  %v1913_v12 = vpop.f32.mrb[138].mxu1 }
 0x286   :  { %v5156_v37 = vpop.f32.mrb[139].mxu1 }
 0x287   :  { %5330 = vmatmul.mubr.msk.bf16.gmra.mrb[188].mxu0 %vm1389_vm4, %v6579_v58 }
 0x288   :  { %5333 = vmatprep.mubr.msk.bf16.mxu0 %vm5734_vm0, %v7954_v13  ;;  %5442 = vmatpush3.bf16.msra.mxu0 %v5723_v29  ;;  %v1715_v8 = vpop.f32.mrb[84].mxu0 }
 0x289   :  { %5443 = vmatprep.subr.bf16.mxu0 %v7954_v13  ;;  %5398 = vmatmul.mubr.msk.bf16.gmra.mrb[244].mxu1 %vm1389_vm4, %v6653_v60  ;;  %v7235_v45 = vadd.f32 %v1902_v57, %v1715_v8  ;;  %v5091_v2 = vpop.f32.mrb[85].mxu0 }
 0x28a   :  { %5401 = vmatprep.mubr.msk.bf16.mxu1 %vm5734_vm0, %v7954_v13  ;;  %v1718_v58 = vpop.f32.mrb[86].mxu0  ;;  %v7988_v2 = vld [vmem:[#allocation17_spill] sm:$0xff] }
 0x28b   :  { %v7239_v5 = vadd.f32 %v1905_v36, %v1718_v58  ;;  %v5092_v11 = vpop.f32.mrb[87].mxu0  ;;  %v1918_v15 = vpop.f32.mrb[140].mxu1 }
 0x28c   :  { %5444 = vmatpush3.bf16.msra.mxu0 %v5725_v41  ;;  %v5159_v48 = vpop.f32.mrb[141].mxu1 }
 0x28d   :  { %5557 = vmatprep.subr.bf16.mxu0 %v7954_v13  ;;  %v1921_v23 = vpop.f32.mrb[142].mxu1 }
 0x28e   :  { %v5160_v60 = vpop.f32.mrb[143].mxu1 }
 0x28f   :  { %5334 = vmatmul.mubr.msk.bf16.gmra.mrb[192].mxu0 %vm1389_vm4, %v6617_v14 }
 0x290   :  { %5337 = vmatprep.mubr.msk.bf16.mxu0 %vm5734_vm0, %v7954_v13  ;;  %v1723_v32 = vpop.f32.mrb[88].mxu0 }
 0x291   :  { %5402 = vmatmul.mubr.msk.bf16.gmra.mrb[248].mxu1 %vm1389_vm4, %v6696_v30  ;;  %v7248_v46 = vadd.f32 %v1910_v54, %v1723_v32  ;;  %v5095_v61 = vpop.f32.mrb[89].mxu0 }
 0x292   :  { %5405 = vmatprep.mubr.msk.bf16.mxu1 %vm5734_vm0, %v7954_v13  ;;  %v1726_v51 = vpop.f32.mrb[90].mxu0 }
 0x293   :  { %v7252_v19 = vadd.f32 %v1913_v12, %v1726_v51  ;;  %v5096_v42 = vpop.f32.mrb[91].mxu0  ;;  %v1926_v39 = vpop.f32.mrb[144].mxu1 }
 0x294   :  { %v5163_v14 = vpop.f32.mrb[145].mxu1  ;;  %v7989_v42 = vld [vmem:[#allocation21_spill] sm:$0xff] }
 0x295   :  { %v1929_v3 = vpop.f32.mrb[146].mxu1  ;;  %v7990_v14 = vld [vmem:[#allocation29_spill] sm:$0xff] }
 0x296   :  { %v5164_v26 = vpop.f32.mrb[147].mxu1 }
 0x297   :  { %5338 = vmatmul.mubr.msk.bf16.gmra.mrb[196].mxu0 %vm1389_vm4, %v6665_v22 }
 0x298   :  { %5341 = vmatprep.mubr.msk.bf16.mxu0 %vm5734_vm0, %v7954_v13  ;;  %v1731_v30 = vpop.f32.mrb[92].mxu0 }
 0x299   :  { %5406 = vmatmul.mubr.msk.bf16.gmra.mrb[252].mxu1 %vm1389_vm4, %v6739_v18  ;;  %v7260_v4 = vadd.f32 %v1918_v15, %v1731_v30  ;;  %v5099_v40 = vpop.f32.mrb[93].mxu0 }
 0x29a   :  { %5409 = vmatprep.mubr.msk.bf16.mxu1 %vm5734_vm0, %v7954_v13  ;;  %v1734_v17 = vpop.f32.mrb[94].mxu0 }
 0x29b   :  { %v7264_v59 = vadd.f32 %v1921_v23, %v1734_v17  ;;  %v5100_v62 = vpop.f32.mrb[95].mxu0  ;;  %v1934_v31 = vpop.f32.mrb[148].mxu1 }
 0x29c   :  { %v5167_v22 = vpop.f32.mrb[149].mxu1 }
 0x29d   :  { %v1937_v10 = vpop.f32.mrb[150].mxu1 }
 0x29e   :  { %v5168_v57 = vpop.f32.mrb[151].mxu1 }
 0x29f   :  { %5342 = vmatmul.mubr.msk.bf16.gmra.mrb[200].mxu0 %vm1389_vm4, %v6708_v53 }
 0x2a0   :  { %5345 = vmatprep.mubr.msk.bf16.mxu0 %vm5734_vm0, %v7954_v13  ;;  %v1739_v18 = vpop.f32.mrb[96].mxu0 }
 0x2a1   :  { %5410 = vmatmul.mubr.msk.bf16.gmra.mrb[0].mxu1 %vm1389_vm4, %v6782_v0  ;;  %v7272_v21 = vadd.f32 %v1926_v39, %v1739_v18  ;;  %v5103_v36 = vpop.f32.mrb[97].mxu0 }
 0x2a2   :  { %5413 = vmatprep.mubr.msk.bf16.mxu1 %vm5734_vm0, %v7954_v13  ;;  %v1742_v16 = vpop.f32.mrb[98].mxu0  ;;  %v7992_v36 = vld [vmem:[#allocation34_spill] sm:$0xff] }
 0x2a3   :  { %v7276_v52 = vadd.f32 %v1929_v3, %v1742_v16  ;;  %v5104_v25 = vpop.f32.mrb[99].mxu0 }
 0x2a4   :  { %v1942_v43 = vpop.f32.mrb[152].mxu1 }
 0x2a5   :  { %v5171_v53 = vpop.f32.mrb[153].mxu1 }
 0x2a6   :  { %v1945_v7 = vpop.f32.mrb[154].mxu1 }
 0x2a7   :  { %5346 = vmatmul.mubr.msk.bf16.gmra.mrb[204].mxu0 %vm1389_vm4, %v6751_v49  ;;  %v5172_v29 = vpop.f32.mrb[155].mxu1 }
 0x2a8   :  { %5349 = vmatprep.mubr.msk.bf16.mxu0 %vm5734_vm0, %v7954_v13 }
 0x2a9   :  { %v1747_v0 = vpop.f32.mrb[100].mxu0  ;;  %5414 = vmatmul.mubr.msk.bf16.gmra.mrb[4].mxu1 %vm1389_vm4, %v6825_v63 }
 0x2aa   :  { %v7284_v20 = vadd.f32 %v1934_v31, %v1747_v0  ;;  %v5107_v54 = vpop.f32.mrb[101].mxu0  ;;  %5417 = vmatprep.mubr.msk.bf16.mxu1 %vm5734_vm0, %v7954_v13 }
 0x2ab   :  { %v1750_v28 = vpop.f32.mrb[102].mxu0 }
 0x2ac   :  { %v7288_v12 = vadd.f32 %v1937_v10, %v1750_v28  ;;  %v5108_v37 = vpop.f32.mrb[103].mxu0  ;;  %v1950_v41 = vpop.f32.mrb[156].mxu1  ;;  %v7991_v10 = vld [vmem:[#allocation25_spill] sm:$0xff]  ;;  %v7993_v28 = vld [vmem:[#allocation30_spill] sm:$0xff] }
 0x2ad   :  { %v5175_v49 = vpop.f32.mrb[157].mxu1 }
 0x2ae   :  { %v1953_v8 = vpop.f32.mrb[158].mxu1  ;;  %v2557_v49 = vld [vmem:[#allocation2 + $0x68] sm:$0x3] }
 0x2af   :  { %5350 = vmatmul.mubr.msk.bf16.gmra.mrb[208].mxu0 %vm1389_vm4, %v7988_v2  ;;  %v5176_v58 = vpop.f32.mrb[159].mxu1 }
 0x2b0   :  { %5353 = vmatprep.mubr.msk.bf16.mxu0 %vm5734_vm0, %v7954_v13  ;;  %v7336_v58 = vld [vmem:[#allocation2 + $0x8] sm:$0xfc] }
 0x2b1   :  { %v1755_v63 = vpop.f32.mrb[104].mxu0  ;;  %5418 = vmatmul.mubr.msk.bf16.gmra.mrb[8].mxu1 %vm1389_vm4, %v6868_v34 }
 0x2b2   :  { %v7296_v11 = vadd.f32 %v1942_v43, %v1755_v63  ;;  %v5111_v15 = vpop.f32.mrb[105].mxu0  ;;  %5421 = vmatprep.mubr.msk.bf16.mxu1 %vm5734_vm0, %v7954_v13 }
 0x2b3   :  { %v1758_v48 = vpop.f32.mrb[106].mxu0 }
 0x2b4   :  { %v7300_v23 = vadd.f32 %v1945_v7, %v1758_v48  ;;  %v5112_v60 = vpop.f32.mrb[107].mxu0  ;;  %v1958_v32 = vpop.f32.mrb[160].mxu1 }
 0x2b5   :  { %v5179_v61 = vpop.f32.mrb[161].mxu1 }
 0x2b6   :  { %v1961_v51 = vpop.f32.mrb[162].mxu1 }
 0x2b7   :  { %5354 = vmatmul.mubr.msk.bf16.gmra.mrb[212].mxu0 %vm1389_vm4, %v7989_v42  ;;  %v5180_v39 = vpop.f32.mrb[163].mxu1 }
 0x2b8   :  { %5357 = vmatprep.mubr.msk.bf16.mxu0 %vm5734_vm0, %v7954_v13  ;;  %v7994_v39 = vld [vmem:[#allocation37_spill] sm:$0xff] }
 0x2b9   :  { %v1763_v34 = vpop.f32.mrb[108].mxu0  ;;  %5422 = vmatmul.mubr.msk.bf16.gmra.mrb[12].mxu1 %vm1389_vm4, %v7990_v14  ;;  %v7995_v14 = vrot.slane %v6968_v38, 6 }
 0x2ba   :  { %v7308_v3 = vadd.f32 %v1950_v41, %v1763_v34  ;;  %v5115_v26 = vpop.f32.mrb[109].mxu0  ;;  %5425 = vmatprep.mubr.msk.bf16.mxu1 %vm5734_vm0, %v7954_v13 }
 0x2bb   :  { %v1766_v30 = vpop.f32.mrb[110].mxu0 }
 0x2bc   :  { %v7312_v40 = vadd.f32 %v1953_v8, %v1766_v30  ;;  %v5116_v17 = vpop.f32.mrb[111].mxu0  ;;  %v1966_v62 = vpop.f32.mrb[164].mxu1 }
 0x2bd   :  { %v5183_v31 = vpop.f32.mrb[165].mxu1  ;;  %v2685_v17 = vshrl.u32 %v2557_v49, 16 }
 0x2be   :  { %v1969_v22 = vpop.f32.mrb[166].mxu1 }
 0x2bf   :  { %5358 = vmatmul.mubr.msk.bf16.gmra.mrb[216].mxu0 %vm1389_vm4, %v7991_v10  ;;  %v5184_v57 = vpop.f32.mrb[167].mxu1 }
 0x2c0   :  { %5361 = vmatprep.mubr.msk.bf16.mxu0 %vm5734_vm0, %v7954_v13 }
 0x2c1   :  { %v1771_v18 = vpop.f32.mrb[112].mxu0  ;;  %5426 = vmatmul.mubr.msk.bf16.gmra.mrb[16].mxu1 %vm1389_vm4, %v7992_v36 }
 0x2c2   :  { %v7320_v16 = vadd.f32 %v1958_v32, %v1771_v18  ;;  %v5119_v25 = vpop.f32.mrb[113].mxu0  ;;  %5429 = vmatprep.mubr.msk.bf16.mxu1 %vm5734_vm0, %v7954_v13  ;;  %v2955_v32 = vrot.slane %v2557_v49, 6 }
 0x2c3   :  { %v1774_v43 = vpop.f32.mrb[114].mxu0 }
 0x2c4   :  { %v7324_v53 = vadd.f32 %v1961_v51, %v1774_v43  ;;  %v5120_v7 = vpop.f32.mrb[115].mxu0  ;;  %v1974_v29 = vpop.f32.mrb[168].mxu1  ;;  %v3456_v51 = vshrl.u32 %v7336_v58, 16  ;;  %v2956_v26 = vsel %vm2929_vm7, %v7995_v14, %v2955_v32 }
 0x2c5   :  { %v5187_v0 = vpop.f32.mrb[169].mxu1 }
 0x2c6   :  { %v1977_v54 = vpop.f32.mrb[170].mxu1  ;;  %v3458_v31 = vrot.slane %v3456_v51, 2  ;;  %v2687_v0 = vrot.slane %v2685_v17, 5 }
 0x2c7   :  { %5362 = vmatmul.mubr.msk.bf16.gmra.mrb[220].mxu0 %vm1389_vm4, %v7993_v28  ;;  %v5188_v37 = vpop.f32.mrb[171].mxu1 }
 0x2c8   :  { %5365 = vmatprep.mubr.msk.bf16.mxu0 %vm5734_vm0, %v7954_v13 }
 0x2c9   :  { %v1779_v41 = vpop.f32.mrb[116].mxu0  ;;  %5430 = vmatmul.mubr.msk.bf16.gmra.mrb[20].mxu1 %vm1389_vm4, %v6995_v9  ;;  %v3459_v9 = vshll.u32 %v7336_v58, 16 }
 0x2ca   :  { %v7332_v8 = vadd.f32 %v1966_v62, %v1779_v41  ;;  %v5123_v2 = vpop.f32.mrb[117].mxu0  ;;  %5433 = vmatprep.mubr.msk.bf16.mxu1 %vm5734_vm0, %v7954_v13  ;;  %v2688_v62 = vshll.u32 %v2557_v49, 16 }
 0x2cb   :  { %v1782_v63 = vpop.f32.mrb[118].mxu0 }
 0x2cc   :  { %v7338_v15 = vadd.f32 %v1969_v22, %v1782_v63  ;;  %v5124_v48 = vpop.f32.mrb[119].mxu0  ;;  %v1982_v60 = vpop.f32.mrb[172].mxu1  ;;  %v3461_v22 = vrot.slane %v3459_v9, 3  ;;  %v2690_v28 = vrot.slane %v2688_v62, 6 }
 0x2cd   :  { %v5191_v61 = vpop.f32.mrb[173].mxu1 }
 0x2ce   :  { %v1985_v42 = vpop.f32.mrb[174].mxu1  ;;  %v3462_v37 = vor.u32 %v3461_v22, %v3458_v31  ;;  %v5729_v31 = vld [vmem:[%s7930_s3 + $0x100] sm:$0xff]  }
 0x2cf   :  { %5366 = vmatmul.mubr.msk.bf16.gmra.mrb[224].mxu0 %vm1389_vm4, %v7994_v39  ;;  %v5192_v34 = vpop.f32.mrb[175].mxu1 }
 0x2d0   :  { %5369 = vmatprep.mubr.msk.bf16.mxu0 %vm5734_vm0, %v7954_v13 }
 0x2d1   :  { %v1787_v30 = vpop.f32.mrb[120].mxu0  ;;  %5434 = vmatmul.mubr.msk.bf16.gmra.mrb[24].mxu1 %vm1389_vm4, %v2956_v26 }
 0x2d2   :  { %v7350_v10 = vadd.f32 %v1974_v29, %v1787_v30  ;;  %v5127_v57 = vpop.f32.mrb[121].mxu0  ;;  %5505 = vmatprep.mubr.msk.bf16.mxu1 %vm5734_vm0, %v7954_v13  ;;  %v7996_v29 = vld [vmem:[#allocation4_spill] sm:$0xff]  ;;  %v7997_v30 = vld [vmem:[#allocation7_spill] sm:$0xff] }
 0x2d3   :  { %v1790_v18 = vpop.f32.mrb[122].mxu0  ;;  %v3466_v2 = vsel %vm3454_vm8, %v3462_v37, %v7996_v29 }
 0x2d4   :  { %v7354_v36 = vadd.f32 %v1977_v54, %v1790_v18  ;;  %v5128_v25 = vpop.f32.mrb[123].mxu0  ;;  %v1990_v43 = vpop.f32.mrb[176].mxu1  ;;  %v2691_v54 = vor.u32 %v2690_v28, %v2687_v0 }
 0x2d5   :  { %v5195_v7 = vpop.f32.mrb[177].mxu1  ;;  %v7998_v25 = vld [vmem:[#allocation3_spill] sm:$0xff] }
 0x2d6   :  { %v1993_v41 = vpop.f32.mrb[178].mxu1  ;;  %v2692_v34 = vsel %vm2567_vm5, %v7004_v35, %v2691_v54  ;;  %v3195_v35 = vrot.slane %v7336_v58, 2  ;;  %v7999_v7 = vrot.slane %v7998_v25, 2  ;;  %v5730_v58 = vld [vmem:[%s7930_s3 + $0x108] sm:$0xff]  }
 0x2d7   :  { %5370 = vmatmul.mubr.msk.bf16.gmra.mrb[228].mxu0 %vm1389_vm4, %v7021_v27  ;;  %v5196_v49 = vpop.f32.mrb[179].mxu1  ;;  %v8000_v41 = vld [vmem:[#allocation10_spill] sm:$0xff] }
 0x2d8   :  { %5373 = vmatprep.mubr.msk.bf16.mxu0 %vm5734_vm0, %v7954_v13  ;;  %v3197_v0 = vsel %vm3194_vm9, %v3195_v35, %v7999_v7 }
 0x2d9   :  { %5506 = vmatmul.mubr.msk.bf16.vlgmr.msra.gmra.mrb[28].mxu1 %vm1389_vm4, %v3466_v2 }
 0x2da   :  { %v1795_v63 = vpop.f32.mrb[124].mxu0  ;;  %5509 = vmatprep.mubr.msk.bf16.mxu1 %vm5734_vm0, %v7954_v13 }
 0x2db   :  { %v7363_v48 = vadd.f32 %v1982_v60, %v1795_v63  ;;  %v5131_v32 = vpop.f32.mrb[125].mxu0  ;;  %v5731_v63 = vld [vmem:[%s7930_s3 + $0x110] sm:$0xff]  }
 0x2dc   :  { %v1798_v61 = vpop.f32.mrb[126].mxu0  ;;  %v2430_v9 = vpop.f32.mrb[180].mxu1 }
 0x2dd   :  { %v7367_v51 = vadd.f32 %v1985_v42, %v1798_v61  ;;  %v5132_v27 = vpop.f32.mrb[127].mxu0  ;;  %v5267_v39 = vpop.f32.mrb[181].mxu1 }
 0x2de   :  { %v2433_v14 = vpop.f32.mrb[182].mxu1 }
 0x2df   :  { %5374 = vmatmul.mubr.msk.bf16.gmra.mrb[232].mxu0 %vm1389_vm4, %v2692_v34  ;;  %v5268_v26 = vpop.f32.mrb[183].mxu1  ;;  %v8001_v34 = vld [vmem:[#allocation5_spill] sm:$0xff] }
 0x2e0   :  { %5445 = vmatprep.mubr.msk.bf16.mxu0 %vm5734_vm0, %v7954_v13 }
 0x2e1   :  { %5510 = vmatmul.mubr.msk.bf16.gmra.mrb[32].mxu1 %vm1389_vm4, %v7997_v30  ;;  %v8002_v30 = vld [vmem:[#allocation13_spill] sm:$0xff] }
 0x2e2   :  { %v1803_v60 = vpop.f32.mrb[128].mxu0  ;;  %5513 = vmatprep.mubr.msk.bf16.mxu1 %vm5734_vm0, %v7954_v13 }
 0x2e3   :  { %v7376_v17 = vadd.f32 %v1990_v43, %v1803_v60  ;;  %v5135_v42 = vpop.f32.mrb[129].mxu0 }
 0x2e4   :  { %v1806_v62 = vpop.f32.mrb[130].mxu0  ;;  %v2438_v57 = vpop.f32.mrb[184].mxu1 }
 0x2e5   :  { %v5136_v22 = vpop.f32.mrb[131].mxu0  ;;  %v5271_v18 = vpop.f32.mrb[185].mxu1 }
 0x2e6   :  { %v2441_v43 = vpop.f32.mrb[186].mxu1 }
 0x2e7   :  { %5446 = vmatmul.mubr.msk.bf16.vlgmr.msra.gmra.mrb[236].mxu0 %vm1389_vm4, %v3197_v0  ;;  %v5272_v28 = vpop.f32.mrb[187].mxu1 }
 0x2e8   :  { %5558 = vmatpush3.bf16.msra.mxu0 %v5729_v31  ;;  %5449 = vmatprep.mubr.msk.bf16.mxu0 %vm5734_vm0, %v7954_v13  ;;  %v8003_v28 = vld [vmem:[#allocation8_spill] sm:$0xff] }
 0x2e9   :  { %5559 = vmatprep.subr.bf16.mxu0 %v7954_v13  ;;  %5514 = vmatmul.mubr.msk.bf16.gmra.mrb[36].mxu1 %vm1389_vm4, %v8000_v41  ;;  %v8004_v41 = vld [vmem:[#allocation16_spill] sm:$0xff] }
 0x2ea   :  { %v2141_v37 = vpop.f32.mrb[132].mxu0  ;;  %5517 = vmatprep.mubr.msk.bf16.mxu1 %vm5734_vm0, %v7954_v13 }
 0x2eb   :  { %v2243_v49 = vadd.f32 %v2141_v37, %v7217_v47  ;;  %v5207_v29 = vpop.f32.mrb[133].mxu0 }
 0x2ec   :  { %v2144_v2 = vpop.f32.mrb[134].mxu0  ;;  %5560 = vmatpush3.bf16.msra.mxu0 %v5730_v58  ;;  %v2446_v61 = vpop.f32.mrb[188].mxu1 }
 0x2ed   :  { %v2244_v54 = vadd.f32 %v2144_v2, %v7223_v24  ;;  %v5208_v32 = vpop.f32.mrb[135].mxu0  ;;  %5561 = vmatprep.subr.bf16.mxu0 %v7954_v13  ;;  %v7404_v27 = vadd.f32 %v2430_v9, %v2243_v49  ;;  %v5275_v39 = vpop.f32.mrb[189].mxu1  ;;  %v5732_v24 = vld [vmem:[%s7930_s3 + $0x118] sm:$0xff]  }
 0x2ee   :  { %v2449_v47 = vpop.f32.mrb[190].mxu1  ;;  %v8005_v39 = vld [vmem:[#allocation11_spill] sm:$0xff] }
 0x2ef   :  { %5450 = vmatmul.mubr.msk.bf16.gmra.mrb[240].mxu0 %vm1389_vm4, %v8001_v34  ;;  %v7408_v26 = vadd.f32 %v2433_v14, %v2244_v54  ;;  %v5276_v60 = vpop.f32.mrb[191].mxu1 }
 0x2f0   :  { %5453 = vmatprep.mubr.msk.bf16.mxu0 %vm5734_vm0, %v7954_v13  ;;  %5562 = vmatpush3.bf16.msra.mxu0 %v5731_v63 }
 0x2f1   :  { %5563 = vmatprep.subr.bf16.mxu0 %v7954_v13  ;;  %5518 = vmatmul.mubr.msk.bf16.gmra.mrb[40].mxu1 %vm1389_vm4, %v8002_v30 }
 0x2f2   :  { %v2149_v9 = vpop.f32.mrb[136].mxu0  ;;  %5521 = vmatprep.mubr.msk.bf16.mxu1 %vm5734_vm0, %v7954_v13 }
 0x2f3   :  { %v2245_v42 = vadd.f32 %v2149_v9, %v7235_v45  ;;  %v5211_v62 = vpop.f32.mrb[137].mxu0 }
 0x2f4   :  { %v2152_v14 = vpop.f32.mrb[138].mxu0  ;;  %5564 = vmatpush3.bf16.msra.mxu0 %v5732_v24  ;;  %v2454_v22 = vpop.f32.mrb[192].mxu1  ;;  %v8006_v24 = vld [vmem:[#allocation20_spill] sm:$0xff] }
 0x2f5   :  { %v2246_v35 = vadd.f32 %v2152_v14, %v7239_v5  ;;  %v5212_v31 = vpop.f32.mrb[139].mxu0  ;;  %v7422_v18 = vadd.f32 %v2438_v57, %v2245_v42  ;;  %v5279_v7 = vpop.f32.mrb[193].mxu1 }
 0x2f6   :  { %v2457_v0 = vpop.f32.mrb[194].mxu1  ;;  %v8007_v31 = vld [vmem:[#allocation14_spill] sm:$0xff] }
 0x2f7   :  { %5454 = vmatmul.mubr.msk.bf16.gmra.mrb[244].mxu0 %vm1389_vm4, %v8003_v28  ;;  %v7426_v58 = vadd.f32 %v2441_v43, %v2246_v35  ;;  %v5280_v45 = vpop.f32.mrb[195].mxu1 }
 0x2f8   :  { %5457 = vmatprep.mubr.msk.bf16.mxu0 %vm5734_vm0, %v7954_v13  ;;  %v8008_v45 = vld [vmem:[#allocation24_spill] sm:$0xff] }
 0x2f9   :  { %5522 = vmatmul.mubr.msk.bf16.gmra.mrb[44].mxu1 %vm1389_vm4, %v8004_v41 }
 0x2fa   :  { %v2157_v37 = vpop.f32.mrb[140].mxu0  ;;  %5525 = vmatprep.mubr.msk.bf16.mxu1 %vm5734_vm0, %v7954_v13 }
 0x2fb   :  { %v2247_v5 = vadd.f32 %v2157_v37, %v7248_v46  ;;  %v5215_v49 = vpop.f32.mrb[141].mxu0 }
 0x2fc   :  { %v2160_v57 = vpop.f32.mrb[142].mxu0  ;;  %v2462_v43 = vpop.f32.mrb[196].mxu1 }
 0x2fd   :  { %v2248_v29 = vadd.f32 %v2160_v57, %v7252_v19  ;;  %v5216_v2 = vpop.f32.mrb[143].mxu0  ;;  %v7436_v63 = vadd.f32 %v2446_v61, %v2247_v5  ;;  %v5283_v54 = vpop.f32.mrb[197].mxu1 }
 0x2fe   :  { %v2465_v32 = vpop.f32.mrb[198].mxu1  ;;  %v8009_v2 = vld [vmem:[#allocation18_spill] sm:$0xff] }
 0x2ff   :  { %5458 = vmatmul.mubr.msk.bf16.gmra.mrb[248].mxu0 %vm1389_vm4, %v8005_v39  ;;  %v7440_v34 = vadd.f32 %v2449_v47, %v2248_v29  ;;  %v5284_v60 = vpop.f32.mrb[199].mxu1 }
 0x300   :  { %5461 = vmatprep.mubr.msk.bf16.mxu0 %vm5734_vm0, %v7954_v13  ;;  %v8010_v60 = vld [vmem:[#allocation28_spill] sm:$0xff] }
 0x301   :  { %5526 = vmatmul.mubr.msk.bf16.gmra.mrb[48].mxu1 %vm1389_vm4, %v8006_v24 }
 0x302   :  { %v2165_v46 = vpop.f32.mrb[144].mxu0  ;;  %5529 = vmatprep.mubr.msk.bf16.mxu1 %vm5734_vm0, %v7954_v13 }
 0x303   :  { %v2249_v19 = vadd.f32 %v2165_v46, %v7260_v4  ;;  %v5219_v9 = vpop.f32.mrb[145].mxu0 }
 0x304   :  { %v2168_v61 = vpop.f32.mrb[146].mxu0  ;;  %v2470_v47 = vpop.f32.mrb[200].mxu1 }
 0x305   :  { %v2250_v30 = vadd.f32 %v2168_v61, %v7264_v59  ;;  %v5220_v42 = vpop.f32.mrb[147].mxu0  ;;  %v7450_v62 = vadd.f32 %v2454_v22, %v2249_v19  ;;  %v5287_v14 = vpop.f32.mrb[201].mxu1 }
 0x306   :  { %v2473_v35 = vpop.f32.mrb[202].mxu1  ;;  %v8011_v42 = vld [vmem:[#allocation22_spill] sm:$0xff] }
 0x307   :  { %5462 = vmatmul.mubr.msk.bf16.gmra.mrb[252].mxu0 %vm1389_vm4, %v8007_v31  ;;  %v7454_v7 = vadd.f32 %v2457_v0, %v2250_v30  ;;  %v5288_v28 = vpop.f32.mrb[203].mxu1 }
 0x308   :  { %5465 = vmatprep.mubr.msk.bf16.mxu0 %vm5734_vm0, %v7954_v13  ;;  %v8012_v28 = vld [vmem:[#allocation33_spill] sm:$0xff] }
 0x309   :  { %5530 = vmatmul.mubr.msk.bf16.gmra.mrb[52].mxu1 %vm1389_vm4, %v8008_v45 }
 0x30a   :  { %v2173_v4 = vpop.f32.mrb[148].mxu0  ;;  %5533 = vmatprep.mubr.msk.bf16.mxu1 %vm5734_vm0, %v7954_v13 }
 0x30b   :  { %v2251_v59 = vadd.f32 %v2173_v4, %v7272_v21  ;;  %v5223_v37 = vpop.f32.mrb[149].mxu0 }
 0x30c   :  { %v2176_v22 = vpop.f32.mrb[150].mxu0  ;;  %v2478_v0 = vpop.f32.mrb[204].mxu1 }
 0x30d   :  { %v2252_v41 = vadd.f32 %v2176_v22, %v7276_v52  ;;  %v5224_v5 = vpop.f32.mrb[151].mxu0  ;;  %v7464_v49 = vadd.f32 %v2462_v43, %v2251_v59  ;;  %v5291_v57 = vpop.f32.mrb[205].mxu1 }
 0x30e   :  { %v2481_v29 = vpop.f32.mrb[206].mxu1  ;;  %v8013_v5 = vld [vmem:[#allocation26_spill] sm:$0xff] }
 0x30f   :  { %5466 = vmatmul.mubr.msk.bf16.gmra.mrb[0].mxu0 %vm1389_vm4, %v8009_v2  ;;  %v7468_v54 = vadd.f32 %v2465_v32, %v2252_v41  ;;  %v5292_v39 = vpop.f32.mrb[207].mxu1 }
 0x310   :  { %5469 = vmatprep.mubr.msk.bf16.mxu0 %vm5734_vm0, %v7954_v13  ;;  %v8014_v39 = vld [vmem:[#allocation38_spill] sm:$0xff] }
 0x311   :  { %5534 = vmatmul.mubr.msk.bf16.gmra.mrb[56].mxu1 %vm1389_vm4, %v8010_v60 }
 0x312   :  { %v2181_v21 = vpop.f32.mrb[152].mxu0  ;;  %5537 = vmatprep.mubr.msk.bf16.mxu1 %vm5734_vm0, %v7954_v13 }
 0x313   :  { %v2253_v52 = vadd.f32 %v2181_v21, %v7284_v20  ;;  %v5227_v46 = vpop.f32.mrb[153].mxu0 }
 0x314   :  { %v2184_v43 = vpop.f32.mrb[154].mxu0  ;;  %v2486_v32 = vpop.f32.mrb[208].mxu1  ;;  %v3508_v46 = vshrl.u32 %v6979_v1, 16 }
 0x315   :  { %v2254_v24 = vadd.f32 %v2184_v43, %v7288_v12  ;;  %v5228_v19 = vpop.f32.mrb[155].mxu0  ;;  %v7478_v9 = vadd.f32 %v2470_v47, %v2253_v52  ;;  %v5295_v61 = vpop.f32.mrb[209].mxu1  ;;  %v3511_v43 = vshll.u32 %v6979_v1, 16 }
 0x316   :  { %v2489_v30 = vpop.f32.mrb[210].mxu1 }
 0x317   :  { %5470 = vmatmul.mubr.msk.bf16.gmra.mrb[4].mxu0 %vm1389_vm4, %v8011_v42  ;;  %v7482_v14 = vadd.f32 %v2473_v35, %v2254_v24  ;;  %v5296_v31 = vpop.f32.mrb[211].mxu1  ;;  %v8015_v42 = vld [vmem:[#allocation31_spill] sm:$0xff] }
 0x318   :  { %5473 = vmatprep.mubr.msk.bf16.mxu0 %vm5734_vm0, %v7954_v13 }
 0x319   :  { %5538 = vmatmul.mubr.msk.bf16.gmra.mrb[60].mxu1 %vm1389_vm4, %v8012_v28 }
 0x31a   :  { %v2189_v20 = vpop.f32.mrb[156].mxu0  ;;  %5541 = vmatprep.mubr.msk.bf16.mxu1 %vm5734_vm0, %v7954_v13 }
 0x31b   :  { %v2255_v12 = vadd.f32 %v2189_v20, %v7296_v11  ;;  %v5231_v4 = vpop.f32.mrb[157].mxu0  ;;  %v3513_v20 = vrot.slane %v3511_v43, 3 }
 0x31c   :  { %v2192_v47 = vpop.f32.mrb[158].mxu0  ;;  %v2494_v35 = vpop.f32.mrb[212].mxu1 }
 0x31d   :  { %v2256_v45 = vadd.f32 %v2192_v47, %v7300_v23  ;;  %v5232_v59 = vpop.f32.mrb[159].mxu0  ;;  %v7492_v37 = vadd.f32 %v2478_v0, %v2255_v12  ;;  %v5299_v22 = vpop.f32.mrb[213].mxu1 }
 0x31e   :  { %v2497_v41 = vpop.f32.mrb[214].mxu1 }
 0x31f   :  { %5474 = vmatmul.mubr.msk.bf16.gmra.mrb[8].mxu0 %vm1389_vm4, %v8013_v5  ;;  %v7496_v57 = vadd.f32 %v2481_v29, %v2256_v45  ;;  %v5300_v2 = vpop.f32.mrb[215].mxu1 }
 0x320   :  { %5477 = vmatprep.mubr.msk.bf16.mxu0 %vm5734_vm0, %v7954_v13 }
 0x321   :  { %5542 = vmatmul.mubr.msk.bf16.gmra.mrb[64].mxu1 %vm1389_vm4, %v8014_v39 }
 0x322   :  { %v2197_v11 = vpop.f32.mrb[160].mxu0  ;;  %5545 = vmatprep.mubr.msk.bf16.mxu1 %vm5734_vm0, %v7954_v13 }
 0x323   :  { %v2257_v23 = vadd.f32 %v2197_v11, %v7308_v3  ;;  %v5235_v21 = vpop.f32.mrb[161].mxu0  ;;  %v8016_v11 = vld [vmem:[#allocation35_spill] sm:$0xff] }
 0x324   :  { %v2200_v0 = vpop.f32.mrb[162].mxu0  ;;  %v2502_v29 = vpop.f32.mrb[216].mxu1 }
 0x325   :  { %v2258_v60 = vadd.f32 %v2200_v0, %v7312_v40  ;;  %v5236_v52 = vpop.f32.mrb[163].mxu0  ;;  %v7508_v24 = vadd.f32 %v2486_v32, %v2257_v23  ;;  %v5303_v19 = vpop.f32.mrb[217].mxu1  ;;  %v3510_v40 = vrot.slane %v3508_v46, 2 }
 0x326   :  { %v2505_v61 = vpop.f32.mrb[218].mxu1 }
 0x327   :  { %5478 = vmatmul.mubr.msk.bf16.gmra.mrb[12].mxu0 %vm1389_vm4, %v8015_v42  ;;  %v7512_v3 = vadd.f32 %v2489_v30, %v2258_v60  ;;  %v5304_v31 = vpop.f32.mrb[219].mxu1  ;;  %v3514_v59 = vor.u32 %v3513_v20, %v3510_v40 }
 0x328   :  { %5481 = vmatprep.mubr.msk.bf16.mxu0 %vm5734_vm0, %v7954_v13 }
 0x329   :  { %5546 = vmatmul.mubr.msk.bf16.gmra.mrb[68].mxu1 %vm1389_vm4, %v7034_v44  ;;  %v3515_v39 = vsel %vm3454_vm8, %v7014_v6, %v3514_v59  ;;  %v3182_v6 = vld [vmem:[#allocation2 + $0x68] sm:$0x3f] }
 0x32a   :  { %v2205_v28 = vpop.f32.mrb[164].mxu0  ;;  %5549 = vmatprep.mubr.msk.bf16.mxu1 %vm5734_vm0, %v7954_v13  ;;  %v3218_v31 = vrot.slane %v3182_v6, 2 }
 0x32b   :  { %v2259_v32 = vadd.f32 %v2205_v28, %v7320_v16  ;;  %v5239_v12 = vpop.f32.mrb[165].mxu0 }
 0x32c   :  { %v2208_v4 = vpop.f32.mrb[166].mxu0  ;;  %v2510_v45 = vpop.f32.mrb[220].mxu1  ;;  %v8017_v12 = vrot.slane %v6968_v38, 2 }
 0x32d   :  { %v2260_v30 = vadd.f32 %v2208_v4, %v7324_v53  ;;  %v5240_v47 = vpop.f32.mrb[167].mxu0  ;;  %v7522_v22 = vadd.f32 %v2494_v35, %v2259_v32  ;;  %v5307_v5 = vpop.f32.mrb[221].mxu1 }
 0x32e   :  { %v2513_v2 = vpop.f32.mrb[222].mxu1  ;;  %v3219_v4 = vsel %vm3194_vm9, %v8017_v12, %v3218_v31 }
 0x32f   :  { %5482 = vmatmul.mubr.msk.bf16.gmra.mrb[16].mxu0 %vm1389_vm4, %v8016_v11  ;;  %v7526_v44 = vadd.f32 %v2497_v41, %v2260_v30  ;;  %v5308_v16 = vpop.f32.mrb[223].mxu1 }
 0x330   :  { %5485 = vmatprep.mubr.msk.bf16.mxu0 %vm5734_vm0, %v7954_v13 }
 0x331   :  { %5550 = vmatmul.mubr.msk.bf16.gmra.mrb[72].mxu1 %vm1389_vm4, %v3515_v39 }
 0x332   :  { %v2213_v53 = vpop.f32.mrb[168].mxu0  ;;  %5553 = vmatprep.mubr.msk.bf16.mxu1 %vm5734_vm0, %v7954_v13 }
 0x333   :  { %v2261_v35 = vadd.f32 %v2213_v53, %v7332_v8  ;;  %v5243_v23 = vpop.f32.mrb[169].mxu0 }
 0x334   :  { %v2216_v21 = vpop.f32.mrb[170].mxu0  ;;  %v2518_v60 = vpop.f32.mrb[224].mxu1 }
 0x335   :  { %v2262_v41 = vadd.f32 %v2216_v21, %v7338_v15  ;;  %v5244_v0 = vpop.f32.mrb[171].mxu0  ;;  %v7537_v52 = vadd.f32 %v2502_v29, %v2261_v35  ;;  %v5311_v46 = vpop.f32.mrb[225].mxu1  ;;  %v3740_v21 = vld [vmem:[#allocation2 + $0x8] sm:$0xf8] }
 0x336   :  { %v2521_v43 = vpop.f32.mrb[226].mxu1  ;;  %v3753_v46 = vrot.slane %v3740_v21, 3 }
 0x337   :  { %5486 = vmatmul.mubr.msk.bf16.gmra.mrb[20].mxu0 %vm1389_vm4, %v7009_v50  ;;  %v7541_v19 = vadd.f32 %v2505_v61, %v2262_v41  ;;  %v5312_v8 = vpop.f32.mrb[227].mxu1 }
 0x338   :  { %5489 = vmatprep.mubr.msk.bf16.mxu0 %vm5734_vm0, %v7954_v13 }
 0x339   :  { %5554 = vmatmul.mubr.msk.bf16.gmra.mrb[76].mxu1 %vm1389_vm4, %v3514_v59 }
 0x33a   :  { %v2221_v42 = vpop.f32.mrb[172].mxu0 }
 0x33b   :  { %v2263_v15 = vadd.f32 %v2221_v42, %v7350_v10  ;;  %v5247_v29 = vpop.f32.mrb[173].mxu0 }
 0x33c   :  { %v2224_v40 = vpop.f32.mrb[174].mxu0  ;;  %v2526_v32 = vpop.f32.mrb[228].mxu1 }
 0x33d   :  { %v2264_v20 = vadd.f32 %v2224_v40, %v7354_v36  ;;  %v5248_v28 = vpop.f32.mrb[175].mxu0  ;;  %v7548_v50 = vadd.f32 %v2510_v45, %v2263_v15  ;;  %v5315_v61 = vpop.f32.mrb[229].mxu1 }
 0x33e   :  { %v2529_v30 = vpop.f32.mrb[230].mxu1 }
 0x33f   :  { %5490 = vmatmul.mubr.msk.bf16.gmra.mrb[24].mxu0 %vm1389_vm4, %v3219_v4  ;;  %v7554_v47 = vadd.f32 %v2513_v2, %v2264_v20  ;;  %v5316_v59 = vpop.f32.mrb[231].mxu1 }
 0x340   :  { %5493 = vmatprep.mubr.msk.bf16.mxu0 %vm5734_vm0, %v7954_v13  ;;  %v8019_v59 = vld [vmem:[#allocation6_spill] sm:$0xff] }
 0x342   :  { %v2229_v10 = vpop.f32.mrb[176].mxu0 }
 0x343   :  { %v2265_v36 = vadd.f32 %v2229_v10, %v7363_v48  ;;  %v5251_v5 = vpop.f32.mrb[177].mxu0 }
 0x344   :  { %v2232_v45 = vpop.f32.mrb[178].mxu0  ;;  %v3054_v38 = vpop.f32.mrb[232].mxu1 }
 0x345   :  { %v2266_v11 = vadd.f32 %v2232_v45, %v7367_v51  ;;  %v5252_v16 = vpop.f32.mrb[179].mxu0  ;;  %v7560_v39 = vadd.f32 %v2518_v60, %v2265_v36  ;;  %v5387_v53 = vpop.f32.mrb[233].mxu1 }
 0x346   :  { %v3057_v35 = vpop.f32.mrb[234].mxu1 }
 0x347   :  { %5494 = vmatmul.mubr.msk.bf16.gmra.mrb[28].mxu0 %vm1389_vm4, %v3218_v31  ;;  %v7563_v2 = vadd.f32 %v2521_v43, %v2266_v11  ;;  %v5388_v23 = vpop.f32.mrb[235].mxu1  ;;  %v8018_v31 = vrot.slane %v7998_v25, 3 }
 0x348   :  { %5565 = vmatprep.mubr.msk.bf16.mxu0 %vm5734_vm0, %v7954_v13 }
 0x349   :  { %v3755_v43 = vsel %vm3752_vm10, %v3753_v46, %v8018_v31 }
 0x34a   :  { %v2237_v48 = vpop.f32.mrb[180].mxu0 }
 0x34b   :  { %v2267_v41 = vadd.f32 %v2237_v48, %v7376_v17  ;;  %v5255_v0 = vpop.f32.mrb[181].mxu0  ;;  %v8020_v48 = vld [vmem:[#allocation9_spill] sm:$0xff] }
 0x34c   :  { %v2240_v51 = vpop.f32.mrb[182].mxu0  ;;  %v3062_v60 = vpop.f32.mrb[236].mxu1 }
 0x34d   :  { %v5256_v6 = vpop.f32.mrb[183].mxu0  ;;  %v7568_v8 = vadd.f32 %v2526_v32, %v2267_v41  ;;  %v5391_v42 = vpop.f32.mrb[237].mxu1 }
 0x34e   :  { %v3065_v15 = vpop.f32.mrb[238].mxu1 }
 0x34f   :  { %5566 = vmatmul.mubr.msk.bf16.vlgmr.msra.gmra.mrb[32].mxu0 %vm1389_vm4, %v3755_v43  ;;  %v5392_v29 = vpop.f32.mrb[239].mxu1 }
 0x350   :  { %5569 = vmatprep.mubr.msk.bf16.mxu0 %vm5734_vm0, %v7954_v13  ;;  %v8021_v29 = vld [vmem:[#allocation12_spill] sm:$0xff] }
 0x352   :  { %v2790_v17 = vpop.f32.mrb[184].mxu0 }
 0x353   :  { %v2892_v40 = vadd.f32 %v2790_v17, %v7404_v27  ;;  %v5327_v20 = vpop.f32.mrb[185].mxu0 }
 0x354   :  { %v2793_v28 = vpop.f32.mrb[186].mxu0  ;;  %v3070_v12 = vpop.f32.mrb[240].mxu1 }
 0x355   :  { %v2893_v32 = vadd.f32 %v2793_v28, %v7408_v26  ;;  %v5328_v61 = vpop.f32.mrb[187].mxu0  ;;  %v7578_v4 = vadd.f32 %v3054_v38, %v2892_v40  ;;  %v5395_v25 = vpop.f32.mrb[241].mxu1 }
 0x356   :  { %v3073_v30 = vpop.f32.mrb[242].mxu1 }
 0x357   :  { %5570 = vmatmul.mubr.msk.bf16.gmra.mrb[36].mxu0 %vm1389_vm4, %v8019_v59  ;;  %v7582_v10 = vadd.f32 %v3057_v35, %v2893_v32  ;;  %v5396_v36 = vpop.f32.mrb[243].mxu1 }
 0x358   :  { %5573 = vmatprep.mubr.msk.bf16.mxu0 %vm5734_vm0, %v7954_v13  ;;  %v8022_v36 = vld [vmem:[#allocation15_spill] sm:$0xff] }
 0x35a   :  { %v2798_v27 = vpop.f32.mrb[188].mxu0 }
 0x35b   :  { %v2894_v5 = vadd.f32 %v2798_v27, %v7422_v18  ;;  %v5331_v45 = vpop.f32.mrb[189].mxu0 }
 0x35c   :  { %v2801_v26 = vpop.f32.mrb[190].mxu0  ;;  %v3078_v38 = vpop.f32.mrb[244].mxu1 }
 0x35d   :  { %v2895_v11 = vadd.f32 %v2801_v26, %v7426_v58  ;;  %v5332_v16 = vpop.f32.mrb[191].mxu0  ;;  %v7588_v53 = vadd.f32 %v3062_v60, %v2894_v5  ;;  %v5399_v23 = vpop.f32.mrb[245].mxu1 }
 0x35e   :  { %v3081_v21 = vpop.f32.mrb[246].mxu1 }
 0x35f   :  { %5574 = vmatmul.mubr.msk.bf16.gmra.mrb[40].mxu0 %vm1389_vm4, %v8020_v48  ;;  %v7592_v35 = vadd.f32 %v3065_v15, %v2895_v11  ;;  %v5400_v41 = vpop.f32.mrb[247].mxu1 }
 0x360   :  { %5577 = vmatprep.mubr.msk.bf16.mxu0 %vm5734_vm0, %v7954_v13  ;;  %v8023_v41 = vld [vmem:[#allocation19_spill] sm:$0xff] }
 0x362   :  { %v2806_v18 = vpop.f32.mrb[192].mxu0 }
 0x363   :  { %v2896_v0 = vadd.f32 %v2806_v18, %v7436_v63  ;;  %v5335_v51 = vpop.f32.mrb[193].mxu0 }
 0x364   :  { %v2809_v58 = vpop.f32.mrb[194].mxu0  ;;  %v3086_v60 = vpop.f32.mrb[248].mxu1 }
 0x365   :  { %v2897_v46 = vadd.f32 %v2809_v58, %v7440_v34  ;;  %v5336_v6 = vpop.f32.mrb[195].mxu0  ;;  %v7598_v42 = vadd.f32 %v3070_v12, %v2896_v0  ;;  %v5403_v31 = vpop.f32.mrb[249].mxu1 }
 0x366   :  { %v3089_v43 = vpop.f32.mrb[250].mxu1 }
 0x367   :  { %5578 = vmatmul.mubr.msk.bf16.gmra.mrb[44].mxu0 %vm1389_vm4, %v8021_v29  ;;  %v7602_v15 = vadd.f32 %v3073_v30, %v2897_v46  ;;  %v5404_v17 = vpop.f32.mrb[251].mxu1 }
 0x368   :  { %5581 = vmatprep.mubr.msk.bf16.mxu0 %vm5734_vm0, %v7954_v13  ;;  %v8024_v17 = vld [vmem:[#allocation23_spill] sm:$0xff] }
 0x36a   :  { %v2814_v63 = vpop.f32.mrb[196].mxu0 }
 0x36b   :  { %v2898_v40 = vadd.f32 %v2814_v63, %v7450_v62  ;;  %v5339_v20 = vpop.f32.mrb[197].mxu0 }
 0x36c   :  { %v2817_v34 = vpop.f32.mrb[198].mxu0  ;;  %v3094_v61 = vpop.f32.mrb[252].mxu1 }
 0x36d   :  { %v2899_v28 = vadd.f32 %v2817_v34, %v7454_v7  ;;  %v5340_v32 = vpop.f32.mrb[199].mxu0  ;;  %v7608_v12 = vadd.f32 %v3078_v38, %v2898_v40  ;;  %v5407_v25 = vpop.f32.mrb[253].mxu1 }
 0x36e   :  { %v3097_v59 = vpop.f32.mrb[254].mxu1 }
 0x36f   :  { %5582 = vmatmul.mubr.msk.bf16.gmra.mrb[48].mxu0 %vm1389_vm4, %v8022_v36  ;;  %v7612_v30 = vadd.f32 %v3081_v21, %v2899_v28  ;;  %v5408_v27 = vpop.f32.mrb[255].mxu1 }
 0x370   :  { %5585 = vmatprep.mubr.msk.bf16.mxu0 %vm5734_vm0, %v7954_v13  ;;  %v8025_v27 = vld [vmem:[#allocation27_spill] sm:$0xff] }
 0x372   :  { %v2822_v62 = vpop.f32.mrb[200].mxu0 }
 0x373   :  { %v2900_v5 = vadd.f32 %v2822_v62, %v7464_v49  ;;  %v5343_v45 = vpop.f32.mrb[201].mxu0 }
 0x374   :  { %v2825_v7 = vpop.f32.mrb[202].mxu0  ;;  %v3102_v16 = vpop.f32.mrb[0].mxu1 }
 0x375   :  { %v2901_v26 = vadd.f32 %v2825_v7, %v7468_v54  ;;  %v5344_v11 = vpop.f32.mrb[203].mxu0  ;;  %v7618_v38 = vadd.f32 %v3086_v60, %v2900_v5  ;;  %v5411_v23 = vpop.f32.mrb[1].mxu1 }
 0x376   :  { %v3105_v48 = vpop.f32.mrb[2].mxu1 }
 0x377   :  { %5586 = vmatmul.mubr.msk.bf16.gmra.mrb[52].mxu0 %vm1389_vm4, %v8023_v41  ;;  %v7622_v21 = vadd.f32 %v3089_v43, %v2901_v26  ;;  %v5412_v18 = vpop.f32.mrb[3].mxu1 }
 0x378   :  { %5589 = vmatprep.mubr.msk.bf16.mxu0 %vm5734_vm0, %v7954_v13  ;;  %v8026_v18 = vld [vmem:[#allocation32_spill] sm:$0xff] }
 0x37a   :  { %v2830_v49 = vpop.f32.mrb[204].mxu0 }
 0x37b   :  { %v2902_v0 = vadd.f32 %v2830_v49, %v7478_v9  ;;  %v5347_v51 = vpop.f32.mrb[205].mxu0 }
 0x37c   :  { %v2833_v54 = vpop.f32.mrb[206].mxu0  ;;  %v3110_v6 = vpop.f32.mrb[4].mxu1 }
 0x37d   :  { %v2903_v58 = vadd.f32 %v2833_v54, %v7482_v14  ;;  %v5348_v46 = vpop.f32.mrb[207].mxu0  ;;  %v7628_v60 = vadd.f32 %v3094_v61, %v2902_v0  ;;  %v5415_v31 = vpop.f32.mrb[5].mxu1 }
 0x37e   :  { %v3113_v29 = vpop.f32.mrb[6].mxu1 }
 0x37f   :  { %5590 = vmatmul.mubr.msk.bf16.gmra.mrb[56].mxu0 %vm1389_vm4, %v8024_v17  ;;  %v7632_v43 = vadd.f32 %v3097_v59, %v2903_v58  ;;  %v5416_v63 = vpop.f32.mrb[7].mxu1 }
 0x380   :  { %5593 = vmatprep.mubr.msk.bf16.mxu0 %vm5734_vm0, %v7954_v13  ;;  %v8027_v63 = vld [vmem:[#allocation36_spill] sm:$0xff] }
 0x382   :  { %v2838_v9 = vpop.f32.mrb[208].mxu0 }
 0x383   :  { %v2904_v40 = vadd.f32 %v2838_v9, %v7492_v37  ;;  %v5351_v20 = vpop.f32.mrb[209].mxu0 }
 0x384   :  { %v2841_v14 = vpop.f32.mrb[210].mxu0  ;;  %v3118_v32 = vpop.f32.mrb[8].mxu1 }
 0x385   :  { %v2905_v34 = vadd.f32 %v2841_v14, %v7496_v57  ;;  %v5352_v28 = vpop.f32.mrb[211].mxu0  ;;  %v7638_v61 = vadd.f32 %v3102_v16, %v2904_v40  ;;  %v5419_v25 = vpop.f32.mrb[9].mxu1 }
 0x386   :  { %v3121_v36 = vpop.f32.mrb[10].mxu1 }
 0x387   :  { %5594 = vmatmul.mubr.msk.bf16.gmra.mrb[60].mxu0 %vm1389_vm4, %v8025_v27  ;;  %v7642_v59 = vadd.f32 %v3105_v48, %v2905_v34  ;;  %v5420_v62 = vpop.f32.mrb[11].mxu1 }
 0x388   :  { %5597 = vmatprep.mubr.msk.bf16.mxu0 %vm5734_vm0, %v7954_v13 }
 0x38a   :  { %v2846_v37 = vpop.f32.mrb[212].mxu0 }
 0x38b   :  { %v2906_v5 = vadd.f32 %v2846_v37, %v7508_v24  ;;  %v5355_v45 = vpop.f32.mrb[213].mxu0 }
 0x38c   :  { %v2849_v57 = vpop.f32.mrb[214].mxu0  ;;  %v3126_v11 = vpop.f32.mrb[12].mxu1 }
 0x38d   :  { %v2907_v7 = vadd.f32 %v2849_v57, %v7512_v3  ;;  %v5356_v26 = vpop.f32.mrb[215].mxu0  ;;  %v7648_v16 = vadd.f32 %v3110_v6, %v2906_v5  ;;  %v5423_v23 = vpop.f32.mrb[13].mxu1 }
 0x38e   :  { %v3129_v41 = vpop.f32.mrb[14].mxu1 }
 0x38f   :  { %5598 = vmatmul.mubr.msk.bf16.gmra.mrb[64].mxu0 %vm1389_vm4, %v8026_v18  ;;  %v7652_v48 = vadd.f32 %v3113_v29, %v2907_v7  ;;  %v5424_v49 = vpop.f32.mrb[15].mxu1 }
 0x390   :  { %5601 = vmatprep.mubr.msk.bf16.mxu0 %vm5734_vm0, %v7954_v13 }
 0x392   :  { %v2854_v24 = vpop.f32.mrb[216].mxu0 }
 0x393   :  { %v2908_v0 = vadd.f32 %v2854_v24, %v7522_v22  ;;  %v5359_v51 = vpop.f32.mrb[217].mxu0 }
 0x394   :  { %v2857_v3 = vpop.f32.mrb[218].mxu0  ;;  %v3134_v46 = vpop.f32.mrb[16].mxu1 }
 0x395   :  { %v2909_v54 = vadd.f32 %v2857_v3, %v7526_v44  ;;  %v5360_v58 = vpop.f32.mrb[219].mxu0  ;;  %v7658_v6 = vadd.f32 %v3118_v32, %v2908_v0  ;;  %v5427_v31 = vpop.f32.mrb[17].mxu1 }
 0x396   :  { %v3137_v17 = vpop.f32.mrb[18].mxu1 }
 0x397   :  { %5602 = vmatmul.mubr.msk.bf16.gmra.mrb[68].mxu0 %vm1389_vm4, %v8027_v63  ;;  %v7662_v29 = vadd.f32 %v3121_v36, %v2909_v54  ;;  %v5428_v9 = vpop.f32.mrb[19].mxu1 }
 0x398   :  { %5605 = vmatprep.mubr.msk.bf16.mxu0 %vm5734_vm0, %v7954_v13 }
 0x39a   :  { %v2862_v22 = vpop.f32.mrb[220].mxu0 }
 0x39b   :  { %v2910_v40 = vadd.f32 %v2862_v22, %v7537_v52  ;;  %v5363_v20 = vpop.f32.mrb[221].mxu0 }
 0x39c   :  { %v2865_v44 = vpop.f32.mrb[222].mxu0  ;;  %v3142_v28 = vpop.f32.mrb[20].mxu1 }
 0x39d   :  { %v2911_v14 = vadd.f32 %v2865_v44, %v7541_v19  ;;  %v5364_v34 = vpop.f32.mrb[223].mxu0  ;;  %v7668_v32 = vadd.f32 %v3126_v11, %v2910_v40  ;;  %v5431_v25 = vpop.f32.mrb[21].mxu1 }
 0x39e   :  { %v3145_v27 = vpop.f32.mrb[22].mxu1 }
 0x39f   :  { %5606 = vmatmul.mubr.msk.bf16.gmra.mrb[72].mxu0 %vm1389_vm4, %v7024_v55  ;;  %v7672_v36 = vadd.f32 %v3129_v41, %v2911_v14  ;;  %v5432_v62 = vpop.f32.mrb[23].mxu1 }
 0x3a0   :  { %5609 = vmatprep.mubr.msk.bf16.mxu0 %vm5734_vm0, %v7954_v13 }
 0x3a2   :  { %v2870_v52 = vpop.f32.mrb[224].mxu0 }
 0x3a3   :  { %v2912_v37 = vadd.f32 %v2870_v52, %v7548_v50  ;;  %v5367_v5 = vpop.f32.mrb[225].mxu0 }
 0x3a4   :  { %v2873_v19 = vpop.f32.mrb[226].mxu0  ;;  %v3150_v7 = vpop.f32.mrb[24].mxu1 }
 0x3a5   :  { %v2913_v45 = vadd.f32 %v2873_v19, %v7554_v47  ;;  %v5368_v57 = vpop.f32.mrb[227].mxu0  ;;  %v7678_v26 = vadd.f32 %v3134_v46, %v2912_v37  ;;  %v5435_v11 = vpop.f32.mrb[25].mxu1 }
 0x3a6   :  { %v3153_v23 = vpop.f32.mrb[26].mxu1 }
 0x3a7   :  { %5610 = vmatmul.mubr.msk.bf16.gmra.mrb[76].mxu0 %vm1389_vm4, %v7029_v33  ;;  %v7682_v55 = vadd.f32 %v3137_v17, %v2913_v45  ;;  %v5436_v41 = vpop.f32.mrb[27].mxu1 }
 0x3a8   :  { %5613 = vmatprep.mubr.msk.bf16.mxu0 %vm5734_vm0, %v7954_v13 }
 0x3aa   :  { %v2878_v50 = vpop.f32.mrb[228].mxu0 }
 0x3ab   :  { %v2914_v18 = vadd.f32 %v2878_v50, %v7560_v39  ;;  %v5371_v49 = vpop.f32.mrb[229].mxu0 }
 0x3ac   :  { %v2881_v47 = vpop.f32.mrb[230].mxu0  ;;  %v3613_v51 = vpop.f32.mrb[28].mxu1 }
 0x3ad   :  { %v2915_v24 = vadd.f32 %v2881_v47, %v7563_v2  ;;  %v5372_v0 = vpop.f32.mrb[231].mxu0  ;;  %v7688_v3 = vadd.f32 %v3142_v28, %v2914_v18  ;;  %v5507_v54 = vpop.f32.mrb[29].mxu1 }
 0x3ae   :  { %v3616_v58 = vpop.f32.mrb[30].mxu1 }
 0x3af   :  { %5614 = vmatmul.mubr.msk.bf16.gmra.mrb[80].mxu0 %vm1389_vm4, %v3776_v56  ;;  %v7693_v33 = vadd.f32 %v3145_v27, %v2915_v24  ;;  %v5508_v13 = vpop.f32.mrb[31].mxu1 }
 0x3b2   :  { %v2886_v46 = vpop.f32.mrb[232].mxu0 }
 0x3b3   :  { %v2916_v39 = vadd.f32 %v2886_v46, %v7568_v8  ;;  %v5375_v31 = vpop.f32.mrb[233].mxu0 }
 0x3b4   :  { %v2889_v17 = vpop.f32.mrb[234].mxu0  ;;  %v3621_v2 = vpop.f32.mrb[32].mxu1 }
 0x3b5   :  { %v5376_v63 = vpop.f32.mrb[235].mxu0  ;;  %v7696_v9 = vadd.f32 %v3150_v7, %v2916_v39  ;;  %v5511_v22 = vpop.f32.mrb[33].mxu1 }
 0x3b6   :  { %v3624_v40 = vpop.f32.mrb[34].mxu1 }
 0x3b7   :  { %v5512_v20 = vpop.f32.mrb[35].mxu1 }
 0x3ba   :  { %v3317_v44 = vpop.f32.mrb[236].mxu0 }
 0x3bb   :  { %v3419_v1 = vadd.f32 %v3317_v44, %v7578_v4  ;;  %v5447_v14 = vpop.f32.mrb[237].mxu0 }
 0x3bc   :  { %v3320_v56 = vpop.f32.mrb[238].mxu0  ;;  %v3629_v25 = vpop.f32.mrb[36].mxu1 }
 0x3bd   :  { %v3420_v34 = vadd.f32 %v3320_v56, %v7582_v10  ;;  %v5448_v28 = vpop.f32.mrb[239].mxu0  ;;  %v7700_v27 = vadd.f32 %v3613_v51, %v3419_v1  ;;  %v5515_v8 = vpop.f32.mrb[37].mxu1 }
 0x3be   :  { %v3632_v62 = vpop.f32.mrb[38].mxu1 }
 0x3bf   :  { %v7702_v52 = vadd.f32 %v3616_v58, %v3420_v34  ;;  %v5516_v37 = vpop.f32.mrb[39].mxu1 }
 0x3c2   :  { %v3325_v5 = vpop.f32.mrb[240].mxu0 }
 0x3c3   :  { %v3421_v19 = vadd.f32 %v3325_v5, %v7588_v53  ;;  %v5451_v45 = vpop.f32.mrb[241].mxu0 }
 0x3c4   :  { %v3328_v57 = vpop.f32.mrb[242].mxu0  ;;  %v3637_v11 = vpop.f32.mrb[40].mxu1 }
 0x3c5   :  { %v3422_v4 = vadd.f32 %v3328_v57, %v7592_v35  ;;  %v5452_v7 = vpop.f32.mrb[243].mxu0  ;;  %v7706_v23 = vadd.f32 %v3621_v2, %v3421_v19  ;;  %v5519_v10 = vpop.f32.mrb[41].mxu1 }
 0x3c6   :  { %v3640_v41 = vpop.f32.mrb[42].mxu1 }
 0x3c7   :  { %v7708_v50 = vadd.f32 %v3624_v40, %v3422_v4  ;;  %v5520_v18 = vpop.f32.mrb[43].mxu1 }
 0x3ca   :  { %v3333_v49 = vpop.f32.mrb[244].mxu0 }
 0x3cb   :  { %v3423_v47 = vadd.f32 %v3333_v49, %v7598_v42  ;;  %v5455_v24 = vpop.f32.mrb[245].mxu0 }
 0x3cc   :  { %v3336_v0 = vpop.f32.mrb[246].mxu0  ;;  %v3645_v54 = vpop.f32.mrb[44].mxu1 }
 0x3cd   :  { %v3424_v53 = vadd.f32 %v3336_v0, %v7602_v15  ;;  %v5456_v51 = vpop.f32.mrb[247].mxu0  ;;  %v7712_v58 = vadd.f32 %v3629_v25, %v3423_v47  ;;  %v5523_v35 = vpop.f32.mrb[45].mxu1 }
 0x3ce   :  { %v3648_v13 = vpop.f32.mrb[46].mxu1 }
 0x3cf   :  { %v7714_v46 = vadd.f32 %v3632_v62, %v3424_v53  ;;  %v5524_v39 = vpop.f32.mrb[47].mxu1 }
 0x3d2   :  { %v3341_v31 = vpop.f32.mrb[248].mxu0 }
 0x3d3   :  { %v3425_v17 = vadd.f32 %v3341_v31, %v7608_v12  ;;  %v5459_v63 = vpop.f32.mrb[249].mxu0 }
 0x3d4   :  { %v3344_v2 = vpop.f32.mrb[250].mxu0  ;;  %v3653_v40 = vpop.f32.mrb[48].mxu1 }
 0x3d5   :  { %v3426_v42 = vadd.f32 %v3344_v2, %v7612_v30  ;;  %v5460_v22 = vpop.f32.mrb[251].mxu0  ;;  %v7718_v20 = vadd.f32 %v3637_v11, %v3425_v17  ;;  %v5527_v15 = vpop.f32.mrb[49].mxu1 }
 0x3d6   :  { %v3656_v44 = vpop.f32.mrb[50].mxu1 }
 0x3d7   :  { %v7720_v1 = vadd.f32 %v3640_v41, %v3426_v42  ;;  %v5528_v14 = vpop.f32.mrb[51].mxu1 }
 0x3da   :  { %v3349_v56 = vpop.f32.mrb[252].mxu0 }
 0x3db   :  { %v3427_v34 = vadd.f32 %v3349_v56, %v7618_v38  ;;  %v5463_v28 = vpop.f32.mrb[253].mxu0 }
 0x3dc   :  { %v3352_v25 = vpop.f32.mrb[254].mxu0  ;;  %v3661_v62 = vpop.f32.mrb[52].mxu1 }
 0x3dd   :  { %v3428_v12 = vadd.f32 %v3352_v25, %v7622_v21  ;;  %v5464_v8 = vpop.f32.mrb[255].mxu0  ;;  %v7724_v37 = vadd.f32 %v3645_v54, %v3427_v34  ;;  %v5531_v30 = vpop.f32.mrb[53].mxu1 }
 0x3de   :  { %v3664_v5 = vpop.f32.mrb[54].mxu1 }
 0x3df   :  { %v7726_v19 = vadd.f32 %v3648_v13, %v3428_v12  ;;  %v5532_v45 = vpop.f32.mrb[55].mxu1 }
 0x3e2   :  { %v3357_v57 = vpop.f32.mrb[0].mxu0 }
 0x3e3   :  { %v3429_v4 = vadd.f32 %v3357_v57, %v7628_v60  ;;  %v5467_v7 = vpop.f32.mrb[1].mxu0 }
 0x3e4   :  { %v3360_v11 = vpop.f32.mrb[2].mxu0  ;;  %v3669_v41 = vpop.f32.mrb[56].mxu1 }
 0x3e5   :  { %v3430_v38 = vadd.f32 %v3360_v11, %v7632_v43  ;;  %v5468_v10 = vpop.f32.mrb[3].mxu0  ;;  %v7730_v18 = vadd.f32 %v3653_v40, %v3429_v4  ;;  %v5535_v21 = vpop.f32.mrb[57].mxu1 }
 0x3e6   :  { %v3672_v49 = vpop.f32.mrb[58].mxu1 }
 0x3e7   :  { %v7732_v47 = vadd.f32 %v3656_v44, %v3430_v38  ;;  %v5536_v24 = vpop.f32.mrb[59].mxu1 }
 0x3ea   :  { %v3365_v0 = vpop.f32.mrb[4].mxu0 }
 0x3eb   :  { %v3431_v53 = vadd.f32 %v3365_v0, %v7638_v61  ;;  %v5471_v51 = vpop.f32.mrb[5].mxu0 }
 0x3ec   :  { %v3368_v54 = vpop.f32.mrb[6].mxu0  ;;  %v3677_v13 = vpop.f32.mrb[60].mxu1 }
 0x3ed   :  { %v3432_v60 = vadd.f32 %v3368_v54, %v7642_v59  ;;  %v5472_v35 = vpop.f32.mrb[7].mxu0  ;;  %v7736_v39 = vadd.f32 %v3661_v62, %v3431_v53  ;;  %v5539_v43 = vpop.f32.mrb[61].mxu1 }
 0x3ee   :  { %v3680_v31 = vpop.f32.mrb[62].mxu1 }
 0x3ef   :  { %v7738_v17 = vadd.f32 %v3664_v5, %v3432_v60  ;;  %v5540_v63 = vpop.f32.mrb[63].mxu1 }
 0x3f2   :  { %v3373_v2 = vpop.f32.mrb[8].mxu0 }
 0x3f3   :  { %v3433_v42 = vadd.f32 %v3373_v2, %v7648_v16  ;;  %v5475_v22 = vpop.f32.mrb[9].mxu0 }
 0x3f4   :  { %v3376_v40 = vpop.f32.mrb[10].mxu0  ;;  %v3685_v44 = vpop.f32.mrb[64].mxu1 }
 0x3f5   :  { %v3434_v61 = vadd.f32 %v3376_v40, %v7652_v48  ;;  %v5476_v15 = vpop.f32.mrb[11].mxu0  ;;  %v7742_v14 = vadd.f32 %v3669_v41, %v3433_v42  ;;  %v5543_v59 = vpop.f32.mrb[65].mxu1 }
 0x3f6   :  { %v3688_v56 = vpop.f32.mrb[66].mxu1 }
 0x3f7   :  { %v7744_v34 = vadd.f32 %v3672_v49, %v3434_v61  ;;  %v5544_v28 = vpop.f32.mrb[67].mxu1 }
 0x3fa   :  { %v3381_v25 = vpop.f32.mrb[12].mxu0 }
 0x3fb   :  { %v3435_v12 = vadd.f32 %v3381_v25, %v7658_v6  ;;  %v5479_v8 = vpop.f32.mrb[13].mxu0 }
 0x3fc   :  { %v3384_v62 = vpop.f32.mrb[14].mxu0  ;;  %v3693_v5 = vpop.f32.mrb[68].mxu1 }
 0x3fd   :  { %v3436_v16 = vadd.f32 %v3384_v62, %v7662_v29  ;;  %v5480_v30 = vpop.f32.mrb[15].mxu0  ;;  %v7748_v45 = vadd.f32 %v3677_v13, %v3435_v12  ;;  %v5547_v48 = vpop.f32.mrb[69].mxu1 }
 0x3fe   :  { %v3696_v57 = vpop.f32.mrb[70].mxu1 }
 0x3ff   :  { %v7750_v4 = vadd.f32 %v3680_v31, %v3436_v16  ;;  %v5548_v7 = vpop.f32.mrb[71].mxu1 }
 0x402   :  { %v3389_v11 = vpop.f32.mrb[16].mxu0 }
 0x403   :  { %v3437_v38 = vadd.f32 %v3389_v11, %v7668_v32  ;;  %v5483_v10 = vpop.f32.mrb[17].mxu0 }
 0x404   :  { %v3392_v41 = vpop.f32.mrb[18].mxu0  ;;  %v3701_v49 = vpop.f32.mrb[72].mxu1 }
 0x405   :  { %v3438_v6 = vadd.f32 %v3392_v41, %v7672_v36  ;;  %v5484_v21 = vpop.f32.mrb[19].mxu0  ;;  %v7754_v24 = vadd.f32 %v3685_v44, %v3437_v38  ;;  %v5551_v29 = vpop.f32.mrb[73].mxu1 }
 0x406   :  { %v3704_v0 = vpop.f32.mrb[74].mxu1 }
 0x407   :  { %v7756_v53 = vadd.f32 %v3688_v56, %v3438_v6  ;;  %v5552_v51 = vpop.f32.mrb[75].mxu1 }
 0x40a   :  { %v3397_v54 = vpop.f32.mrb[20].mxu0 }
 0x40b   :  { %v3439_v60 = vadd.f32 %v3397_v54, %v7678_v26  ;;  %v5487_v35 = vpop.f32.mrb[21].mxu0 }
 0x40c   :  { %v3400_v13 = vpop.f32.mrb[22].mxu0  ;;  %v3709_v31 = vpop.f32.mrb[76].mxu1 }
 0x40d   :  { %v3440_v32 = vadd.f32 %v3400_v13, %v7682_v55  ;;  %v5488_v43 = vpop.f32.mrb[23].mxu0  ;;  %v7760_v63 = vadd.f32 %v3693_v5, %v3439_v60  ;;  %v5555_v36 = vpop.f32.mrb[77].mxu1 }
 0x40e   :  { %v3712_v42 = vpop.f32.mrb[78].mxu1 }
 0x40f   :  { %v7762_v2 = vadd.f32 %v3696_v57, %v3440_v32  ;;  %v5556_v22 = vpop.f32.mrb[79].mxu1 }
 0x412   :  { %v3405_v40 = vpop.f32.mrb[24].mxu0 }
 0x413   :  { %v3441_v61 = vadd.f32 %v3405_v40, %v7688_v3  ;;  %v5491_v15 = vpop.f32.mrb[25].mxu0  ;;  %v7776_v3 = vld [vmem:[%s7932_s4] ss:$0 sm:$0xff] }
 0x414   :  { %v3408_v44 = vpop.f32.mrb[26].mxu0 }
 0x415   :  { %v3442_v26 = vadd.f32 %v3408_v44, %v7693_v33  ;;  %v5492_v59 = vpop.f32.mrb[27].mxu0  ;;  %v7766_v56 = vadd.f32 %v3701_v49, %v3441_v61 }
 0x417   :  { %v7768_v55 = vadd.f32 %v3704_v0, %v3442_v26 }
 0x41a   :  { %v3413_v28 = vpop.f32.mrb[28].mxu0 }
 0x41b   :  { %v3443_v25 = vadd.f32 %v3413_v28, %v7696_v9  ;;  %v5495_v12 = vpop.f32.mrb[29].mxu0 }
 0x41c   :  { %v3416_v8 = vpop.f32.mrb[30].mxu0 }
 0x41d   :  { %v7771_v62 = vadd.f32 %v3709_v31, %v3443_v25  ;;  %v5496_v16 = vpop.f32.mrb[31].mxu0 }
 0x422   :  { %v3875_v30 = vpop.f32.mrb[32].mxu0 }
 0x423   :  { %v3977_v33 = vadd.f32 %v3875_v30, %v7700_v27  ;;  %v5567_v5 = vpop.f32.mrb[33].mxu0 }
 0x424   :  { %v3878_v48 = vpop.f32.mrb[34].mxu0 }
 0x425   :  { %v4009_v57 = vadd.f32 %v7776_v3, %v3977_v33  ;;  %v3978_v7 = vadd.f32 %v3878_v48, %v7702_v52  ;;  %v5568_v9 = vpop.f32.mrb[35].mxu0 }
 0x427   :  { %v4034_v11 = vmax.f32 %v4009_v57, 0.0  ;;  %v4010_v38 = vadd.f32 %v7776_v3, %v3978_v7 }
 0x429   :  { %v4543_v10 = vpack.c.bf16 %v4034_v11, %v4034_v11  ;;  %v4035_v41 = vmax.f32 %v4010_v38, 0.0 }
 0x42a   :  { %v3883_v6 = vpop.f32.mrb[36].mxu0 }
 0x42b   :  { %4161 = vst.msk [vmem:[%s7933_s5] sm:$0xf] %vm4160_vm11, %v4543_v10  ;;  %v4544_v27 = vpack.c.bf16 %v4035_v41, %v4035_v41  ;;  %v3979_v21 = vadd.f32 %v3883_v6, %v7706_v23  ;;  %v5571_v49 = vpop.f32.mrb[37].mxu0 }
 0x42c   :  { %v3886_v29 = vpop.f32.mrb[38].mxu0 }
 0x42d   :  { %4162 = vst.msk [vmem:[%s7933_s5 + $0x4] sm:$0xf] %vm4160_vm11, %v4544_v27  ;;  %v4011_v52 = vadd.f32 %v7776_v3, %v3979_v21  ;;  %v3980_v0 = vadd.f32 %v3886_v29, %v7708_v50  ;;  %v5572_v51 = vpop.f32.mrb[39].mxu0 }
 0x42f   :  { %v4036_v54 = vmax.f32 %v4011_v52, 0.0  ;;  %v4012_v60 = vadd.f32 %v7776_v3, %v3980_v0 }
 0x431   :  { %v4545_v35 = vpack.c.bf16 %v4036_v54, %v4036_v54  ;;  %v4037_v13 = vmax.f32 %v4012_v60, 0.0 }
 0x432   :  { %v3891_v32 = vpop.f32.mrb[40].mxu0 }
 0x433   :  { %4163 = vst.msk [vmem:[%s7933_s5 + $0x8] sm:$0xf] %vm4160_vm11, %v4545_v35  ;;  %v4546_v23 = vpack.c.bf16 %v4037_v13, %v4037_v13  ;;  %v3981_v43 = vadd.f32 %v3891_v32, %v7712_v58  ;;  %v5575_v31 = vpop.f32.mrb[41].mxu0 }
 0x434   :  { %v3894_v36 = vpop.f32.mrb[42].mxu0 }
 0x435   :  { %4164 = vst.msk [vmem:[%s7933_s5 + $0xc] sm:$0xf] %vm4160_vm11, %v4546_v23  ;;  %v4013_v50 = vadd.f32 %v7776_v3, %v3981_v43  ;;  %v3982_v42 = vadd.f32 %v3894_v36, %v7714_v46  ;;  %v5576_v22 = vpop.f32.mrb[43].mxu0 }
 0x437   :  { %v4038_v40 = vmax.f32 %v4013_v50, 0.0  ;;  %v4014_v61 = vadd.f32 %v7776_v3, %v3982_v42 }
 0x439   :  { %v4547_v15 = vpack.c.bf16 %v4038_v40, %v4038_v40  ;;  %v4039_v44 = vmax.f32 %v4014_v61, 0.0 }
 0x43a   :  { %v3899_v26 = vpop.f32.mrb[44].mxu0 }
 0x43b   :  { %4165 = vst.msk [vmem:[%s7933_s5 + $0x10] sm:$0xf] %vm4160_vm11, %v4547_v15  ;;  %v4548_v58 = vpack.c.bf16 %v4039_v44, %v4039_v44  ;;  %v3983_v59 = vadd.f32 %v3899_v26, %v7718_v20  ;;  %v5579_v28 = vpop.f32.mrb[45].mxu0 }
 0x43c   :  { %v3902_v25 = vpop.f32.mrb[46].mxu0 }
 0x43d   :  { %4166 = vst.msk [vmem:[%s7933_s5 + $0x14] sm:$0xf] %vm4160_vm11, %v4548_v58  ;;  %v4015_v46 = vadd.f32 %v7776_v3, %v3983_v59  ;;  %v3984_v12 = vadd.f32 %v3902_v25, %v7720_v1  ;;  %v5580_v8 = vpop.f32.mrb[47].mxu0 }
 0x43f   :  { %v4040_v16 = vmax.f32 %v4015_v46, 0.0  ;;  %v4016_v30 = vadd.f32 %v7776_v3, %v3984_v12 }
 0x441   :  { %v4549_v33 = vpack.c.bf16 %v4040_v16, %v4040_v16  ;;  %v4041_v5 = vmax.f32 %v4016_v30, 0.0 }
 0x442   :  { %v3907_v48 = vpop.f32.mrb[48].mxu0 }
 0x443   :  { %4167 = vst.msk [vmem:[%s7933_s5 + $0x18] sm:$0xf] %vm4160_vm11, %v4549_v33  ;;  %v4550_v20 = vpack.c.bf16 %v4041_v5, %v4041_v5  ;;  %v3985_v57 = vadd.f32 %v3907_v48, %v7724_v37  ;;  %v5583_v7 = vpop.f32.mrb[49].mxu0 }
 0x444   :  { %v3910_v9 = vpop.f32.mrb[50].mxu0 }
 0x445   :  { %4168 = vst.msk [vmem:[%s7933_s5 + $0x1c] sm:$0xf] %vm4160_vm11, %v4550_v20  ;;  %v4017_v1 = vadd.f32 %v7776_v3, %v3985_v57  ;;  %v3986_v11 = vadd.f32 %v3910_v9, %v7726_v19  ;;  %v5584_v38 = vpop.f32.mrb[51].mxu0 }
 0x447   :  { %v4042_v10 = vmax.f32 %v4017_v1, 0.0  ;;  %v4018_v41 = vadd.f32 %v7776_v3, %v3986_v11 }
 0x449   :  { %v4551_v6 = vpack.c.bf16 %v4042_v10, %v4042_v10  ;;  %v4043_v27 = vmax.f32 %v4018_v41, 0.0 }
 0x44a   :  { %v3915_v21 = vpop.f32.mrb[52].mxu0 }
 0x44b   :  { %4169 = vst.msk [vmem:[%s7933_s5 + $0x20] sm:$0xf] %vm4160_vm11, %v4551_v6  ;;  %v4552_v37 = vpack.c.bf16 %v4043_v27, %v4043_v27  ;;  %v3987_v49 = vadd.f32 %v3915_v21, %v7730_v18  ;;  %v5587_v29 = vpop.f32.mrb[53].mxu0 }
 0x44c   :  { %v3918_v52 = vpop.f32.mrb[54].mxu0 }
 0x44d   :  { %4170 = vst.msk [vmem:[%s7933_s5 + $0x24] sm:$0xf] %vm4160_vm11, %v4552_v37  ;;  %v4019_v19 = vadd.f32 %v7776_v3, %v3987_v49  ;;  %v3988_v0 = vadd.f32 %v3918_v52, %v7732_v47  ;;  %v5588_v51 = vpop.f32.mrb[55].mxu0 }
 0x44f   :  { %v4044_v54 = vmax.f32 %v4019_v19, 0.0  ;;  %v4020_v60 = vadd.f32 %v7776_v3, %v3988_v0 }
 0x451   :  { %v4553_v35 = vpack.c.bf16 %v4044_v54, %v4044_v54  ;;  %v4045_v13 = vmax.f32 %v4020_v60, 0.0 }
 0x452   :  { %v3923_v32 = vpop.f32.mrb[56].mxu0 }
 0x453   :  { %4171 = vst.msk [vmem:[%s7933_s5 + $0x28] sm:$0xf] %vm4160_vm11, %v4553_v35  ;;  %v4554_v18 = vpack.c.bf16 %v4045_v13, %v4045_v13  ;;  %v3989_v23 = vadd.f32 %v3923_v32, %v7736_v39  ;;  %v5591_v43 = vpop.f32.mrb[57].mxu0 }
 0x454   :  { %v3926_v31 = vpop.f32.mrb[58].mxu0 }
 0x455   :  { %4172 = vst.msk [vmem:[%s7933_s5 + $0x2c] sm:$0xf] %vm4160_vm11, %v4554_v18  ;;  %v4021_v47 = vadd.f32 %v7776_v3, %v3989_v23  ;;  %v3990_v36 = vadd.f32 %v3926_v31, %v7738_v17  ;;  %v5592_v50 = vpop.f32.mrb[59].mxu0 }
 0x457   :  { %v4046_v42 = vmax.f32 %v4021_v47, 0.0  ;;  %v4022_v22 = vadd.f32 %v7776_v3, %v3990_v36 }
 0x459   :  { %v4555_v40 = vpack.c.bf16 %v4046_v42, %v4046_v42  ;;  %v4047_v61 = vmax.f32 %v4022_v22, 0.0 }
 0x45a   :  { %v3931_v15 = vpop.f32.mrb[60].mxu0 }
 0x45b   :  { %4173 = vst.msk [vmem:[%s7933_s5 + $0x30] sm:$0xf] %vm4160_vm11, %v4555_v40  ;;  %v4556_v39 = vpack.c.bf16 %v4047_v61, %v4047_v61  ;;  %v3991_v44 = vadd.f32 %v3931_v15, %v7742_v14  ;;  %v5595_v26 = vpop.f32.mrb[61].mxu0 }
 0x45c   :  { %v3934_v58 = vpop.f32.mrb[62].mxu0 }
 0x45d   :  { %4174 = vst.msk [vmem:[%s7933_s5 + $0x34] sm:$0xf] %vm4160_vm11, %v4556_v39  ;;  %v4023_v17 = vadd.f32 %v7776_v3, %v3991_v44  ;;  %v3992_v59 = vadd.f32 %v3934_v58, %v7744_v34  ;;  %v5596_v28 = vpop.f32.mrb[63].mxu0 }
 0x45f   :  { %v4048_v25 = vmax.f32 %v4023_v17, 0.0  ;;  %v4024_v46 = vadd.f32 %v7776_v3, %v3992_v59 }
 0x461   :  { %v4557_v12 = vpack.c.bf16 %v4048_v25, %v4048_v25  ;;  %v4049_v8 = vmax.f32 %v4024_v46, 0.0 }
 0x462   :  { %v3939_v16 = vpop.f32.mrb[64].mxu0 }
 0x463   :  { %4175 = vst.msk [vmem:[%s7933_s5 + $0x38] sm:$0xf] %vm4160_vm11, %v4557_v12  ;;  %v4558_v14 = vpack.c.bf16 %v4049_v8, %v4049_v8  ;;  %v3993_v30 = vadd.f32 %v3939_v16, %v7748_v45  ;;  %v5599_v33 = vpop.f32.mrb[65].mxu0 }
 0x464   :  { %v3942_v5 = vpop.f32.mrb[66].mxu0 }
 0x465   :  { %4176 = vst.msk [vmem:[%s7933_s5 + $0x3c] sm:$0xf] %vm4160_vm11, %v4558_v14  ;;  %v4025_v34 = vadd.f32 %v7776_v3, %v3993_v30  ;;  %v3994_v48 = vadd.f32 %v3942_v5, %v7750_v4  ;;  %v5600_v20 = vpop.f32.mrb[67].mxu0 }
 0x467   :  { %v4050_v57 = vmax.f32 %v4025_v34, 0.0  ;;  %v4026_v7 = vadd.f32 %v7776_v3, %v3994_v48 }
 0x469   :  { %v4559_v9 = vpack.c.bf16 %v4050_v57, %v4050_v57  ;;  %v4051_v1 = vmax.f32 %v4026_v7, 0.0 }
 0x46a   :  { %v3947_v11 = vpop.f32.mrb[68].mxu0 }
 0x46b   :  { %4177 = vst.msk [vmem:[%s7933_s5 + $0x40] sm:$0xf] %vm4160_vm11, %v4559_v9  ;;  %v4560_v45 = vpack.c.bf16 %v4051_v1, %v4051_v1  ;;  %v3995_v38 = vadd.f32 %v3947_v11, %v7754_v24  ;;  %v5603_v10 = vpop.f32.mrb[69].mxu0 }
 0x46c   :  { %v3950_v41 = vpop.f32.mrb[70].mxu0 }
 0x46d   :  { %4178 = vst.msk [vmem:[%s7933_s5 + $0x44] sm:$0xf] %vm4160_vm11, %v4560_v45  ;;  %v4027_v4 = vadd.f32 %v7776_v3, %v3995_v38  ;;  %v3996_v6 = vadd.f32 %v3950_v41, %v7756_v53  ;;  %v5604_v27 = vpop.f32.mrb[71].mxu0 }
 0x46f   :  { %v4052_v21 = vmax.f32 %v4027_v4, 0.0  ;;  %v4028_v37 = vadd.f32 %v7776_v3, %v3996_v6 }
 0x471   :  { %v4561_v49 = vpack.c.bf16 %v4052_v21, %v4052_v21  ;;  %v4053_v29 = vmax.f32 %v4028_v37, 0.0 }
 0x472   :  { %v3955_v52 = vpop.f32.mrb[72].mxu0 }
 0x473   :  { %4179 = vst.msk [vmem:[%s7933_s5 + $0x48] sm:$0xf] %vm4160_vm11, %v4561_v49  ;;  %v4562_v24 = vpack.c.bf16 %v4053_v29, %v4053_v29  ;;  %v3997_v19 = vadd.f32 %v3955_v52, %v7760_v63  ;;  %v5607_v0 = vpop.f32.mrb[73].mxu0 }
 0x474   :  { %v3958_v51 = vpop.f32.mrb[74].mxu0 }
 0x475   :  { %4180 = vst.msk [vmem:[%s7933_s5 + $0x4c] sm:$0xf] %vm4160_vm11, %v4562_v24  ;;  %v4029_v53 = vadd.f32 %v7776_v3, %v3997_v19  ;;  %v3998_v54 = vadd.f32 %v3958_v51, %v7762_v2  ;;  %v5608_v60 = vpop.f32.mrb[75].mxu0 }
 0x477   :  { %v4054_v35 = vmax.f32 %v4029_v53, 0.0  ;;  %v4030_v13 = vadd.f32 %v7776_v3, %v3998_v54 }
 0x479   :  { %v4563_v32 = vpack.c.bf16 %v4054_v35, %v4054_v35  ;;  %v4055_v18 = vmax.f32 %v4030_v13, 0.0 }
 0x47a   :  { %v3963_v23 = vpop.f32.mrb[76].mxu0 }
 0x47b   :  { %4181 = vst.msk [vmem:[%s7933_s5 + $0x50] sm:$0xf] %vm4160_vm11, %v4563_v32  ;;  %v4564_v63 = vpack.c.bf16 %v4055_v18, %v4055_v18  ;;  %v3999_v43 = vadd.f32 %v3963_v23, %v7766_v56  ;;  %v5611_v31 = vpop.f32.mrb[77].mxu0 }
 0x47c   :  { %v3966_v47 = vpop.f32.mrb[78].mxu0 }
 0x47d   :  { %4182 = vst.msk [vmem:[%s7933_s5 + $0x54] sm:$0xf] %vm4160_vm11, %v4564_v63  ;;  %v4031_v2 = vadd.f32 %v7776_v3, %v3999_v43  ;;  %v4000_v36 = vadd.f32 %v3966_v47, %v7768_v55  ;;  %v5612_v50 = vpop.f32.mrb[79].mxu0 }
 0x47f   :  { %v4056_v42 = vmax.f32 %v4031_v2, 0.0  ;;  %v4032_v22 = vadd.f32 %v7776_v3, %v4000_v36 }
 0x481   :  { %v4565_v40 = vpack.c.bf16 %v4056_v42, %v4056_v42  ;;  %v4057_v61 = vmax.f32 %v4032_v22, 0.0 }
 0x482   :  { %v3971_v15 = vpop.f32.mrb[80].mxu0 }
 0x483   :  { %4183 = vst.msk [vmem:[%s7933_s5 + $0x58] sm:$0xf] %vm4160_vm11, %v4565_v40  ;;  %v4566_v56 = vpack.c.bf16 %v4057_v61, %v4057_v61  ;;  %v4001_v39 = vadd.f32 %v3971_v15, %v7771_v62  ;;  %v5615_v44 = vpop.f32.mrb[81].mxu0 }
 0x484   :  { %v3974_v26 = vpop.f32.mrb[82].mxu0 }
 0x485   :  { %4184 = vst.msk [vmem:[%s7933_s5 + $0x5c] sm:$0xf] %vm4160_vm11, %v4566_v56  ;;  %v4033_v55 = vadd.f32 %v7776_v3, %v4001_v39  ;;  %v5616_v58 = vpop.f32.mrb[83].mxu0 }
 0x487   :  { %v4058_v17 = vmax.f32 %v4033_v55, 0.0 }
 0x489   :  { %v4567_v59 = vpack.c.bf16 %v4058_v17, %v4058_v17 }
 0x48b   :  { %4185 = vst.msk [vmem:[%s7933_s5 + $0x60] sm:$0xf] %vm4160_vm11, %v4567_v59 }

// kernel: dqn_forward.5
= control target key start
LH: loop header
LB: loop body
LE: loop exit
PB: predicated region body
PF: predicated region fallthrough
CT: control target
= control target key end

     0   :  { %s11366_s1 = inlined_call_operand.vmem [shape: bf16[3200,512], index: 1, kind: input, shape index: {}]   ;;  %s11367_s0 = inlined_call_operand.vmem [shape: bf16[16,3200], index: 0, kind: input, shape index: {}]   ;;  %s11368_s3 = inlined_call_operand.vmem [shape: bf16[512,128], index: 3, kind: input, shape index: {}]   ;;  %s11369_s2 = inlined_call_operand.vmem [shape: f32[1,512], index: 2, kind: input, shape index: {}]   ;;  %s11370_s4 = inlined_call_operand.vmem [shape: f32[1,128], index: 4, kind: input, shape index: {}]   ;;  %s11371_s5 = inlined_call_operand.vmem [shape: f32[16,128], index: 5, kind: output, shape index: {}]  }
   0x1   :  { %v7483_v0 = vld [vmem:[%s11366_s1 + $0x4] ss:$16 sps:$4 sm:$0xff]   ;;  %v7485_v1 = vld [vmem:[%s11366_s1 + $0xc] ss:$16 sps:$4 sm:$0xff]   ;;  %v7487_v2 = vld [vmem:[%s11366_s1] ss:$16 sps:$4 sm:$0xff]  }
   0x2   :  { %4995 = vmatprep.subr.bf16.mxu0 %v7483_v0  ;;  %v7488_v3 = vld [vmem:[%s11366_s1 + $0x8] ss:$16 sps:$4 sm:$0xff]   ;;  %5554 = vmatprep.subr.bf16.mxu1 %v7485_v1  ;;  %v7489_v4 = vld [vmem:[%s11366_s1 + $0x24] ss:$16 sps:$4 sm:$0xff]   ;;  %v7491_v5 = vld [vmem:[%s11366_s1 + $0x2c] ss:$16 sps:$4 sm:$0xff]  }
   0x3   :  { %4996 = vmatpush1.bf16.msra.mxu0 %v7487_v2  ;;  %5555 = vmatpush1.bf16.msra.mxu1 %v7488_v3  ;;  %v7493_v6 = vld [vmem:[%s11366_s1 + $0x20] ss:$16 sps:$4 sm:$0xff]   ;;  %v7494_v7 = vld [vmem:[%s11366_s1 + $0x28] ss:$16 sps:$4 sm:$0xff]   ;;  %v7495_v8 = vld [vmem:[%s11366_s1 + $0x44] ss:$16 sps:$4 sm:$0xff]  }
   0x4   :  { %4997 = vmatprep.subr.bf16.mxu0 %v7489_v4  ;;  %5556 = vmatprep.subr.bf16.mxu1 %v7491_v5  ;;  %v7497_v9 = vld [vmem:[%s11366_s1 + $0x4c] ss:$16 sps:$4 sm:$0xff]   ;;  %v7499_v10 = vld [vmem:[%s11366_s1 + $0x40] ss:$16 sps:$4 sm:$0xff]   ;;  %v7500_v11 = vld [vmem:[%s11366_s1 + $0x48] ss:$16 sps:$4 sm:$0xff]  }
   0x5   :  { %v7501_v12 = vld [vmem:[%s11366_s1 + $0x64] ss:$16 sps:$4 sm:$0xff]   ;;  %v7503_v13 = vld [vmem:[%s11366_s1 + $0x6c] ss:$16 sps:$4 sm:$0xff]   ;;  %v7505_v14 = vld [vmem:[%s11366_s1 + $0x60] ss:$16 sps:$4 sm:$0xff]  }
   0x6   :  { %v7506_v15 = vld [vmem:[%s11366_s1 + $0x68] ss:$16 sps:$4 sm:$0xff]   ;;  %v7507_v16 = vld [vmem:[%s11366_s1 + $0x84] ss:$16 sps:$4 sm:$0xff]   ;;  %v7509_v17 = vld [vmem:[%s11366_s1 + $0x8c] ss:$16 sps:$4 sm:$0xff]  }
   0x7   :  { %4998 = vmatpush1.bf16.msra.mxu0 %v7493_v6  ;;  %5557 = vmatpush1.bf16.msra.mxu1 %v7494_v7  ;;  %v7511_v18 = vld [vmem:[%s11366_s1 + $0x80] ss:$16 sps:$4 sm:$0xff]   ;;  %v7512_v19 = vld [vmem:[%s11366_s1 + $0x88] ss:$16 sps:$4 sm:$0xff]   ;;  %v7513_v20 = vld [vmem:[%s11366_s1 + $0xa4] ss:$16 sps:$4 sm:$0xff]  }
   0x8   :  { %4999 = vmatprep.subr.bf16.mxu0 %v7495_v8  ;;  %5558 = vmatprep.subr.bf16.mxu1 %v7497_v9  ;;  %v7515_v21 = vld [vmem:[%s11366_s1 + $0xac] ss:$16 sps:$4 sm:$0xff]   ;;  %v7517_v22 = vld [vmem:[%s11366_s1 + $0xa0] ss:$16 sps:$4 sm:$0xff]   ;;  %v7518_v23 = vld [vmem:[%s11366_s1 + $0xa8] ss:$16 sps:$4 sm:$0xff]  }
   0x9   :  { %v7519_v24 = vld [vmem:[%s11366_s1 + $0xc4] ss:$16 sps:$4 sm:$0xff]   ;;  %v7521_v25 = vld [vmem:[%s11366_s1 + $0xcc] ss:$16 sps:$4 sm:$0xff]   ;;  %v7523_v26 = vld [vmem:[%s11366_s1 + $0xc0] ss:$16 sps:$4 sm:$0xff]  }
   0xa   :  { %v7524_v27 = vld [vmem:[%s11366_s1 + $0xc8] ss:$16 sps:$4 sm:$0xff]   ;;  %v7525_v28 = vld [vmem:[%s11366_s1 + $0xe4] ss:$16 sps:$4 sm:$0xff]   ;;  %v7527_v29 = vld [vmem:[%s11366_s1 + $0xec] ss:$16 sps:$4 sm:$0xff]  }
   0xb   :  { %5000 = vmatpush1.bf16.msra.mxu0 %v7499_v10  ;;  %5559 = vmatpush1.bf16.msra.mxu1 %v7500_v11  ;;  %v7529_v30 = vld [vmem:[%s11366_s1 + $0xe0] ss:$16 sps:$4 sm:$0xff]   ;;  %v7530_v31 = vld [vmem:[%s11366_s1 + $0xe8] ss:$16 sps:$4 sm:$0xff]   ;;  %v7531_v32 = vld [vmem:[%s11366_s1 + $0x104] ss:$16 sps:$4 sm:$0xff]  }
   0xc   :  { %5001 = vmatprep.subr.bf16.mxu0 %v7501_v12  ;;  %5560 = vmatprep.subr.bf16.mxu1 %v7503_v13  ;;  %v7533_v33 = vld [vmem:[%s11366_s1 + $0x10c] ss:$16 sps:$4 sm:$0xff]   ;;  %v7535_v34 = vld [vmem:[%s11366_s1 + $0x100] ss:$16 sps:$4 sm:$0xff]   ;;  %v7536_v35 = vld [vmem:[%s11366_s1 + $0x108] ss:$16 sps:$4 sm:$0xff]  }
   0xd   :  { %v7537_v36 = vld [vmem:[%s11366_s1 + $0x124] ss:$16 sps:$4 sm:$0xff]   ;;  %v7539_v37 = vld [vmem:[%s11366_s1 + $0x12c] ss:$16 sps:$4 sm:$0xff]   ;;  %v7541_v38 = vld [vmem:[%s11366_s1 + $0x120] ss:$16 sps:$4 sm:$0xff]  }
   0xe   :  { %v7542_v39 = vld [vmem:[%s11366_s1 + $0x128] ss:$16 sps:$4 sm:$0xff]   ;;  %v7543_v40 = vld [vmem:[%s11366_s1 + $0x144] ss:$16 sps:$4 sm:$0xff]   ;;  %v7545_v41 = vld [vmem:[%s11366_s1 + $0x14c] ss:$16 sps:$4 sm:$0xff]  }
   0xf   :  { %5002 = vmatpush1.bf16.msra.mxu0 %v7505_v14  ;;  %5561 = vmatpush1.bf16.msra.mxu1 %v7506_v15  ;;  %v7547_v42 = vld [vmem:[%s11366_s1 + $0x140] ss:$16 sps:$4 sm:$0xff]   ;;  %v7548_v43 = vld [vmem:[%s11366_s1 + $0x148] ss:$16 sps:$4 sm:$0xff]   ;;  %v7549_v44 = vld [vmem:[%s11366_s1 + $0x164] ss:$16 sps:$4 sm:$0xff]  }
  0x10   :  { %5003 = vmatprep.subr.bf16.mxu0 %v7507_v16  ;;  %5562 = vmatprep.subr.bf16.mxu1 %v7509_v17  ;;  %v7551_v45 = vld [vmem:[%s11366_s1 + $0x16c] ss:$16 sps:$4 sm:$0xff]   ;;  %v7553_v46 = vld [vmem:[%s11366_s1 + $0x160] ss:$16 sps:$4 sm:$0xff]   ;;  %v7554_v47 = vld [vmem:[%s11366_s1 + $0x168] ss:$16 sps:$4 sm:$0xff]  }
  0x11   :  { %v7581_v48 = vld [vmem:[%s11367_s0 + $0x4] ss:$100 sps:$4 sm:$0xff]   ;;  %v7557_v50 = vld [vmem:[%s11366_s1 + $0x18c] ss:$16 sps:$4 sm:$0xff]   ;;  %v7559_v51 = vld [vmem:[%s11366_s1 + $0x180] ss:$16 sps:$4 sm:$0xff]  }
  0x12   :  { %v7555_v49 = vld [vmem:[%s11366_s1 + $0x184] ss:$16 sps:$4 sm:$0xff]   ;;  %5027 = vmatprep.mubr.bf16.mxu0 %v7581_v48  ;;  %5586 = vmatprep.mubr.bf16.mxu1 %v7581_v48  ;;  %v7560_v52 = vld [vmem:[%s11366_s1 + $0x188] ss:$16 sps:$4 sm:$0xff]   ;;  %v7563_v54 = vld [vmem:[%s11366_s1 + $0x1ac] ss:$16 sps:$4 sm:$0xff]  }
  0x13   :  { %5004 = vmatpush1.bf16.msra.mxu0 %v7511_v18  ;;  %5563 = vmatpush1.bf16.msra.mxu1 %v7512_v19  ;;  %v7561_v53 = vld [vmem:[%s11366_s1 + $0x1a4] ss:$16 sps:$4 sm:$0xff]   ;;  %v7565_v55 = vld [vmem:[%s11366_s1 + $0x1a0] ss:$16 sps:$4 sm:$0xff]   ;;  %v7566_v56 = vld [vmem:[%s11366_s1 + $0x1a8] ss:$16 sps:$4 sm:$0xff]  }
  0x14   :  { %5005 = vmatprep.subr.bf16.mxu0 %v7513_v20  ;;  %5564 = vmatprep.subr.bf16.mxu1 %v7515_v21  ;;  %v7567_v57 = vld [vmem:[%s11366_s1 + $0x1c4] ss:$16 sps:$4 sm:$0xff]   ;;  %v7569_v58 = vld [vmem:[%s11366_s1 + $0x1cc] ss:$16 sps:$4 sm:$0xff]   ;;  %v7571_v59 = vld [vmem:[%s11366_s1 + $0x1c0] ss:$16 sps:$4 sm:$0xff]  }
  0x15   :  { %v7572_v60 = vld [vmem:[%s11366_s1 + $0x1c8] ss:$16 sps:$4 sm:$0xff]   ;;  %v7573_v61 = vld [vmem:[%s11366_s1 + $0x1e4] ss:$16 sps:$4 sm:$0xff]   ;;  %v7575_v62 = vld [vmem:[%s11366_s1 + $0x1ec] ss:$16 sps:$4 sm:$0xff]  }
  0x16   :  { %v7577_v63 = vld [vmem:[%s11366_s1 + $0x1e0] ss:$16 sps:$4 sm:$0xff]   ;;  %v7578_v0 = vld [vmem:[%s11366_s1 + $0x1e8] ss:$16 sps:$4 sm:$0xff]   ;;  %v7584_v1 = vld [vmem:[%s11366_s1 + $0x204] ss:$16 sps:$4 sm:$0xff]  }
  0x17   :  { %5006 = vmatpush1.bf16.msra.mxu0 %v7517_v22  ;;  %5565 = vmatpush1.bf16.msra.mxu1 %v7518_v23  ;;  %v7587_v2 = vld [vmem:[%s11366_s1 + $0x20c] ss:$16 sps:$4 sm:$0xff]   ;;  %v7579_v3 = vld [vmem:[%s11367_s0] ss:$100 sps:$4 sm:$0xff]   ;;  %v7585_v5 = vld [vmem:[%s11366_s1 + $0x208] ss:$16 sps:$4 sm:$0xff]  }
  0x18   :  { %5007 = vmatprep.subr.bf16.mxu0 %v7519_v24  ;;  %5566 = vmatprep.subr.bf16.mxu1 %v7521_v25  ;;  %v7582_v4 = vld [vmem:[%s11366_s1 + $0x200] ss:$16 sps:$4 sm:$0xff]   ;;  %v7590_v6 = vld [vmem:[%s11366_s1 + $0x224] ss:$16 sps:$4 sm:$0xff]   ;;  %v7593_v7 = vld [vmem:[%s11366_s1 + $0x22c] ss:$16 sps:$4 sm:$0xff]  }
  0x19   :  { %v7588_v8 = vld [vmem:[%s11366_s1 + $0x220] ss:$16 sps:$4 sm:$0xff]   ;;  %v7591_v9 = vld [vmem:[%s11366_s1 + $0x228] ss:$16 sps:$4 sm:$0xff]   ;;  %v7596_v10 = vld [vmem:[%s11366_s1 + $0x244] ss:$16 sps:$4 sm:$0xff]  }
  0x1a   :  { %v7599_v11 = vld [vmem:[%s11366_s1 + $0x24c] ss:$16 sps:$4 sm:$0xff]   ;;  %v7594_v12 = vld [vmem:[%s11366_s1 + $0x240] ss:$16 sps:$4 sm:$0xff]   ;;  %v7597_v13 = vld [vmem:[%s11366_s1 + $0x248] ss:$16 sps:$4 sm:$0xff]  }
  0x1b   :  { %5008 = vmatpush1.bf16.msra.mxu0 %v7523_v26  ;;  %5567 = vmatpush1.bf16.msra.mxu1 %v7524_v27  ;;  %v7602_v14 = vld [vmem:[%s11366_s1 + $0x264] ss:$16 sps:$4 sm:$0xff]   ;;  %v7605_v15 = vld [vmem:[%s11366_s1 + $0x26c] ss:$16 sps:$4 sm:$0xff]   ;;  %v7600_v16 = vld [vmem:[%s11366_s1 + $0x260] ss:$16 sps:$4 sm:$0xff]  }
  0x1c   :  { %5009 = vmatprep.subr.bf16.mxu0 %v7525_v28  ;;  %5568 = vmatprep.subr.bf16.mxu1 %v7527_v29  ;;  %v7603_v17 = vld [vmem:[%s11366_s1 + $0x268] ss:$16 sps:$4 sm:$0xff]   ;;  %v7608_v18 = vld [vmem:[%s11366_s1 + $0x284] ss:$16 sps:$4 sm:$0xff]   ;;  %v7611_v19 = vld [vmem:[%s11366_s1 + $0x28c] ss:$16 sps:$4 sm:$0xff]  }
  0x1d   :  { %v7606_v20 = vld [vmem:[%s11366_s1 + $0x280] ss:$16 sps:$4 sm:$0xff]   ;;  %v7609_v21 = vld [vmem:[%s11366_s1 + $0x288] ss:$16 sps:$4 sm:$0xff]   ;;  %v7614_v22 = vld [vmem:[%s11366_s1 + $0x2a4] ss:$16 sps:$4 sm:$0xff]  }
  0x1e   :  { %v7617_v23 = vld [vmem:[%s11366_s1 + $0x2ac] ss:$16 sps:$4 sm:$0xff]   ;;  %v7612_v24 = vld [vmem:[%s11366_s1 + $0x2a0] ss:$16 sps:$4 sm:$0xff]   ;;  %v7615_v25 = vld [vmem:[%s11366_s1 + $0x2a8] ss:$16 sps:$4 sm:$0xff]  }
  0x1f   :  { %5010 = vmatpush1.bf16.msra.mxu0 %v7529_v30  ;;  %5569 = vmatpush1.bf16.msra.mxu1 %v7530_v31  ;;  %v7620_v26 = vld [vmem:[%s11366_s1 + $0x2c4] ss:$16 sps:$4 sm:$0xff]   ;;  %v7623_v27 = vld [vmem:[%s11366_s1 + $0x2cc] ss:$16 sps:$4 sm:$0xff]   ;;  %v7618_v28 = vld [vmem:[%s11366_s1 + $0x2c0] ss:$16 sps:$4 sm:$0xff]  }
  0x20   :  { %5011 = vmatprep.subr.bf16.mxu0 %v7531_v32  ;;  %5570 = vmatprep.subr.bf16.mxu1 %v7533_v33  ;;  %v7621_v29 = vld [vmem:[%s11366_s1 + $0x2c8] ss:$16 sps:$4 sm:$0xff]   ;;  %v7680_v30 = vld [vmem:[%s11367_s0 + $0xc] ss:$100 sps:$4 sm:$0xff]   ;;  %v7626_v31 = vld [vmem:[%s11366_s1 + $0x2e4] ss:$16 sps:$4 sm:$0xff]  }
  0x21   :  { %v7629_v32 = vld [vmem:[%s11366_s1 + $0x2ec] ss:$16 sps:$4 sm:$0xff]   ;;  %v7624_v33 = vld [vmem:[%s11366_s1 + $0x2e0] ss:$16 sps:$4 sm:$0xff]  }
  0x22   :  { %v7653_v48 = vld [vmem:[%s11366_s1 + $0x36c] ss:$16 sps:$4 sm:$0xff]  }
  0x23   :  { %5012 = vmatpush1.bf16.msra.mxu0 %v7535_v34  ;;  %5571 = vmatpush1.bf16.msra.mxu1 %v7536_v35  ;;  %v7627_v34 = vld [vmem:[%s11366_s1 + $0x2e8] ss:$16 sps:$4 sm:$0xff]   ;;  %v7632_v35 = vld [vmem:[%s11366_s1 + $0x304] ss:$16 sps:$4 sm:$0xff]  }
  0x24   :  { %5013 = vmatprep.subr.bf16.mxu0 %v7537_v36  ;;  %5572 = vmatprep.subr.bf16.mxu1 %v7539_v37  ;;  %v7635_v36 = vld [vmem:[%s11366_s1 + $0x30c] ss:$16 sps:$4 sm:$0xff]   ;;  %v7630_v37 = vld [vmem:[%s11366_s1 + $0x300] ss:$16 sps:$4 sm:$0xff]  }
  0x27   :  { %5014 = vmatpush1.bf16.msra.mxu0 %v7541_v38  ;;  %5573 = vmatpush1.bf16.msra.mxu1 %v7542_v39  ;;  %v7633_v38 = vld [vmem:[%s11366_s1 + $0x308] ss:$16 sps:$4 sm:$0xff]   ;;  %v7638_v39 = vld [vmem:[%s11366_s1 + $0x324] ss:$16 sps:$4 sm:$0xff]  }
  0x28   :  { %5015 = vmatprep.subr.bf16.mxu0 %v7543_v40  ;;  %5574 = vmatprep.subr.bf16.mxu1 %v7545_v41  ;;  %v7641_v40 = vld [vmem:[%s11366_s1 + $0x32c] ss:$16 sps:$4 sm:$0xff]   ;;  %v7636_v41 = vld [vmem:[%s11366_s1 + $0x320] ss:$16 sps:$4 sm:$0xff]  }
  0x2b   :  { %5016 = vmatpush1.bf16.msra.mxu0 %v7547_v42  ;;  %5575 = vmatpush1.bf16.msra.mxu1 %v7548_v43  ;;  %v7639_v42 = vld [vmem:[%s11366_s1 + $0x328] ss:$16 sps:$4 sm:$0xff]   ;;  %v7644_v43 = vld [vmem:[%s11366_s1 + $0x344] ss:$16 sps:$4 sm:$0xff]  }
  0x2c   :  { %5017 = vmatprep.subr.bf16.mxu0 %v7549_v44  ;;  %5576 = vmatprep.subr.bf16.mxu1 %v7551_v45  ;;  %v7647_v44 = vld [vmem:[%s11366_s1 + $0x34c] ss:$16 sps:$4 sm:$0xff]   ;;  %v7642_v45 = vld [vmem:[%s11366_s1 + $0x340] ss:$16 sps:$4 sm:$0xff]  }
  0x2f   :  { %5018 = vmatpush1.bf16.msra.mxu0 %v7553_v46  ;;  %5577 = vmatpush1.bf16.msra.mxu1 %v7554_v47  ;;  %v7645_v46 = vld [vmem:[%s11366_s1 + $0x348] ss:$16 sps:$4 sm:$0xff]   ;;  %v7650_v47 = vld [vmem:[%s11366_s1 + $0x364] ss:$16 sps:$4 sm:$0xff]  }
  0x30   :  { %5019 = vmatprep.subr.bf16.mxu0 %v7555_v49  ;;  %5578 = vmatprep.subr.bf16.mxu1 %v7557_v50  ;;  %v7648_v49 = vld [vmem:[%s11366_s1 + $0x360] ss:$16 sps:$4 sm:$0xff]   ;;  %v7651_v50 = vld [vmem:[%s11366_s1 + $0x368] ss:$16 sps:$4 sm:$0xff]  }
  0x33   :  { %5020 = vmatpush1.bf16.msra.mxu0 %v7559_v51  ;;  %5579 = vmatpush1.bf16.msra.mxu1 %v7560_v52  ;;  %v7656_v51 = vld [vmem:[%s11366_s1 + $0x384] ss:$16 sps:$4 sm:$0xff]   ;;  %v7659_v52 = vld [vmem:[%s11366_s1 + $0x38c] ss:$16 sps:$4 sm:$0xff]  }
  0x34   :  { %5021 = vmatprep.subr.bf16.mxu0 %v7561_v53  ;;  %5580 = vmatprep.subr.bf16.mxu1 %v7563_v54  ;;  %v7654_v53 = vld [vmem:[%s11366_s1 + $0x380] ss:$16 sps:$4 sm:$0xff]   ;;  %v7657_v54 = vld [vmem:[%s11366_s1 + $0x388] ss:$16 sps:$4 sm:$0xff]  }
  0x37   :  { %5022 = vmatpush1.bf16.msra.mxu0 %v7565_v55  ;;  %5581 = vmatpush1.bf16.msra.mxu1 %v7566_v56  ;;  %v7662_v55 = vld [vmem:[%s11366_s1 + $0x3a4] ss:$16 sps:$4 sm:$0xff]   ;;  %v7665_v56 = vld [vmem:[%s11366_s1 + $0x3ac] ss:$16 sps:$4 sm:$0xff]  }
  0x38   :  { %5023 = vmatprep.subr.bf16.mxu0 %v7567_v57  ;;  %5582 = vmatprep.subr.bf16.mxu1 %v7569_v58  ;;  %v7660_v57 = vld [vmem:[%s11366_s1 + $0x3a0] ss:$16 sps:$4 sm:$0xff]   ;;  %v7663_v58 = vld [vmem:[%s11366_s1 + $0x3a8] ss:$16 sps:$4 sm:$0xff]  }
  0x3b   :  { %5024 = vmatpush1.bf16.msra.mxu0 %v7571_v59  ;;  %5583 = vmatpush1.bf16.msra.mxu1 %v7572_v60  ;;  %v7668_v59 = vld [vmem:[%s11366_s1 + $0x3c4] ss:$16 sps:$4 sm:$0xff]   ;;  %v7671_v60 = vld [vmem:[%s11366_s1 + $0x3cc] ss:$16 sps:$4 sm:$0xff]  }
  0x3c   :  { %5025 = vmatprep.subr.bf16.mxu0 %v7573_v61  ;;  %5584 = vmatprep.subr.bf16.mxu1 %v7575_v62  ;;  %v7666_v61 = vld [vmem:[%s11366_s1 + $0x3c0] ss:$16 sps:$4 sm:$0xff]   ;;  %v7669_v62 = vld [vmem:[%s11366_s1 + $0x3c8] ss:$16 sps:$4 sm:$0xff]  }
  0x3f   :  { %5026 = vmatpush1.bf16.msra.mxu0 %v7577_v63  ;;  %5585 = vmatpush1.bf16.msra.mxu1 %v7578_v0  ;;  %v7674_v63 = vld [vmem:[%s11366_s1 + $0x3e4] ss:$16 sps:$4 sm:$0xff]   ;;  %v7677_v0 = vld [vmem:[%s11366_s1 + $0x3ec] ss:$16 sps:$4 sm:$0xff]  }
  0x40   :  { %5038 = vmatprep.subr.bf16.mxu0 %v7584_v1  ;;  %5597 = vmatprep.subr.bf16.mxu1 %v7587_v2  ;;  %v7672_v1 = vld [vmem:[%s11366_s1 + $0x3e0] ss:$16 sps:$4 sm:$0xff]   ;;  %v7675_v2 = vld [vmem:[%s11366_s1 + $0x3e8] ss:$16 sps:$4 sm:$0xff]  }
  0x42   :  { %5028 = vmatmul.mubr.bf16.vlgmr.msra.gmra.mrb[0].mxu0 %v7579_v3  ;;  %5587 = vmatmul.mubr.bf16.vlgmr.msra.gmra.mrb[0].mxu1 %v7579_v3  ;;  %v7683_v3 = vld [vmem:[%s11366_s1 + $0x404] ss:$16 sps:$4 sm:$0xff]  }
  0x43   :  { %5039 = vmatpush1.bf16.msra.mxu0 %v7582_v4  ;;  %5598 = vmatpush1.bf16.msra.mxu1 %v7585_v5  ;;  %v7686_v4 = vld [vmem:[%s11366_s1 + $0x40c] ss:$16 sps:$4 sm:$0xff]  }
  0x44   :  { %5040 = vmatprep.subr.bf16.mxu0 %v7590_v6  ;;  %5599 = vmatprep.subr.bf16.mxu1 %v7593_v7  ;;  %v7678_v5 = vld [vmem:[%s11367_s0 + $0x8] ss:$100 sps:$4 sm:$0xff]   ;;  %v7681_v6 = vld [vmem:[%s11366_s1 + $0x400] ss:$16 sps:$4 sm:$0xff]  }
  0x45   :  { %5070 = vmatprep.mubr.bf16.mxu0 %v7680_v30  ;;  %5629 = vmatprep.mubr.bf16.mxu1 %v7680_v30  ;;  %v7684_v7 = vld [vmem:[%s11366_s1 + $0x408] ss:$16 sps:$4 sm:$0xff]   ;;  %v7722_v30 = vld [vmem:[%s11366_s1 + $0x4cc] ss:$16 sps:$4 sm:$0xff]  }
  0x47   :  { %5041 = vmatpush1.bf16.msra.mxu0 %v7588_v8  ;;  %5600 = vmatpush1.bf16.msra.mxu1 %v7591_v9  ;;  %v7689_v8 = vld [vmem:[%s11366_s1 + $0x424] ss:$16 sps:$4 sm:$0xff]   ;;  %v7692_v9 = vld [vmem:[%s11366_s1 + $0x42c] ss:$16 sps:$4 sm:$0xff]  }
  0x48   :  { %5042 = vmatprep.subr.bf16.mxu0 %v7596_v10  ;;  %5601 = vmatprep.subr.bf16.mxu1 %v7599_v11  ;;  %v7687_v10 = vld [vmem:[%s11366_s1 + $0x420] ss:$16 sps:$4 sm:$0xff]   ;;  %v7690_v11 = vld [vmem:[%s11366_s1 + $0x428] ss:$16 sps:$4 sm:$0xff]  }
  0x4b   :  { %5043 = vmatpush1.bf16.msra.mxu0 %v7594_v12  ;;  %5602 = vmatpush1.bf16.msra.mxu1 %v7597_v13  ;;  %v7779_v12 = vld [vmem:[%s11367_s0 + $0x14] ss:$100 sps:$4 sm:$0xff]  }
  0x4c   :  { %5044 = vmatprep.subr.bf16.mxu0 %v7602_v14  ;;  %5603 = vmatprep.subr.bf16.mxu1 %v7605_v15  ;;  %v7695_v13 = vld [vmem:[%s11366_s1 + $0x444] ss:$16 sps:$4 sm:$0xff]   ;;  %v7698_v14 = vld [vmem:[%s11366_s1 + $0x44c] ss:$16 sps:$4 sm:$0xff]   ;;  %v7693_v15 = vld [vmem:[%s11366_s1 + $0x440] ss:$16 sps:$4 sm:$0xff]  }
  0x4f   :  { %5045 = vmatpush1.bf16.msra.mxu0 %v7600_v16  ;;  %5604 = vmatpush1.bf16.msra.mxu1 %v7603_v17  ;;  %v7696_v16 = vld [vmem:[%s11366_s1 + $0x448] ss:$16 sps:$4 sm:$0xff]   ;;  %v7701_v17 = vld [vmem:[%s11366_s1 + $0x464] ss:$16 sps:$4 sm:$0xff]  }
  0x50   :  { %5046 = vmatprep.subr.bf16.mxu0 %v7608_v18  ;;  %5605 = vmatprep.subr.bf16.mxu1 %v7611_v19  ;;  %v7704_v18 = vld [vmem:[%s11366_s1 + $0x46c] ss:$16 sps:$4 sm:$0xff]   ;;  %v7699_v19 = vld [vmem:[%s11366_s1 + $0x460] ss:$16 sps:$4 sm:$0xff]  }
  0x53   :  { %5047 = vmatpush1.bf16.msra.mxu0 %v7606_v20  ;;  %5606 = vmatpush1.bf16.msra.mxu1 %v7609_v21  ;;  %v7702_v20 = vld [vmem:[%s11366_s1 + $0x468] ss:$16 sps:$4 sm:$0xff]   ;;  %v7707_v21 = vld [vmem:[%s11366_s1 + $0x484] ss:$16 sps:$4 sm:$0xff]  }
  0x54   :  { %5048 = vmatprep.subr.bf16.mxu0 %v7614_v22  ;;  %5607 = vmatprep.subr.bf16.mxu1 %v7617_v23  ;;  %v7710_v22 = vld [vmem:[%s11366_s1 + $0x48c] ss:$16 sps:$4 sm:$0xff]   ;;  %v7705_v23 = vld [vmem:[%s11366_s1 + $0x480] ss:$16 sps:$4 sm:$0xff]  }
  0x57   :  { %5049 = vmatpush1.bf16.msra.mxu0 %v7612_v24  ;;  %5608 = vmatpush1.bf16.msra.mxu1 %v7615_v25  ;;  %v7708_v24 = vld [vmem:[%s11366_s1 + $0x488] ss:$16 sps:$4 sm:$0xff]   ;;  %v7713_v25 = vld [vmem:[%s11366_s1 + $0x4a4] ss:$16 sps:$4 sm:$0xff]  }
  0x58   :  { %5050 = vmatprep.subr.bf16.mxu0 %v7620_v26  ;;  %5609 = vmatprep.subr.bf16.mxu1 %v7623_v27  ;;  %v7716_v26 = vld [vmem:[%s11366_s1 + $0x4ac] ss:$16 sps:$4 sm:$0xff]   ;;  %v7711_v27 = vld [vmem:[%s11366_s1 + $0x4a0] ss:$16 sps:$4 sm:$0xff]  }
  0x5b   :  { %5051 = vmatpush1.bf16.msra.mxu0 %v7618_v28  ;;  %5610 = vmatpush1.bf16.msra.mxu1 %v7621_v29  ;;  %v7714_v28 = vld [vmem:[%s11366_s1 + $0x4a8] ss:$16 sps:$4 sm:$0xff]   ;;  %v7719_v29 = vld [vmem:[%s11366_s1 + $0x4c4] ss:$16 sps:$4 sm:$0xff]  }
  0x5c   :  { %5052 = vmatprep.subr.bf16.mxu0 %v7626_v31  ;;  %5611 = vmatprep.subr.bf16.mxu1 %v7629_v32  ;;  %v7717_v31 = vld [vmem:[%s11366_s1 + $0x4c0] ss:$16 sps:$4 sm:$0xff]   ;;  %v7720_v32 = vld [vmem:[%s11366_s1 + $0x4c8] ss:$16 sps:$4 sm:$0xff]  }
  0x5f   :  { %5053 = vmatpush1.bf16.msra.mxu0 %v7624_v33  ;;  %5612 = vmatpush1.bf16.msra.mxu1 %v7627_v34  ;;  %v7725_v33 = vld [vmem:[%s11366_s1 + $0x4e4] ss:$16 sps:$4 sm:$0xff]   ;;  %v7728_v34 = vld [vmem:[%s11366_s1 + $0x4ec] ss:$16 sps:$4 sm:$0xff]  }
  0x60   :  { %5054 = vmatprep.subr.bf16.mxu0 %v7632_v35  ;;  %5613 = vmatprep.subr.bf16.mxu1 %v7635_v36  ;;  %v7723_v35 = vld [vmem:[%s11366_s1 + $0x4e0] ss:$16 sps:$4 sm:$0xff]   ;;  %v7726_v36 = vld [vmem:[%s11366_s1 + $0x4e8] ss:$16 sps:$4 sm:$0xff]  }
  0x63   :  { %5055 = vmatpush1.bf16.msra.mxu0 %v7630_v37  ;;  %5614 = vmatpush1.bf16.msra.mxu1 %v7633_v38  ;;  %v7731_v37 = vld [vmem:[%s11366_s1 + $0x504] ss:$16 sps:$4 sm:$0xff]   ;;  %v7734_v38 = vld [vmem:[%s11366_s1 + $0x50c] ss:$16 sps:$4 sm:$0xff]  }
  0x64   :  { %5056 = vmatprep.subr.bf16.mxu0 %v7638_v39  ;;  %5615 = vmatprep.subr.bf16.mxu1 %v7641_v40  ;;  %v7729_v39 = vld [vmem:[%s11366_s1 + $0x500] ss:$16 sps:$4 sm:$0xff]   ;;  %v7732_v40 = vld [vmem:[%s11366_s1 + $0x508] ss:$16 sps:$4 sm:$0xff]  }
  0x67   :  { %5057 = vmatpush1.bf16.msra.mxu0 %v7636_v41  ;;  %5616 = vmatpush1.bf16.msra.mxu1 %v7639_v42  ;;  %v7737_v41 = vld [vmem:[%s11366_s1 + $0x524] ss:$16 sps:$4 sm:$0xff]   ;;  %v7740_v42 = vld [vmem:[%s11366_s1 + $0x52c] ss:$16 sps:$4 sm:$0xff]  }
  0x68   :  { %5058 = vmatprep.subr.bf16.mxu0 %v7644_v43  ;;  %5617 = vmatprep.subr.bf16.mxu1 %v7647_v44  ;;  %v7735_v43 = vld [vmem:[%s11366_s1 + $0x520] ss:$16 sps:$4 sm:$0xff]   ;;  %v7738_v44 = vld [vmem:[%s11366_s1 + $0x528] ss:$16 sps:$4 sm:$0xff]  }
  0x6b   :  { %5059 = vmatpush1.bf16.msra.mxu0 %v7642_v45  ;;  %5618 = vmatpush1.bf16.msra.mxu1 %v7645_v46  ;;  %v7743_v45 = vld [vmem:[%s11366_s1 + $0x544] ss:$16 sps:$4 sm:$0xff]   ;;  %v7746_v46 = vld [vmem:[%s11366_s1 + $0x54c] ss:$16 sps:$4 sm:$0xff]  }
  0x6c   :  { %5060 = vmatprep.subr.bf16.mxu0 %v7650_v47  ;;  %5619 = vmatprep.subr.bf16.mxu1 %v7653_v48  ;;  %v7741_v47 = vld [vmem:[%s11366_s1 + $0x540] ss:$16 sps:$4 sm:$0xff]   ;;  %v7744_v48 = vld [vmem:[%s11366_s1 + $0x548] ss:$16 sps:$4 sm:$0xff]  }
  0x6f   :  { %5061 = vmatpush1.bf16.msra.mxu0 %v7648_v49  ;;  %5620 = vmatpush1.bf16.msra.mxu1 %v7651_v50  ;;  %v7749_v49 = vld [vmem:[%s11366_s1 + $0x564] ss:$16 sps:$4 sm:$0xff]   ;;  %v7752_v50 = vld [vmem:[%s11366_s1 + $0x56c] ss:$16 sps:$4 sm:$0xff]  }
  0x70   :  { %5062 = vmatprep.subr.bf16.mxu0 %v7656_v51  ;;  %5621 = vmatprep.subr.bf16.mxu1 %v7659_v52  ;;  %v7747_v51 = vld [vmem:[%s11366_s1 + $0x560] ss:$16 sps:$4 sm:$0xff]   ;;  %v7750_v52 = vld [vmem:[%s11366_s1 + $0x568] ss:$16 sps:$4 sm:$0xff]  }
  0x73   :  { %5063 = vmatpush1.bf16.msra.mxu0 %v7654_v53  ;;  %5622 = vmatpush1.bf16.msra.mxu1 %v7657_v54  ;;  %v7755_v53 = vld [vmem:[%s11366_s1 + $0x584] ss:$16 sps:$4 sm:$0xff]   ;;  %v7758_v54 = vld [vmem:[%s11366_s1 + $0x58c] ss:$16 sps:$4 sm:$0xff]  }
  0x74   :  { %5064 = vmatprep.subr.bf16.mxu0 %v7662_v55  ;;  %5623 = vmatprep.subr.bf16.mxu1 %v7665_v56  ;;  %v7753_v55 = vld [vmem:[%s11366_s1 + $0x580] ss:$16 sps:$4 sm:$0xff]   ;;  %v7756_v56 = vld [vmem:[%s11366_s1 + $0x588] ss:$16 sps:$4 sm:$0xff]  }
  0x77   :  { %5065 = vmatpush1.bf16.msra.mxu0 %v7660_v57  ;;  %5624 = vmatpush1.bf16.msra.mxu1 %v7663_v58  ;;  %v7761_v57 = vld [vmem:[%s11366_s1 + $0x5a4] ss:$16 sps:$4 sm:$0xff]   ;;  %v7764_v58 = vld [vmem:[%s11366_s1 + $0x5ac] ss:$16 sps:$4 sm:$0xff]  }
  0x78   :  { %5066 = vmatprep.subr.bf16.mxu0 %v7668_v59  ;;  %5625 = vmatprep.subr.bf16.mxu1 %v7671_v60  ;;  %v7759_v59 = vld [vmem:[%s11366_s1 + $0x5a0] ss:$16 sps:$4 sm:$0xff]   ;;  %v7762_v60 = vld [vmem:[%s11366_s1 + $0x5a8] ss:$16 sps:$4 sm:$0xff]  }
  0x7b   :  { %5067 = vmatpush1.bf16.msra.mxu0 %v7666_v61  ;;  %5626 = vmatpush1.bf16.msra.mxu1 %v7669_v62  ;;  %v7767_v61 = vld [vmem:[%s11366_s1 + $0x5c4] ss:$16 sps:$4 sm:$0xff]   ;;  %v7770_v62 = vld [vmem:[%s11366_s1 + $0x5cc] ss:$16 sps:$4 sm:$0xff]  }
  0x7c   :  { %5068 = vmatprep.subr.bf16.mxu0 %v7674_v63  ;;  %5627 = vmatprep.subr.bf16.mxu1 %v7677_v0  ;;  %v7765_v63 = vld [vmem:[%s11366_s1 + $0x5c0] ss:$16 sps:$4 sm:$0xff]   ;;  %v7768_v0 = vld [vmem:[%s11366_s1 + $0x5c8] ss:$16 sps:$4 sm:$0xff]  }
  0x7f   :  { %5069 = vmatpush1.bf16.msra.mxu0 %v7672_v1  ;;  %5628 = vmatpush1.bf16.msra.mxu1 %v7675_v2  ;;  %v7773_v1 = vld [vmem:[%s11366_s1 + $0x5e4] ss:$16 sps:$4 sm:$0xff]   ;;  %v7776_v2 = vld [vmem:[%s11366_s1 + $0x5ec] ss:$16 sps:$4 sm:$0xff]  }
  0x80   :  { %5081 = vmatprep.subr.bf16.mxu0 %v7683_v3  ;;  %5640 = vmatprep.subr.bf16.mxu1 %v7686_v4  ;;  %v7771_v3 = vld [vmem:[%s11366_s1 + $0x5e0] ss:$16 sps:$4 sm:$0xff]   ;;  %v7774_v4 = vld [vmem:[%s11366_s1 + $0x5e8] ss:$16 sps:$4 sm:$0xff]  }
  0x82   :  { %5071 = vmatmul.mubr.bf16.vlgmr.msra.gmra.mrb[0].mxu0 %v7678_v5  ;;  %5630 = vmatmul.mubr.bf16.vlgmr.msra.gmra.mrb[0].mxu1 %v7678_v5  ;;  %v7782_v5 = vld [vmem:[%s11366_s1 + $0x604] ss:$16 sps:$4 sm:$0xff]  }
  0x83   :  { %5082 = vmatpush1.bf16.msra.mxu0 %v7681_v6  ;;  %5641 = vmatpush1.bf16.msra.mxu1 %v7684_v7  ;;  %v7785_v6 = vld [vmem:[%s11366_s1 + $0x60c] ss:$16 sps:$4 sm:$0xff]   ;;  %v7777_v7 = vld [vmem:[%s11367_s0 + $0x10] ss:$100 sps:$4 sm:$0xff]  }
  0x84   :  { %5083 = vmatprep.subr.bf16.mxu0 %v7689_v8  ;;  %5642 = vmatprep.subr.bf16.mxu1 %v7692_v9  ;;  %v7780_v8 = vld [vmem:[%s11366_s1 + $0x600] ss:$16 sps:$4 sm:$0xff]   ;;  %v7783_v9 = vld [vmem:[%s11366_s1 + $0x608] ss:$16 sps:$4 sm:$0xff]  }
  0x85   :  { %5113 = vmatprep.mubr.bf16.mxu0 %v7779_v12  ;;  %5672 = vmatprep.mubr.bf16.mxu1 %v7779_v12  ;;  %v7878_v12 = vld [vmem:[%s11367_s0 + $0x1c] ss:$100 sps:$4 sm:$0xff]  }
  0x87   :  { %5084 = vmatpush1.bf16.msra.mxu0 %v7687_v10  ;;  %5643 = vmatpush1.bf16.msra.mxu1 %v7690_v11  ;;  %v7788_v10 = vld [vmem:[%s11366_s1 + $0x624] ss:$16 sps:$4 sm:$0xff]   ;;  %v7791_v11 = vld [vmem:[%s11366_s1 + $0x62c] ss:$16 sps:$4 sm:$0xff]  }
  0x88   :  { %5085 = vmatprep.subr.bf16.mxu0 %v7695_v13  ;;  %5644 = vmatprep.subr.bf16.mxu1 %v7698_v14  ;;  %v7786_v13 = vld [vmem:[%s11366_s1 + $0x620] ss:$16 sps:$4 sm:$0xff]   ;;  %v7789_v14 = vld [vmem:[%s11366_s1 + $0x628] ss:$16 sps:$4 sm:$0xff]  }
  0x8b   :  { %5086 = vmatpush1.bf16.msra.mxu0 %v7693_v15  ;;  %5645 = vmatpush1.bf16.msra.mxu1 %v7696_v16  ;;  %v7794_v15 = vld [vmem:[%s11366_s1 + $0x644] ss:$16 sps:$4 sm:$0xff]   ;;  %v7797_v16 = vld [vmem:[%s11366_s1 + $0x64c] ss:$16 sps:$4 sm:$0xff]  }
  0x8c   :  { %5087 = vmatprep.subr.bf16.mxu0 %v7701_v17  ;;  %5646 = vmatprep.subr.bf16.mxu1 %v7704_v18  ;;  %v7792_v17 = vld [vmem:[%s11366_s1 + $0x640] ss:$16 sps:$4 sm:$0xff]   ;;  %v7795_v18 = vld [vmem:[%s11366_s1 + $0x648] ss:$16 sps:$4 sm:$0xff]  }
  0x8f   :  { %5088 = vmatpush1.bf16.msra.mxu0 %v7699_v19  ;;  %5647 = vmatpush1.bf16.msra.mxu1 %v7702_v20  ;;  %v7800_v19 = vld [vmem:[%s11366_s1 + $0x664] ss:$16 sps:$4 sm:$0xff]   ;;  %v7803_v20 = vld [vmem:[%s11366_s1 + $0x66c] ss:$16 sps:$4 sm:$0xff]  }
  0x90   :  { %5089 = vmatprep.subr.bf16.mxu0 %v7707_v21  ;;  %5648 = vmatprep.subr.bf16.mxu1 %v7710_v22  ;;  %v7798_v21 = vld [vmem:[%s11366_s1 + $0x660] ss:$16 sps:$4 sm:$0xff]   ;;  %v7801_v22 = vld [vmem:[%s11366_s1 + $0x668] ss:$16 sps:$4 sm:$0xff]  }
  0x93   :  { %5090 = vmatpush1.bf16.msra.mxu0 %v7705_v23  ;;  %5649 = vmatpush1.bf16.msra.mxu1 %v7708_v24  ;;  %v7806_v23 = vld [vmem:[%s11366_s1 + $0x684] ss:$16 sps:$4 sm:$0xff]   ;;  %v7809_v24 = vld [vmem:[%s11366_s1 + $0x68c] ss:$16 sps:$4 sm:$0xff]  }
  0x94   :  { %5091 = vmatprep.subr.bf16.mxu0 %v7713_v25  ;;  %5650 = vmatprep.subr.bf16.mxu1 %v7716_v26  ;;  %v7804_v25 = vld [vmem:[%s11366_s1 + $0x680] ss:$16 sps:$4 sm:$0xff]   ;;  %v7807_v26 = vld [vmem:[%s11366_s1 + $0x688] ss:$16 sps:$4 sm:$0xff]  }
  0x97   :  { %5092 = vmatpush1.bf16.msra.mxu0 %v7711_v27  ;;  %5651 = vmatpush1.bf16.msra.mxu1 %v7714_v28  ;;  %v7812_v27 = vld [vmem:[%s11366_s1 + $0x6a4] ss:$16 sps:$4 sm:$0xff]   ;;  %v7815_v28 = vld [vmem:[%s11366_s1 + $0x6ac] ss:$16 sps:$4 sm:$0xff]  }
  0x98   :  { %5093 = vmatprep.subr.bf16.mxu0 %v7719_v29  ;;  %5652 = vmatprep.subr.bf16.mxu1 %v7722_v30  ;;  %v7810_v29 = vld [vmem:[%s11366_s1 + $0x6a0] ss:$16 sps:$4 sm:$0xff]   ;;  %v7813_v30 = vld [vmem:[%s11366_s1 + $0x6a8] ss:$16 sps:$4 sm:$0xff]  }
  0x9b   :  { %5094 = vmatpush1.bf16.msra.mxu0 %v7717_v31  ;;  %5653 = vmatpush1.bf16.msra.mxu1 %v7720_v32  ;;  %v7818_v31 = vld [vmem:[%s11366_s1 + $0x6c4] ss:$16 sps:$4 sm:$0xff]   ;;  %v7821_v32 = vld [vmem:[%s11366_s1 + $0x6cc] ss:$16 sps:$4 sm:$0xff]  }
  0x9c   :  { %5095 = vmatprep.subr.bf16.mxu0 %v7725_v33  ;;  %5654 = vmatprep.subr.bf16.mxu1 %v7728_v34  ;;  %v7816_v33 = vld [vmem:[%s11366_s1 + $0x6c0] ss:$16 sps:$4 sm:$0xff]   ;;  %v7819_v34 = vld [vmem:[%s11366_s1 + $0x6c8] ss:$16 sps:$4 sm:$0xff]  }
  0x9f   :  { %5096 = vmatpush1.bf16.msra.mxu0 %v7723_v35  ;;  %5655 = vmatpush1.bf16.msra.mxu1 %v7726_v36  ;;  %v7824_v35 = vld [vmem:[%s11366_s1 + $0x6e4] ss:$16 sps:$4 sm:$0xff]   ;;  %v7827_v36 = vld [vmem:[%s11366_s1 + $0x6ec] ss:$16 sps:$4 sm:$0xff]  }
  0xa0   :  { %5097 = vmatprep.subr.bf16.mxu0 %v7731_v37  ;;  %5656 = vmatprep.subr.bf16.mxu1 %v7734_v38  ;;  %v7822_v37 = vld [vmem:[%s11366_s1 + $0x6e0] ss:$16 sps:$4 sm:$0xff]   ;;  %v7825_v38 = vld [vmem:[%s11366_s1 + $0x6e8] ss:$16 sps:$4 sm:$0xff]  }
  0xa3   :  { %5098 = vmatpush1.bf16.msra.mxu0 %v7729_v39  ;;  %5657 = vmatpush1.bf16.msra.mxu1 %v7732_v40  ;;  %v7830_v39 = vld [vmem:[%s11366_s1 + $0x704] ss:$16 sps:$4 sm:$0xff]   ;;  %v7833_v40 = vld [vmem:[%s11366_s1 + $0x70c] ss:$16 sps:$4 sm:$0xff]  }
  0xa4   :  { %5099 = vmatprep.subr.bf16.mxu0 %v7737_v41  ;;  %5658 = vmatprep.subr.bf16.mxu1 %v7740_v42  ;;  %v7828_v41 = vld [vmem:[%s11366_s1 + $0x700] ss:$16 sps:$4 sm:$0xff]   ;;  %v7831_v42 = vld [vmem:[%s11366_s1 + $0x708] ss:$16 sps:$4 sm:$0xff]  }
  0xa7   :  { %5100 = vmatpush1.bf16.msra.mxu0 %v7735_v43  ;;  %5659 = vmatpush1.bf16.msra.mxu1 %v7738_v44  ;;  %v7836_v43 = vld [vmem:[%s11366_s1 + $0x724] ss:$16 sps:$4 sm:$0xff]   ;;  %v7839_v44 = vld [vmem:[%s11366_s1 + $0x72c] ss:$16 sps:$4 sm:$0xff]  }
  0xa8   :  { %5101 = vmatprep.subr.bf16.mxu0 %v7743_v45  ;;  %5660 = vmatprep.subr.bf16.mxu1 %v7746_v46  ;;  %v7834_v45 = vld [vmem:[%s11366_s1 + $0x720] ss:$16 sps:$4 sm:$0xff]   ;;  %v7837_v46 = vld [vmem:[%s11366_s1 + $0x728] ss:$16 sps:$4 sm:$0xff]  }
  0xab   :  { %5102 = vmatpush1.bf16.msra.mxu0 %v7741_v47  ;;  %5661 = vmatpush1.bf16.msra.mxu1 %v7744_v48  ;;  %v7842_v47 = vld [vmem:[%s11366_s1 + $0x744] ss:$16 sps:$4 sm:$0xff]   ;;  %v7845_v48 = vld [vmem:[%s11366_s1 + $0x74c] ss:$16 sps:$4 sm:$0xff]  }
  0xac   :  { %5103 = vmatprep.subr.bf16.mxu0 %v7749_v49  ;;  %5662 = vmatprep.subr.bf16.mxu1 %v7752_v50  ;;  %v7840_v49 = vld [vmem:[%s11366_s1 + $0x740] ss:$16 sps:$4 sm:$0xff]   ;;  %v7843_v50 = vld [vmem:[%s11366_s1 + $0x748] ss:$16 sps:$4 sm:$0xff]  }
  0xaf   :  { %5104 = vmatpush1.bf16.msra.mxu0 %v7747_v51  ;;  %5663 = vmatpush1.bf16.msra.mxu1 %v7750_v52  ;;  %v7848_v51 = vld [vmem:[%s11366_s1 + $0x764] ss:$16 sps:$4 sm:$0xff]   ;;  %v7851_v52 = vld [vmem:[%s11366_s1 + $0x76c] ss:$16 sps:$4 sm:$0xff]  }
  0xb0   :  { %5105 = vmatprep.subr.bf16.mxu0 %v7755_v53  ;;  %5664 = vmatprep.subr.bf16.mxu1 %v7758_v54  ;;  %v7846_v53 = vld [vmem:[%s11366_s1 + $0x760] ss:$16 sps:$4 sm:$0xff]   ;;  %v7849_v54 = vld [vmem:[%s11366_s1 + $0x768] ss:$16 sps:$4 sm:$0xff]  }
  0xb3   :  { %5106 = vmatpush1.bf16.msra.mxu0 %v7753_v55  ;;  %5665 = vmatpush1.bf16.msra.mxu1 %v7756_v56  ;;  %v7854_v55 = vld [vmem:[%s11366_s1 + $0x784] ss:$16 sps:$4 sm:$0xff]   ;;  %v7857_v56 = vld [vmem:[%s11366_s1 + $0x78c] ss:$16 sps:$4 sm:$0xff]  }
  0xb4   :  { %5107 = vmatprep.subr.bf16.mxu0 %v7761_v57  ;;  %5666 = vmatprep.subr.bf16.mxu1 %v7764_v58  ;;  %v7852_v57 = vld [vmem:[%s11366_s1 + $0x780] ss:$16 sps:$4 sm:$0xff]   ;;  %v7855_v58 = vld [vmem:[%s11366_s1 + $0x788] ss:$16 sps:$4 sm:$0xff]  }
  0xb7   :  { %5108 = vmatpush1.bf16.msra.mxu0 %v7759_v59  ;;  %5667 = vmatpush1.bf16.msra.mxu1 %v7762_v60  ;;  %v7860_v59 = vld [vmem:[%s11366_s1 + $0x7a4] ss:$16 sps:$4 sm:$0xff]   ;;  %v7863_v60 = vld [vmem:[%s11366_s1 + $0x7ac] ss:$16 sps:$4 sm:$0xff]  }
  0xb8   :  { %5109 = vmatprep.subr.bf16.mxu0 %v7767_v61  ;;  %5668 = vmatprep.subr.bf16.mxu1 %v7770_v62  ;;  %v7858_v61 = vld [vmem:[%s11366_s1 + $0x7a0] ss:$16 sps:$4 sm:$0xff]   ;;  %v7861_v62 = vld [vmem:[%s11366_s1 + $0x7a8] ss:$16 sps:$4 sm:$0xff]  }
  0xbb   :  { %5110 = vmatpush1.bf16.msra.mxu0 %v7765_v63  ;;  %5669 = vmatpush1.bf16.msra.mxu1 %v7768_v0  ;;  %v7866_v63 = vld [vmem:[%s11366_s1 + $0x7c4] ss:$16 sps:$4 sm:$0xff]   ;;  %v7869_v0 = vld [vmem:[%s11366_s1 + $0x7cc] ss:$16 sps:$4 sm:$0xff]  }
  0xbc   :  { %5111 = vmatprep.subr.bf16.mxu0 %v7773_v1  ;;  %5670 = vmatprep.subr.bf16.mxu1 %v7776_v2  ;;  %v7864_v1 = vld [vmem:[%s11366_s1 + $0x7c0] ss:$16 sps:$4 sm:$0xff]   ;;  %v7867_v2 = vld [vmem:[%s11366_s1 + $0x7c8] ss:$16 sps:$4 sm:$0xff]  }
  0xbf   :  { %5112 = vmatpush1.bf16.msra.mxu0 %v7771_v3  ;;  %5671 = vmatpush1.bf16.msra.mxu1 %v7774_v4  ;;  %v7872_v3 = vld [vmem:[%s11366_s1 + $0x7e4] ss:$16 sps:$4 sm:$0xff]   ;;  %v7875_v4 = vld [vmem:[%s11366_s1 + $0x7ec] ss:$16 sps:$4 sm:$0xff]  }
  0xc0   :  { %5124 = vmatprep.subr.bf16.mxu0 %v7782_v5  ;;  %5683 = vmatprep.subr.bf16.mxu1 %v7785_v6  ;;  %v7870_v5 = vld [vmem:[%s11366_s1 + $0x7e0] ss:$16 sps:$4 sm:$0xff]   ;;  %v7873_v6 = vld [vmem:[%s11366_s1 + $0x7e8] ss:$16 sps:$4 sm:$0xff]  }
  0xc2   :  { %5114 = vmatmul.mubr.bf16.vlgmr.msra.gmra.mrb[0].mxu0 %v7777_v7  ;;  %5673 = vmatmul.mubr.bf16.vlgmr.msra.gmra.mrb[0].mxu1 %v7777_v7  ;;  %v7881_v7 = vld [vmem:[%s11366_s1 + $0x804] ss:$16 sps:$4 sm:$0xff]  }
  0xc3   :  { %5125 = vmatpush1.bf16.msra.mxu0 %v7780_v8  ;;  %5684 = vmatpush1.bf16.msra.mxu1 %v7783_v9  ;;  %v7884_v8 = vld [vmem:[%s11366_s1 + $0x80c] ss:$16 sps:$4 sm:$0xff]  }
  0xc4   :  { %5126 = vmatprep.subr.bf16.mxu0 %v7788_v10  ;;  %5685 = vmatprep.subr.bf16.mxu1 %v7791_v11  ;;  %v7876_v9 = vld [vmem:[%s11367_s0 + $0x18] ss:$100 sps:$4 sm:$0xff]   ;;  %v7879_v10 = vld [vmem:[%s11366_s1 + $0x800] ss:$16 sps:$4 sm:$0xff]  }
  0xc5   :  { %5156 = vmatprep.mubr.bf16.mxu0 %v7878_v12  ;;  %5715 = vmatprep.mubr.bf16.mxu1 %v7878_v12  ;;  %v7882_v11 = vld [vmem:[%s11366_s1 + $0x808] ss:$16 sps:$4 sm:$0xff]   ;;  %v7887_v12 = vld [vmem:[%s11366_s1 + $0x824] ss:$16 sps:$4 sm:$0xff]  }
  0xc7   :  { %5127 = vmatpush1.bf16.msra.mxu0 %v7786_v13  ;;  %5686 = vmatpush1.bf16.msra.mxu1 %v7789_v14  ;;  %v7890_v13 = vld [vmem:[%s11366_s1 + $0x82c] ss:$16 sps:$4 sm:$0xff]   ;;  %v7977_v14 = vld [vmem:[%s11367_s0 + $0x24] ss:$100 sps:$4 sm:$0xff]  }
  0xc8   :  { %5128 = vmatprep.subr.bf16.mxu0 %v7794_v15  ;;  %5687 = vmatprep.subr.bf16.mxu1 %v7797_v16  ;;  %v7885_v15 = vld [vmem:[%s11366_s1 + $0x820] ss:$16 sps:$4 sm:$0xff]   ;;  %v7888_v16 = vld [vmem:[%s11366_s1 + $0x828] ss:$16 sps:$4 sm:$0xff]  }
  0xcb   :  { %5129 = vmatpush1.bf16.msra.mxu0 %v7792_v17  ;;  %5688 = vmatpush1.bf16.msra.mxu1 %v7795_v18  ;;  %v7893_v17 = vld [vmem:[%s11366_s1 + $0x844] ss:$16 sps:$4 sm:$0xff]   ;;  %v7896_v18 = vld [vmem:[%s11366_s1 + $0x84c] ss:$16 sps:$4 sm:$0xff]  }
  0xcc   :  { %5130 = vmatprep.subr.bf16.mxu0 %v7800_v19  ;;  %5689 = vmatprep.subr.bf16.mxu1 %v7803_v20  ;;  %v7891_v19 = vld [vmem:[%s11366_s1 + $0x840] ss:$16 sps:$4 sm:$0xff]   ;;  %v7894_v20 = vld [vmem:[%s11366_s1 + $0x848] ss:$16 sps:$4 sm:$0xff]  }
  0xcf   :  { %5131 = vmatpush1.bf16.msra.mxu0 %v7798_v21  ;;  %5690 = vmatpush1.bf16.msra.mxu1 %v7801_v22  ;;  %v7899_v21 = vld [vmem:[%s11366_s1 + $0x864] ss:$16 sps:$4 sm:$0xff]   ;;  %v7902_v22 = vld [vmem:[%s11366_s1 + $0x86c] ss:$16 sps:$4 sm:$0xff]  }
  0xd0   :  { %5132 = vmatprep.subr.bf16.mxu0 %v7806_v23  ;;  %5691 = vmatprep.subr.bf16.mxu1 %v7809_v24  ;;  %v7897_v23 = vld [vmem:[%s11366_s1 + $0x860] ss:$16 sps:$4 sm:$0xff]   ;;  %v7900_v24 = vld [vmem:[%s11366_s1 + $0x868] ss:$16 sps:$4 sm:$0xff]  }
  0xd3   :  { %5133 = vmatpush1.bf16.msra.mxu0 %v7804_v25  ;;  %5692 = vmatpush1.bf16.msra.mxu1 %v7807_v26  ;;  %v7905_v25 = vld [vmem:[%s11366_s1 + $0x884] ss:$16 sps:$4 sm:$0xff]   ;;  %v7908_v26 = vld [vmem:[%s11366_s1 + $0x88c] ss:$16 sps:$4 sm:$0xff]  }
  0xd4   :  { %5134 = vmatprep.subr.bf16.mxu0 %v7812_v27  ;;  %5693 = vmatprep.subr.bf16.mxu1 %v7815_v28  ;;  %v7903_v27 = vld [vmem:[%s11366_s1 + $0x880] ss:$16 sps:$4 sm:$0xff]   ;;  %v7906_v28 = vld [vmem:[%s11366_s1 + $0x888] ss:$16 sps:$4 sm:$0xff]  }
  0xd7   :  { %5135 = vmatpush1.bf16.msra.mxu0 %v7810_v29  ;;  %5694 = vmatpush1.bf16.msra.mxu1 %v7813_v30  ;;  %v7911_v29 = vld [vmem:[%s11366_s1 + $0x8a4] ss:$16 sps:$4 sm:$0xff]   ;;  %v7914_v30 = vld [vmem:[%s11366_s1 + $0x8ac] ss:$16 sps:$4 sm:$0xff]  }
  0xd8   :  { %5136 = vmatprep.subr.bf16.mxu0 %v7818_v31  ;;  %5695 = vmatprep.subr.bf16.mxu1 %v7821_v32  ;;  %v7909_v31 = vld [vmem:[%s11366_s1 + $0x8a0] ss:$16 sps:$4 sm:$0xff]   ;;  %v7912_v32 = vld [vmem:[%s11366_s1 + $0x8a8] ss:$16 sps:$4 sm:$0xff]  }
  0xdb   :  { %5137 = vmatpush1.bf16.msra.mxu0 %v7816_v33  ;;  %5696 = vmatpush1.bf16.msra.mxu1 %v7819_v34  ;;  %v7917_v33 = vld [vmem:[%s11366_s1 + $0x8c4] ss:$16 sps:$4 sm:$0xff]   ;;  %v7920_v34 = vld [vmem:[%s11366_s1 + $0x8cc] ss:$16 sps:$4 sm:$0xff]  }
  0xdc   :  { %5138 = vmatprep.subr.bf16.mxu0 %v7824_v35  ;;  %5697 = vmatprep.subr.bf16.mxu1 %v7827_v36  ;;  %v7915_v35 = vld [vmem:[%s11366_s1 + $0x8c0] ss:$16 sps:$4 sm:$0xff]   ;;  %v7918_v36 = vld [vmem:[%s11366_s1 + $0x8c8] ss:$16 sps:$4 sm:$0xff]  }
  0xdf   :  { %5139 = vmatpush1.bf16.msra.mxu0 %v7822_v37  ;;  %5698 = vmatpush1.bf16.msra.mxu1 %v7825_v38  ;;  %v7923_v37 = vld [vmem:[%s11366_s1 + $0x8e4] ss:$16 sps:$4 sm:$0xff]   ;;  %v7926_v38 = vld [vmem:[%s11366_s1 + $0x8ec] ss:$16 sps:$4 sm:$0xff]  }
  0xe0   :  { %5140 = vmatprep.subr.bf16.mxu0 %v7830_v39  ;;  %5699 = vmatprep.subr.bf16.mxu1 %v7833_v40  ;;  %v7921_v39 = vld [vmem:[%s11366_s1 + $0x8e0] ss:$16 sps:$4 sm:$0xff]   ;;  %v7924_v40 = vld [vmem:[%s11366_s1 + $0x8e8] ss:$16 sps:$4 sm:$0xff]  }
  0xe3   :  { %5141 = vmatpush1.bf16.msra.mxu0 %v7828_v41  ;;  %5700 = vmatpush1.bf16.msra.mxu1 %v7831_v42  ;;  %v7929_v41 = vld [vmem:[%s11366_s1 + $0x904] ss:$16 sps:$4 sm:$0xff]   ;;  %v7932_v42 = vld [vmem:[%s11366_s1 + $0x90c] ss:$16 sps:$4 sm:$0xff]  }
  0xe4   :  { %5142 = vmatprep.subr.bf16.mxu0 %v7836_v43  ;;  %5701 = vmatprep.subr.bf16.mxu1 %v7839_v44  ;;  %v7927_v43 = vld [vmem:[%s11366_s1 + $0x900] ss:$16 sps:$4 sm:$0xff]   ;;  %v7930_v44 = vld [vmem:[%s11366_s1 + $0x908] ss:$16 sps:$4 sm:$0xff]  }
  0xe7   :  { %5143 = vmatpush1.bf16.msra.mxu0 %v7834_v45  ;;  %5702 = vmatpush1.bf16.msra.mxu1 %v7837_v46  ;;  %v7935_v45 = vld [vmem:[%s11366_s1 + $0x924] ss:$16 sps:$4 sm:$0xff]   ;;  %v7938_v46 = vld [vmem:[%s11366_s1 + $0x92c] ss:$16 sps:$4 sm:$0xff]  }
  0xe8   :  { %5144 = vmatprep.subr.bf16.mxu0 %v7842_v47  ;;  %5703 = vmatprep.subr.bf16.mxu1 %v7845_v48  ;;  %v7933_v47 = vld [vmem:[%s11366_s1 + $0x920] ss:$16 sps:$4 sm:$0xff]   ;;  %v7936_v48 = vld [vmem:[%s11366_s1 + $0x928] ss:$16 sps:$4 sm:$0xff]  }
  0xeb   :  { %5145 = vmatpush1.bf16.msra.mxu0 %v7840_v49  ;;  %5704 = vmatpush1.bf16.msra.mxu1 %v7843_v50  ;;  %v7941_v49 = vld [vmem:[%s11366_s1 + $0x944] ss:$16 sps:$4 sm:$0xff]   ;;  %v7944_v50 = vld [vmem:[%s11366_s1 + $0x94c] ss:$16 sps:$4 sm:$0xff]  }
  0xec   :  { %5146 = vmatprep.subr.bf16.mxu0 %v7848_v51  ;;  %5705 = vmatprep.subr.bf16.mxu1 %v7851_v52  ;;  %v7939_v51 = vld [vmem:[%s11366_s1 + $0x940] ss:$16 sps:$4 sm:$0xff]   ;;  %v7942_v52 = vld [vmem:[%s11366_s1 + $0x948] ss:$16 sps:$4 sm:$0xff]  }
  0xef   :  { %5147 = vmatpush1.bf16.msra.mxu0 %v7846_v53  ;;  %5706 = vmatpush1.bf16.msra.mxu1 %v7849_v54  ;;  %v7947_v53 = vld [vmem:[%s11366_s1 + $0x964] ss:$16 sps:$4 sm:$0xff]   ;;  %v7950_v54 = vld [vmem:[%s11366_s1 + $0x96c] ss:$16 sps:$4 sm:$0xff]  }
  0xf0   :  { %5148 = vmatprep.subr.bf16.mxu0 %v7854_v55  ;;  %5707 = vmatprep.subr.bf16.mxu1 %v7857_v56  ;;  %v7945_v55 = vld [vmem:[%s11366_s1 + $0x960] ss:$16 sps:$4 sm:$0xff]   ;;  %v7948_v56 = vld [vmem:[%s11366_s1 + $0x968] ss:$16 sps:$4 sm:$0xff]  }
  0xf3   :  { %5149 = vmatpush1.bf16.msra.mxu0 %v7852_v57  ;;  %5708 = vmatpush1.bf16.msra.mxu1 %v7855_v58  ;;  %v7953_v57 = vld [vmem:[%s11366_s1 + $0x984] ss:$16 sps:$4 sm:$0xff]   ;;  %v7956_v58 = vld [vmem:[%s11366_s1 + $0x98c] ss:$16 sps:$4 sm:$0xff]  }
  0xf4   :  { %5150 = vmatprep.subr.bf16.mxu0 %v7860_v59  ;;  %5709 = vmatprep.subr.bf16.mxu1 %v7863_v60  ;;  %v7951_v59 = vld [vmem:[%s11366_s1 + $0x980] ss:$16 sps:$4 sm:$0xff]   ;;  %v7954_v60 = vld [vmem:[%s11366_s1 + $0x988] ss:$16 sps:$4 sm:$0xff]  }
  0xf7   :  { %5151 = vmatpush1.bf16.msra.mxu0 %v7858_v61  ;;  %5710 = vmatpush1.bf16.msra.mxu1 %v7861_v62  ;;  %v7959_v61 = vld [vmem:[%s11366_s1 + $0x9a4] ss:$16 sps:$4 sm:$0xff]   ;;  %v7962_v62 = vld [vmem:[%s11366_s1 + $0x9ac] ss:$16 sps:$4 sm:$0xff]  }
  0xf8   :  { %5152 = vmatprep.subr.bf16.mxu0 %v7866_v63  ;;  %5711 = vmatprep.subr.bf16.mxu1 %v7869_v0  ;;  %v7957_v63 = vld [vmem:[%s11366_s1 + $0x9a0] ss:$16 sps:$4 sm:$0xff]   ;;  %v7960_v0 = vld [vmem:[%s11366_s1 + $0x9a8] ss:$16 sps:$4 sm:$0xff]  }
  0xfb   :  { %5153 = vmatpush1.bf16.msra.mxu0 %v7864_v1  ;;  %5712 = vmatpush1.bf16.msra.mxu1 %v7867_v2  ;;  %v7965_v1 = vld [vmem:[%s11366_s1 + $0x9c4] ss:$16 sps:$4 sm:$0xff]   ;;  %v7968_v2 = vld [vmem:[%s11366_s1 + $0x9cc] ss:$16 sps:$4 sm:$0xff]  }
  0xfc   :  { %5154 = vmatprep.subr.bf16.mxu0 %v7872_v3  ;;  %5713 = vmatprep.subr.bf16.mxu1 %v7875_v4  ;;  %v7963_v3 = vld [vmem:[%s11366_s1 + $0x9c0] ss:$16 sps:$4 sm:$0xff]   ;;  %v7966_v4 = vld [vmem:[%s11366_s1 + $0x9c8] ss:$16 sps:$4 sm:$0xff]  }
  0xff   :  { %5155 = vmatpush1.bf16.msra.mxu0 %v7870_v5  ;;  %5714 = vmatpush1.bf16.msra.mxu1 %v7873_v6  ;;  %v7971_v5 = vld [vmem:[%s11366_s1 + $0x9e4] ss:$16 sps:$4 sm:$0xff]   ;;  %v7974_v6 = vld [vmem:[%s11366_s1 + $0x9ec] ss:$16 sps:$4 sm:$0xff]  }
 0x100   :  { %5167 = vmatprep.subr.bf16.mxu0 %v7881_v7  ;;  %5726 = vmatprep.subr.bf16.mxu1 %v7884_v8  ;;  %v7969_v7 = vld [vmem:[%s11366_s1 + $0x9e0] ss:$16 sps:$4 sm:$0xff]   ;;  %v7972_v8 = vld [vmem:[%s11366_s1 + $0x9e8] ss:$16 sps:$4 sm:$0xff]  }
 0x102   :  { %5157 = vmatmul.mubr.bf16.vlgmr.msra.gmra.mrb[0].mxu0 %v7876_v9  ;;  %5716 = vmatmul.mubr.bf16.vlgmr.msra.gmra.mrb[0].mxu1 %v7876_v9  ;;  %v7975_v9 = vld [vmem:[%s11367_s0 + $0x20] ss:$100 sps:$4 sm:$0xff]  }
 0x103   :  { %5168 = vmatpush1.bf16.msra.mxu0 %v7879_v10  ;;  %5727 = vmatpush1.bf16.msra.mxu1 %v7882_v11  ;;  %v7980_v10 = vld [vmem:[%s11366_s1 + $0xa04] ss:$16 sps:$4 sm:$0xff]   ;;  %v7983_v11 = vld [vmem:[%s11366_s1 + $0xa0c] ss:$16 sps:$4 sm:$0xff]  }
 0x104   :  { %5169 = vmatprep.subr.bf16.mxu0 %v7887_v12  ;;  %5728 = vmatprep.subr.bf16.mxu1 %v7890_v13  ;;  %v7978_v12 = vld [vmem:[%s11366_s1 + $0xa00] ss:$16 sps:$4 sm:$0xff]   ;;  %v7981_v13 = vld [vmem:[%s11366_s1 + $0xa08] ss:$16 sps:$4 sm:$0xff]  }
 0x105   :  { %5199 = vmatprep.mubr.bf16.mxu0 %v7977_v14  ;;  %5758 = vmatprep.mubr.bf16.mxu1 %v7977_v14  ;;  %v7986_v14 = vld [vmem:[%s11366_s1 + $0xa24] ss:$16 sps:$4 sm:$0xff]  }
 0x107   :  { %5170 = vmatpush1.bf16.msra.mxu0 %v7885_v15  ;;  %5729 = vmatpush1.bf16.msra.mxu1 %v7888_v16  ;;  %v7989_v15 = vld [vmem:[%s11366_s1 + $0xa2c] ss:$16 sps:$4 sm:$0xff]  }
 0x108   :  { %5171 = vmatprep.subr.bf16.mxu0 %v7893_v17  ;;  %5730 = vmatprep.subr.bf16.mxu1 %v7896_v18  ;;  %v8076_v16 = vld [vmem:[%s11367_s0 + $0x2c] ss:$100 sps:$4 sm:$0xff]   ;;  %v7987_v18 = vld [vmem:[%s11366_s1 + $0xa28] ss:$16 sps:$4 sm:$0xff]  }
 0x109   :  { %v7984_v17 = vld [vmem:[%s11366_s1 + $0xa20] ss:$16 sps:$4 sm:$0xff]  }
 0x10b   :  { %5172 = vmatpush1.bf16.msra.mxu0 %v7891_v19  ;;  %5731 = vmatpush1.bf16.msra.mxu1 %v7894_v20  ;;  %v7992_v19 = vld [vmem:[%s11366_s1 + $0xa44] ss:$16 sps:$4 sm:$0xff]   ;;  %v7995_v20 = vld [vmem:[%s11366_s1 + $0xa4c] ss:$16 sps:$4 sm:$0xff]  }
 0x10c   :  { %5173 = vmatprep.subr.bf16.mxu0 %v7899_v21  ;;  %5732 = vmatprep.subr.bf16.mxu1 %v7902_v22  ;;  %v7990_v21 = vld [vmem:[%s11366_s1 + $0xa40] ss:$16 sps:$4 sm:$0xff]   ;;  %v7993_v22 = vld [vmem:[%s11366_s1 + $0xa48] ss:$16 sps:$4 sm:$0xff]  }
 0x10f   :  { %5174 = vmatpush1.bf16.msra.mxu0 %v7897_v23  ;;  %5733 = vmatpush1.bf16.msra.mxu1 %v7900_v24  ;;  %v7998_v23 = vld [vmem:[%s11366_s1 + $0xa64] ss:$16 sps:$4 sm:$0xff]   ;;  %v8001_v24 = vld [vmem:[%s11366_s1 + $0xa6c] ss:$16 sps:$4 sm:$0xff]  }
 0x110   :  { %5175 = vmatprep.subr.bf16.mxu0 %v7905_v25  ;;  %5734 = vmatprep.subr.bf16.mxu1 %v7908_v26  ;;  %v7996_v25 = vld [vmem:[%s11366_s1 + $0xa60] ss:$16 sps:$4 sm:$0xff]   ;;  %v7999_v26 = vld [vmem:[%s11366_s1 + $0xa68] ss:$16 sps:$4 sm:$0xff]  }
 0x113   :  { %5176 = vmatpush1.bf16.msra.mxu0 %v7903_v27  ;;  %5735 = vmatpush1.bf16.msra.mxu1 %v7906_v28  ;;  %v8004_v27 = vld [vmem:[%s11366_s1 + $0xa84] ss:$16 sps:$4 sm:$0xff]   ;;  %v8007_v28 = vld [vmem:[%s11366_s1 + $0xa8c] ss:$16 sps:$4 sm:$0xff]  }
 0x114   :  { %5177 = vmatprep.subr.bf16.mxu0 %v7911_v29  ;;  %5736 = vmatprep.subr.bf16.mxu1 %v7914_v30  ;;  %v8002_v29 = vld [vmem:[%s11366_s1 + $0xa80] ss:$16 sps:$4 sm:$0xff]   ;;  %v8005_v30 = vld [vmem:[%s11366_s1 + $0xa88] ss:$16 sps:$4 sm:$0xff]  }
 0x117   :  { %5178 = vmatpush1.bf16.msra.mxu0 %v7909_v31  ;;  %5737 = vmatpush1.bf16.msra.mxu1 %v7912_v32  ;;  %v8010_v31 = vld [vmem:[%s11366_s1 + $0xaa4] ss:$16 sps:$4 sm:$0xff]   ;;  %v8013_v32 = vld [vmem:[%s11366_s1 + $0xaac] ss:$16 sps:$4 sm:$0xff]  }
 0x118   :  { %5179 = vmatprep.subr.bf16.mxu0 %v7917_v33  ;;  %5738 = vmatprep.subr.bf16.mxu1 %v7920_v34  ;;  %v8008_v33 = vld [vmem:[%s11366_s1 + $0xaa0] ss:$16 sps:$4 sm:$0xff]   ;;  %v8011_v34 = vld [vmem:[%s11366_s1 + $0xaa8] ss:$16 sps:$4 sm:$0xff]  }
 0x11b   :  { %5180 = vmatpush1.bf16.msra.mxu0 %v7915_v35  ;;  %5739 = vmatpush1.bf16.msra.mxu1 %v7918_v36  ;;  %v8016_v35 = vld [vmem:[%s11366_s1 + $0xac4] ss:$16 sps:$4 sm:$0xff]   ;;  %v8019_v36 = vld [vmem:[%s11366_s1 + $0xacc] ss:$16 sps:$4 sm:$0xff]  }
 0x11c   :  { %5181 = vmatprep.subr.bf16.mxu0 %v7923_v37  ;;  %5740 = vmatprep.subr.bf16.mxu1 %v7926_v38  ;;  %v8014_v37 = vld [vmem:[%s11366_s1 + $0xac0] ss:$16 sps:$4 sm:$0xff]   ;;  %v8017_v38 = vld [vmem:[%s11366_s1 + $0xac8] ss:$16 sps:$4 sm:$0xff]  }
 0x11f   :  { %5182 = vmatpush1.bf16.msra.mxu0 %v7921_v39  ;;  %5741 = vmatpush1.bf16.msra.mxu1 %v7924_v40  ;;  %v8022_v39 = vld [vmem:[%s11366_s1 + $0xae4] ss:$16 sps:$4 sm:$0xff]   ;;  %v8025_v40 = vld [vmem:[%s11366_s1 + $0xaec] ss:$16 sps:$4 sm:$0xff]  }
 0x120   :  { %5183 = vmatprep.subr.bf16.mxu0 %v7929_v41  ;;  %5742 = vmatprep.subr.bf16.mxu1 %v7932_v42  ;;  %v8020_v41 = vld [vmem:[%s11366_s1 + $0xae0] ss:$16 sps:$4 sm:$0xff]   ;;  %v8023_v42 = vld [vmem:[%s11366_s1 + $0xae8] ss:$16 sps:$4 sm:$0xff]  }
 0x123   :  { %5184 = vmatpush1.bf16.msra.mxu0 %v7927_v43  ;;  %5743 = vmatpush1.bf16.msra.mxu1 %v7930_v44  ;;  %v8028_v43 = vld [vmem:[%s11366_s1 + $0xb04] ss:$16 sps:$4 sm:$0xff]   ;;  %v8031_v44 = vld [vmem:[%s11366_s1 + $0xb0c] ss:$16 sps:$4 sm:$0xff]  }
 0x124   :  { %5185 = vmatprep.subr.bf16.mxu0 %v7935_v45  ;;  %5744 = vmatprep.subr.bf16.mxu1 %v7938_v46  ;;  %v8026_v45 = vld [vmem:[%s11366_s1 + $0xb00] ss:$16 sps:$4 sm:$0xff]   ;;  %v8029_v46 = vld [vmem:[%s11366_s1 + $0xb08] ss:$16 sps:$4 sm:$0xff]  }
 0x127   :  { %5186 = vmatpush1.bf16.msra.mxu0 %v7933_v47  ;;  %5745 = vmatpush1.bf16.msra.mxu1 %v7936_v48  ;;  %v8034_v47 = vld [vmem:[%s11366_s1 + $0xb24] ss:$16 sps:$4 sm:$0xff]   ;;  %v8037_v48 = vld [vmem:[%s11366_s1 + $0xb2c] ss:$16 sps:$4 sm:$0xff]  }
 0x128   :  { %5187 = vmatprep.subr.bf16.mxu0 %v7941_v49  ;;  %5746 = vmatprep.subr.bf16.mxu1 %v7944_v50  ;;  %v8032_v49 = vld [vmem:[%s11366_s1 + $0xb20] ss:$16 sps:$4 sm:$0xff]   ;;  %v8035_v50 = vld [vmem:[%s11366_s1 + $0xb28] ss:$16 sps:$4 sm:$0xff]  }
 0x12b   :  { %5188 = vmatpush1.bf16.msra.mxu0 %v7939_v51  ;;  %5747 = vmatpush1.bf16.msra.mxu1 %v7942_v52  ;;  %v8040_v51 = vld [vmem:[%s11366_s1 + $0xb44] ss:$16 sps:$4 sm:$0xff]   ;;  %v8043_v52 = vld [vmem:[%s11366_s1 + $0xb4c] ss:$16 sps:$4 sm:$0xff]  }
 0x12c   :  { %5189 = vmatprep.subr.bf16.mxu0 %v7947_v53  ;;  %5748 = vmatprep.subr.bf16.mxu1 %v7950_v54  ;;  %v8038_v53 = vld [vmem:[%s11366_s1 + $0xb40] ss:$16 sps:$4 sm:$0xff]   ;;  %v8041_v54 = vld [vmem:[%s11366_s1 + $0xb48] ss:$16 sps:$4 sm:$0xff]  }
 0x12f   :  { %5190 = vmatpush1.bf16.msra.mxu0 %v7945_v55  ;;  %5749 = vmatpush1.bf16.msra.mxu1 %v7948_v56  ;;  %v8046_v55 = vld [vmem:[%s11366_s1 + $0xb64] ss:$16 sps:$4 sm:$0xff]   ;;  %v8049_v56 = vld [vmem:[%s11366_s1 + $0xb6c] ss:$16 sps:$4 sm:$0xff]  }
 0x130   :  { %5191 = vmatprep.subr.bf16.mxu0 %v7953_v57  ;;  %5750 = vmatprep.subr.bf16.mxu1 %v7956_v58  ;;  %v8044_v57 = vld [vmem:[%s11366_s1 + $0xb60] ss:$16 sps:$4 sm:$0xff]   ;;  %v8047_v58 = vld [vmem:[%s11366_s1 + $0xb68] ss:$16 sps:$4 sm:$0xff]  }
 0x133   :  { %5192 = vmatpush1.bf16.msra.mxu0 %v7951_v59  ;;  %5751 = vmatpush1.bf16.msra.mxu1 %v7954_v60  ;;  %v8052_v59 = vld [vmem:[%s11366_s1 + $0xb84] ss:$16 sps:$4 sm:$0xff]   ;;  %v8055_v60 = vld [vmem:[%s11366_s1 + $0xb8c] ss:$16 sps:$4 sm:$0xff]  }
 0x134   :  { %5193 = vmatprep.subr.bf16.mxu0 %v7959_v61  ;;  %5752 = vmatprep.subr.bf16.mxu1 %v7962_v62  ;;  %v8050_v61 = vld [vmem:[%s11366_s1 + $0xb80] ss:$16 sps:$4 sm:$0xff]   ;;  %v8053_v62 = vld [vmem:[%s11366_s1 + $0xb88] ss:$16 sps:$4 sm:$0xff]  }
 0x137   :  { %5194 = vmatpush1.bf16.msra.mxu0 %v7957_v63  ;;  %5753 = vmatpush1.bf16.msra.mxu1 %v7960_v0  ;;  %v8058_v63 = vld [vmem:[%s11366_s1 + $0xba4] ss:$16 sps:$4 sm:$0xff]   ;;  %v8061_v0 = vld [vmem:[%s11366_s1 + $0xbac] ss:$16 sps:$4 sm:$0xff]  }
 0x138   :  { %5195 = vmatprep.subr.bf16.mxu0 %v7965_v1  ;;  %5754 = vmatprep.subr.bf16.mxu1 %v7968_v2  ;;  %v8056_v1 = vld [vmem:[%s11366_s1 + $0xba0] ss:$16 sps:$4 sm:$0xff]   ;;  %v8059_v2 = vld [vmem:[%s11366_s1 + $0xba8] ss:$16 sps:$4 sm:$0xff]  }
 0x13b   :  { %5196 = vmatpush1.bf16.msra.mxu0 %v7963_v3  ;;  %5755 = vmatpush1.bf16.msra.mxu1 %v7966_v4  ;;  %v8064_v3 = vld [vmem:[%s11366_s1 + $0xbc4] ss:$16 sps:$4 sm:$0xff]   ;;  %v8067_v4 = vld [vmem:[%s11366_s1 + $0xbcc] ss:$16 sps:$4 sm:$0xff]  }
 0x13c   :  { %5197 = vmatprep.subr.bf16.mxu0 %v7971_v5  ;;  %5756 = vmatprep.subr.bf16.mxu1 %v7974_v6  ;;  %v8062_v5 = vld [vmem:[%s11366_s1 + $0xbc0] ss:$16 sps:$4 sm:$0xff]   ;;  %v8065_v6 = vld [vmem:[%s11366_s1 + $0xbc8] ss:$16 sps:$4 sm:$0xff]  }
 0x13f   :  { %5198 = vmatpush1.bf16.msra.mxu0 %v7969_v7  ;;  %5757 = vmatpush1.bf16.msra.mxu1 %v7972_v8  ;;  %v8070_v7 = vld [vmem:[%s11366_s1 + $0xbe4] ss:$16 sps:$4 sm:$0xff]   ;;  %v8073_v8 = vld [vmem:[%s11366_s1 + $0xbec] ss:$16 sps:$4 sm:$0xff]  }
 0x140   :  { %5210 = vmatprep.subr.bf16.mxu0 %v7980_v10  ;;  %5769 = vmatprep.subr.bf16.mxu1 %v7983_v11  ;;  %v8071_v10 = vld [vmem:[%s11366_s1 + $0xbe8] ss:$16 sps:$4 sm:$0xff]  }
 0x141   :  { %v8074_v11 = vld [vmem:[%s11367_s0 + $0x28] ss:$100 sps:$4 sm:$0xff]  }
 0x142   :  { %5200 = vmatmul.mubr.bf16.vlgmr.msra.gmra.mrb[0].mxu0 %v7975_v9  ;;  %5759 = vmatmul.mubr.bf16.vlgmr.msra.gmra.mrb[0].mxu1 %v7975_v9  ;;  %v8068_v9 = vld [vmem:[%s11366_s1 + $0xbe0] ss:$16 sps:$4 sm:$0xff]  }
 0x143   :  { %5211 = vmatpush1.bf16.msra.mxu0 %v7978_v12  ;;  %5770 = vmatpush1.bf16.msra.mxu1 %v7981_v13  ;;  %v8079_v12 = vld [vmem:[%s11366_s1 + $0xc04] ss:$16 sps:$4 sm:$0xff]   ;;  %v8082_v13 = vld [vmem:[%s11366_s1 + $0xc0c] ss:$16 sps:$4 sm:$0xff]  }
 0x144   :  { %5212 = vmatprep.subr.bf16.mxu0 %v7986_v14  ;;  %5771 = vmatprep.subr.bf16.mxu1 %v7989_v15  ;;  %v8077_v14 = vld [vmem:[%s11366_s1 + $0xc00] ss:$16 sps:$4 sm:$0xff]   ;;  %v8080_v15 = vld [vmem:[%s11366_s1 + $0xc08] ss:$16 sps:$4 sm:$0xff]  }
 0x145   :  { %5242 = vmatprep.mubr.bf16.mxu0 %v8076_v16  ;;  %5801 = vmatprep.mubr.bf16.mxu1 %v8076_v16  ;;  %v8085_v16 = vld [vmem:[%s11366_s1 + $0xc24] ss:$16 sps:$4 sm:$0xff]  }
 0x147   :  { %5213 = vmatpush1.bf16.msra.mxu0 %v7984_v17  ;;  %5772 = vmatpush1.bf16.msra.mxu1 %v7987_v18  ;;  %v8088_v17 = vld [vmem:[%s11366_s1 + $0xc2c] ss:$16 sps:$4 sm:$0xff]   ;;  %v8175_v18 = vld [vmem:[%s11367_s0 + $0x34] ss:$100 sps:$4 sm:$0xff]  }
 0x148   :  { %5214 = vmatprep.subr.bf16.mxu0 %v7992_v19  ;;  %5773 = vmatprep.subr.bf16.mxu1 %v7995_v20  ;;  %v8083_v19 = vld [vmem:[%s11366_s1 + $0xc20] ss:$16 sps:$4 sm:$0xff]   ;;  %v8086_v20 = vld [vmem:[%s11366_s1 + $0xc28] ss:$16 sps:$4 sm:$0xff]  }
 0x14b   :  { %5215 = vmatpush1.bf16.msra.mxu0 %v7990_v21  ;;  %5774 = vmatpush1.bf16.msra.mxu1 %v7993_v22  ;;  %v8091_v21 = vld [vmem:[%s11366_s1 + $0xc44] ss:$16 sps:$4 sm:$0xff]   ;;  %v8094_v22 = vld [vmem:[%s11366_s1 + $0xc4c] ss:$16 sps:$4 sm:$0xff]  }
 0x14c   :  { %5216 = vmatprep.subr.bf16.mxu0 %v7998_v23  ;;  %5775 = vmatprep.subr.bf16.mxu1 %v8001_v24  ;;  %v8089_v23 = vld [vmem:[%s11366_s1 + $0xc40] ss:$16 sps:$4 sm:$0xff]   ;;  %v8092_v24 = vld [vmem:[%s11366_s1 + $0xc48] ss:$16 sps:$4 sm:$0xff]  }
 0x14f   :  { %5217 = vmatpush1.bf16.msra.mxu0 %v7996_v25  ;;  %5776 = vmatpush1.bf16.msra.mxu1 %v7999_v26  ;;  %v8097_v25 = vld [vmem:[%s11366_s1 + $0xc64] ss:$16 sps:$4 sm:$0xff]   ;;  %v8100_v26 = vld [vmem:[%s11366_s1 + $0xc6c] ss:$16 sps:$4 sm:$0xff]  }
 0x150   :  { %5218 = vmatprep.subr.bf16.mxu0 %v8004_v27  ;;  %5777 = vmatprep.subr.bf16.mxu1 %v8007_v28  ;;  %v8095_v27 = vld [vmem:[%s11366_s1 + $0xc60] ss:$16 sps:$4 sm:$0xff]   ;;  %v8098_v28 = vld [vmem:[%s11366_s1 + $0xc68] ss:$16 sps:$4 sm:$0xff]  }
 0x153   :  { %5219 = vmatpush1.bf16.msra.mxu0 %v8002_v29  ;;  %5778 = vmatpush1.bf16.msra.mxu1 %v8005_v30  ;;  %v8103_v29 = vld [vmem:[%s11366_s1 + $0xc84] ss:$16 sps:$4 sm:$0xff]   ;;  %v8106_v30 = vld [vmem:[%s11366_s1 + $0xc8c] ss:$16 sps:$4 sm:$0xff]  }
 0x154   :  { %5220 = vmatprep.subr.bf16.mxu0 %v8010_v31  ;;  %5779 = vmatprep.subr.bf16.mxu1 %v8013_v32  ;;  %v8101_v31 = vld [vmem:[%s11366_s1 + $0xc80] ss:$16 sps:$4 sm:$0xff]   ;;  %v8104_v32 = vld [vmem:[%s11366_s1 + $0xc88] ss:$16 sps:$4 sm:$0xff]  }
 0x157   :  { %5221 = vmatpush1.bf16.msra.mxu0 %v8008_v33  ;;  %5780 = vmatpush1.bf16.msra.mxu1 %v8011_v34  ;;  %v8109_v33 = vld [vmem:[%s11366_s1 + $0xca4] ss:$16 sps:$4 sm:$0xff]   ;;  %v8112_v34 = vld [vmem:[%s11366_s1 + $0xcac] ss:$16 sps:$4 sm:$0xff]  }
 0x158   :  { %5222 = vmatprep.subr.bf16.mxu0 %v8016_v35  ;;  %5781 = vmatprep.subr.bf16.mxu1 %v8019_v36  ;;  %v8107_v35 = vld [vmem:[%s11366_s1 + $0xca0] ss:$16 sps:$4 sm:$0xff]   ;;  %v8110_v36 = vld [vmem:[%s11366_s1 + $0xca8] ss:$16 sps:$4 sm:$0xff]  }
 0x15b   :  { %5223 = vmatpush1.bf16.msra.mxu0 %v8014_v37  ;;  %5782 = vmatpush1.bf16.msra.mxu1 %v8017_v38  ;;  %v8115_v37 = vld [vmem:[%s11366_s1 + $0xcc4] ss:$16 sps:$4 sm:$0xff]   ;;  %v8118_v38 = vld [vmem:[%s11366_s1 + $0xccc] ss:$16 sps:$4 sm:$0xff]  }
 0x15c   :  { %5224 = vmatprep.subr.bf16.mxu0 %v8022_v39  ;;  %5783 = vmatprep.subr.bf16.mxu1 %v8025_v40  ;;  %v8113_v39 = vld [vmem:[%s11366_s1 + $0xcc0] ss:$16 sps:$4 sm:$0xff]   ;;  %v8116_v40 = vld [vmem:[%s11366_s1 + $0xcc8] ss:$16 sps:$4 sm:$0xff]  }
 0x15f   :  { %5225 = vmatpush1.bf16.msra.mxu0 %v8020_v41  ;;  %5784 = vmatpush1.bf16.msra.mxu1 %v8023_v42  ;;  %v8121_v41 = vld [vmem:[%s11366_s1 + $0xce4] ss:$16 sps:$4 sm:$0xff]   ;;  %v8124_v42 = vld [vmem:[%s11366_s1 + $0xcec] ss:$16 sps:$4 sm:$0xff]  }
 0x160   :  { %5226 = vmatprep.subr.bf16.mxu0 %v8028_v43  ;;  %5785 = vmatprep.subr.bf16.mxu1 %v8031_v44  ;;  %v8119_v43 = vld [vmem:[%s11366_s1 + $0xce0] ss:$16 sps:$4 sm:$0xff]   ;;  %v8122_v44 = vld [vmem:[%s11366_s1 + $0xce8] ss:$16 sps:$4 sm:$0xff]  }
 0x163   :  { %5227 = vmatpush1.bf16.msra.mxu0 %v8026_v45  ;;  %5786 = vmatpush1.bf16.msra.mxu1 %v8029_v46  ;;  %v8127_v45 = vld [vmem:[%s11366_s1 + $0xd04] ss:$16 sps:$4 sm:$0xff]   ;;  %v8130_v46 = vld [vmem:[%s11366_s1 + $0xd0c] ss:$16 sps:$4 sm:$0xff]  }
 0x164   :  { %5228 = vmatprep.subr.bf16.mxu0 %v8034_v47  ;;  %5787 = vmatprep.subr.bf16.mxu1 %v8037_v48  ;;  %v8125_v47 = vld [vmem:[%s11366_s1 + $0xd00] ss:$16 sps:$4 sm:$0xff]   ;;  %v8128_v48 = vld [vmem:[%s11366_s1 + $0xd08] ss:$16 sps:$4 sm:$0xff]  }
 0x167   :  { %5229 = vmatpush1.bf16.msra.mxu0 %v8032_v49  ;;  %5788 = vmatpush1.bf16.msra.mxu1 %v8035_v50  ;;  %v8133_v49 = vld [vmem:[%s11366_s1 + $0xd24] ss:$16 sps:$4 sm:$0xff]   ;;  %v8136_v50 = vld [vmem:[%s11366_s1 + $0xd2c] ss:$16 sps:$4 sm:$0xff]  }
 0x168   :  { %5230 = vmatprep.subr.bf16.mxu0 %v8040_v51  ;;  %5789 = vmatprep.subr.bf16.mxu1 %v8043_v52  ;;  %v8131_v51 = vld [vmem:[%s11366_s1 + $0xd20] ss:$16 sps:$4 sm:$0xff]   ;;  %v8134_v52 = vld [vmem:[%s11366_s1 + $0xd28] ss:$16 sps:$4 sm:$0xff]  }
 0x16b   :  { %5231 = vmatpush1.bf16.msra.mxu0 %v8038_v53  ;;  %5790 = vmatpush1.bf16.msra.mxu1 %v8041_v54  ;;  %v8139_v53 = vld [vmem:[%s11366_s1 + $0xd44] ss:$16 sps:$4 sm:$0xff]   ;;  %v8142_v54 = vld [vmem:[%s11366_s1 + $0xd4c] ss:$16 sps:$4 sm:$0xff]  }
 0x16c   :  { %5232 = vmatprep.subr.bf16.mxu0 %v8046_v55  ;;  %5791 = vmatprep.subr.bf16.mxu1 %v8049_v56  ;;  %v8137_v55 = vld [vmem:[%s11366_s1 + $0xd40] ss:$16 sps:$4 sm:$0xff]   ;;  %v8140_v56 = vld [vmem:[%s11366_s1 + $0xd48] ss:$16 sps:$4 sm:$0xff]  }
 0x16f   :  { %5233 = vmatpush1.bf16.msra.mxu0 %v8044_v57  ;;  %5792 = vmatpush1.bf16.msra.mxu1 %v8047_v58  ;;  %v8145_v57 = vld [vmem:[%s11366_s1 + $0xd64] ss:$16 sps:$4 sm:$0xff]   ;;  %v8148_v58 = vld [vmem:[%s11366_s1 + $0xd6c] ss:$16 sps:$4 sm:$0xff]  }
 0x170   :  { %5234 = vmatprep.subr.bf16.mxu0 %v8052_v59  ;;  %5793 = vmatprep.subr.bf16.mxu1 %v8055_v60  ;;  %v8143_v59 = vld [vmem:[%s11366_s1 + $0xd60] ss:$16 sps:$4 sm:$0xff]   ;;  %v8146_v60 = vld [vmem:[%s11366_s1 + $0xd68] ss:$16 sps:$4 sm:$0xff]  }
 0x173   :  { %5235 = vmatpush1.bf16.msra.mxu0 %v8050_v61  ;;  %5794 = vmatpush1.bf16.msra.mxu1 %v8053_v62  ;;  %v8151_v61 = vld [vmem:[%s11366_s1 + $0xd84] ss:$16 sps:$4 sm:$0xff]   ;;  %v8154_v62 = vld [vmem:[%s11366_s1 + $0xd8c] ss:$16 sps:$4 sm:$0xff]  }
 0x174   :  { %5236 = vmatprep.subr.bf16.mxu0 %v8058_v63  ;;  %5795 = vmatprep.subr.bf16.mxu1 %v8061_v0  ;;  %v8149_v63 = vld [vmem:[%s11366_s1 + $0xd80] ss:$16 sps:$4 sm:$0xff]   ;;  %v8152_v0 = vld [vmem:[%s11366_s1 + $0xd88] ss:$16 sps:$4 sm:$0xff]  }
 0x177   :  { %5237 = vmatpush1.bf16.msra.mxu0 %v8056_v1  ;;  %5796 = vmatpush1.bf16.msra.mxu1 %v8059_v2  ;;  %v8157_v1 = vld [vmem:[%s11366_s1 + $0xda4] ss:$16 sps:$4 sm:$0xff]   ;;  %v8160_v2 = vld [vmem:[%s11366_s1 + $0xdac] ss:$16 sps:$4 sm:$0xff]  }
 0x178   :  { %5238 = vmatprep.subr.bf16.mxu0 %v8064_v3  ;;  %5797 = vmatprep.subr.bf16.mxu1 %v8067_v4  ;;  %v8155_v3 = vld [vmem:[%s11366_s1 + $0xda0] ss:$16 sps:$4 sm:$0xff]   ;;  %v8158_v4 = vld [vmem:[%s11366_s1 + $0xda8] ss:$16 sps:$4 sm:$0xff]  }
 0x17b   :  { %5239 = vmatpush1.bf16.msra.mxu0 %v8062_v5  ;;  %5798 = vmatpush1.bf16.msra.mxu1 %v8065_v6  ;;  %v8163_v5 = vld [vmem:[%s11366_s1 + $0xdc4] ss:$16 sps:$4 sm:$0xff]   ;;  %v8166_v6 = vld [vmem:[%s11366_s1 + $0xdcc] ss:$16 sps:$4 sm:$0xff]  }
 0x17c   :  { %5240 = vmatprep.subr.bf16.mxu0 %v8070_v7  ;;  %5799 = vmatprep.subr.bf16.mxu1 %v8073_v8  ;;  %v8161_v7 = vld [vmem:[%s11366_s1 + $0xdc0] ss:$16 sps:$4 sm:$0xff]   ;;  %v8164_v8 = vld [vmem:[%s11366_s1 + $0xdc8] ss:$16 sps:$4 sm:$0xff]  }
 0x17f   :  { %5241 = vmatpush1.bf16.msra.mxu0 %v8068_v9  ;;  %5800 = vmatpush1.bf16.msra.mxu1 %v8071_v10  ;;  %v8169_v9 = vld [vmem:[%s11366_s1 + $0xde4] ss:$16 sps:$4 sm:$0xff]   ;;  %v8172_v10 = vld [vmem:[%s11366_s1 + $0xdec] ss:$16 sps:$4 sm:$0xff]  }
 0x180   :  { %5253 = vmatprep.subr.bf16.mxu0 %v8079_v12  ;;  %5812 = vmatprep.subr.bf16.mxu1 %v8082_v13  ;;  %v8170_v12 = vld [vmem:[%s11366_s1 + $0xde8] ss:$16 sps:$4 sm:$0xff]   ;;  %v8173_v13 = vld [vmem:[%s11367_s0 + $0x30] ss:$100 sps:$4 sm:$0xff]  }
 0x182   :  { %5243 = vmatmul.mubr.bf16.vlgmr.msra.gmra.mrb[0].mxu0 %v8074_v11  ;;  %5802 = vmatmul.mubr.bf16.vlgmr.msra.gmra.mrb[0].mxu1 %v8074_v11  ;;  %v8167_v11 = vld [vmem:[%s11366_s1 + $0xde0] ss:$16 sps:$4 sm:$0xff]  }
 0x183   :  { %5254 = vmatpush1.bf16.msra.mxu0 %v8077_v14  ;;  %5813 = vmatpush1.bf16.msra.mxu1 %v8080_v15  ;;  %v8178_v14 = vld [vmem:[%s11366_s1 + $0xe04] ss:$16 sps:$4 sm:$0xff]   ;;  %v8181_v15 = vld [vmem:[%s11366_s1 + $0xe0c] ss:$16 sps:$4 sm:$0xff]  }
 0x184   :  { %5255 = vmatprep.subr.bf16.mxu0 %v8085_v16  ;;  %5814 = vmatprep.subr.bf16.mxu1 %v8088_v17  ;;  %v8176_v16 = vld [vmem:[%s11366_s1 + $0xe00] ss:$16 sps:$4 sm:$0xff]   ;;  %v8179_v17 = vld [vmem:[%s11366_s1 + $0xe08] ss:$16 sps:$4 sm:$0xff]  }
 0x185   :  { %5285 = vmatprep.mubr.bf16.mxu0 %v8175_v18  ;;  %5844 = vmatprep.mubr.bf16.mxu1 %v8175_v18  ;;  %v8184_v18 = vld [vmem:[%s11366_s1 + $0xe24] ss:$16 sps:$4 sm:$0xff]  }
 0x187   :  { %5256 = vmatpush1.bf16.msra.mxu0 %v8083_v19  ;;  %5815 = vmatpush1.bf16.msra.mxu1 %v8086_v20  ;;  %v8187_v19 = vld [vmem:[%s11366_s1 + $0xe2c] ss:$16 sps:$4 sm:$0xff]  }
 0x188   :  { %5257 = vmatprep.subr.bf16.mxu0 %v8091_v21  ;;  %5816 = vmatprep.subr.bf16.mxu1 %v8094_v22  ;;  %v8274_v20 = vld [vmem:[%s11367_s0 + $0x3c] ss:$100 sps:$4 sm:$0xff]   ;;  %v8185_v22 = vld [vmem:[%s11366_s1 + $0xe28] ss:$16 sps:$4 sm:$0xff]  }
 0x189   :  { %v8182_v21 = vld [vmem:[%s11366_s1 + $0xe20] ss:$16 sps:$4 sm:$0xff]  }
 0x18b   :  { %5258 = vmatpush1.bf16.msra.mxu0 %v8089_v23  ;;  %5817 = vmatpush1.bf16.msra.mxu1 %v8092_v24  ;;  %v8190_v23 = vld [vmem:[%s11366_s1 + $0xe44] ss:$16 sps:$4 sm:$0xff]   ;;  %v8193_v24 = vld [vmem:[%s11366_s1 + $0xe4c] ss:$16 sps:$4 sm:$0xff]  }
 0x18c   :  { %5259 = vmatprep.subr.bf16.mxu0 %v8097_v25  ;;  %5818 = vmatprep.subr.bf16.mxu1 %v8100_v26  ;;  %v8188_v25 = vld [vmem:[%s11366_s1 + $0xe40] ss:$16 sps:$4 sm:$0xff]   ;;  %v8191_v26 = vld [vmem:[%s11366_s1 + $0xe48] ss:$16 sps:$4 sm:$0xff]  }
 0x18f   :  { %5260 = vmatpush1.bf16.msra.mxu0 %v8095_v27  ;;  %5819 = vmatpush1.bf16.msra.mxu1 %v8098_v28  ;;  %v8196_v27 = vld [vmem:[%s11366_s1 + $0xe64] ss:$16 sps:$4 sm:$0xff]   ;;  %v8199_v28 = vld [vmem:[%s11366_s1 + $0xe6c] ss:$16 sps:$4 sm:$0xff]  }
 0x190   :  { %5261 = vmatprep.subr.bf16.mxu0 %v8103_v29  ;;  %5820 = vmatprep.subr.bf16.mxu1 %v8106_v30  ;;  %v8194_v29 = vld [vmem:[%s11366_s1 + $0xe60] ss:$16 sps:$4 sm:$0xff]   ;;  %v8197_v30 = vld [vmem:[%s11366_s1 + $0xe68] ss:$16 sps:$4 sm:$0xff]  }
 0x193   :  { %5262 = vmatpush1.bf16.msra.mxu0 %v8101_v31  ;;  %5821 = vmatpush1.bf16.msra.mxu1 %v8104_v32  ;;  %v8202_v31 = vld [vmem:[%s11366_s1 + $0xe84] ss:$16 sps:$4 sm:$0xff]   ;;  %v8205_v32 = vld [vmem:[%s11366_s1 + $0xe8c] ss:$16 sps:$4 sm:$0xff]  }
 0x194   :  { %5263 = vmatprep.subr.bf16.mxu0 %v8109_v33  ;;  %5822 = vmatprep.subr.bf16.mxu1 %v8112_v34  ;;  %v8200_v33 = vld [vmem:[%s11366_s1 + $0xe80] ss:$16 sps:$4 sm:$0xff]   ;;  %v8203_v34 = vld [vmem:[%s11366_s1 + $0xe88] ss:$16 sps:$4 sm:$0xff]  }
 0x197   :  { %5264 = vmatpush1.bf16.msra.mxu0 %v8107_v35  ;;  %5823 = vmatpush1.bf16.msra.mxu1 %v8110_v36  ;;  %v8208_v35 = vld [vmem:[%s11366_s1 + $0xea4] ss:$16 sps:$4 sm:$0xff]   ;;  %v8211_v36 = vld [vmem:[%s11366_s1 + $0xeac] ss:$16 sps:$4 sm:$0xff]  }
 0x198   :  { %5265 = vmatprep.subr.bf16.mxu0 %v8115_v37  ;;  %5824 = vmatprep.subr.bf16.mxu1 %v8118_v38  ;;  %v8206_v37 = vld [vmem:[%s11366_s1 + $0xea0] ss:$16 sps:$4 sm:$0xff]   ;;  %v8209_v38 = vld [vmem:[%s11366_s1 + $0xea8] ss:$16 sps:$4 sm:$0xff]  }
 0x19b   :  { %5266 = vmatpush1.bf16.msra.mxu0 %v8113_v39  ;;  %5825 = vmatpush1.bf16.msra.mxu1 %v8116_v40  ;;  %v8214_v39 = vld [vmem:[%s11366_s1 + $0xec4] ss:$16 sps:$4 sm:$0xff]   ;;  %v8217_v40 = vld [vmem:[%s11366_s1 + $0xecc] ss:$16 sps:$4 sm:$0xff]  }
 0x19c   :  { %5267 = vmatprep.subr.bf16.mxu0 %v8121_v41  ;;  %5826 = vmatprep.subr.bf16.mxu1 %v8124_v42  ;;  %v8212_v41 = vld [vmem:[%s11366_s1 + $0xec0] ss:$16 sps:$4 sm:$0xff]   ;;  %v8215_v42 = vld [vmem:[%s11366_s1 + $0xec8] ss:$16 sps:$4 sm:$0xff]  }
 0x19f   :  { %5268 = vmatpush1.bf16.msra.mxu0 %v8119_v43  ;;  %5827 = vmatpush1.bf16.msra.mxu1 %v8122_v44  ;;  %v8220_v43 = vld [vmem:[%s11366_s1 + $0xee4] ss:$16 sps:$4 sm:$0xff]   ;;  %v8223_v44 = vld [vmem:[%s11366_s1 + $0xeec] ss:$16 sps:$4 sm:$0xff]  }
 0x1a0   :  { %5269 = vmatprep.subr.bf16.mxu0 %v8127_v45  ;;  %5828 = vmatprep.subr.bf16.mxu1 %v8130_v46  ;;  %v8218_v45 = vld [vmem:[%s11366_s1 + $0xee0] ss:$16 sps:$4 sm:$0xff]   ;;  %v8221_v46 = vld [vmem:[%s11366_s1 + $0xee8] ss:$16 sps:$4 sm:$0xff]  }
 0x1a3   :  { %5270 = vmatpush1.bf16.msra.mxu0 %v8125_v47  ;;  %5829 = vmatpush1.bf16.msra.mxu1 %v8128_v48  ;;  %v8226_v47 = vld [vmem:[%s11366_s1 + $0xf04] ss:$16 sps:$4 sm:$0xff]   ;;  %v8229_v48 = vld [vmem:[%s11366_s1 + $0xf0c] ss:$16 sps:$4 sm:$0xff]  }
 0x1a4   :  { %5271 = vmatprep.subr.bf16.mxu0 %v8133_v49  ;;  %5830 = vmatprep.subr.bf16.mxu1 %v8136_v50  ;;  %v8224_v49 = vld [vmem:[%s11366_s1 + $0xf00] ss:$16 sps:$4 sm:$0xff]   ;;  %v8227_v50 = vld [vmem:[%s11366_s1 + $0xf08] ss:$16 sps:$4 sm:$0xff]  }
 0x1a7   :  { %5272 = vmatpush1.bf16.msra.mxu0 %v8131_v51  ;;  %5831 = vmatpush1.bf16.msra.mxu1 %v8134_v52  ;;  %v8232_v51 = vld [vmem:[%s11366_s1 + $0xf24] ss:$16 sps:$4 sm:$0xff]   ;;  %v8235_v52 = vld [vmem:[%s11366_s1 + $0xf2c] ss:$16 sps:$4 sm:$0xff]  }
 0x1a8   :  { %5273 = vmatprep.subr.bf16.mxu0 %v8139_v53  ;;  %5832 = vmatprep.subr.bf16.mxu1 %v8142_v54  ;;  %v8230_v53 = vld [vmem:[%s11366_s1 + $0xf20] ss:$16 sps:$4 sm:$0xff]   ;;  %v8233_v54 = vld [vmem:[%s11366_s1 + $0xf28] ss:$16 sps:$4 sm:$0xff]  }
 0x1ab   :  { %5274 = vmatpush1.bf16.msra.mxu0 %v8137_v55  ;;  %5833 = vmatpush1.bf16.msra.mxu1 %v8140_v56  ;;  %v8238_v55 = vld [vmem:[%s11366_s1 + $0xf44] ss:$16 sps:$4 sm:$0xff]   ;;  %v8241_v56 = vld [vmem:[%s11366_s1 + $0xf4c] ss:$16 sps:$4 sm:$0xff]  }
 0x1ac   :  { %5275 = vmatprep.subr.bf16.mxu0 %v8145_v57  ;;  %5834 = vmatprep.subr.bf16.mxu1 %v8148_v58  ;;  %v8236_v57 = vld [vmem:[%s11366_s1 + $0xf40] ss:$16 sps:$4 sm:$0xff]   ;;  %v8239_v58 = vld [vmem:[%s11366_s1 + $0xf48] ss:$16 sps:$4 sm:$0xff]  }
 0x1af   :  { %5276 = vmatpush1.bf16.msra.mxu0 %v8143_v59  ;;  %5835 = vmatpush1.bf16.msra.mxu1 %v8146_v60  ;;  %v8244_v59 = vld [vmem:[%s11366_s1 + $0xf64] ss:$16 sps:$4 sm:$0xff]   ;;  %v8247_v60 = vld [vmem:[%s11366_s1 + $0xf6c] ss:$16 sps:$4 sm:$0xff]  }
 0x1b0   :  { %5277 = vmatprep.subr.bf16.mxu0 %v8151_v61  ;;  %5836 = vmatprep.subr.bf16.mxu1 %v8154_v62  ;;  %v8242_v61 = vld [vmem:[%s11366_s1 + $0xf60] ss:$16 sps:$4 sm:$0xff]   ;;  %v8245_v62 = vld [vmem:[%s11366_s1 + $0xf68] ss:$16 sps:$4 sm:$0xff]  }
 0x1b3   :  { %5278 = vmatpush1.bf16.msra.mxu0 %v8149_v63  ;;  %5837 = vmatpush1.bf16.msra.mxu1 %v8152_v0  ;;  %v8250_v63 = vld [vmem:[%s11366_s1 + $0xf84] ss:$16 sps:$4 sm:$0xff]   ;;  %v8253_v0 = vld [vmem:[%s11366_s1 + $0xf8c] ss:$16 sps:$4 sm:$0xff]  }
 0x1b4   :  { %5279 = vmatprep.subr.bf16.mxu0 %v8157_v1  ;;  %5838 = vmatprep.subr.bf16.mxu1 %v8160_v2  ;;  %v8248_v1 = vld [vmem:[%s11366_s1 + $0xf80] ss:$16 sps:$4 sm:$0xff]   ;;  %v8251_v2 = vld [vmem:[%s11366_s1 + $0xf88] ss:$16 sps:$4 sm:$0xff]  }
 0x1b7   :  { %5280 = vmatpush1.bf16.msra.mxu0 %v8155_v3  ;;  %5839 = vmatpush1.bf16.msra.mxu1 %v8158_v4  ;;  %v8256_v3 = vld [vmem:[%s11366_s1 + $0xfa4] ss:$16 sps:$4 sm:$0xff]   ;;  %v8259_v4 = vld [vmem:[%s11366_s1 + $0xfac] ss:$16 sps:$4 sm:$0xff]  }
 0x1b8   :  { %5281 = vmatprep.subr.bf16.mxu0 %v8163_v5  ;;  %5840 = vmatprep.subr.bf16.mxu1 %v8166_v6  ;;  %v8254_v5 = vld [vmem:[%s11366_s1 + $0xfa0] ss:$16 sps:$4 sm:$0xff]   ;;  %v8257_v6 = vld [vmem:[%s11366_s1 + $0xfa8] ss:$16 sps:$4 sm:$0xff]  }
 0x1bb   :  { %5282 = vmatpush1.bf16.msra.mxu0 %v8161_v7  ;;  %5841 = vmatpush1.bf16.msra.mxu1 %v8164_v8  ;;  %v8262_v7 = vld [vmem:[%s11366_s1 + $0xfc4] ss:$16 sps:$4 sm:$0xff]   ;;  %v8265_v8 = vld [vmem:[%s11366_s1 + $0xfcc] ss:$16 sps:$4 sm:$0xff]  }
 0x1bc   :  { %5283 = vmatprep.subr.bf16.mxu0 %v8169_v9  ;;  %5842 = vmatprep.subr.bf16.mxu1 %v8172_v10  ;;  %v8260_v9 = vld [vmem:[%s11366_s1 + $0xfc0] ss:$16 sps:$4 sm:$0xff]   ;;  %v8263_v10 = vld [vmem:[%s11366_s1 + $0xfc8] ss:$16 sps:$4 sm:$0xff]  }
 0x1bf   :  { %5284 = vmatpush1.bf16.msra.mxu0 %v8167_v11  ;;  %5843 = vmatpush1.bf16.msra.mxu1 %v8170_v12  ;;  %v8268_v11 = vld [vmem:[%s11366_s1 + $0xfe4] ss:$16 sps:$4 sm:$0xff]   ;;  %v8271_v12 = vld [vmem:[%s11366_s1 + $0xfec] ss:$16 sps:$4 sm:$0xff]  }
 0x1c0   :  { %5296 = vmatprep.subr.bf16.mxu0 %v8178_v14  ;;  %5855 = vmatprep.subr.bf16.mxu1 %v8181_v15  ;;  %v8269_v14 = vld [vmem:[%s11366_s1 + $0xfe8] ss:$16 sps:$4 sm:$0xff]   ;;  %v8277_v15 = vld [vmem:[%s11366_s1 + $0x1004] ss:$16 sps:$4 sm:$0xff]  }
 0x1c2   :  { %5286 = vmatmul.mubr.bf16.vlgmr.msra.gmra.mrb[0].mxu0 %v8173_v13  ;;  %5845 = vmatmul.mubr.bf16.vlgmr.msra.gmra.mrb[0].mxu1 %v8173_v13  ;;  %v8266_v13 = vld [vmem:[%s11366_s1 + $0xfe0] ss:$16 sps:$4 sm:$0xff]  }
 0x1c3   :  { %5297 = vmatpush1.bf16.msra.mxu0 %v8176_v16  ;;  %5856 = vmatpush1.bf16.msra.mxu1 %v8179_v17  ;;  %v8280_v16 = vld [vmem:[%s11366_s1 + $0x100c] ss:$16 sps:$4 sm:$0xff]  }
 0x1c4   :  { %5298 = vmatprep.subr.bf16.mxu0 %v8184_v18  ;;  %5857 = vmatprep.subr.bf16.mxu1 %v8187_v19  ;;  %v8272_v17 = vld [vmem:[%s11367_s0 + $0x38] ss:$100 sps:$4 sm:$0xff]   ;;  %v8275_v18 = vld [vmem:[%s11366_s1 + $0x1000] ss:$16 sps:$4 sm:$0xff]  }
 0x1c5   :  { %5328 = vmatprep.mubr.bf16.mxu0 %v8274_v20  ;;  %5887 = vmatprep.mubr.bf16.mxu1 %v8274_v20  ;;  %v8278_v19 = vld [vmem:[%s11366_s1 + $0x1008] ss:$16 sps:$4 sm:$0xff]   ;;  %v8283_v20 = vld [vmem:[%s11366_s1 + $0x1024] ss:$16 sps:$4 sm:$0xff]  }
 0x1c7   :  { %5299 = vmatpush1.bf16.msra.mxu0 %v8182_v21  ;;  %5858 = vmatpush1.bf16.msra.mxu1 %v8185_v22  ;;  %v8286_v21 = vld [vmem:[%s11366_s1 + $0x102c] ss:$16 sps:$4 sm:$0xff]   ;;  %v8373_v22 = vld [vmem:[%s11367_s0 + $0x44] ss:$100 sps:$4 sm:$0xff]  }
 0x1c8   :  { %5300 = vmatprep.subr.bf16.mxu0 %v8190_v23  ;;  %5859 = vmatprep.subr.bf16.mxu1 %v8193_v24  ;;  %v8281_v23 = vld [vmem:[%s11366_s1 + $0x1020] ss:$16 sps:$4 sm:$0xff]   ;;  %v8284_v24 = vld [vmem:[%s11366_s1 + $0x1028] ss:$16 sps:$4 sm:$0xff]  }
 0x1cb   :  { %5301 = vmatpush1.bf16.msra.mxu0 %v8188_v25  ;;  %5860 = vmatpush1.bf16.msra.mxu1 %v8191_v26  ;;  %v8289_v25 = vld [vmem:[%s11366_s1 + $0x1044] ss:$16 sps:$4 sm:$0xff]   ;;  %v8292_v26 = vld [vmem:[%s11366_s1 + $0x104c] ss:$16 sps:$4 sm:$0xff]  }
 0x1cc   :  { %5302 = vmatprep.subr.bf16.mxu0 %v8196_v27  ;;  %5861 = vmatprep.subr.bf16.mxu1 %v8199_v28  ;;  %v8287_v27 = vld [vmem:[%s11366_s1 + $0x1040] ss:$16 sps:$4 sm:$0xff]   ;;  %v8290_v28 = vld [vmem:[%s11366_s1 + $0x1048] ss:$16 sps:$4 sm:$0xff]  }
 0x1cf   :  { %5303 = vmatpush1.bf16.msra.mxu0 %v8194_v29  ;;  %5862 = vmatpush1.bf16.msra.mxu1 %v8197_v30  ;;  %v8295_v29 = vld [vmem:[%s11366_s1 + $0x1064] ss:$16 sps:$4 sm:$0xff]   ;;  %v8298_v30 = vld [vmem:[%s11366_s1 + $0x106c] ss:$16 sps:$4 sm:$0xff]  }
 0x1d0   :  { %5304 = vmatprep.subr.bf16.mxu0 %v8202_v31  ;;  %5863 = vmatprep.subr.bf16.mxu1 %v8205_v32  ;;  %v8293_v31 = vld [vmem:[%s11366_s1 + $0x1060] ss:$16 sps:$4 sm:$0xff]   ;;  %v8296_v32 = vld [vmem:[%s11366_s1 + $0x1068] ss:$16 sps:$4 sm:$0xff]  }
 0x1d3   :  { %5305 = vmatpush1.bf16.msra.mxu0 %v8200_v33  ;;  %5864 = vmatpush1.bf16.msra.mxu1 %v8203_v34  ;;  %v8301_v33 = vld [vmem:[%s11366_s1 + $0x1084] ss:$16 sps:$4 sm:$0xff]   ;;  %v8304_v34 = vld [vmem:[%s11366_s1 + $0x108c] ss:$16 sps:$4 sm:$0xff]  }
 0x1d4   :  { %5306 = vmatprep.subr.bf16.mxu0 %v8208_v35  ;;  %5865 = vmatprep.subr.bf16.mxu1 %v8211_v36  ;;  %v8299_v35 = vld [vmem:[%s11366_s1 + $0x1080] ss:$16 sps:$4 sm:$0xff]   ;;  %v8302_v36 = vld [vmem:[%s11366_s1 + $0x1088] ss:$16 sps:$4 sm:$0xff]  }
 0x1d7   :  { %5307 = vmatpush1.bf16.msra.mxu0 %v8206_v37  ;;  %5866 = vmatpush1.bf16.msra.mxu1 %v8209_v38  ;;  %v8307_v37 = vld [vmem:[%s11366_s1 + $0x10a4] ss:$16 sps:$4 sm:$0xff]   ;;  %v8310_v38 = vld [vmem:[%s11366_s1 + $0x10ac] ss:$16 sps:$4 sm:$0xff]  }
 0x1d8   :  { %5308 = vmatprep.subr.bf16.mxu0 %v8214_v39  ;;  %5867 = vmatprep.subr.bf16.mxu1 %v8217_v40  ;;  %v8305_v39 = vld [vmem:[%s11366_s1 + $0x10a0] ss:$16 sps:$4 sm:$0xff]   ;;  %v8308_v40 = vld [vmem:[%s11366_s1 + $0x10a8] ss:$16 sps:$4 sm:$0xff]  }
 0x1db   :  { %5309 = vmatpush1.bf16.msra.mxu0 %v8212_v41  ;;  %5868 = vmatpush1.bf16.msra.mxu1 %v8215_v42  ;;  %v8313_v41 = vld [vmem:[%s11366_s1 + $0x10c4] ss:$16 sps:$4 sm:$0xff]   ;;  %v8316_v42 = vld [vmem:[%s11366_s1 + $0x10cc] ss:$16 sps:$4 sm:$0xff]  }
 0x1dc   :  { %5310 = vmatprep.subr.bf16.mxu0 %v8220_v43  ;;  %5869 = vmatprep.subr.bf16.mxu1 %v8223_v44  ;;  %v8311_v43 = vld [vmem:[%s11366_s1 + $0x10c0] ss:$16 sps:$4 sm:$0xff]   ;;  %v8314_v44 = vld [vmem:[%s11366_s1 + $0x10c8] ss:$16 sps:$4 sm:$0xff]  }
 0x1df   :  { %5311 = vmatpush1.bf16.msra.mxu0 %v8218_v45  ;;  %5870 = vmatpush1.bf16.msra.mxu1 %v8221_v46  ;;  %v8319_v45 = vld [vmem:[%s11366_s1 + $0x10e4] ss:$16 sps:$4 sm:$0xff]   ;;  %v8322_v46 = vld [vmem:[%s11366_s1 + $0x10ec] ss:$16 sps:$4 sm:$0xff]  }
 0x1e0   :  { %5312 = vmatprep.subr.bf16.mxu0 %v8226_v47  ;;  %5871 = vmatprep.subr.bf16.mxu1 %v8229_v48  ;;  %v8317_v47 = vld [vmem:[%s11366_s1 + $0x10e0] ss:$16 sps:$4 sm:$0xff]   ;;  %v8320_v48 = vld [vmem:[%s11366_s1 + $0x10e8] ss:$16 sps:$4 sm:$0xff]  }
 0x1e3   :  { %5313 = vmatpush1.bf16.msra.mxu0 %v8224_v49  ;;  %5872 = vmatpush1.bf16.msra.mxu1 %v8227_v50  ;;  %v8325_v49 = vld [vmem:[%s11366_s1 + $0x1104] ss:$16 sps:$4 sm:$0xff]   ;;  %v8328_v50 = vld [vmem:[%s11366_s1 + $0x110c] ss:$16 sps:$4 sm:$0xff]  }
 0x1e4   :  { %5314 = vmatprep.subr.bf16.mxu0 %v8232_v51  ;;  %5873 = vmatprep.subr.bf16.mxu1 %v8235_v52  ;;  %v8323_v51 = vld [vmem:[%s11366_s1 + $0x1100] ss:$16 sps:$4 sm:$0xff]   ;;  %v8326_v52 = vld [vmem:[%s11366_s1 + $0x1108] ss:$16 sps:$4 sm:$0xff]  }
 0x1e7   :  { %5315 = vmatpush1.bf16.msra.mxu0 %v8230_v53  ;;  %5874 = vmatpush1.bf16.msra.mxu1 %v8233_v54  ;;  %v8331_v53 = vld [vmem:[%s11366_s1 + $0x1124] ss:$16 sps:$4 sm:$0xff]   ;;  %v8334_v54 = vld [vmem:[%s11366_s1 + $0x112c] ss:$16 sps:$4 sm:$0xff]  }
 0x1e8   :  { %5316 = vmatprep.subr.bf16.mxu0 %v8238_v55  ;;  %5875 = vmatprep.subr.bf16.mxu1 %v8241_v56  ;;  %v8329_v55 = vld [vmem:[%s11366_s1 + $0x1120] ss:$16 sps:$4 sm:$0xff]   ;;  %v8332_v56 = vld [vmem:[%s11366_s1 + $0x1128] ss:$16 sps:$4 sm:$0xff]  }
 0x1eb   :  { %5317 = vmatpush1.bf16.msra.mxu0 %v8236_v57  ;;  %5876 = vmatpush1.bf16.msra.mxu1 %v8239_v58  ;;  %v8337_v57 = vld [vmem:[%s11366_s1 + $0x1144] ss:$16 sps:$4 sm:$0xff]   ;;  %v8340_v58 = vld [vmem:[%s11366_s1 + $0x114c] ss:$16 sps:$4 sm:$0xff]  }
 0x1ec   :  { %5318 = vmatprep.subr.bf16.mxu0 %v8244_v59  ;;  %5877 = vmatprep.subr.bf16.mxu1 %v8247_v60  ;;  %v8335_v59 = vld [vmem:[%s11366_s1 + $0x1140] ss:$16 sps:$4 sm:$0xff]   ;;  %v8338_v60 = vld [vmem:[%s11366_s1 + $0x1148] ss:$16 sps:$4 sm:$0xff]  }
 0x1ef   :  { %5319 = vmatpush1.bf16.msra.mxu0 %v8242_v61  ;;  %5878 = vmatpush1.bf16.msra.mxu1 %v8245_v62  ;;  %v8343_v61 = vld [vmem:[%s11366_s1 + $0x1164] ss:$16 sps:$4 sm:$0xff]   ;;  %v8346_v62 = vld [vmem:[%s11366_s1 + $0x116c] ss:$16 sps:$4 sm:$0xff]  }
 0x1f0   :  { %5320 = vmatprep.subr.bf16.mxu0 %v8250_v63  ;;  %5879 = vmatprep.subr.bf16.mxu1 %v8253_v0  ;;  %v8341_v63 = vld [vmem:[%s11366_s1 + $0x1160] ss:$16 sps:$4 sm:$0xff]   ;;  %v8344_v0 = vld [vmem:[%s11366_s1 + $0x1168] ss:$16 sps:$4 sm:$0xff]  }
 0x1f3   :  { %5321 = vmatpush1.bf16.msra.mxu0 %v8248_v1  ;;  %5880 = vmatpush1.bf16.msra.mxu1 %v8251_v2  ;;  %v8349_v1 = vld [vmem:[%s11366_s1 + $0x1184] ss:$16 sps:$4 sm:$0xff]   ;;  %v8352_v2 = vld [vmem:[%s11366_s1 + $0x118c] ss:$16 sps:$4 sm:$0xff]  }
 0x1f4   :  { %5322 = vmatprep.subr.bf16.mxu0 %v8256_v3  ;;  %5881 = vmatprep.subr.bf16.mxu1 %v8259_v4  ;;  %v8347_v3 = vld [vmem:[%s11366_s1 + $0x1180] ss:$16 sps:$4 sm:$0xff]   ;;  %v8350_v4 = vld [vmem:[%s11366_s1 + $0x1188] ss:$16 sps:$4 sm:$0xff]  }
 0x1f7   :  { %5323 = vmatpush1.bf16.msra.mxu0 %v8254_v5  ;;  %5882 = vmatpush1.bf16.msra.mxu1 %v8257_v6  ;;  %v8355_v5 = vld [vmem:[%s11366_s1 + $0x11a4] ss:$16 sps:$4 sm:$0xff]   ;;  %v8358_v6 = vld [vmem:[%s11366_s1 + $0x11ac] ss:$16 sps:$4 sm:$0xff]  }
 0x1f8   :  { %5324 = vmatprep.subr.bf16.mxu0 %v8262_v7  ;;  %5883 = vmatprep.subr.bf16.mxu1 %v8265_v8  ;;  %v8353_v7 = vld [vmem:[%s11366_s1 + $0x11a0] ss:$16 sps:$4 sm:$0xff]   ;;  %v8356_v8 = vld [vmem:[%s11366_s1 + $0x11a8] ss:$16 sps:$4 sm:$0xff]  }
 0x1fb   :  { %5325 = vmatpush1.bf16.msra.mxu0 %v8260_v9  ;;  %5884 = vmatpush1.bf16.msra.mxu1 %v8263_v10  ;;  %v8361_v9 = vld [vmem:[%s11366_s1 + $0x11c4] ss:$16 sps:$4 sm:$0xff]   ;;  %v8364_v10 = vld [vmem:[%s11366_s1 + $0x11cc] ss:$16 sps:$4 sm:$0xff]  }
 0x1fc   :  { %5326 = vmatprep.subr.bf16.mxu0 %v8268_v11  ;;  %5885 = vmatprep.subr.bf16.mxu1 %v8271_v12  ;;  %v8359_v11 = vld [vmem:[%s11366_s1 + $0x11c0] ss:$16 sps:$4 sm:$0xff]   ;;  %v8362_v12 = vld [vmem:[%s11366_s1 + $0x11c8] ss:$16 sps:$4 sm:$0xff]  }
 0x1ff   :  { %5327 = vmatpush1.bf16.msra.mxu0 %v8266_v13  ;;  %5886 = vmatpush1.bf16.msra.mxu1 %v8269_v14  ;;  %v8367_v13 = vld [vmem:[%s11366_s1 + $0x11e4] ss:$16 sps:$4 sm:$0xff]   ;;  %v8370_v14 = vld [vmem:[%s11366_s1 + $0x11ec] ss:$16 sps:$4 sm:$0xff]  }
 0x200   :  { %5339 = vmatprep.subr.bf16.mxu0 %v8277_v15  ;;  %5898 = vmatprep.subr.bf16.mxu1 %v8280_v16  ;;  %v8365_v15 = vld [vmem:[%s11366_s1 + $0x11e0] ss:$16 sps:$4 sm:$0xff]   ;;  %v8368_v16 = vld [vmem:[%s11366_s1 + $0x11e8] ss:$16 sps:$4 sm:$0xff]  }
 0x202   :  { %5329 = vmatmul.mubr.bf16.vlgmr.msra.gmra.mrb[0].mxu0 %v8272_v17  ;;  %5888 = vmatmul.mubr.bf16.vlgmr.msra.gmra.mrb[0].mxu1 %v8272_v17  ;;  %v8376_v17 = vld [vmem:[%s11366_s1 + $0x1204] ss:$16 sps:$4 sm:$0xff]  }
 0x203   :  { %5340 = vmatpush1.bf16.msra.mxu0 %v8275_v18  ;;  %5899 = vmatpush1.bf16.msra.mxu1 %v8278_v19  ;;  %v8379_v18 = vld [vmem:[%s11366_s1 + $0x120c] ss:$16 sps:$4 sm:$0xff]   ;;  %v8371_v19 = vld [vmem:[%s11367_s0 + $0x40] ss:$100 sps:$4 sm:$0xff]  }
 0x204   :  { %5341 = vmatprep.subr.bf16.mxu0 %v8283_v20  ;;  %5900 = vmatprep.subr.bf16.mxu1 %v8286_v21  ;;  %v8374_v20 = vld [vmem:[%s11366_s1 + $0x1200] ss:$16 sps:$4 sm:$0xff]   ;;  %v8377_v21 = vld [vmem:[%s11366_s1 + $0x1208] ss:$16 sps:$4 sm:$0xff]  }
 0x205   :  { %5371 = vmatprep.mubr.bf16.mxu0 %v8373_v22  ;;  %5930 = vmatprep.mubr.bf16.mxu1 %v8373_v22  ;;  %v8382_v22 = vld [vmem:[%s11366_s1 + $0x1224] ss:$16 sps:$4 sm:$0xff]  }
 0x207   :  { %5342 = vmatpush1.bf16.msra.mxu0 %v8281_v23  ;;  %5901 = vmatpush1.bf16.msra.mxu1 %v8284_v24  ;;  %v8385_v23 = vld [vmem:[%s11366_s1 + $0x122c] ss:$16 sps:$4 sm:$0xff]  }
 0x208   :  { %5343 = vmatprep.subr.bf16.mxu0 %v8289_v25  ;;  %5902 = vmatprep.subr.bf16.mxu1 %v8292_v26  ;;  %v8472_v24 = vld [vmem:[%s11367_s0 + $0x4c] ss:$100 sps:$4 sm:$0xff]   ;;  %v8383_v26 = vld [vmem:[%s11366_s1 + $0x1228] ss:$16 sps:$4 sm:$0xff]  }
 0x209   :  { %v8380_v25 = vld [vmem:[%s11366_s1 + $0x1220] ss:$16 sps:$4 sm:$0xff]  }
 0x20b   :  { %5344 = vmatpush1.bf16.msra.mxu0 %v8287_v27  ;;  %5903 = vmatpush1.bf16.msra.mxu1 %v8290_v28  ;;  %v8388_v27 = vld [vmem:[%s11366_s1 + $0x1244] ss:$16 sps:$4 sm:$0xff]   ;;  %v8391_v28 = vld [vmem:[%s11366_s1 + $0x124c] ss:$16 sps:$4 sm:$0xff]  }
 0x20c   :  { %5345 = vmatprep.subr.bf16.mxu0 %v8295_v29  ;;  %5904 = vmatprep.subr.bf16.mxu1 %v8298_v30  ;;  %v8386_v29 = vld [vmem:[%s11366_s1 + $0x1240] ss:$16 sps:$4 sm:$0xff]   ;;  %v8389_v30 = vld [vmem:[%s11366_s1 + $0x1248] ss:$16 sps:$4 sm:$0xff]  }
 0x20f   :  { %5346 = vmatpush1.bf16.msra.mxu0 %v8293_v31  ;;  %5905 = vmatpush1.bf16.msra.mxu1 %v8296_v32  ;;  %v8394_v31 = vld [vmem:[%s11366_s1 + $0x1264] ss:$16 sps:$4 sm:$0xff]   ;;  %v8397_v32 = vld [vmem:[%s11366_s1 + $0x126c] ss:$16 sps:$4 sm:$0xff]  }
 0x210   :  { %5347 = vmatprep.subr.bf16.mxu0 %v8301_v33  ;;  %5906 = vmatprep.subr.bf16.mxu1 %v8304_v34  ;;  %v8392_v33 = vld [vmem:[%s11366_s1 + $0x1260] ss:$16 sps:$4 sm:$0xff]   ;;  %v8395_v34 = vld [vmem:[%s11366_s1 + $0x1268] ss:$16 sps:$4 sm:$0xff]  }
 0x213   :  { %5348 = vmatpush1.bf16.msra.mxu0 %v8299_v35  ;;  %5907 = vmatpush1.bf16.msra.mxu1 %v8302_v36  ;;  %v8400_v35 = vld [vmem:[%s11366_s1 + $0x1284] ss:$16 sps:$4 sm:$0xff]   ;;  %v8403_v36 = vld [vmem:[%s11366_s1 + $0x128c] ss:$16 sps:$4 sm:$0xff]  }
 0x214   :  { %5349 = vmatprep.subr.bf16.mxu0 %v8307_v37  ;;  %5908 = vmatprep.subr.bf16.mxu1 %v8310_v38  ;;  %v8398_v37 = vld [vmem:[%s11366_s1 + $0x1280] ss:$16 sps:$4 sm:$0xff]   ;;  %v8401_v38 = vld [vmem:[%s11366_s1 + $0x1288] ss:$16 sps:$4 sm:$0xff]  }
 0x217   :  { %5350 = vmatpush1.bf16.msra.mxu0 %v8305_v39  ;;  %5909 = vmatpush1.bf16.msra.mxu1 %v8308_v40  ;;  %v8406_v39 = vld [vmem:[%s11366_s1 + $0x12a4] ss:$16 sps:$4 sm:$0xff]   ;;  %v8409_v40 = vld [vmem:[%s11366_s1 + $0x12ac] ss:$16 sps:$4 sm:$0xff]  }
 0x218   :  { %5351 = vmatprep.subr.bf16.mxu0 %v8313_v41  ;;  %5910 = vmatprep.subr.bf16.mxu1 %v8316_v42  ;;  %v8404_v41 = vld [vmem:[%s11366_s1 + $0x12a0] ss:$16 sps:$4 sm:$0xff]   ;;  %v8407_v42 = vld [vmem:[%s11366_s1 + $0x12a8] ss:$16 sps:$4 sm:$0xff]  }
 0x21b   :  { %5352 = vmatpush1.bf16.msra.mxu0 %v8311_v43  ;;  %5911 = vmatpush1.bf16.msra.mxu1 %v8314_v44  ;;  %v8412_v43 = vld [vmem:[%s11366_s1 + $0x12c4] ss:$16 sps:$4 sm:$0xff]   ;;  %v8415_v44 = vld [vmem:[%s11366_s1 + $0x12cc] ss:$16 sps:$4 sm:$0xff]  }
 0x21c   :  { %5353 = vmatprep.subr.bf16.mxu0 %v8319_v45  ;;  %5912 = vmatprep.subr.bf16.mxu1 %v8322_v46  ;;  %v8410_v45 = vld [vmem:[%s11366_s1 + $0x12c0] ss:$16 sps:$4 sm:$0xff]   ;;  %v8413_v46 = vld [vmem:[%s11366_s1 + $0x12c8] ss:$16 sps:$4 sm:$0xff]  }
 0x21f   :  { %5354 = vmatpush1.bf16.msra.mxu0 %v8317_v47  ;;  %5913 = vmatpush1.bf16.msra.mxu1 %v8320_v48  ;;  %v8418_v47 = vld [vmem:[%s11366_s1 + $0x12e4] ss:$16 sps:$4 sm:$0xff]   ;;  %v8421_v48 = vld [vmem:[%s11366_s1 + $0x12ec] ss:$16 sps:$4 sm:$0xff]  }
 0x220   :  { %5355 = vmatprep.subr.bf16.mxu0 %v8325_v49  ;;  %5914 = vmatprep.subr.bf16.mxu1 %v8328_v50  ;;  %v8416_v49 = vld [vmem:[%s11366_s1 + $0x12e0] ss:$16 sps:$4 sm:$0xff]   ;;  %v8419_v50 = vld [vmem:[%s11366_s1 + $0x12e8] ss:$16 sps:$4 sm:$0xff]  }
 0x223   :  { %5356 = vmatpush1.bf16.msra.mxu0 %v8323_v51  ;;  %5915 = vmatpush1.bf16.msra.mxu1 %v8326_v52  ;;  %v8424_v51 = vld [vmem:[%s11366_s1 + $0x1304] ss:$16 sps:$4 sm:$0xff]   ;;  %v8427_v52 = vld [vmem:[%s11366_s1 + $0x130c] ss:$16 sps:$4 sm:$0xff]  }
 0x224   :  { %5357 = vmatprep.subr.bf16.mxu0 %v8331_v53  ;;  %5916 = vmatprep.subr.bf16.mxu1 %v8334_v54  ;;  %v8422_v53 = vld [vmem:[%s11366_s1 + $0x1300] ss:$16 sps:$4 sm:$0xff]   ;;  %v8425_v54 = vld [vmem:[%s11366_s1 + $0x1308] ss:$16 sps:$4 sm:$0xff]  }
 0x227   :  { %5358 = vmatpush1.bf16.msra.mxu0 %v8329_v55  ;;  %5917 = vmatpush1.bf16.msra.mxu1 %v8332_v56  ;;  %v8430_v55 = vld [vmem:[%s11366_s1 + $0x1324] ss:$16 sps:$4 sm:$0xff]   ;;  %v8433_v56 = vld [vmem:[%s11366_s1 + $0x132c] ss:$16 sps:$4 sm:$0xff]  }
 0x228   :  { %5359 = vmatprep.subr.bf16.mxu0 %v8337_v57  ;;  %5918 = vmatprep.subr.bf16.mxu1 %v8340_v58  ;;  %v8428_v57 = vld [vmem:[%s11366_s1 + $0x1320] ss:$16 sps:$4 sm:$0xff]   ;;  %v8431_v58 = vld [vmem:[%s11366_s1 + $0x1328] ss:$16 sps:$4 sm:$0xff]  }
 0x22b   :  { %5360 = vmatpush1.bf16.msra.mxu0 %v8335_v59  ;;  %5919 = vmatpush1.bf16.msra.mxu1 %v8338_v60  ;;  %v8436_v59 = vld [vmem:[%s11366_s1 + $0x1344] ss:$16 sps:$4 sm:$0xff]   ;;  %v8439_v60 = vld [vmem:[%s11366_s1 + $0x134c] ss:$16 sps:$4 sm:$0xff]  }
 0x22c   :  { %5361 = vmatprep.subr.bf16.mxu0 %v8343_v61  ;;  %5920 = vmatprep.subr.bf16.mxu1 %v8346_v62  ;;  %v8434_v61 = vld [vmem:[%s11366_s1 + $0x1340] ss:$16 sps:$4 sm:$0xff]   ;;  %v8437_v62 = vld [vmem:[%s11366_s1 + $0x1348] ss:$16 sps:$4 sm:$0xff]  }
 0x22f   :  { %5362 = vmatpush1.bf16.msra.mxu0 %v8341_v63  ;;  %5921 = vmatpush1.bf16.msra.mxu1 %v8344_v0  ;;  %v8442_v63 = vld [vmem:[%s11366_s1 + $0x1364] ss:$16 sps:$4 sm:$0xff]   ;;  %v8445_v0 = vld [vmem:[%s11366_s1 + $0x136c] ss:$16 sps:$4 sm:$0xff]  }
 0x230   :  { %5363 = vmatprep.subr.bf16.mxu0 %v8349_v1  ;;  %5922 = vmatprep.subr.bf16.mxu1 %v8352_v2  ;;  %v8440_v1 = vld [vmem:[%s11366_s1 + $0x1360] ss:$16 sps:$4 sm:$0xff]   ;;  %v8443_v2 = vld [vmem:[%s11366_s1 + $0x1368] ss:$16 sps:$4 sm:$0xff]  }
 0x233   :  { %5364 = vmatpush1.bf16.msra.mxu0 %v8347_v3  ;;  %5923 = vmatpush1.bf16.msra.mxu1 %v8350_v4  ;;  %v8448_v3 = vld [vmem:[%s11366_s1 + $0x1384] ss:$16 sps:$4 sm:$0xff]   ;;  %v8451_v4 = vld [vmem:[%s11366_s1 + $0x138c] ss:$16 sps:$4 sm:$0xff]  }
 0x234   :  { %5365 = vmatprep.subr.bf16.mxu0 %v8355_v5  ;;  %5924 = vmatprep.subr.bf16.mxu1 %v8358_v6  ;;  %v8446_v5 = vld [vmem:[%s11366_s1 + $0x1380] ss:$16 sps:$4 sm:$0xff]   ;;  %v8449_v6 = vld [vmem:[%s11366_s1 + $0x1388] ss:$16 sps:$4 sm:$0xff]  }
 0x237   :  { %5366 = vmatpush1.bf16.msra.mxu0 %v8353_v7  ;;  %5925 = vmatpush1.bf16.msra.mxu1 %v8356_v8  ;;  %v8454_v7 = vld [vmem:[%s11366_s1 + $0x13a4] ss:$16 sps:$4 sm:$0xff]   ;;  %v8457_v8 = vld [vmem:[%s11366_s1 + $0x13ac] ss:$16 sps:$4 sm:$0xff]  }
 0x238   :  { %5367 = vmatprep.subr.bf16.mxu0 %v8361_v9  ;;  %5926 = vmatprep.subr.bf16.mxu1 %v8364_v10  ;;  %v8452_v9 = vld [vmem:[%s11366_s1 + $0x13a0] ss:$16 sps:$4 sm:$0xff]   ;;  %v8455_v10 = vld [vmem:[%s11366_s1 + $0x13a8] ss:$16 sps:$4 sm:$0xff]  }
 0x23b   :  { %5368 = vmatpush1.bf16.msra.mxu0 %v8359_v11  ;;  %5927 = vmatpush1.bf16.msra.mxu1 %v8362_v12  ;;  %v8460_v11 = vld [vmem:[%s11366_s1 + $0x13c4] ss:$16 sps:$4 sm:$0xff]   ;;  %v8463_v12 = vld [vmem:[%s11366_s1 + $0x13cc] ss:$16 sps:$4 sm:$0xff]  }
 0x23c   :  { %5369 = vmatprep.subr.bf16.mxu0 %v8367_v13  ;;  %5928 = vmatprep.subr.bf16.mxu1 %v8370_v14  ;;  %v8458_v13 = vld [vmem:[%s11366_s1 + $0x13c0] ss:$16 sps:$4 sm:$0xff]   ;;  %v8461_v14 = vld [vmem:[%s11366_s1 + $0x13c8] ss:$16 sps:$4 sm:$0xff]  }
 0x23f   :  { %5370 = vmatpush1.bf16.msra.mxu0 %v8365_v15  ;;  %5929 = vmatpush1.bf16.msra.mxu1 %v8368_v16  ;;  %v8466_v15 = vld [vmem:[%s11366_s1 + $0x13e4] ss:$16 sps:$4 sm:$0xff]   ;;  %v8469_v16 = vld [vmem:[%s11366_s1 + $0x13ec] ss:$16 sps:$4 sm:$0xff]  }
 0x240   :  { %5382 = vmatprep.subr.bf16.mxu0 %v8376_v17  ;;  %5941 = vmatprep.subr.bf16.mxu1 %v8379_v18  ;;  %v8464_v17 = vld [vmem:[%s11366_s1 + $0x13e0] ss:$16 sps:$4 sm:$0xff]   ;;  %v8467_v18 = vld [vmem:[%s11366_s1 + $0x13e8] ss:$16 sps:$4 sm:$0xff]  }
 0x242   :  { %5372 = vmatmul.mubr.bf16.vlgmr.msra.gmra.mrb[0].mxu0 %v8371_v19  ;;  %5931 = vmatmul.mubr.bf16.vlgmr.msra.gmra.mrb[0].mxu1 %v8371_v19  ;;  %v8475_v19 = vld [vmem:[%s11366_s1 + $0x1404] ss:$16 sps:$4 sm:$0xff]  }
 0x243   :  { %5383 = vmatpush1.bf16.msra.mxu0 %v8374_v20  ;;  %5942 = vmatpush1.bf16.msra.mxu1 %v8377_v21  ;;  %v8478_v20 = vld [vmem:[%s11366_s1 + $0x140c] ss:$16 sps:$4 sm:$0xff]  }
 0x244   :  { %5384 = vmatprep.subr.bf16.mxu0 %v8382_v22  ;;  %5943 = vmatprep.subr.bf16.mxu1 %v8385_v23  ;;  %v8470_v21 = vld [vmem:[%s11367_s0 + $0x48] ss:$100 sps:$4 sm:$0xff]   ;;  %v8473_v22 = vld [vmem:[%s11366_s1 + $0x1400] ss:$16 sps:$4 sm:$0xff]  }
 0x245   :  { %5414 = vmatprep.mubr.bf16.mxu0 %v8472_v24  ;;  %5973 = vmatprep.mubr.bf16.mxu1 %v8472_v24  ;;  %v8476_v23 = vld [vmem:[%s11366_s1 + $0x1408] ss:$16 sps:$4 sm:$0xff]   ;;  %v8481_v24 = vld [vmem:[%s11366_s1 + $0x1424] ss:$16 sps:$4 sm:$0xff]  }
 0x247   :  { %5385 = vmatpush1.bf16.msra.mxu0 %v8380_v25  ;;  %5944 = vmatpush1.bf16.msra.mxu1 %v8383_v26  ;;  %v8484_v25 = vld [vmem:[%s11366_s1 + $0x142c] ss:$16 sps:$4 sm:$0xff]   ;;  %v8571_v26 = vld [vmem:[%s11367_s0 + $0x54] ss:$100 sps:$4 sm:$0xff]  }
 0x248   :  { %5386 = vmatprep.subr.bf16.mxu0 %v8388_v27  ;;  %5945 = vmatprep.subr.bf16.mxu1 %v8391_v28  ;;  %v8479_v27 = vld [vmem:[%s11366_s1 + $0x1420] ss:$16 sps:$4 sm:$0xff]   ;;  %v8482_v28 = vld [vmem:[%s11366_s1 + $0x1428] ss:$16 sps:$4 sm:$0xff]  }
 0x24b   :  { %5387 = vmatpush1.bf16.msra.mxu0 %v8386_v29  ;;  %5946 = vmatpush1.bf16.msra.mxu1 %v8389_v30  ;;  %v8487_v29 = vld [vmem:[%s11366_s1 + $0x1444] ss:$16 sps:$4 sm:$0xff]   ;;  %v8490_v30 = vld [vmem:[%s11366_s1 + $0x144c] ss:$16 sps:$4 sm:$0xff]  }
 0x24c   :  { %5388 = vmatprep.subr.bf16.mxu0 %v8394_v31  ;;  %5947 = vmatprep.subr.bf16.mxu1 %v8397_v32  ;;  %v8485_v31 = vld [vmem:[%s11366_s1 + $0x1440] ss:$16 sps:$4 sm:$0xff]   ;;  %v8488_v32 = vld [vmem:[%s11366_s1 + $0x1448] ss:$16 sps:$4 sm:$0xff]  }
 0x24f   :  { %5389 = vmatpush1.bf16.msra.mxu0 %v8392_v33  ;;  %5948 = vmatpush1.bf16.msra.mxu1 %v8395_v34  ;;  %v8493_v33 = vld [vmem:[%s11366_s1 + $0x1464] ss:$16 sps:$4 sm:$0xff]   ;;  %v8496_v34 = vld [vmem:[%s11366_s1 + $0x146c] ss:$16 sps:$4 sm:$0xff]  }
 0x250   :  { %5390 = vmatprep.subr.bf16.mxu0 %v8400_v35  ;;  %5949 = vmatprep.subr.bf16.mxu1 %v8403_v36  ;;  %v8491_v35 = vld [vmem:[%s11366_s1 + $0x1460] ss:$16 sps:$4 sm:$0xff]   ;;  %v8494_v36 = vld [vmem:[%s11366_s1 + $0x1468] ss:$16 sps:$4 sm:$0xff]  }
 0x253   :  { %5391 = vmatpush1.bf16.msra.mxu0 %v8398_v37  ;;  %5950 = vmatpush1.bf16.msra.mxu1 %v8401_v38  ;;  %v8499_v37 = vld [vmem:[%s11366_s1 + $0x1484] ss:$16 sps:$4 sm:$0xff]   ;;  %v8502_v38 = vld [vmem:[%s11366_s1 + $0x148c] ss:$16 sps:$4 sm:$0xff]  }
 0x254   :  { %5392 = vmatprep.subr.bf16.mxu0 %v8406_v39  ;;  %5951 = vmatprep.subr.bf16.mxu1 %v8409_v40  ;;  %v8497_v39 = vld [vmem:[%s11366_s1 + $0x1480] ss:$16 sps:$4 sm:$0xff]   ;;  %v8500_v40 = vld [vmem:[%s11366_s1 + $0x1488] ss:$16 sps:$4 sm:$0xff]  }
 0x257   :  { %5393 = vmatpush1.bf16.msra.mxu0 %v8404_v41  ;;  %5952 = vmatpush1.bf16.msra.mxu1 %v8407_v42  ;;  %v8505_v41 = vld [vmem:[%s11366_s1 + $0x14a4] ss:$16 sps:$4 sm:$0xff]   ;;  %v8508_v42 = vld [vmem:[%s11366_s1 + $0x14ac] ss:$16 sps:$4 sm:$0xff]  }
 0x258   :  { %5394 = vmatprep.subr.bf16.mxu0 %v8412_v43  ;;  %5953 = vmatprep.subr.bf16.mxu1 %v8415_v44  ;;  %v8503_v43 = vld [vmem:[%s11366_s1 + $0x14a0] ss:$16 sps:$4 sm:$0xff]   ;;  %v8506_v44 = vld [vmem:[%s11366_s1 + $0x14a8] ss:$16 sps:$4 sm:$0xff]  }
 0x25b   :  { %5395 = vmatpush1.bf16.msra.mxu0 %v8410_v45  ;;  %5954 = vmatpush1.bf16.msra.mxu1 %v8413_v46  ;;  %v8511_v45 = vld [vmem:[%s11366_s1 + $0x14c4] ss:$16 sps:$4 sm:$0xff]   ;;  %v8514_v46 = vld [vmem:[%s11366_s1 + $0x14cc] ss:$16 sps:$4 sm:$0xff]  }
 0x25c   :  { %5396 = vmatprep.subr.bf16.mxu0 %v8418_v47  ;;  %5955 = vmatprep.subr.bf16.mxu1 %v8421_v48  ;;  %v8509_v47 = vld [vmem:[%s11366_s1 + $0x14c0] ss:$16 sps:$4 sm:$0xff]   ;;  %v8512_v48 = vld [vmem:[%s11366_s1 + $0x14c8] ss:$16 sps:$4 sm:$0xff]  }
 0x25f   :  { %5397 = vmatpush1.bf16.msra.mxu0 %v8416_v49  ;;  %5956 = vmatpush1.bf16.msra.mxu1 %v8419_v50  ;;  %v8517_v49 = vld [vmem:[%s11366_s1 + $0x14e4] ss:$16 sps:$4 sm:$0xff]   ;;  %v8520_v50 = vld [vmem:[%s11366_s1 + $0x14ec] ss:$16 sps:$4 sm:$0xff]  }
 0x260   :  { %5398 = vmatprep.subr.bf16.mxu0 %v8424_v51  ;;  %5957 = vmatprep.subr.bf16.mxu1 %v8427_v52  ;;  %v8515_v51 = vld [vmem:[%s11366_s1 + $0x14e0] ss:$16 sps:$4 sm:$0xff]   ;;  %v8518_v52 = vld [vmem:[%s11366_s1 + $0x14e8] ss:$16 sps:$4 sm:$0xff]  }
 0x263   :  { %5399 = vmatpush1.bf16.msra.mxu0 %v8422_v53  ;;  %5958 = vmatpush1.bf16.msra.mxu1 %v8425_v54  ;;  %v8523_v53 = vld [vmem:[%s11366_s1 + $0x1504] ss:$16 sps:$4 sm:$0xff]   ;;  %v8526_v54 = vld [vmem:[%s11366_s1 + $0x150c] ss:$16 sps:$4 sm:$0xff]  }
 0x264   :  { %5400 = vmatprep.subr.bf16.mxu0 %v8430_v55  ;;  %5959 = vmatprep.subr.bf16.mxu1 %v8433_v56  ;;  %v8521_v55 = vld [vmem:[%s11366_s1 + $0x1500] ss:$16 sps:$4 sm:$0xff]   ;;  %v8524_v56 = vld [vmem:[%s11366_s1 + $0x1508] ss:$16 sps:$4 sm:$0xff]  }
 0x267   :  { %5401 = vmatpush1.bf16.msra.mxu0 %v8428_v57  ;;  %5960 = vmatpush1.bf16.msra.mxu1 %v8431_v58  ;;  %v8529_v57 = vld [vmem:[%s11366_s1 + $0x1524] ss:$16 sps:$4 sm:$0xff]   ;;  %v8532_v58 = vld [vmem:[%s11366_s1 + $0x152c] ss:$16 sps:$4 sm:$0xff]  }
 0x268   :  { %5402 = vmatprep.subr.bf16.mxu0 %v8436_v59  ;;  %5961 = vmatprep.subr.bf16.mxu1 %v8439_v60  ;;  %v8527_v59 = vld [vmem:[%s11366_s1 + $0x1520] ss:$16 sps:$4 sm:$0xff]   ;;  %v8530_v60 = vld [vmem:[%s11366_s1 + $0x1528] ss:$16 sps:$4 sm:$0xff]  }
 0x26b   :  { %5403 = vmatpush1.bf16.msra.mxu0 %v8434_v61  ;;  %5962 = vmatpush1.bf16.msra.mxu1 %v8437_v62  ;;  %v8535_v61 = vld [vmem:[%s11366_s1 + $0x1544] ss:$16 sps:$4 sm:$0xff]   ;;  %v8538_v62 = vld [vmem:[%s11366_s1 + $0x154c] ss:$16 sps:$4 sm:$0xff]  }
 0x26c   :  { %5404 = vmatprep.subr.bf16.mxu0 %v8442_v63  ;;  %5963 = vmatprep.subr.bf16.mxu1 %v8445_v0  ;;  %v8533_v63 = vld [vmem:[%s11366_s1 + $0x1540] ss:$16 sps:$4 sm:$0xff]   ;;  %v8536_v0 = vld [vmem:[%s11366_s1 + $0x1548] ss:$16 sps:$4 sm:$0xff]  }
 0x26f   :  { %5405 = vmatpush1.bf16.msra.mxu0 %v8440_v1  ;;  %5964 = vmatpush1.bf16.msra.mxu1 %v8443_v2  ;;  %v8541_v1 = vld [vmem:[%s11366_s1 + $0x1564] ss:$16 sps:$4 sm:$0xff]   ;;  %v8544_v2 = vld [vmem:[%s11366_s1 + $0x156c] ss:$16 sps:$4 sm:$0xff]  }
 0x270   :  { %5406 = vmatprep.subr.bf16.mxu0 %v8448_v3  ;;  %5965 = vmatprep.subr.bf16.mxu1 %v8451_v4  ;;  %v8539_v3 = vld [vmem:[%s11366_s1 + $0x1560] ss:$16 sps:$4 sm:$0xff]   ;;  %v8542_v4 = vld [vmem:[%s11366_s1 + $0x1568] ss:$16 sps:$4 sm:$0xff]  }
 0x273   :  { %5407 = vmatpush1.bf16.msra.mxu0 %v8446_v5  ;;  %5966 = vmatpush1.bf16.msra.mxu1 %v8449_v6  ;;  %v8547_v5 = vld [vmem:[%s11366_s1 + $0x1584] ss:$16 sps:$4 sm:$0xff]   ;;  %v8550_v6 = vld [vmem:[%s11366_s1 + $0x158c] ss:$16 sps:$4 sm:$0xff]  }
 0x274   :  { %5408 = vmatprep.subr.bf16.mxu0 %v8454_v7  ;;  %5967 = vmatprep.subr.bf16.mxu1 %v8457_v8  ;;  %v8545_v7 = vld [vmem:[%s11366_s1 + $0x1580] ss:$16 sps:$4 sm:$0xff]   ;;  %v8548_v8 = vld [vmem:[%s11366_s1 + $0x1588] ss:$16 sps:$4 sm:$0xff]  }
 0x277   :  { %5409 = vmatpush1.bf16.msra.mxu0 %v8452_v9  ;;  %5968 = vmatpush1.bf16.msra.mxu1 %v8455_v10  ;;  %v8553_v9 = vld [vmem:[%s11366_s1 + $0x15a4] ss:$16 sps:$4 sm:$0xff]   ;;  %v8556_v10 = vld [vmem:[%s11366_s1 + $0x15ac] ss:$16 sps:$4 sm:$0xff]  }
 0x278   :  { %5410 = vmatprep.subr.bf16.mxu0 %v8460_v11  ;;  %5969 = vmatprep.subr.bf16.mxu1 %v8463_v12  ;;  %v8551_v11 = vld [vmem:[%s11366_s1 + $0x15a0] ss:$16 sps:$4 sm:$0xff]   ;;  %v8554_v12 = vld [vmem:[%s11366_s1 + $0x15a8] ss:$16 sps:$4 sm:$0xff]  }
 0x27b   :  { %5411 = vmatpush1.bf16.msra.mxu0 %v8458_v13  ;;  %5970 = vmatpush1.bf16.msra.mxu1 %v8461_v14  ;;  %v8559_v13 = vld [vmem:[%s11366_s1 + $0x15c4] ss:$16 sps:$4 sm:$0xff]   ;;  %v8562_v14 = vld [vmem:[%s11366_s1 + $0x15cc] ss:$16 sps:$4 sm:$0xff]  }
 0x27c   :  { %5412 = vmatprep.subr.bf16.mxu0 %v8466_v15  ;;  %5971 = vmatprep.subr.bf16.mxu1 %v8469_v16  ;;  %v8557_v15 = vld [vmem:[%s11366_s1 + $0x15c0] ss:$16 sps:$4 sm:$0xff]   ;;  %v8560_v16 = vld [vmem:[%s11366_s1 + $0x15c8] ss:$16 sps:$4 sm:$0xff]  }
 0x27f   :  { %5413 = vmatpush1.bf16.msra.mxu0 %v8464_v17  ;;  %5972 = vmatpush1.bf16.msra.mxu1 %v8467_v18  ;;  %v8565_v17 = vld [vmem:[%s11366_s1 + $0x15e4] ss:$16 sps:$4 sm:$0xff]   ;;  %v8568_v18 = vld [vmem:[%s11366_s1 + $0x15ec] ss:$16 sps:$4 sm:$0xff]  }
 0x280   :  { %5425 = vmatprep.subr.bf16.mxu0 %v8475_v19  ;;  %5984 = vmatprep.subr.bf16.mxu1 %v8478_v20  ;;  %v8563_v19 = vld [vmem:[%s11366_s1 + $0x15e0] ss:$16 sps:$4 sm:$0xff]   ;;  %v8566_v20 = vld [vmem:[%s11366_s1 + $0x15e8] ss:$16 sps:$4 sm:$0xff]  }
 0x282   :  { %5415 = vmatmul.mubr.bf16.vlgmr.msra.gmra.mrb[0].mxu0 %v8470_v21  ;;  %5974 = vmatmul.mubr.bf16.vlgmr.msra.gmra.mrb[0].mxu1 %v8470_v21  ;;  %v8574_v21 = vld [vmem:[%s11366_s1 + $0x1604] ss:$16 sps:$4 sm:$0xff]  }
 0x283   :  { %5426 = vmatpush1.bf16.msra.mxu0 %v8473_v22  ;;  %5985 = vmatpush1.bf16.msra.mxu1 %v8476_v23  ;;  %v8577_v22 = vld [vmem:[%s11366_s1 + $0x160c] ss:$16 sps:$4 sm:$0xff]   ;;  %v8569_v23 = vld [vmem:[%s11367_s0 + $0x50] ss:$100 sps:$4 sm:$0xff]  }
 0x284   :  { %5427 = vmatprep.subr.bf16.mxu0 %v8481_v24  ;;  %5986 = vmatprep.subr.bf16.mxu1 %v8484_v25  ;;  %v8572_v24 = vld [vmem:[%s11366_s1 + $0x1600] ss:$16 sps:$4 sm:$0xff]   ;;  %v8575_v25 = vld [vmem:[%s11366_s1 + $0x1608] ss:$16 sps:$4 sm:$0xff]  }
 0x285   :  { %5457 = vmatprep.mubr.bf16.mxu0 %v8571_v26  ;;  %6016 = vmatprep.mubr.bf16.mxu1 %v8571_v26  ;;  %v8580_v26 = vld [vmem:[%s11366_s1 + $0x1624] ss:$16 sps:$4 sm:$0xff]  }
 0x287   :  { %5428 = vmatpush1.bf16.msra.mxu0 %v8479_v27  ;;  %5987 = vmatpush1.bf16.msra.mxu1 %v8482_v28  ;;  %v8583_v27 = vld [vmem:[%s11366_s1 + $0x162c] ss:$16 sps:$4 sm:$0xff]  }
 0x288   :  { %5429 = vmatprep.subr.bf16.mxu0 %v8487_v29  ;;  %5988 = vmatprep.subr.bf16.mxu1 %v8490_v30  ;;  %v8670_v28 = vld [vmem:[%s11367_s0 + $0x5c] ss:$100 sps:$4 sm:$0xff]   ;;  %v8581_v30 = vld [vmem:[%s11366_s1 + $0x1628] ss:$16 sps:$4 sm:$0xff]  }
 0x289   :  { %v8578_v29 = vld [vmem:[%s11366_s1 + $0x1620] ss:$16 sps:$4 sm:$0xff]  }
 0x28b   :  { %5430 = vmatpush1.bf16.msra.mxu0 %v8485_v31  ;;  %5989 = vmatpush1.bf16.msra.mxu1 %v8488_v32  ;;  %v8586_v31 = vld [vmem:[%s11366_s1 + $0x1644] ss:$16 sps:$4 sm:$0xff]   ;;  %v8589_v32 = vld [vmem:[%s11366_s1 + $0x164c] ss:$16 sps:$4 sm:$0xff]  }
 0x28c   :  { %5431 = vmatprep.subr.bf16.mxu0 %v8493_v33  ;;  %5990 = vmatprep.subr.bf16.mxu1 %v8496_v34  ;;  %v8584_v33 = vld [vmem:[%s11366_s1 + $0x1640] ss:$16 sps:$4 sm:$0xff]   ;;  %v8587_v34 = vld [vmem:[%s11366_s1 + $0x1648] ss:$16 sps:$4 sm:$0xff]  }
 0x28f   :  { %5432 = vmatpush1.bf16.msra.mxu0 %v8491_v35  ;;  %5991 = vmatpush1.bf16.msra.mxu1 %v8494_v36  ;;  %v8592_v35 = vld [vmem:[%s11366_s1 + $0x1664] ss:$16 sps:$4 sm:$0xff]   ;;  %v8595_v36 = vld [vmem:[%s11366_s1 + $0x166c] ss:$16 sps:$4 sm:$0xff]  }
 0x290   :  { %5433 = vmatprep.subr.bf16.mxu0 %v8499_v37  ;;  %5992 = vmatprep.subr.bf16.mxu1 %v8502_v38  ;;  %v8590_v37 = vld [vmem:[%s11366_s1 + $0x1660] ss:$16 sps:$4 sm:$0xff]   ;;  %v8593_v38 = vld [vmem:[%s11366_s1 + $0x1668] ss:$16 sps:$4 sm:$0xff]  }
 0x293   :  { %5434 = vmatpush1.bf16.msra.mxu0 %v8497_v39  ;;  %5993 = vmatpush1.bf16.msra.mxu1 %v8500_v40  ;;  %v8598_v39 = vld [vmem:[%s11366_s1 + $0x1684] ss:$16 sps:$4 sm:$0xff]   ;;  %v8601_v40 = vld [vmem:[%s11366_s1 + $0x168c] ss:$16 sps:$4 sm:$0xff]  }
 0x294   :  { %5435 = vmatprep.subr.bf16.mxu0 %v8505_v41  ;;  %5994 = vmatprep.subr.bf16.mxu1 %v8508_v42  ;;  %v8596_v41 = vld [vmem:[%s11366_s1 + $0x1680] ss:$16 sps:$4 sm:$0xff]   ;;  %v8599_v42 = vld [vmem:[%s11366_s1 + $0x1688] ss:$16 sps:$4 sm:$0xff]  }
 0x297   :  { %5436 = vmatpush1.bf16.msra.mxu0 %v8503_v43  ;;  %5995 = vmatpush1.bf16.msra.mxu1 %v8506_v44  ;;  %v8604_v43 = vld [vmem:[%s11366_s1 + $0x16a4] ss:$16 sps:$4 sm:$0xff]   ;;  %v8607_v44 = vld [vmem:[%s11366_s1 + $0x16ac] ss:$16 sps:$4 sm:$0xff]  }
 0x298   :  { %5437 = vmatprep.subr.bf16.mxu0 %v8511_v45  ;;  %5996 = vmatprep.subr.bf16.mxu1 %v8514_v46  ;;  %v8602_v45 = vld [vmem:[%s11366_s1 + $0x16a0] ss:$16 sps:$4 sm:$0xff]   ;;  %v8605_v46 = vld [vmem:[%s11366_s1 + $0x16a8] ss:$16 sps:$4 sm:$0xff]  }
 0x29b   :  { %5438 = vmatpush1.bf16.msra.mxu0 %v8509_v47  ;;  %5997 = vmatpush1.bf16.msra.mxu1 %v8512_v48  ;;  %v8610_v47 = vld [vmem:[%s11366_s1 + $0x16c4] ss:$16 sps:$4 sm:$0xff]   ;;  %v8613_v48 = vld [vmem:[%s11366_s1 + $0x16cc] ss:$16 sps:$4 sm:$0xff]  }
 0x29c   :  { %5439 = vmatprep.subr.bf16.mxu0 %v8517_v49  ;;  %5998 = vmatprep.subr.bf16.mxu1 %v8520_v50  ;;  %v8608_v49 = vld [vmem:[%s11366_s1 + $0x16c0] ss:$16 sps:$4 sm:$0xff]   ;;  %v8611_v50 = vld [vmem:[%s11366_s1 + $0x16c8] ss:$16 sps:$4 sm:$0xff]  }
 0x29f   :  { %5440 = vmatpush1.bf16.msra.mxu0 %v8515_v51  ;;  %5999 = vmatpush1.bf16.msra.mxu1 %v8518_v52  ;;  %v8616_v51 = vld [vmem:[%s11366_s1 + $0x16e4] ss:$16 sps:$4 sm:$0xff]   ;;  %v8619_v52 = vld [vmem:[%s11366_s1 + $0x16ec] ss:$16 sps:$4 sm:$0xff]  }
 0x2a0   :  { %5441 = vmatprep.subr.bf16.mxu0 %v8523_v53  ;;  %6000 = vmatprep.subr.bf16.mxu1 %v8526_v54  ;;  %v8614_v53 = vld [vmem:[%s11366_s1 + $0x16e0] ss:$16 sps:$4 sm:$0xff]   ;;  %v8617_v54 = vld [vmem:[%s11366_s1 + $0x16e8] ss:$16 sps:$4 sm:$0xff]  }
 0x2a3   :  { %5442 = vmatpush1.bf16.msra.mxu0 %v8521_v55  ;;  %6001 = vmatpush1.bf16.msra.mxu1 %v8524_v56  ;;  %v8622_v55 = vld [vmem:[%s11366_s1 + $0x1704] ss:$16 sps:$4 sm:$0xff]   ;;  %v8625_v56 = vld [vmem:[%s11366_s1 + $0x170c] ss:$16 sps:$4 sm:$0xff]  }
 0x2a4   :  { %5443 = vmatprep.subr.bf16.mxu0 %v8529_v57  ;;  %6002 = vmatprep.subr.bf16.mxu1 %v8532_v58  ;;  %v8620_v57 = vld [vmem:[%s11366_s1 + $0x1700] ss:$16 sps:$4 sm:$0xff]   ;;  %v8623_v58 = vld [vmem:[%s11366_s1 + $0x1708] ss:$16 sps:$4 sm:$0xff]  }
 0x2a7   :  { %5444 = vmatpush1.bf16.msra.mxu0 %v8527_v59  ;;  %6003 = vmatpush1.bf16.msra.mxu1 %v8530_v60  ;;  %v8628_v59 = vld [vmem:[%s11366_s1 + $0x1724] ss:$16 sps:$4 sm:$0xff]   ;;  %v8631_v60 = vld [vmem:[%s11366_s1 + $0x172c] ss:$16 sps:$4 sm:$0xff]  }
 0x2a8   :  { %5445 = vmatprep.subr.bf16.mxu0 %v8535_v61  ;;  %6004 = vmatprep.subr.bf16.mxu1 %v8538_v62  ;;  %v8626_v61 = vld [vmem:[%s11366_s1 + $0x1720] ss:$16 sps:$4 sm:$0xff]   ;;  %v8629_v62 = vld [vmem:[%s11366_s1 + $0x1728] ss:$16 sps:$4 sm:$0xff]  }
 0x2ab   :  { %5446 = vmatpush1.bf16.msra.mxu0 %v8533_v63  ;;  %6005 = vmatpush1.bf16.msra.mxu1 %v8536_v0  ;;  %v8634_v63 = vld [vmem:[%s11366_s1 + $0x1744] ss:$16 sps:$4 sm:$0xff]   ;;  %v8637_v0 = vld [vmem:[%s11366_s1 + $0x174c] ss:$16 sps:$4 sm:$0xff]  }
 0x2ac   :  { %5447 = vmatprep.subr.bf16.mxu0 %v8541_v1  ;;  %6006 = vmatprep.subr.bf16.mxu1 %v8544_v2  ;;  %v8632_v1 = vld [vmem:[%s11366_s1 + $0x1740] ss:$16 sps:$4 sm:$0xff]   ;;  %v8635_v2 = vld [vmem:[%s11366_s1 + $0x1748] ss:$16 sps:$4 sm:$0xff]  }
 0x2af   :  { %5448 = vmatpush1.bf16.msra.mxu0 %v8539_v3  ;;  %6007 = vmatpush1.bf16.msra.mxu1 %v8542_v4  ;;  %v8640_v3 = vld [vmem:[%s11366_s1 + $0x1764] ss:$16 sps:$4 sm:$0xff]   ;;  %v8643_v4 = vld [vmem:[%s11366_s1 + $0x176c] ss:$16 sps:$4 sm:$0xff]  }
 0x2b0   :  { %5449 = vmatprep.subr.bf16.mxu0 %v8547_v5  ;;  %6008 = vmatprep.subr.bf16.mxu1 %v8550_v6  ;;  %v8638_v5 = vld [vmem:[%s11366_s1 + $0x1760] ss:$16 sps:$4 sm:$0xff]   ;;  %v8641_v6 = vld [vmem:[%s11366_s1 + $0x1768] ss:$16 sps:$4 sm:$0xff]  }
 0x2b3   :  { %5450 = vmatpush1.bf16.msra.mxu0 %v8545_v7  ;;  %6009 = vmatpush1.bf16.msra.mxu1 %v8548_v8  ;;  %v8646_v7 = vld [vmem:[%s11366_s1 + $0x1784] ss:$16 sps:$4 sm:$0xff]   ;;  %v8649_v8 = vld [vmem:[%s11366_s1 + $0x178c] ss:$16 sps:$4 sm:$0xff]  }
 0x2b4   :  { %5451 = vmatprep.subr.bf16.mxu0 %v8553_v9  ;;  %6010 = vmatprep.subr.bf16.mxu1 %v8556_v10  ;;  %v8644_v9 = vld [vmem:[%s11366_s1 + $0x1780] ss:$16 sps:$4 sm:$0xff]   ;;  %v8647_v10 = vld [vmem:[%s11366_s1 + $0x1788] ss:$16 sps:$4 sm:$0xff]  }
 0x2b7   :  { %5452 = vmatpush1.bf16.msra.mxu0 %v8551_v11  ;;  %6011 = vmatpush1.bf16.msra.mxu1 %v8554_v12  ;;  %v8652_v11 = vld [vmem:[%s11366_s1 + $0x17a4] ss:$16 sps:$4 sm:$0xff]   ;;  %v8655_v12 = vld [vmem:[%s11366_s1 + $0x17ac] ss:$16 sps:$4 sm:$0xff]  }
 0x2b8   :  { %5453 = vmatprep.subr.bf16.mxu0 %v8559_v13  ;;  %6012 = vmatprep.subr.bf16.mxu1 %v8562_v14  ;;  %v8650_v13 = vld [vmem:[%s11366_s1 + $0x17a0] ss:$16 sps:$4 sm:$0xff]   ;;  %v8653_v14 = vld [vmem:[%s11366_s1 + $0x17a8] ss:$16 sps:$4 sm:$0xff]  }
 0x2bb   :  { %5454 = vmatpush1.bf16.msra.mxu0 %v8557_v15  ;;  %6013 = vmatpush1.bf16.msra.mxu1 %v8560_v16  ;;  %v8658_v15 = vld [vmem:[%s11366_s1 + $0x17c4] ss:$16 sps:$4 sm:$0xff]   ;;  %v8661_v16 = vld [vmem:[%s11366_s1 + $0x17cc] ss:$16 sps:$4 sm:$0xff]  }
 0x2bc   :  { %5455 = vmatprep.subr.bf16.mxu0 %v8565_v17  ;;  %6014 = vmatprep.subr.bf16.mxu1 %v8568_v18  ;;  %v8656_v17 = vld [vmem:[%s11366_s1 + $0x17c0] ss:$16 sps:$4 sm:$0xff]   ;;  %v8659_v18 = vld [vmem:[%s11366_s1 + $0x17c8] ss:$16 sps:$4 sm:$0xff]  }
 0x2bf   :  { %5456 = vmatpush1.bf16.msra.mxu0 %v8563_v19  ;;  %6015 = vmatpush1.bf16.msra.mxu1 %v8566_v20  ;;  %v8664_v19 = vld [vmem:[%s11366_s1 + $0x17e4] ss:$16 sps:$4 sm:$0xff]   ;;  %v8667_v20 = vld [vmem:[%s11366_s1 + $0x17ec] ss:$16 sps:$4 sm:$0xff]  }
 0x2c0   :  { %5468 = vmatprep.subr.bf16.mxu0 %v8574_v21  ;;  %6027 = vmatprep.subr.bf16.mxu1 %v8577_v22  ;;  %v8662_v21 = vld [vmem:[%s11366_s1 + $0x17e0] ss:$16 sps:$4 sm:$0xff]   ;;  %v8665_v22 = vld [vmem:[%s11366_s1 + $0x17e8] ss:$16 sps:$4 sm:$0xff]  }
 0x2c2   :  { %5458 = vmatmul.mubr.bf16.vlgmr.msra.gmra.mrb[0].mxu0 %v8569_v23  ;;  %6017 = vmatmul.mubr.bf16.vlgmr.msra.gmra.mrb[0].mxu1 %v8569_v23  ;;  %v8673_v23 = vld [vmem:[%s11366_s1 + $0x1804] ss:$16 sps:$4 sm:$0xff]  }
 0x2c3   :  { %5469 = vmatpush1.bf16.msra.mxu0 %v8572_v24  ;;  %6028 = vmatpush1.bf16.msra.mxu1 %v8575_v25  ;;  %v8676_v24 = vld [vmem:[%s11366_s1 + $0x180c] ss:$16 sps:$4 sm:$0xff]  }
 0x2c4   :  { %5470 = vmatprep.subr.bf16.mxu0 %v8580_v26  ;;  %6029 = vmatprep.subr.bf16.mxu1 %v8583_v27  ;;  %v8668_v25 = vld [vmem:[%s11367_s0 + $0x58] ss:$100 sps:$4 sm:$0xff]   ;;  %v8671_v26 = vld [vmem:[%s11366_s1 + $0x1800] ss:$16 sps:$4 sm:$0xff]  }
 0x2c5   :  { %5500 = vmatprep.mubr.bf16.mxu0 %v8670_v28  ;;  %6059 = vmatprep.mubr.bf16.mxu1 %v8670_v28  ;;  %v8674_v27 = vld [vmem:[%s11366_s1 + $0x1808] ss:$16 sps:$4 sm:$0xff]   ;;  %v8679_v28 = vld [vmem:[%s11366_s1 + $0x1824] ss:$16 sps:$4 sm:$0xff]  }
 0x2c7   :  { %5471 = vmatpush1.bf16.msra.mxu0 %v8578_v29  ;;  %6030 = vmatpush1.bf16.msra.mxu1 %v8581_v30  ;;  %v8682_v29 = vld [vmem:[%s11366_s1 + $0x182c] ss:$16 sps:$4 sm:$0xff]   ;;  %v8677_v30 = vld [vmem:[%s11366_s1 + $0x1820] ss:$16 sps:$4 sm:$0xff]  }
 0x2c8   :  { %5472 = vmatprep.subr.bf16.mxu0 %v8586_v31  ;;  %6031 = vmatprep.subr.bf16.mxu1 %v8589_v32  ;;  %v8680_v31 = vld [vmem:[%s11366_s1 + $0x1828] ss:$16 sps:$4 sm:$0xff]   ;;  %v8685_v32 = vld [vmem:[%s11366_s1 + $0x1844] ss:$16 sps:$4 sm:$0xff]  }
 0x2cb   :  { %5473 = vmatpush1.bf16.msra.mxu0 %v8584_v33  ;;  %6032 = vmatpush1.bf16.msra.mxu1 %v8587_v34  ;;  %v8688_v33 = vld [vmem:[%s11366_s1 + $0x184c] ss:$16 sps:$4 sm:$0xff]   ;;  %v8752_v34 = vmov 0  }
 0x2cc   :  { %5474 = vmatprep.subr.bf16.mxu0 %v8592_v35  ;;  %6033 = vmatprep.subr.bf16.mxu1 %v8595_v36  ;;  %v8683_v35 = vld [vmem:[%s11366_s1 + $0x1840] ss:$16 sps:$4 sm:$0xff]   ;;  %v8686_v36 = vld [vmem:[%s11366_s1 + $0x1848] ss:$16 sps:$4 sm:$0xff]  }
 0x2cf   :  { %5475 = vmatpush1.bf16.msra.mxu0 %v8590_v37  ;;  %6034 = vmatpush1.bf16.msra.mxu1 %v8593_v38  ;;  %v8691_v37 = vld [vmem:[%s11366_s1 + $0x1864] ss:$16 sps:$4 sm:$0xff]   ;;  %v8694_v38 = vld [vmem:[%s11366_s1 + $0x186c] ss:$16 sps:$4 sm:$0xff]  }
 0x2d0   :  { %5476 = vmatprep.subr.bf16.mxu0 %v8598_v39  ;;  %6035 = vmatprep.subr.bf16.mxu1 %v8601_v40  ;;  %v8689_v39 = vld [vmem:[%s11366_s1 + $0x1860] ss:$16 sps:$4 sm:$0xff]   ;;  %v8692_v40 = vld [vmem:[%s11366_s1 + $0x1868] ss:$16 sps:$4 sm:$0xff]  }
 0x2d3   :  { %5477 = vmatpush1.bf16.msra.mxu0 %v8596_v41  ;;  %6036 = vmatpush1.bf16.msra.mxu1 %v8599_v42  ;;  %v8697_v41 = vld [vmem:[%s11366_s1 + $0x1884] ss:$16 sps:$4 sm:$0xff]   ;;  %v8700_v42 = vld [vmem:[%s11366_s1 + $0x188c] ss:$16 sps:$4 sm:$0xff]  }
 0x2d4   :  { %5478 = vmatprep.subr.bf16.mxu0 %v8604_v43  ;;  %6037 = vmatprep.subr.bf16.mxu1 %v8607_v44  ;;  %v8695_v43 = vld [vmem:[%s11366_s1 + $0x1880] ss:$16 sps:$4 sm:$0xff]   ;;  %v8698_v44 = vld [vmem:[%s11366_s1 + $0x1888] ss:$16 sps:$4 sm:$0xff]  }
 0x2d7   :  { %5479 = vmatpush1.bf16.msra.mxu0 %v8602_v45  ;;  %6038 = vmatpush1.bf16.msra.mxu1 %v8605_v46  ;;  %v8703_v45 = vld [vmem:[%s11366_s1 + $0x18a4] ss:$16 sps:$4 sm:$0xff]   ;;  %v8706_v46 = vld [vmem:[%s11366_s1 + $0x18ac] ss:$16 sps:$4 sm:$0xff]  }
 0x2d8   :  { %5480 = vmatprep.subr.bf16.mxu0 %v8610_v47  ;;  %6039 = vmatprep.subr.bf16.mxu1 %v8613_v48  ;;  %v8701_v47 = vld [vmem:[%s11366_s1 + $0x18a0] ss:$16 sps:$4 sm:$0xff]   ;;  %v8704_v48 = vld [vmem:[%s11366_s1 + $0x18a8] ss:$16 sps:$4 sm:$0xff]  }
 0x2db   :  { %5481 = vmatpush1.bf16.msra.mxu0 %v8608_v49  ;;  %6040 = vmatpush1.bf16.msra.mxu1 %v8611_v50  ;;  %v8709_v49 = vld [vmem:[%s11366_s1 + $0x18c4] ss:$16 sps:$4 sm:$0xff]   ;;  %v8712_v50 = vld [vmem:[%s11366_s1 + $0x18cc] ss:$16 sps:$4 sm:$0xff]  }
 0x2dc   :  { %5482 = vmatprep.subr.bf16.mxu0 %v8616_v51  ;;  %6041 = vmatprep.subr.bf16.mxu1 %v8619_v52  ;;  %v8707_v51 = vld [vmem:[%s11366_s1 + $0x18c0] ss:$16 sps:$4 sm:$0xff]   ;;  %v8710_v52 = vld [vmem:[%s11366_s1 + $0x18c8] ss:$16 sps:$4 sm:$0xff]  }
 0x2df   :  { %5483 = vmatpush1.bf16.msra.mxu0 %v8614_v53  ;;  %6042 = vmatpush1.bf16.msra.mxu1 %v8617_v54  ;;  %v8715_v53 = vld [vmem:[%s11366_s1 + $0x18e4] ss:$16 sps:$4 sm:$0xff]   ;;  %v8718_v54 = vld [vmem:[%s11366_s1 + $0x18ec] ss:$16 sps:$4 sm:$0xff]  }
 0x2e0   :  { %5484 = vmatprep.subr.bf16.mxu0 %v8622_v55  ;;  %6043 = vmatprep.subr.bf16.mxu1 %v8625_v56  ;;  %v8713_v55 = vld [vmem:[%s11366_s1 + $0x18e0] ss:$16 sps:$4 sm:$0xff]   ;;  %v8716_v56 = vld [vmem:[%s11366_s1 + $0x18e8] ss:$16 sps:$4 sm:$0xff]  }
 0x2e3   :  { %5485 = vmatpush1.bf16.msra.mxu0 %v8620_v57  ;;  %6044 = vmatpush1.bf16.msra.mxu1 %v8623_v58  ;;  %v8720_v57 = vld [vmem:[%s11368_s3 + $0x40] sm:$0xff]  }
 0x2e4   :  { %5486 = vmatprep.subr.bf16.mxu0 %v8628_v59  ;;  %6045 = vmatprep.subr.bf16.mxu1 %v8631_v60  ;;  %v8721_v58 = vld [vmem:[%s11368_s3 + $0xc0] sm:$0xff]  }
 0x2e5   :  { %v8719_v59 = vld [vmem:[%s11367_s0 + $0x60] ss:$100 sps:$4 sm:$0xff]  }
 0x2e6   :  { %v8722_v60 = vld [vmem:[%s11368_s3] sm:$0xff]  }
 0x2e7   :  { %5487 = vmatpush1.bf16.msra.mxu0 %v8626_v61  ;;  %6046 = vmatpush1.bf16.msra.mxu1 %v8629_v62  ;;  %v8723_v61 = vld [vmem:[%s11368_s3 + $0x80] sm:$0xff]   ;;  %v8724_v62 = vld [vmem:[%s11368_s3 + $0x48] sm:$0xff]  }
 0x2e8   :  { %5488 = vmatprep.subr.bf16.mxu0 %v8634_v63  ;;  %6047 = vmatprep.subr.bf16.mxu1 %v8637_v0  ;;  %v8725_v63 = vld [vmem:[%s11368_s3 + $0xc8] sm:$0xff]  }
 0x2e9   :  { %v8726_v0 = vld [vmem:[%s11368_s3 + $0x8] sm:$0xff]  }
 0x2eb   :  { %5489 = vmatpush1.bf16.msra.mxu0 %v8632_v1  ;;  %6048 = vmatpush1.bf16.msra.mxu1 %v8635_v2  ;;  %v8727_v1 = vld [vmem:[%s11368_s3 + $0x88] sm:$0xff]   ;;  %v8728_v2 = vld [vmem:[%s11368_s3 + $0x50] sm:$0xff]  }
 0x2ec   :  { %5490 = vmatprep.subr.bf16.mxu0 %v8640_v3  ;;  %6049 = vmatprep.subr.bf16.mxu1 %v8643_v4  ;;  %v8729_v3 = vld [vmem:[%s11368_s3 + $0xd0] sm:$0xff]  }
 0x2ed   :  { %v8730_v4 = vld [vmem:[%s11368_s3 + $0x10] sm:$0xff]  }
 0x2ef   :  { %5491 = vmatpush1.bf16.msra.mxu0 %v8638_v5  ;;  %6050 = vmatpush1.bf16.msra.mxu1 %v8641_v6  ;;  %v8731_v5 = vld [vmem:[%s11368_s3 + $0x90] sm:$0xff]   ;;  %v8732_v6 = vld [vmem:[%s11368_s3 + $0x58] sm:$0xff]  }
 0x2f0   :  { %5492 = vmatprep.subr.bf16.mxu0 %v8646_v7  ;;  %6051 = vmatprep.subr.bf16.mxu1 %v8649_v8  ;;  %v8733_v7 = vld [vmem:[%s11368_s3 + $0xd8] sm:$0xff]  }
 0x2f1   :  { %v8734_v8 = vld [vmem:[%s11368_s3 + $0x18] sm:$0xff]  }
 0x2f3   :  { %5493 = vmatpush1.bf16.msra.mxu0 %v8644_v9  ;;  %6052 = vmatpush1.bf16.msra.mxu1 %v8647_v10  ;;  %v8735_v9 = vld [vmem:[%s11368_s3 + $0x98] sm:$0xff]   ;;  %v8736_v10 = vld [vmem:[%s11368_s3 + $0x60] sm:$0xff]  }
 0x2f4   :  { %5494 = vmatprep.subr.bf16.mxu0 %v8652_v11  ;;  %6053 = vmatprep.subr.bf16.mxu1 %v8655_v12  ;;  %v8737_v11 = vld [vmem:[%s11368_s3 + $0xe0] sm:$0xff]  }
 0x2f5   :  { %v8738_v12 = vld [vmem:[%s11368_s3 + $0x20] sm:$0xff]  }
 0x2f7   :  { %5495 = vmatpush1.bf16.msra.mxu0 %v8650_v13  ;;  %6054 = vmatpush1.bf16.msra.mxu1 %v8653_v14  ;;  %v8739_v13 = vld [vmem:[%s11368_s3 + $0xa0] sm:$0xff]   ;;  %v8740_v14 = vld [vmem:[%s11368_s3 + $0x68] sm:$0xff]  }
 0x2f8   :  { %5496 = vmatprep.subr.bf16.mxu0 %v8658_v15  ;;  %6055 = vmatprep.subr.bf16.mxu1 %v8661_v16  ;;  %v8741_v15 = vld [vmem:[%s11368_s3 + $0xe8] sm:$0xff]  }
 0x2f9   :  { %v8742_v16 = vld [vmem:[%s11368_s3 + $0x28] sm:$0xff]  }
 0x2fb   :  { %5497 = vmatpush1.bf16.msra.mxu0 %v8656_v17  ;;  %6056 = vmatpush1.bf16.msra.mxu1 %v8659_v18  ;;  %v8743_v17 = vld [vmem:[%s11368_s3 + $0xa8] sm:$0xff]   ;;  %v8744_v18 = vld [vmem:[%s11368_s3 + $0x70] sm:$0xff]  }
 0x2fc   :  { %5498 = vmatprep.subr.bf16.mxu0 %v8664_v19  ;;  %6057 = vmatprep.subr.bf16.mxu1 %v8667_v20  ;;  %v8745_v19 = vld [vmem:[%s11368_s3 + $0xf0] sm:$0xff]  }
 0x2fd   :  { %v8746_v20 = vld [vmem:[%s11368_s3 + $0x30] sm:$0xff]  }
 0x2ff   :  { %5499 = vmatpush1.bf16.msra.mxu0 %v8662_v21  ;;  %6058 = vmatpush1.bf16.msra.mxu1 %v8665_v22  ;;  %v8747_v21 = vld [vmem:[%s11368_s3 + $0xb0] sm:$0xff]   ;;  %v8748_v22 = vld [vmem:[%s11368_s3 + $0x78] sm:$0xff]  }
 0x300   :  { %5511 = vmatprep.subr.bf16.mxu0 %v8673_v23  ;;  %6070 = vmatprep.subr.bf16.mxu1 %v8676_v24  ;;  %v8749_v23 = vld [vmem:[%s11368_s3 + $0xf8] sm:$0xff]  }
 0x301   :  { %v8750_v24 = vld [vmem:[%s11368_s3 + $0x38] sm:$0xff]  }
 0x302   :  { %5501 = vmatmul.mubr.bf16.vlgmr.msra.gmra.mrb[0].mxu0 %v8668_v25  ;;  %6060 = vmatmul.mubr.bf16.vlgmr.msra.gmra.mrb[0].mxu1 %v8668_v25  ;;  %v8751_v25 = vld [vmem:[%s11368_s3 + $0xb8] sm:$0xff]  }
 0x303   :  { %5512 = vmatpush1.bf16.msra.mxu0 %v8671_v26  ;;  %6071 = vmatpush1.bf16.msra.mxu1 %v8674_v27  ;;  %v849_v26 = vlaneseq }
 0x304   :  { %5513 = vmatprep.subr.bf16.mxu0 %v8679_v28  ;;  %6072 = vmatprep.subr.bf16.mxu1 %v8682_v29 }
 0x305   :  { %5543 = vmatprep.mubr.bf16.mxu0 %v8752_v34  ;;  %6102 = vmatprep.mubr.bf16.mxu1 %v8752_v34  ;;  %v850_v27 = vshrl.u32 %v849_v26, 7 }
 0x307   :  { %5514 = vmatpush1.bf16.msra.mxu0 %v8677_v30  ;;  %6073 = vmatpush1.bf16.msra.mxu1 %v8680_v31  ;;  %v851_v28 = vsub.s32 0, %v850_v27  ;;  %v859_v29 = vsub.s32 2, %v850_v27  ;;  %v847_v30 = vld [vmem:[%s11369_s2] sm:$0xf]  ;;  %v855_v31 = vsub.s32 1, %v850_v27 }
 0x308   :  { %5515 = vmatprep.subr.bf16.mxu0 %v8685_v32  ;;  %6074 = vmatprep.subr.bf16.mxu1 %v8688_v33  ;;  %v863_v32 = vsub.s32 3, %v850_v27 }
 0x309   :  { %v852_v33 = vrot.slane %v847_v30, %v851_v28  ;;  %v860_v34 = vrot.slane %v847_v30, %v859_v29 }
 0x30b   :  { %5516 = vmatpush1.bf16.msra.mxu0 %v8683_v35  ;;  %6075 = vmatpush1.bf16.msra.mxu1 %v8686_v36  ;;  %v856_v35 = vrot.slane %v847_v30, %v855_v31  ;;  %v864_v36 = vrot.slane %v847_v30, %v863_v32 }
 0x30c   :  { %5517 = vmatprep.subr.bf16.mxu0 %v8691_v37  ;;  %6076 = vmatprep.subr.bf16.mxu1 %v8694_v38 }
 0x30f   :  { %5518 = vmatpush1.bf16.msra.mxu0 %v8689_v39  ;;  %6077 = vmatpush1.bf16.msra.mxu1 %v8692_v40 }
 0x310   :  { %5519 = vmatprep.subr.bf16.mxu0 %v8697_v41  ;;  %6078 = vmatprep.subr.bf16.mxu1 %v8700_v42 }
 0x313   :  { %5520 = vmatpush1.bf16.msra.mxu0 %v8695_v43  ;;  %6079 = vmatpush1.bf16.msra.mxu1 %v8698_v44 }
 0x314   :  { %5521 = vmatprep.subr.bf16.mxu0 %v8703_v45  ;;  %6080 = vmatprep.subr.bf16.mxu1 %v8706_v46 }
 0x317   :  { %5522 = vmatpush1.bf16.msra.mxu0 %v8701_v47  ;;  %6081 = vmatpush1.bf16.msra.mxu1 %v8704_v48 }
 0x318   :  { %5523 = vmatprep.subr.bf16.mxu0 %v8709_v49  ;;  %6082 = vmatprep.subr.bf16.mxu1 %v8712_v50 }
 0x31b   :  { %5524 = vmatpush1.bf16.msra.mxu0 %v8707_v51  ;;  %6083 = vmatpush1.bf16.msra.mxu1 %v8710_v52 }
 0x31c   :  { %5525 = vmatprep.subr.bf16.mxu0 %v8715_v53  ;;  %6084 = vmatprep.subr.bf16.mxu1 %v8718_v54 }
 0x31f   :  { %5526 = vmatpush1.bf16.msra.mxu0 %v8713_v55  ;;  %6085 = vmatpush1.bf16.msra.mxu1 %v8716_v56 }
 0x320   :  { %7334 = vmatprep.subr.bf16.mxu0 %v8720_v57  ;;  %7356 = vmatprep.subr.bf16.mxu1 %v8721_v58 }
 0x322   :  { %5544 = vmatmul.mubr.bf16.vlgmr.msra.gmra.mrb[0].mxu0 %v8719_v59  ;;  %6103 = vmatmul.mubr.bf16.vlgmr.msra.gmra.mrb[0].mxu1 %v8719_v59 }
 0x323   :  { %7335 = vmatpush3.bf16.msra.mxu0 %v8722_v60  ;;  %7357 = vmatpush3.bf16.msra.mxu1 %v8723_v61 }
 0x324   :  { %7336 = vmatprep.subr.bf16.mxu0 %v8724_v62  ;;  %7358 = vmatprep.subr.bf16.mxu1 %v8725_v63 }
 0x327   :  { %7337 = vmatpush3.bf16.msra.mxu0 %v8726_v0  ;;  %7359 = vmatpush3.bf16.msra.mxu1 %v8727_v1 }
 0x328   :  { %7338 = vmatprep.subr.bf16.mxu0 %v8728_v2  ;;  %7360 = vmatprep.subr.bf16.mxu1 %v8729_v3  ;;  %v7301_v3 = vld [vmem:[%s11370_s4] ss:$0 sm:$0xff] }
 0x32b   :  { %7339 = vmatpush3.bf16.msra.mxu0 %v8730_v4  ;;  %7361 = vmatpush3.bf16.msra.mxu1 %v8731_v5 }
 0x32c   :  { %7340 = vmatprep.subr.bf16.mxu0 %v8732_v6  ;;  %7362 = vmatprep.subr.bf16.mxu1 %v8733_v7 }
 0x32f   :  { %7341 = vmatpush3.bf16.msra.mxu0 %v8734_v8  ;;  %7363 = vmatpush3.bf16.msra.mxu1 %v8735_v9 }
 0x330   :  { %7342 = vmatprep.subr.bf16.mxu0 %v8736_v10  ;;  %7364 = vmatprep.subr.bf16.mxu1 %v8737_v11 }
 0x333   :  { %7343 = vmatpush3.bf16.msra.mxu0 %v8738_v12  ;;  %7365 = vmatpush3.bf16.msra.mxu1 %v8739_v13 }
 0x334   :  { %7344 = vmatprep.subr.bf16.mxu0 %v8740_v14  ;;  %7366 = vmatprep.subr.bf16.mxu1 %v8741_v15 }
 0x337   :  { %7345 = vmatpush3.bf16.msra.mxu0 %v8742_v16  ;;  %7367 = vmatpush3.bf16.msra.mxu1 %v8743_v17 }
 0x338   :  { %7346 = vmatprep.subr.bf16.mxu0 %v8744_v18  ;;  %7368 = vmatprep.subr.bf16.mxu1 %v8745_v19 }
 0x33b   :  { %7347 = vmatpush3.bf16.msra.mxu0 %v8746_v20  ;;  %7369 = vmatpush3.bf16.msra.mxu1 %v8747_v21 }
 0x33c   :  { %7348 = vmatprep.subr.bf16.mxu0 %v8748_v22  ;;  %7370 = vmatprep.subr.bf16.mxu1 %v8749_v23 }
 0x33f   :  { %7349 = vmatpush3.bf16.msra.mxu0 %v8750_v24  ;;  %7371 = vmatpush3.bf16.msra.mxu1 %v8751_v25 }
 0x3f5   :  { %v5545_v37 = vpop.f32.mrb[0].mxu0  ;;  %v6104_v38 = vpop.f32.mrb[0].mxu1 }
 0x3f6   :  { %v7378_v39 = vadd.f32 %v5545_v37, %v852_v33  ;;  %v7382_v40 = vadd.f32 %v6104_v38, %v860_v34  ;;  %v5547_v41 = vpop.f32.mrb[1].mxu0  ;;  %v6106_v42 = vpop.f32.mrb[1].mxu1 }
 0x3f7   :  { %v7379_v43 = vadd.f32 %v5547_v41, %v856_v35  ;;  %v7383_v44 = vadd.f32 %v6106_v42, %v864_v36  ;;  %v5549_v45 = vpop.f32.mrb[2].mxu0  ;;  %v6108_v46 = vpop.f32.mrb[2].mxu1 }
 0x3f8   :  { %v7380_v47 = vadd.f32 %v5549_v45, %v852_v33  ;;  %v7384_v48 = vadd.f32 %v6108_v46, %v860_v34  ;;  %v5551_v49 = vpop.f32.mrb[3].mxu0  ;;  %v6110_v50 = vpop.f32.mrb[3].mxu1  ;;  %v6113_v53 = vmax.f32 %v7378_v39, 0.0  ;;  %v6115_v54 = vmax.f32 %v7382_v40, 0.0 }
 0x3f9   :  { %v7381_v51 = vadd.f32 %v5551_v49, %v856_v35  ;;  %v7385_v52 = vadd.f32 %v6110_v50, %v864_v36  ;;  %v6114_v57 = vmax.f32 %v7379_v43, 0.0  ;;  %v6116_v58 = vmax.f32 %v7383_v44, 0.0 }
 0x3fa   :  { %v6117_v55 = vmax.f32 %v7380_v47, 0.0  ;;  %v6119_v56 = vmax.f32 %v7384_v48, 0.0 }
 0x3fb   :  { %v6118_v59 = vmax.f32 %v7381_v51, 0.0  ;;  %v6120_v60 = vmax.f32 %v7385_v52, 0.0 }
 0x3fc   :  { %v6121_v61 = vpack.c.bf16 %v6117_v55, %v6113_v53  ;;  %v6123_v62 = vpack.c.bf16 %v6119_v56, %v6115_v54 }
 0x3fd   :  { %v6122_v63 = vpack.c.bf16 %v6118_v59, %v6114_v57  ;;  %v6124_v0 = vpack.c.bf16 %v6120_v60, %v6116_v58 }
 0x3ff   :  { %6420 = vmatprep.mubr.bf16.mxu0 %v6122_v63  ;;  %6461 = vmatprep.mubr.bf16.mxu1 %v6124_v0 }
 0x400   :  { %6421 = vmatmul.mubr.bf16.vlgmr.msra.gmra.mrb[4].mxu0 %v6121_v61  ;;  %6462 = vmatmul.mubr.bf16.vlgmr.msra.gmra.mrb[4].mxu1 %v6123_v62 }
 0x4d3   :  { %v7350_v1 = vpop.f32.mrb[4].mxu0  ;;  %v7372_v2 = vpop.f32.mrb[4].mxu1 }
 0x4d4   :  { %v7351_v4 = vpop.f32.mrb[5].mxu0  ;;  %v7373_v5 = vpop.f32.mrb[5].mxu1 }
 0x4d5   :  { %v7352_v6 = vadd.f32 %v7351_v4, %v7350_v1  ;;  %v7374_v7 = vadd.f32 %v7373_v5, %v7372_v2  ;;  %v7353_v8 = vpop.f32.mrb[6].mxu0  ;;  %v7375_v9 = vpop.f32.mrb[6].mxu1 }
 0x4d6   :  { %v7354_v10 = vpop.f32.mrb[7].mxu0  ;;  %v7376_v11 = vpop.f32.mrb[7].mxu1 }
 0x4d7   :  { %v6423_v12 = vadd.f32 %v7352_v6, %v7301_v3  ;;  %v7355_v13 = vadd.f32 %v7354_v10, %v7353_v8  ;;  %v7377_v14 = vadd.f32 %v7376_v11, %v7375_v9 }
 0x4d9   :  { %v6464_v15 = vadd.f32 %v7374_v7, %v6423_v12  ;;  %v6426_v16 = vadd.f32 %v7355_v13, %v7301_v3 }
 0x4db   :  { %6470 = vst [vmem:[%s11371_s5] sm:$0xff] %v6464_v15  ;;  %v6467_v17 = vadd.f32 %v7377_v14, %v6426_v16 }
 0x4dd   :  { %6471 = vst [vmem:[%s11371_s5 + $0x8] sm:$0xff] %v6467_v17 }

</bundles_post_ra>
